<compile_context>
chip_gen: v7x
topology: tpu7x:2x2x1
jax: 0.10.0
libtpu: 0.0.40
codegen_flags: <defaults>
</compile_context>

<pallas_src>
import math

import numpy as np
import jax
import jax.numpy as jnp
from jax.experimental import pallas as pl
from jax.experimental.pallas import tpu as pltpu


_PAR_PARAMS = pltpu.CompilerParams(
    dimension_semantics=("parallel",),
    vmem_limit_bytes=32 * 1024 * 1024,
)


# ----------------------------------------------------------------------------- fused kernels

def _conv3x3_in_lrelu_kernel(w_ref, p_ref, o_ref):
    # w: (Cout, Cin*9) bf16 ; p: (Cin*9, H*W) bf16 ; o: (Cout, H*W) f32
    y = jnp.dot(w_ref[...], p_ref[...], preferred_element_type=jnp.float32)
    mean = jnp.mean(y, axis=1, keepdims=True)                        # f32 stats
    var = jnp.maximum(jnp.mean(y * y, axis=1, keepdims=True) - mean * mean, 0.0)
    yn = (y - mean) * jax.lax.rsqrt(var + 1e-5)                      # InstanceNorm (biased)
    o_ref[...] = jnp.where(yn >= 0, yn, 0.2 * yn)                    # LeakyReLU(0.2)


def _convT2x2_in_lrelu_kernel(w_ref, x_ref, o_ref):
    # w: (4, Cout, Cin) bf16 ; x: (Cin, H*W) bf16 ; o: (4, Cout, H*W) f32
    hw = x_ref.shape[1]
    x = x_ref[...]
    ys = [jnp.dot(w_ref[j], x, preferred_element_type=jnp.float32) for j in range(4)]
    s_list = [jnp.sum(y, axis=1, keepdims=True) for y in ys]
    q_list = [jnp.sum(y * y, axis=1, keepdims=True) for y in ys]
    ssum = s_list[0] + s_list[1] + s_list[2] + s_list[3]             # (Cout, 1)
    ssq = q_list[0] + q_list[1] + q_list[2] + q_list[3]
    n_el = 4.0 * hw                                                  # IN over upsampled map
    mean = ssum / n_el
    var = jnp.maximum(ssq / n_el - mean * mean, 0.0)
    inv = jax.lax.rsqrt(var + 1e-5)
    for j in range(4):
        z = (ys[j] - mean) * inv
        o_ref[j] = jnp.where(z >= 0, z, 0.2 * z)


def _conv1x1_bias_kernel(w_ref, b_ref, x_ref, o_ref):
    # w: (Cout, Cin) bf16 ; b: (Cout, 1) f32 ; x: (Cin, H*W) bf16
    o_ref[...] = (jnp.dot(w_ref[...], x_ref[...], preferred_element_type=jnp.float32)
                  + b_ref[...])


def _ifft2c_kernel(ahr_ref, ahi_ref, awrt_ref, awit_ref, keep_ref,
                   xr_ref, xi_ref, zr_ref, zi_ref):
    # Per image: center-mask multiply + centered orthonormal 2-D IFFT via DFT matmuls.
    keep = keep_ref[...]                                             # (1, W) f32
    xr = (xr_ref[...] * keep).astype(jnp.bfloat16)                   # (H, W)
    xi = (xi_ref[...] * keep).astype(jnp.bfloat16)
    ahr = ahr_ref[...]
    ahi = ahi_ref[...]
    yr = (jnp.dot(ahr, xr, preferred_element_type=jnp.float32)
          - jnp.dot(ahi, xi, preferred_element_type=jnp.float32))
    yi = (jnp.dot(ahr, xi, preferred_element_type=jnp.float32)
          + jnp.dot(ahi, xr, preferred_element_type=jnp.float32))
    yr16 = yr.astype(jnp.bfloat16)
    yi16 = yi.astype(jnp.bfloat16)
    awrt = awrt_ref[...]
    awit = awit_ref[...]
    zr_ref[...] = (jnp.dot(yr16, awrt, preferred_element_type=jnp.float32)
                   - jnp.dot(yi16, awit, preferred_element_type=jnp.float32))
    zi_ref[...] = (jnp.dot(yr16, awit, preferred_element_type=jnp.float32)
                   + jnp.dot(yi16, awrt, preferred_element_type=jnp.float32))


def _rss_div_kernel(x_ref, o_ref):
    # x: (2*coils, B*H*W) f32 -- sublane reduce, lane-dense output, rsqrt on EUP.
    x = x_ref[...]
    ss = jnp.sum(x * x, axis=0, keepdims=True)
    o_ref[...] = x * jax.lax.rsqrt(ss)


# ----------------------------------------------------------------------------- layer wrappers

def _im2col_3x3(x):
    """x: (N, Cin, H, W) -> patches (N, Cin*9, H*W); stride 1, pad 1."""
    N, Cin, H, W = x.shape
    xp = jnp.pad(x, ((0, 0), (0, 0), (1, 1), (1, 1)))
    taps = [xp[:, :, dh:dh + H, dw:dw + W] for dh in range(3) for dw in range(3)]
    pats = jnp.stack(taps, axis=2)                                   # (N, Cin, 9, H, W)
    return pats.reshape(N, Cin * 9, H * W)


def conv3x3_in_lrelu(x, wmat):
    """Fused Conv2d(3x3, pad 1, no bias) + InstanceNorm2d + LeakyReLU(0.2)."""
    N, Cin, H, W = x.shape
    Cout, K = wmat.shape
    HW = H * W
    pats = _im2col_3x3(x.astype(jnp.bfloat16))                       # (N, K, HW) bf16
    y = pl.pallas_call(
        _conv3x3_in_lrelu_kernel,
        out_shape=jax.ShapeDtypeStruct((N, Cout, HW), jnp.float32),
        grid=(N,),
        in_specs=[
            pl.BlockSpec((Cout, K), lambda n: (0, 0)),
            pl.BlockSpec((None, K, HW), lambda n: (n, 0, 0)),
        ],
        out_specs=pl.BlockSpec((None, Cout, HW), lambda n: (n, 0, 0)),
        compiler_params=_PAR_PARAMS,
    )(wmat, pats)
    return y.reshape(N, Cout, H, W)


def conv_transpose_2x2_in_lrelu(x, w4):
    """Fused ConvTranspose2d(k=2, s=2, no bias) + InstanceNorm2d + LeakyReLU(0.2)."""
    N, Cin, H, W = x.shape
    Cout = w4.shape[1]
    HW = H * W
    xm = x.reshape(N, Cin, HW).astype(jnp.bfloat16)
    y = pl.pallas_call(
        _convT2x2_in_lrelu_kernel,
        out_shape=jax.ShapeDtypeStruct((N, 4, Cout, HW), jnp.float32),
        grid=(N,),
        in_specs=[
            pl.BlockSpec((4, Cout, Cin), lambda n: (0, 0, 0)),
            pl.BlockSpec((None, Cin, HW), lambda n: (n, 0, 0)),
        ],
        out_specs=pl.BlockSpec((None, 4, Cout, HW), lambda n: (n, 0, 0, 0)),
        compiler_params=_PAR_PARAMS,
    )(w4, xm)
    # (N, kh*2+kw, Cout, H*W) -> (N, Cout, 2H, 2W)
    y = y.reshape(N, 2, 2, Cout, H, W)
    y = jnp.transpose(y, (0, 3, 4, 1, 5, 2))
    return y.reshape(N, Cout, 2 * H, 2 * W)


def conv1x1_bias(x, w, b2):
    """1x1 conv with bias (final U-Net layer)."""
    N, Cin, H, W = x.shape
    Cout = w.shape[0]
    HW = H * W
    xm = x.reshape(N, Cin, HW).astype(jnp.bfloat16)
    y = pl.pallas_call(
        _conv1x1_bias_kernel,
        out_shape=jax.ShapeDtypeStruct((N, Cout, HW), jnp.float32),
        grid=(N,),
        in_specs=[
            pl.BlockSpec((Cout, Cin), lambda n: (0, 0)),
            pl.BlockSpec((Cout, 1), lambda n: (0, 0)),
            pl.BlockSpec((None, Cin, HW), lambda n: (n, 0, 0)),
        ],
        out_specs=pl.BlockSpec((None, Cout, HW), lambda n: (n, 0, 0)),
        compiler_params=_PAR_PARAMS,
    )(w, b2, xm)
    return y.reshape(N, Cout, H, W)


def avg_pool_2x2(x):
    N, C, H, W = x.shape
    return x.reshape(N, C, H // 2, 2, W // 2, 2).mean(axis=(3, 5))


def divide_rss(x):
    """x / rss_complex(x, dim=1)[:, None, ..., None]. x: (B, C, H, W, 2) f32."""
    B, C, H, W, _ = x.shape
    xt = jnp.transpose(x, (1, 4, 0, 2, 3)).reshape(C * 2, B * H * W).astype(jnp.float32)
    y = pl.pallas_call(
        _rss_div_kernel,
        out_shape=jax.ShapeDtypeStruct(xt.shape, jnp.float32),
        grid=(1,),
        in_specs=[pl.BlockSpec(xt.shape, lambda i: (0, 0))],
        out_specs=pl.BlockSpec(xt.shape, lambda i: (0, 0)),
    )(xt)
    return jnp.transpose(y.reshape(C, 2, B, H, W), (2, 0, 3, 4, 1))


# ----------------------------------------------------------------------------- centered IFFT (DFT)

def _centered_idft_matrix(n):
    """Matrix A with A @ x == fftshift(ifft(ifftshift(x), norm='ortho')) along axis 0."""
    eye = np.eye(n)
    m = np.fft.fftshift(
        np.fft.ifft(np.fft.ifftshift(eye, axes=0), axis=0, norm="ortho"), axes=0)
    return jnp.asarray(m.real, jnp.float32), jnp.asarray(m.imag, jnp.float32)


def ifft2c_center_masked(masked_kspace, keep_bc):
    """Center-mask + orthonormal centered 2-D IFFT, fused in one pallas_call.

    masked_kspace: (B, C, H, W, 2) f32; keep_bc: (B*C, 1, W) f32.
    Returns (zr, zi), each (B*C, H, W) f32.
    """
    B, C, H, W, _ = masked_kspace.shape
    BC = B * C
    xr = masked_kspace[..., 0].reshape(BC, H, W)
    xi = masked_kspace[..., 1].reshape(BC, H, W)
    ahr, ahi = _centered_idft_matrix(H)
    awr, awi = _centered_idft_matrix(W)
    ahr = ahr.astype(jnp.bfloat16)
    ahi = ahi.astype(jnp.bfloat16)
    awrt = awr.T.astype(jnp.bfloat16)
    awit = awi.T.astype(jnp.bfloat16)
    zr, zi = pl.pallas_call(
        _ifft2c_kernel,
        out_shape=(jax.ShapeDtypeStruct((BC, H, W), jnp.float32),
                   jax.ShapeDtypeStruct((BC, H, W), jnp.float32)),
        grid=(BC,),
        in_specs=[
            pl.BlockSpec((H, H), lambda i: (0, 0)),
            pl.BlockSpec((H, H), lambda i: (0, 0)),
            pl.BlockSpec((W, W), lambda i: (0, 0)),
            pl.BlockSpec((W, W), lambda i: (0, 0)),
            pl.BlockSpec((None, 1, W), lambda i: (i, 0, 0)),
            pl.BlockSpec((None, H, W), lambda i: (i, 0, 0)),
            pl.BlockSpec((None, H, W), lambda i: (i, 0, 0)),
        ],
        out_specs=[pl.BlockSpec((None, H, W), lambda i: (i, 0, 0)),
                   pl.BlockSpec((None, H, W), lambda i: (i, 0, 0))],
        compiler_params=_PAR_PARAMS,
    )(ahr, ahi, awrt, awit, keep_bc, xr, xi)
    return zr, zi


# ----------------------------------------------------------------------------- U-Net / NormUnet

def conv_block(x, p):
    # Conv3x3 -> IN -> LeakyReLU -> Dropout(0) -> Conv3x3 -> IN -> LeakyReLU -> Dropout(0)
    x = conv3x3_in_lrelu(x, p["w1"])
    x = conv3x3_in_lrelu(x, p["w2"])
    return x


def unet_forward(x, params):
    stack = []
    out = x
    for p in params["down"]:
        out = conv_block(out, p)
        stack.append(out)
        out = avg_pool_2x2(out)
    out = conv_block(out, params["bottleneck"])
    for w4, p in zip(params["up_transpose"], params["up_conv"]):
        skip = stack.pop()
        out = conv_transpose_2x2_in_lrelu(out, w4)
        pad_h = skip.shape[-2] - out.shape[-2]
        pad_w = skip.shape[-1] - out.shape[-1]
        if pad_h or pad_w:  # reflect pad right/bottom for odd sizes (unused for 16x16)
            out = jnp.pad(out, ((0, 0), (0, 0), (0, pad_h), (0, pad_w)), mode="reflect")
        out = jnp.concatenate([out, skip], axis=1)
        out = conv_block(out, p)
    return conv1x1_bias(out, params["final_w"], params["final_b"])


def norm_unet_forward(xc, params, padding_size=15, normalize=True):
    """xc: (B*C, 2, H, W) channel-form (real, imag) images."""
    b, _, h, w = xc.shape
    mean = std = None
    if normalize:
        xv = xc.reshape(b, 2, h * w)
        mean = xv.mean(axis=2).reshape(b, 2, 1, 1)
        std = jnp.std(xv, axis=2, ddof=1).reshape(b, 2, 1, 1)  # torch .std() is unbiased
        xc = (xc - mean) / std
    w_mult = ((w - 1) | padding_size) + 1
    h_mult = ((h - 1) | padding_size) + 1
    w_pad = (math.floor((w_mult - w) / 2), math.ceil((w_mult - w) / 2))
    h_pad = (math.floor((h_mult - h) / 2), math.ceil((h_mult - h) / 2))
    if any(w_pad) or any(h_pad):
        xc = jnp.pad(xc, ((0, 0), (0, 0), h_pad, w_pad))
    out = unet_forward(xc, params)
    out = out[..., h_pad[0]:h_mult - h_pad[1], w_pad[0]:w_mult - w_pad[1]]
    if normalize:
        out = out * std + mean
    return out


# ----------------------------------------------------------------------------- parameters

def init_params(key, chans=8, num_pools=4, in_chans=2, out_chans=2):
    keys = iter(jax.random.split(key, 64))

    def conv_w(cout, cin, k):
        fan_in = cin * k * k
        return jax.random.normal(next(keys), (cout, cin, k, k), jnp.float32) / np.sqrt(fan_in)

    def convT_w(cin, cout, k):
        fan_in = cin * k * k
        return jax.random.normal(next(keys), (cin, cout, k, k), jnp.float32) / np.sqrt(fan_in)

    params = {"down": [], "up_transpose": [], "up_conv": []}
    ch = chans
    params["down"].append({"w1": conv_w(chans, in_chans, 3), "w2": conv_w(chans, chans, 3)})
    for _ in range(num_pools - 1):
        params["down"].append({"w1": conv_w(ch * 2, ch, 3), "w2": conv_w(ch * 2, ch * 2, 3)})
        ch *= 2
    params["bottleneck"] = {"w1": conv_w(ch * 2, ch, 3), "w2": conv_w(ch * 2, ch * 2, 3)}
    for _ in range(num_pools - 1):
        params["up_transpose"].append(convT_w(ch * 2, ch, 2))
        params["up_conv"].append({"w1": conv_w(ch, ch * 2, 3), "w2": conv_w(ch, ch, 3)})
        ch //= 2
    params["up_transpose"].append(convT_w(ch * 2, ch, 2))
    params["up_conv"].append({"w1": conv_w(ch, ch * 2, 3), "w2": conv_w(ch, ch, 3)})
    params["final_w"] = conv_w(out_chans, ch, 1)
    params["final_b"] = jnp.zeros((out_chans,), jnp.float32)
    return params


def prepare_params(raw):
    """Hoist weight reshapes/casts out of the per-call path: GEMM-ready bf16 layouts."""
    def conv_mat(w):                                   # (Cout, Cin, 3, 3) -> (Cout, Cin*9) bf16
        co, ci = w.shape[:2]
        return w.reshape(co, ci * 9).astype(jnp.bfloat16)

    def convT_mat(w):                                  # (Cin, Cout, 2, 2) -> (4, Cout, Cin) bf16
        ci, co = w.shape[:2]
        return jnp.transpose(w, (2, 3, 1, 0)).reshape(4, co, ci).astype(jnp.bfloat16)

    return {
        "down": [{"w1": conv_mat(d["w1"]), "w2": conv_mat(d["w2"])} for d in raw["down"]],
        "bottleneck": {"w1": conv_mat(raw["bottleneck"]["w1"]),
                       "w2": conv_mat(raw["bottleneck"]["w2"])},
        "up_transpose": [convT_mat(w) for w in raw["up_transpose"]],
        "up_conv": [{"w1": conv_mat(d["w1"]), "w2": conv_mat(d["w2"])} for d in raw["up_conv"]],
        "final_w": raw["final_w"].reshape(raw["final_w"].shape[0], -1).astype(jnp.bfloat16),
        "final_b": raw["final_b"].reshape(-1, 1).astype(jnp.float32),
    }


# ----------------------------------------------------------------------------- full forward

def base_sensitivity_model_forward(masked_kspace, mask, params,
                                   num_low_frequencies=None,
                                   mask_center=True, normalize=True,
                                   mask_type="2D"):
    """masked_kspace: (b, c, h, w, 2); mask: (b, 1, h, w, 1)."""
    B, C, H, W, _ = masked_kspace.shape
    BC = B * C

    if mask_center:
        # get_pad_and_num_low_freqs
        if num_low_frequencies is None or num_low_frequencies == 0:
            sq = mask[:, 0, 0, :, 0].astype(jnp.int8)
            cent = sq.shape[1] // 2
            left = jnp.argmin(jnp.flip(sq[:, :cent], axis=1), axis=1)
            right = jnp.argmin(sq[:, cent:], axis=1)
            nlf = jnp.maximum(2 * jnp.minimum(left, right), 1)
        else:
            nlf = jnp.full((B,), num_low_frequencies, dtype=jnp.int32)
        pad = (mask.shape[-2] - nlf + 1) // 2
        # batched_mask_center (mask_type == '2D'): keep columns [pad, pad + nlf) along w
        cols = jnp.arange(W)
        keep = ((cols[None, :] >= pad[:, None]) &
                (cols[None, :] < (pad + nlf)[:, None])).astype(jnp.float32)   # (B, W)
    else:
        keep = jnp.ones((B, W), jnp.float32)
    keep_bc = jnp.broadcast_to(keep[:, None, :], (B, C, W)).reshape(BC, 1, W)

    # chans_to_batch_dim + center mask + ifft2c (fused): -> (BC, 2, H, W) real/imag channels
    zr, zi = ifft2c_center_masked(masked_kspace, keep_bc)
    xc = jnp.stack([zr, zi], axis=1)

    out = norm_unet_forward(xc, params, normalize=normalize)          # (BC, 2, H, W)

    # chan_complex_to_last_dim + batch_chans_to_chan_dim
    images = jnp.stack([out[:, 0], out[:, 1]], axis=-1).reshape(B, C, H, W, 2)
    if normalize:
        images = divide_rss(images)
    return images


# ----------------------------------------------------------------------------- main

if __name__ == "__main__":
    key = jax.random.PRNGKey(0)
    k_data, k_par = jax.random.split(key)

    B, C, H, W = 2, 4, 16, 16
    kspace = jax.random.normal(k_data, (B, C, H, W, 2), jnp.float32)

    # sampling mask: 6 fully-sampled center columns + a couple of outer columns
    col_on = np.zeros((W,), np.float32)
    col_on[5:11] = 1.0
    col_on[1] = 1.0
    col_on[13] = 1.0
    mask = jnp.asarray(np.broadcast_to(col_on[None, None, None, :, None],
                                       (B, 1, H, W, 1)).copy())
    masked_kspace = kspace * mask

    raw_params = init_params(k_par, chans=8, num_pools=4, in_chans=2, out_chans=2)
    params = prepare_params(raw_params)

    @jax.jit
    def run(mk, m):
        return base_sensitivity_model_forward(mk, m, params)

    out = run(masked_kspace, mask)
    jax.block_until_ready(out)
    assert out.shape == (B, C, H, W, 2)
    print("KERNEL_OK")
</pallas_src>

<mosaic_0001>
module attributes {stable_mosaic.version = 11 : i64} {
  func.func @_ifft2c_kernel(%arg0: i32, %arg1: memref<16x16xbf16, #tpu.memory_space<vmem>>, %arg2: memref<16x16xbf16, #tpu.memory_space<vmem>>, %arg3: memref<16x16xbf16, #tpu.memory_space<vmem>>, %arg4: memref<16x16xbf16, #tpu.memory_space<vmem>>, %arg5: memref<1x1x16xf32, #tpu.memory_space<vmem>>, %arg6: memref<1x16x16xf32, #tpu.memory_space<vmem>>, %arg7: memref<1x16x16xf32, #tpu.memory_space<vmem>>, %arg8: memref<1x16x16xf32, #tpu.memory_space<vmem>>, %arg9: memref<1x16x16xf32, #tpu.memory_space<vmem>>) attributes {dimension_semantics = [#tpu.dimension_semantics<parallel>], iteration_bounds = array<i64: 8>, scalar_prefetch = 0 : i64, scratch_operands = 0 : i64, tpu.core_type = #tpu.core_type<tc>, window_params = [{pipeline_mode = #tpu.pipeline_mode<synchronous>, transform_indices = @transform_0, window_bounds = array<i64: 16, 16>}, {pipeline_mode = #tpu.pipeline_mode<synchronous>, transform_indices = @transform_1, window_bounds = array<i64: 16, 16>}, {pipeline_mode = #tpu.pipeline_mode<synchronous>, transform_indices = @transform_2, window_bounds = array<i64: 16, 16>}, {pipeline_mode = #tpu.pipeline_mode<synchronous>, transform_indices = @transform_3, window_bounds = array<i64: 16, 16>}, {transform_indices = @transform_4, window_bounds = array<i64: 1, 1, 16>}, {transform_indices = @transform_5, window_bounds = array<i64: 1, 16, 16>}, {transform_indices = @transform_6, window_bounds = array<i64: 1, 16, 16>}, {transform_indices = @transform_7, window_bounds = array<i64: 1, 16, 16>}, {transform_indices = @transform_8, window_bounds = array<i64: 1, 16, 16>}]} {
    %c0 = arith.constant 0 : index
    %c0_0 = arith.constant 0 : index
    %c0_1 = arith.constant 0 : index
    %0 = vector.load %arg5[%c0, %c0_0, %c0_1] : memref<1x1x16xf32, #tpu.memory_space<vmem>>, vector<1x1x16xf32>
    %1 = vector.shape_cast %0 : vector<1x1x16xf32> to vector<1x16xf32>
    %c0_2 = arith.constant 0 : index
    %c0_3 = arith.constant 0 : index
    %c0_4 = arith.constant 0 : index
    %2 = vector.load %arg6[%c0_2, %c0_3, %c0_4] : memref<1x16x16xf32, #tpu.memory_space<vmem>>, vector<1x16x16xf32>
    %3 = vector.shape_cast %2 : vector<1x16x16xf32> to vector<16x16xf32>
    %4 = vector.broadcast %1 : vector<1x16xf32> to vector<16x16xf32>
    %5 = arith.mulf %3, %4 : vector<16x16xf32>
    %6 = arith.truncf %5 : vector<16x16xf32> to vector<16x16xbf16>
    %c0_5 = arith.constant 0 : index
    %c0_6 = arith.constant 0 : index
    %c0_7 = arith.constant 0 : index
    %7 = vector.load %arg7[%c0_5, %c0_6, %c0_7] : memref<1x16x16xf32, #tpu.memory_space<vmem>>, vector<1x16x16xf32>
    %8 = vector.shape_cast %7 : vector<1x16x16xf32> to vector<16x16xf32>
    %9 = vector.broadcast %1 : vector<1x16xf32> to vector<16x16xf32>
    %10 = arith.mulf %8, %9 : vector<16x16xf32>
    %11 = arith.truncf %10 : vector<16x16xf32> to vector<16x16xbf16>
    %c0_8 = arith.constant 0 : index
    %c0_9 = arith.constant 0 : index
    %12 = vector.load %arg1[%c0_8, %c0_9] : memref<16x16xbf16, #tpu.memory_space<vmem>>, vector<16x16xbf16>
    %c0_10 = arith.constant 0 : index
    %c0_11 = arith.constant 0 : index
    %13 = vector.load %arg2[%c0_10, %c0_11] : memref<16x16xbf16, #tpu.memory_space<vmem>>, vector<16x16xbf16>
    %cst = arith.constant dense<0.000000e+00> : vector<16x16xf32>
    %14 = tpu.matmul %12, %6, %cst {dimension_numbers = #tpu.dot_dimension_numbers<[1], [0], [0], [1], [0, 0, 1, 1], [], []>} : vector<16x16xbf16>, vector<16x16xbf16>, vector<16x16xf32> -> vector<16x16xf32>
    %cst_12 = arith.constant dense<0.000000e+00> : vector<16x16xf32>
    %15 = tpu.matmul %13, %11, %cst_12 {dimension_numbers = #tpu.dot_dimension_numbers<[1], [0], [0], [1], [0, 0, 1, 1], [], []>} : vector<16x16xbf16>, vector<16x16xbf16>, vector<16x16xf32> -> vector<16x16xf32>
    %16 = arith.subf %14, %15 : vector<16x16xf32>
    %cst_13 = arith.constant dense<0.000000e+00> : vector<16x16xf32>
    %17 = tpu.matmul %12, %11, %cst_13 {dimension_numbers = #tpu.dot_dimension_numbers<[1], [0], [0], [1], [0, 0, 1, 1], [], []>} : vector<16x16xbf16>, vector<16x16xbf16>, vector<16x16xf32> -> vector<16x16xf32>
    %cst_14 = arith.constant dense<0.000000e+00> : vector<16x16xf32>
    %18 = tpu.matmul %13, %6, %cst_14 {dimension_numbers = #tpu.dot_dimension_numbers<[1], [0], [0], [1], [0, 0, 1, 1], [], []>} : vector<16x16xbf16>, vector<16x16xbf16>, vector<16x16xf32> -> vector<16x16xf32>
    %19 = arith.addf %17, %18 : vector<16x16xf32>
    %20 = arith.truncf %16 : vector<16x16xf32> to vector<16x16xbf16>
    %21 = arith.truncf %19 : vector<16x16xf32> to vector<16x16xbf16>
    %c0_15 = arith.constant 0 : index
    %c0_16 = arith.constant 0 : index
    %22 = vector.load %arg3[%c0_15, %c0_16] : memref<16x16xbf16, #tpu.memory_space<vmem>>, vector<16x16xbf16>
    %c0_17 = arith.constant 0 : index
    %c0_18 = arith.constant 0 : index
    %23 = vector.load %arg4[%c0_17, %c0_18] : memref<16x16xbf16, #tpu.memory_space<vmem>>, vector<16x16xbf16>
    %cst_19 = arith.constant dense<0.000000e+00> : vector<16x16xf32>
    %24 = tpu.matmul %20, %22, %cst_19 {dimension_numbers = #tpu.dot_dimension_numbers<[1], [0], [0], [1], [0, 0, 1, 1], [], []>} : vector<16x16xbf16>, vector<16x16xbf16>, vector<16x16xf32> -> vector<16x16xf32>
    %cst_20 = arith.constant dense<0.000000e+00> : vector<16x16xf32>
    %25 = tpu.matmul %21, %23, %cst_20 {dimension_numbers = #tpu.dot_dimension_numbers<[1], [0], [0], [1], [0, 0, 1, 1], [], []>} : vector<16x16xbf16>, vector<16x16xbf16>, vector<16x16xf32> -> vector<16x16xf32>
    %26 = arith.subf %24, %25 : vector<16x16xf32>
    %c0_21 = arith.constant 0 : index
    %c0_22 = arith.constant 0 : index
    %c0_23 = arith.constant 0 : index
    %27 = vector.load %arg8[%c0_21, %c0_22, %c0_23] : memref<1x16x16xf32, #tpu.memory_space<vmem>>, vector<1x16x16xf32>
    %28 = vector.shape_cast %27 : vector<1x16x16xf32> to vector<16x16xf32>
    %29 = vector.shape_cast %26 : vector<16x16xf32> to vector<1x16x16xf32>
    tpu.vector_store %arg8[%c0_21, %c0_22, %c0_23], %29 {strides = array<i32>} : memref<1x16x16xf32, #tpu.memory_space<vmem>>, vector<1x16x16xf32>,
    %cst_24 = arith.constant dense<0.000000e+00> : vector<16x16xf32>
    %30 = tpu.matmul %20, %23, %cst_24 {dimension_numbers = #tpu.dot_dimension_numbers<[1], [0], [0], [1], [0, 0, 1, 1], [], []>} : vector<16x16xbf16>, vector<16x16xbf16>, vector<16x16xf32> -> vector<16x16xf32>
    %cst_25 = arith.constant dense<0.000000e+00> : vector<16x16xf32>
    %31 = tpu.matmul %21, %22, %cst_25 {dimension_numbers = #tpu.dot_dimension_numbers<[1], [0], [0], [1], [0, 0, 1, 1], [], []>} : vector<16x16xbf16>, vector<16x16xbf16>, vector<16x16xf32> -> vector<16x16xf32>
    %32 = arith.addf %30, %31 : vector<16x16xf32>
    %c0_26 = arith.constant 0 : index
    %c0_27 = arith.constant 0 : index
    %c0_28 = arith.constant 0 : index
    %33 = vector.load %arg9[%c0_26, %c0_27, %c0_28] : memref<1x16x16xf32, #tpu.memory_space<vmem>>, vector<1x16x16xf32>
    %34 = vector.shape_cast %33 : vector<1x16x16xf32> to vector<16x16xf32>
    %35 = vector.shape_cast %32 : vector<16x16xf32> to vector<1x16x16xf32>
    tpu.vector_store %arg9[%c0_26, %c0_27, %c0_28], %35 {strides = array<i32>} : memref<1x16x16xf32, #tpu.memory_space<vmem>>, vector<1x16x16xf32>,
    return
  }
  func.func @transform_0(%arg0: i32) -> (i32, i32) {
    %c0_i32 = arith.constant 0 : i32
    %c0_i32_0 = arith.constant 0 : i32
    %c0_i32_1 = arith.constant 0 : i32
    return %c0_i32, %c0_i32_0 : i32, i32
  }
  func.func @transform_1(%arg0: i32) -> (i32, i32) {
    %c0_i32 = arith.constant 0 : i32
    %c0_i32_0 = arith.constant 0 : i32
    %c0_i32_1 = arith.constant 0 : i32
    return %c0_i32, %c0_i32_0 : i32, i32
  }
  func.func @transform_2(%arg0: i32) -> (i32, i32) {
    %c0_i32 = arith.constant 0 : i32
    %c0_i32_0 = arith.constant 0 : i32
    %c0_i32_1 = arith.constant 0 : i32
    return %c0_i32, %c0_i32_0 : i32, i32
  }
  func.func @transform_3(%arg0: i32) -> (i32, i32) {
    %c0_i32 = arith.constant 0 : i32
    %c0_i32_0 = arith.constant 0 : i32
    %c0_i32_1 = arith.constant 0 : i32
    return %c0_i32, %c0_i32_0 : i32, i32
  }
  func.func @transform_4(%arg0: i32) -> (i32, i32, i32) {
    %c0_i32 = arith.constant 0 : i32
    %c0_i32_0 = arith.constant 0 : i32
    %c0_i32_1 = arith.constant 0 : i32
    return %arg0, %c0_i32, %c0_i32_0 : i32, i32, i32
  }
  func.func @transform_5(%arg0: i32) -> (i32, i32, i32) {
    %c0_i32 = arith.constant 0 : i32
    %c0_i32_0 = arith.constant 0 : i32
    %c0_i32_1 = arith.constant 0 : i32
    return %arg0, %c0_i32, %c0_i32_0 : i32, i32, i32
  }
  func.func @transform_6(%arg0: i32) -> (i32, i32, i32) {
    %c0_i32 = arith.constant 0 : i32
    %c0_i32_0 = arith.constant 0 : i32
    %c0_i32_1 = arith.constant 0 : i32
    return %arg0, %c0_i32, %c0_i32_0 : i32, i32, i32
  }
  func.func @transform_7(%arg0: i32) -> (i32, i32, i32) {
    %c0_i32 = arith.constant 0 : i32
    %c0_i32_0 = arith.constant 0 : i32
    %c0_i32_1 = arith.constant 0 : i32
    return %arg0, %c0_i32, %c0_i32_0 : i32, i32, i32
  }
  func.func @transform_8(%arg0: i32) -> (i32, i32, i32) {
    %c0_i32 = arith.constant 0 : i32
    %c0_i32_0 = arith.constant 0 : i32
    %c0_i32_1 = arith.constant 0 : i32
    return %arg0, %c0_i32, %c0_i32_0 : i32, i32, i32
  }
}

module attributes {stable_mosaic.version = 11 : i64} {
  func.func @_conv3x3_in_lrelu_kernel(%arg0: i32, %arg1: memref<8x18xbf16, #tpu.memory_space<vmem>>, %arg2: memref<1x18x256xbf16, #tpu.memory_space<vmem>>, %arg3: memref<1x8x256xf32, #tpu.memory_space<vmem>>) attributes {dimension_semantics = [#tpu.dimension_semantics<parallel>], iteration_bounds = array<i64: 8>, scalar_prefetch = 0 : i64, scratch_operands = 0 : i64, tpu.core_type = #tpu.core_type<tc>, window_params = [{pipeline_mode = #tpu.pipeline_mode<synchronous>, transform_indices = @transform_0, window_bounds = array<i64: 8, 18>}, {transform_indices = @transform_1, window_bounds = array<i64: 1, 18, 256>}, {transform_indices = @transform_2, window_bounds = array<i64: 1, 8, 256>}]} {
    %c0 = arith.constant 0 : index
    %c0_0 = arith.constant 0 : index
    %0 = vector.load %arg1[%c0, %c0_0] : memref<8x18xbf16, #tpu.memory_space<vmem>>, vector<8x18xbf16>
    %c0_1 = arith.constant 0 : index
    %c0_2 = arith.constant 0 : index
    %c0_3 = arith.constant 0 : index
    %1 = vector.load %arg2[%c0_1, %c0_2, %c0_3] : memref<1x18x256xbf16, #tpu.memory_space<vmem>>, vector<1x18x256xbf16>
    %2 = vector.shape_cast %1 : vector<1x18x256xbf16> to vector<18x256xbf16>
    %cst = arith.constant dense<0.000000e+00> : vector<8x256xf32>
    %3 = tpu.matmul %0, %2, %cst {dimension_numbers = #tpu.dot_dimension_numbers<[1], [0], [0], [1], [0, 0, 1, 1], [], []>} : vector<8x18xbf16>, vector<18x256xbf16>, vector<8x256xf32> -> vector<8x256xf32>
    %cst_4 = arith.constant dense<0.000000e+00> : vector<8xf32>
    %4 = vector.multi_reduction <add>, %3, %cst_4 [1] : vector<8x256xf32> to vector<8xf32>
    %5 = vector.shape_cast %4 : vector<8xf32> to vector<8x1xf32>
    %cst_5 = arith.constant 2.560000e+02 : f32
    %6 = vector.broadcast %cst_5 : f32 to vector<8x1xf32>
    %7 = arith.divf %5, %6 : vector<8x1xf32>
    %8 = arith.mulf %3, %3 : vector<8x256xf32>
    %cst_6 = arith.constant dense<0.000000e+00> : vector<8xf32>
    %9 = vector.multi_reduction <add>, %8, %cst_6 [1] : vector<8x256xf32> to vector<8xf32>
    %10 = vector.shape_cast %9 : vector<8xf32> to vector<8x1xf32>
    %cst_7 = arith.constant 2.560000e+02 : f32
    %11 = vector.broadcast %cst_7 : f32 to vector<8x1xf32>
    %12 = arith.divf %10, %11 : vector<8x1xf32>
    %13 = arith.mulf %7, %7 : vector<8x1xf32>
    %14 = arith.subf %12, %13 : vector<8x1xf32>
    %cst_8 = arith.constant 0.000000e+00 : f32
    %15 = vector.broadcast %cst_8 : f32 to vector<8x1xf32>
    %16 = arith.maximumf %14, %15 : vector<8x1xf32>
    %17 = vector.broadcast %7 : vector<8x1xf32> to vector<8x256xf32>
    %18 = arith.subf %3, %17 : vector<8x256xf32>
    %cst_9 = arith.constant 9.99999974E-6 : f32
    %19 = vector.broadcast %cst_9 : f32 to vector<8x1xf32>
    %20 = arith.addf %16, %19 : vector<8x1xf32>
    %21 = math.rsqrt %20 : vector<8x1xf32>
    %22 = vector.broadcast %21 : vector<8x1xf32> to vector<8x256xf32>
    %23 = arith.mulf %18, %22 : vector<8x256xf32>
    %cst_10 = arith.constant 0.000000e+00 : f32
    %24 = vector.broadcast %cst_10 : f32 to vector<8x256xf32>
    %25 = arith.cmpf oge, %23, %24 : vector<8x256xf32>
    %cst_11 = arith.constant 2.000000e-01 : f32
    %26 = vector.broadcast %cst_11 : f32 to vector<8x256xf32>
    %27 = arith.mulf %26, %23 : vector<8x256xf32>
    %28 = arith.select %25, %23, %27 : vector<8x256xi1>, vector<8x256xf32>
    %c0_12 = arith.constant 0 : index
    %c0_13 = arith.constant 0 : index
    %c0_14 = arith.constant 0 : index
    %29 = vector.load %arg3[%c0_12, %c0_13, %c0_14] : memref<1x8x256xf32, #tpu.memory_space<vmem>>, vector<1x8x256xf32>
    %30 = vector.shape_cast %29 : vector<1x8x256xf32> to vector<8x256xf32>
    %31 = vector.shape_cast %28 : vector<8x256xf32> to vector<1x8x256xf32>
    tpu.vector_store %arg3[%c0_12, %c0_13, %c0_14], %31 {strides = array<i32>} : memref<1x8x256xf32, #tpu.memory_space<vmem>>, vector<1x8x256xf32>,
    return
  }
  func.func @transform_0(%arg0: i32) -> (i32, i32) {
    %c0_i32 = arith.constant 0 : i32
    %c0_i32_0 = arith.constant 0 : i32
    %c0_i32_1 = arith.constant 0 : i32
    return %c0_i32, %c0_i32_0 : i32, i32
  }
  func.func @transform_1(%arg0: i32) -> (i32, i32, i32) {
    %c0_i32 = arith.constant 0 : i32
    %c0_i32_0 = arith.constant 0 : i32
    %c0_i32_1 = arith.constant 0 : i32
    return %arg0, %c0_i32, %c0_i32_0 : i32, i32, i32
  }
  func.func @transform_2(%arg0: i32) -> (i32, i32, i32) {
    %c0_i32 = arith.constant 0 : i32
    %c0_i32_0 = arith.constant 0 : i32
    %c0_i32_1 = arith.constant 0 : i32
    return %arg0, %c0_i32, %c0_i32_0 : i32, i32, i32
  }
}

module attributes {stable_mosaic.version = 11 : i64} {
  func.func @_conv3x3_in_lrelu_kernel(%arg0: i32, %arg1: memref<8x72xbf16, #tpu.memory_space<vmem>>, %arg2: memref<1x72x256xbf16, #tpu.memory_space<vmem>>, %arg3: memref<1x8x256xf32, #tpu.memory_space<vmem>>) attributes {dimension_semantics = [#tpu.dimension_semantics<parallel>], iteration_bounds = array<i64: 8>, scalar_prefetch = 0 : i64, scratch_operands = 0 : i64, tpu.core_type = #tpu.core_type<tc>, window_params = [{pipeline_mode = #tpu.pipeline_mode<synchronous>, transform_indices = @transform_0, window_bounds = array<i64: 8, 72>}, {transform_indices = @transform_1, window_bounds = array<i64: 1, 72, 256>}, {transform_indices = @transform_2, window_bounds = array<i64: 1, 8, 256>}]} {
    %c0 = arith.constant 0 : index
    %c0_0 = arith.constant 0 : index
    %0 = vector.load %arg1[%c0, %c0_0] : memref<8x72xbf16, #tpu.memory_space<vmem>>, vector<8x72xbf16>
    %c0_1 = arith.constant 0 : index
    %c0_2 = arith.constant 0 : index
    %c0_3 = arith.constant 0 : index
    %1 = vector.load %arg2[%c0_1, %c0_2, %c0_3] : memref<1x72x256xbf16, #tpu.memory_space<vmem>>, vector<1x72x256xbf16>
    %2 = vector.shape_cast %1 : vector<1x72x256xbf16> to vector<72x256xbf16>
    %cst = arith.constant dense<0.000000e+00> : vector<8x256xf32>
    %3 = tpu.matmul %0, %2, %cst {dimension_numbers = #tpu.dot_dimension_numbers<[1], [0], [0], [1], [0, 0, 1, 1], [], []>} : vector<8x72xbf16>, vector<72x256xbf16>, vector<8x256xf32> -> vector<8x256xf32>
    %cst_4 = arith.constant dense<0.000000e+00> : vector<8xf32>
    %4 = vector.multi_reduction <add>, %3, %cst_4 [1] : vector<8x256xf32> to vector<8xf32>
    %5 = vector.shape_cast %4 : vector<8xf32> to vector<8x1xf32>
    %cst_5 = arith.constant 2.560000e+02 : f32
    %6 = vector.broadcast %cst_5 : f32 to vector<8x1xf32>
    %7 = arith.divf %5, %6 : vector<8x1xf32>
    %8 = arith.mulf %3, %3 : vector<8x256xf32>
    %cst_6 = arith.constant dense<0.000000e+00> : vector<8xf32>
    %9 = vector.multi_reduction <add>, %8, %cst_6 [1] : vector<8x256xf32> to vector<8xf32>
    %10 = vector.shape_cast %9 : vector<8xf32> to vector<8x1xf32>
    %cst_7 = arith.constant 2.560000e+02 : f32
    %11 = vector.broadcast %cst_7 : f32 to vector<8x1xf32>
    %12 = arith.divf %10, %11 : vector<8x1xf32>
    %13 = arith.mulf %7, %7 : vector<8x1xf32>
    %14 = arith.subf %12, %13 : vector<8x1xf32>
    %cst_8 = arith.constant 0.000000e+00 : f32
    %15 = vector.broadcast %cst_8 : f32 to vector<8x1xf32>
    %16 = arith.maximumf %14, %15 : vector<8x1xf32>
    %17 = vector.broadcast %7 : vector<8x1xf32> to vector<8x256xf32>
    %18 = arith.subf %3, %17 : vector<8x256xf32>
    %cst_9 = arith.constant 9.99999974E-6 : f32
    %19 = vector.broadcast %cst_9 : f32 to vector<8x1xf32>
    %20 = arith.addf %16, %19 : vector<8x1xf32>
    %21 = math.rsqrt %20 : vector<8x1xf32>
    %22 = vector.broadcast %21 : vector<8x1xf32> to vector<8x256xf32>
    %23 = arith.mulf %18, %22 : vector<8x256xf32>
    %cst_10 = arith.constant 0.000000e+00 : f32
    %24 = vector.broadcast %cst_10 : f32 to vector<8x256xf32>
    %25 = arith.cmpf oge, %23, %24 : vector<8x256xf32>
    %cst_11 = arith.constant 2.000000e-01 : f32
    %26 = vector.broadcast %cst_11 : f32 to vector<8x256xf32>
    %27 = arith.mulf %26, %23 : vector<8x256xf32>
    %28 = arith.select %25, %23, %27 : vector<8x256xi1>, vector<8x256xf32>
    %c0_12 = arith.constant 0 : index
    %c0_13 = arith.constant 0 : index
    %c0_14 = arith.constant 0 : index
    %29 = vector.load %arg3[%c0_12, %c0_13, %c0_14] : memref<1x8x256xf32, #tpu.memory_space<vmem>>, vector<1x8x256xf32>
    %30 = vector.shape_cast %29 : vector<1x8x256xf32> to vector<8x256xf32>
    %31 = vector.shape_cast %28 : vector<8x256xf32> to vector<1x8x256xf32>
    tpu.vector_store %arg3[%c0_12, %c0_13, %c0_14], %31 {strides = array<i32>} : memref<1x8x256xf32, #tpu.memory_space<vmem>>, vector<1x8x256xf32>,
    return
  }
  func.func @transform_0(%arg0: i32) -> (i32, i32) {
    %c0_i32 = arith.constant 0 : i32
    %c0_i32_0 = arith.constant 0 : i32
    %c0_i32_1 = arith.constant 0 : i32
    return %c0_i32, %c0_i32_0 : i32, i32
  }
  func.func @transform_1(%arg0: i32) -> (i32, i32, i32) {
    %c0_i32 = arith.constant 0 : i32
    %c0_i32_0 = arith.constant 0 : i32
    %c0_i32_1 = arith.constant 0 : i32
    return %arg0, %c0_i32, %c0_i32_0 : i32, i32, i32
  }
  func.func @transform_2(%arg0: i32) -> (i32, i32, i32) {
    %c0_i32 = arith.constant 0 : i32
    %c0_i32_0 = arith.constant 0 : i32
    %c0_i32_1 = arith.constant 0 : i32
    return %arg0, %c0_i32, %c0_i32_0 : i32, i32, i32
  }
}

module attributes {stable_mosaic.version = 11 : i64} {
  func.func @_conv3x3_in_lrelu_kernel(%arg0: i32, %arg1: memref<16x72xbf16, #tpu.memory_space<vmem>>, %arg2: memref<1x72x64xbf16, #tpu.memory_space<vmem>>, %arg3: memref<1x16x64xf32, #tpu.memory_space<vmem>>) attributes {dimension_semantics = [#tpu.dimension_semantics<parallel>], iteration_bounds = array<i64: 8>, scalar_prefetch = 0 : i64, scratch_operands = 0 : i64, tpu.core_type = #tpu.core_type<tc>, window_params = [{pipeline_mode = #tpu.pipeline_mode<synchronous>, transform_indices = @transform_0, window_bounds = array<i64: 16, 72>}, {transform_indices = @transform_1, window_bounds = array<i64: 1, 72, 64>}, {transform_indices = @transform_2, window_bounds = array<i64: 1, 16, 64>}]} {
    %c0 = arith.constant 0 : index
    %c0_0 = arith.constant 0 : index
    %0 = vector.load %arg1[%c0, %c0_0] : memref<16x72xbf16, #tpu.memory_space<vmem>>, vector<16x72xbf16>
    %c0_1 = arith.constant 0 : index
    %c0_2 = arith.constant 0 : index
    %c0_3 = arith.constant 0 : index
    %1 = vector.load %arg2[%c0_1, %c0_2, %c0_3] : memref<1x72x64xbf16, #tpu.memory_space<vmem>>, vector<1x72x64xbf16>
    %2 = vector.shape_cast %1 : vector<1x72x64xbf16> to vector<72x64xbf16>
    %cst = arith.constant dense<0.000000e+00> : vector<16x64xf32>
    %3 = tpu.matmul %0, %2, %cst {dimension_numbers = #tpu.dot_dimension_numbers<[1], [0], [0], [1], [0, 0, 1, 1], [], []>} : vector<16x72xbf16>, vector<72x64xbf16>, vector<16x64xf32> -> vector<16x64xf32>
    %cst_4 = arith.constant dense<0.000000e+00> : vector<16xf32>
    %4 = vector.multi_reduction <add>, %3, %cst_4 [1] : vector<16x64xf32> to vector<16xf32>
    %5 = vector.shape_cast %4 : vector<16xf32> to vector<16x1xf32>
    %cst_5 = arith.constant 6.400000e+01 : f32
    %6 = vector.broadcast %cst_5 : f32 to vector<16x1xf32>
    %7 = arith.divf %5, %6 : vector<16x1xf32>
    %8 = arith.mulf %3, %3 : vector<16x64xf32>
    %cst_6 = arith.constant dense<0.000000e+00> : vector<16xf32>
    %9 = vector.multi_reduction <add>, %8, %cst_6 [1] : vector<16x64xf32> to vector<16xf32>
    %10 = vector.shape_cast %9 : vector<16xf32> to vector<16x1xf32>
    %cst_7 = arith.constant 6.400000e+01 : f32
    %11 = vector.broadcast %cst_7 : f32 to vector<16x1xf32>
    %12 = arith.divf %10, %11 : vector<16x1xf32>
    %13 = arith.mulf %7, %7 : vector<16x1xf32>
    %14 = arith.subf %12, %13 : vector<16x1xf32>
    %cst_8 = arith.constant 0.000000e+00 : f32
    %15 = vector.broadcast %cst_8 : f32 to vector<16x1xf32>
    %16 = arith.maximumf %14, %15 : vector<16x1xf32>
    %17 = vector.broadcast %7 : vector<16x1xf32> to vector<16x64xf32>
    %18 = arith.subf %3, %17 : vector<16x64xf32>
    %cst_9 = arith.constant 9.99999974E-6 : f32
    %19 = vector.broadcast %cst_9 : f32 to vector<16x1xf32>
    %20 = arith.addf %16, %19 : vector<16x1xf32>
    %21 = math.rsqrt %20 : vector<16x1xf32>
    %22 = vector.broadcast %21 : vector<16x1xf32> to vector<16x64xf32>
    %23 = arith.mulf %18, %22 : vector<16x64xf32>
    %cst_10 = arith.constant 0.000000e+00 : f32
    %24 = vector.broadcast %cst_10 : f32 to vector<16x64xf32>
    %25 = arith.cmpf oge, %23, %24 : vector<16x64xf32>
    %cst_11 = arith.constant 2.000000e-01 : f32
    %26 = vector.broadcast %cst_11 : f32 to vector<16x64xf32>
    %27 = arith.mulf %26, %23 : vector<16x64xf32>
    %28 = arith.select %25, %23, %27 : vector<16x64xi1>, vector<16x64xf32>
    %c0_12 = arith.constant 0 : index
    %c0_13 = arith.constant 0 : index
    %c0_14 = arith.constant 0 : index
    %29 = vector.load %arg3[%c0_12, %c0_13, %c0_14] : memref<1x16x64xf32, #tpu.memory_space<vmem>>, vector<1x16x64xf32>
    %30 = vector.shape_cast %29 : vector<1x16x64xf32> to vector<16x64xf32>
    %31 = vector.shape_cast %28 : vector<16x64xf32> to vector<1x16x64xf32>
    tpu.vector_store %arg3[%c0_12, %c0_13, %c0_14], %31 {strides = array<i32>} : memref<1x16x64xf32, #tpu.memory_space<vmem>>, vector<1x16x64xf32>,
    return
  }
  func.func @transform_0(%arg0: i32) -> (i32, i32) {
    %c0_i32 = arith.constant 0 : i32
    %c0_i32_0 = arith.constant 0 : i32
    %c0_i32_1 = arith.constant 0 : i32
    return %c0_i32, %c0_i32_0 : i32, i32
  }
  func.func @transform_1(%arg0: i32) -> (i32, i32, i32) {
    %c0_i32 = arith.constant 0 : i32
    %c0_i32_0 = arith.constant 0 : i32
    %c0_i32_1 = arith.constant 0 : i32
    return %arg0, %c0_i32, %c0_i32_0 : i32, i32, i32
  }
  func.func @transform_2(%arg0: i32) -> (i32, i32, i32) {
    %c0_i32 = arith.constant 0 : i32
    %c0_i32_0 = arith.constant 0 : i32
    %c0_i32_1 = arith.constant 0 : i32
    return %arg0, %c0_i32, %c0_i32_0 : i32, i32, i32
  }
}

module attributes {stable_mosaic.version = 11 : i64} {
  func.func @_conv3x3_in_lrelu_kernel(%arg0: i32, %arg1: memref<16x144xbf16, #tpu.memory_space<vmem>>, %arg2: memref<1x144x64xbf16, #tpu.memory_space<vmem>>, %arg3: memref<1x16x64xf32, #tpu.memory_space<vmem>>) attributes {dimension_semantics = [#tpu.dimension_semantics<parallel>], iteration_bounds = array<i64: 8>, scalar_prefetch = 0 : i64, scratch_operands = 0 : i64, tpu.core_type = #tpu.core_type<tc>, window_params = [{pipeline_mode = #tpu.pipeline_mode<synchronous>, transform_indices = @transform_0, window_bounds = array<i64: 16, 144>}, {transform_indices = @transform_1, window_bounds = array<i64: 1, 144, 64>}, {transform_indices = @transform_2, window_bounds = array<i64: 1, 16, 64>}]} {
    %c0 = arith.constant 0 : index
    %c0_0 = arith.constant 0 : index
    %0 = vector.load %arg1[%c0, %c0_0] : memref<16x144xbf16, #tpu.memory_space<vmem>>, vector<16x144xbf16>
    %c0_1 = arith.constant 0 : index
    %c0_2 = arith.constant 0 : index
    %c0_3 = arith.constant 0 : index
    %1 = vector.load %arg2[%c0_1, %c0_2, %c0_3] : memref<1x144x64xbf16, #tpu.memory_space<vmem>>, vector<1x144x64xbf16>
    %2 = vector.shape_cast %1 : vector<1x144x64xbf16> to vector<144x64xbf16>
    %cst = arith.constant dense<0.000000e+00> : vector<16x64xf32>
    %3 = tpu.matmul %0, %2, %cst {dimension_numbers = #tpu.dot_dimension_numbers<[1], [0], [0], [1], [0, 0, 1, 1], [], []>} : vector<16x144xbf16>, vector<144x64xbf16>, vector<16x64xf32> -> vector<16x64xf32>
    %cst_4 = arith.constant dense<0.000000e+00> : vector<16xf32>
    %4 = vector.multi_reduction <add>, %3, %cst_4 [1] : vector<16x64xf32> to vector<16xf32>
    %5 = vector.shape_cast %4 : vector<16xf32> to vector<16x1xf32>
    %cst_5 = arith.constant 6.400000e+01 : f32
    %6 = vector.broadcast %cst_5 : f32 to vector<16x1xf32>
    %7 = arith.divf %5, %6 : vector<16x1xf32>
    %8 = arith.mulf %3, %3 : vector<16x64xf32>
    %cst_6 = arith.constant dense<0.000000e+00> : vector<16xf32>
    %9 = vector.multi_reduction <add>, %8, %cst_6 [1] : vector<16x64xf32> to vector<16xf32>
    %10 = vector.shape_cast %9 : vector<16xf32> to vector<16x1xf32>
    %cst_7 = arith.constant 6.400000e+01 : f32
    %11 = vector.broadcast %cst_7 : f32 to vector<16x1xf32>
    %12 = arith.divf %10, %11 : vector<16x1xf32>
    %13 = arith.mulf %7, %7 : vector<16x1xf32>
    %14 = arith.subf %12, %13 : vector<16x1xf32>
    %cst_8 = arith.constant 0.000000e+00 : f32
    %15 = vector.broadcast %cst_8 : f32 to vector<16x1xf32>
    %16 = arith.maximumf %14, %15 : vector<16x1xf32>
    %17 = vector.broadcast %7 : vector<16x1xf32> to vector<16x64xf32>
    %18 = arith.subf %3, %17 : vector<16x64xf32>
    %cst_9 = arith.constant 9.99999974E-6 : f32
    %19 = vector.broadcast %cst_9 : f32 to vector<16x1xf32>
    %20 = arith.addf %16, %19 : vector<16x1xf32>
    %21 = math.rsqrt %20 : vector<16x1xf32>
    %22 = vector.broadcast %21 : vector<16x1xf32> to vector<16x64xf32>
    %23 = arith.mulf %18, %22 : vector<16x64xf32>
    %cst_10 = arith.constant 0.000000e+00 : f32
    %24 = vector.broadcast %cst_10 : f32 to vector<16x64xf32>
    %25 = arith.cmpf oge, %23, %24 : vector<16x64xf32>
    %cst_11 = arith.constant 2.000000e-01 : f32
    %26 = vector.broadcast %cst_11 : f32 to vector<16x64xf32>
    %27 = arith.mulf %26, %23 : vector<16x64xf32>
    %28 = arith.select %25, %23, %27 : vector<16x64xi1>, vector<16x64xf32>
    %c0_12 = arith.constant 0 : index
    %c0_13 = arith.constant 0 : index
    %c0_14 = arith.constant 0 : index
    %29 = vector.load %arg3[%c0_12, %c0_13, %c0_14] : memref<1x16x64xf32, #tpu.memory_space<vmem>>, vector<1x16x64xf32>
    %30 = vector.shape_cast %29 : vector<1x16x64xf32> to vector<16x64xf32>
    %31 = vector.shape_cast %28 : vector<16x64xf32> to vector<1x16x64xf32>
    tpu.vector_store %arg3[%c0_12, %c0_13, %c0_14], %31 {strides = array<i32>} : memref<1x16x64xf32, #tpu.memory_space<vmem>>, vector<1x16x64xf32>,
    return
  }
  func.func @transform_0(%arg0: i32) -> (i32, i32) {
    %c0_i32 = arith.constant 0 : i32
    %c0_i32_0 = arith.constant 0 : i32
    %c0_i32_1 = arith.constant 0 : i32
    return %c0_i32, %c0_i32_0 : i32, i32
  }
  func.func @transform_1(%arg0: i32) -> (i32, i32, i32) {
    %c0_i32 = arith.constant 0 : i32
    %c0_i32_0 = arith.constant 0 : i32
    %c0_i32_1 = arith.constant 0 : i32
    return %arg0, %c0_i32, %c0_i32_0 : i32, i32, i32
  }
  func.func @transform_2(%arg0: i32) -> (i32, i32, i32) {
    %c0_i32 = arith.constant 0 : i32
    %c0_i32_0 = arith.constant 0 : i32
    %c0_i32_1 = arith.constant 0 : i32
    return %arg0, %c0_i32, %c0_i32_0 : i32, i32, i32
  }
}

module attributes {stable_mosaic.version = 11 : i64} {
  func.func @_conv3x3_in_lrelu_kernel(%arg0: i32, %arg1: memref<32x144xbf16, #tpu.memory_space<vmem>>, %arg2: memref<1x144x16xbf16, #tpu.memory_space<vmem>>, %arg3: memref<1x32x16xf32, #tpu.memory_space<vmem>>) attributes {dimension_semantics = [#tpu.dimension_semantics<parallel>], iteration_bounds = array<i64: 8>, scalar_prefetch = 0 : i64, scratch_operands = 0 : i64, tpu.core_type = #tpu.core_type<tc>, window_params = [{pipeline_mode = #tpu.pipeline_mode<synchronous>, transform_indices = @transform_0, window_bounds = array<i64: 32, 144>}, {transform_indices = @transform_1, window_bounds = array<i64: 1, 144, 16>}, {transform_indices = @transform_2, window_bounds = array<i64: 1, 32, 16>}]} {
    %c0 = arith.constant 0 : index
    %c0_0 = arith.constant 0 : index
    %0 = vector.load %arg1[%c0, %c0_0] : memref<32x144xbf16, #tpu.memory_space<vmem>>, vector<32x144xbf16>
    %c0_1 = arith.constant 0 : index
    %c0_2 = arith.constant 0 : index
    %c0_3 = arith.constant 0 : index
    %1 = vector.load %arg2[%c0_1, %c0_2, %c0_3] : memref<1x144x16xbf16, #tpu.memory_space<vmem>>, vector<1x144x16xbf16>
    %2 = vector.shape_cast %1 : vector<1x144x16xbf16> to vector<144x16xbf16>
    %cst = arith.constant dense<0.000000e+00> : vector<32x16xf32>
    %3 = tpu.matmul %0, %2, %cst {dimension_numbers = #tpu.dot_dimension_numbers<[1], [0], [0], [1], [0, 0, 1, 1], [], []>} : vector<32x144xbf16>, vector<144x16xbf16>, vector<32x16xf32> -> vector<32x16xf32>
    %cst_4 = arith.constant dense<0.000000e+00> : vector<32xf32>
    %4 = vector.multi_reduction <add>, %3, %cst_4 [1] : vector<32x16xf32> to vector<32xf32>
    %5 = vector.shape_cast %4 : vector<32xf32> to vector<32x1xf32>
    %cst_5 = arith.constant 1.600000e+01 : f32
    %6 = vector.broadcast %cst_5 : f32 to vector<32x1xf32>
    %7 = arith.divf %5, %6 : vector<32x1xf32>
    %8 = arith.mulf %3, %3 : vector<32x16xf32>
    %cst_6 = arith.constant dense<0.000000e+00> : vector<32xf32>
    %9 = vector.multi_reduction <add>, %8, %cst_6 [1] : vector<32x16xf32> to vector<32xf32>
    %10 = vector.shape_cast %9 : vector<32xf32> to vector<32x1xf32>
    %cst_7 = arith.constant 1.600000e+01 : f32
    %11 = vector.broadcast %cst_7 : f32 to vector<32x1xf32>
    %12 = arith.divf %10, %11 : vector<32x1xf32>
    %13 = arith.mulf %7, %7 : vector<32x1xf32>
    %14 = arith.subf %12, %13 : vector<32x1xf32>
    %cst_8 = arith.constant 0.000000e+00 : f32
    %15 = vector.broadcast %cst_8 : f32 to vector<32x1xf32>
    %16 = arith.maximumf %14, %15 : vector<32x1xf32>
    %17 = vector.broadcast %7 : vector<32x1xf32> to vector<32x16xf32>
    %18 = arith.subf %3, %17 : vector<32x16xf32>
    %cst_9 = arith.constant 9.99999974E-6 : f32
    %19 = vector.broadcast %cst_9 : f32 to vector<32x1xf32>
    %20 = arith.addf %16, %19 : vector<32x1xf32>
    %21 = math.rsqrt %20 : vector<32x1xf32>
    %22 = vector.broadcast %21 : vector<32x1xf32> to vector<32x16xf32>
    %23 = arith.mulf %18, %22 : vector<32x16xf32>
    %cst_10 = arith.constant 0.000000e+00 : f32
    %24 = vector.broadcast %cst_10 : f32 to vector<32x16xf32>
    %25 = arith.cmpf oge, %23, %24 : vector<32x16xf32>
    %cst_11 = arith.constant 2.000000e-01 : f32
    %26 = vector.broadcast %cst_11 : f32 to vector<32x16xf32>
    %27 = arith.mulf %26, %23 : vector<32x16xf32>
    %28 = arith.select %25, %23, %27 : vector<32x16xi1>, vector<32x16xf32>
    %c0_12 = arith.constant 0 : index
    %c0_13 = arith.constant 0 : index
    %c0_14 = arith.constant 0 : index
    %29 = vector.load %arg3[%c0_12, %c0_13, %c0_14] : memref<1x32x16xf32, #tpu.memory_space<vmem>>, vector<1x32x16xf32>
    %30 = vector.shape_cast %29 : vector<1x32x16xf32> to vector<32x16xf32>
    %31 = vector.shape_cast %28 : vector<32x16xf32> to vector<1x32x16xf32>
    tpu.vector_store %arg3[%c0_12, %c0_13, %c0_14], %31 {strides = array<i32>} : memref<1x32x16xf32, #tpu.memory_space<vmem>>, vector<1x32x16xf32>,
    return
  }
  func.func @transform_0(%arg0: i32) -> (i32, i32) {
    %c0_i32 = arith.constant 0 : i32
    %c0_i32_0 = arith.constant 0 : i32
    %c0_i32_1 = arith.constant 0 : i32
    return %c0_i32, %c0_i32_0 : i32, i32
  }
  func.func @transform_1(%arg0: i32) -> (i32, i32, i32) {
    %c0_i32 = arith.constant 0 : i32
    %c0_i32_0 = arith.constant 0 : i32
    %c0_i32_1 = arith.constant 0 : i32
    return %arg0, %c0_i32, %c0_i32_0 : i32, i32, i32
  }
  func.func @transform_2(%arg0: i32) -> (i32, i32, i32) {
    %c0_i32 = arith.constant 0 : i32
    %c0_i32_0 = arith.constant 0 : i32
    %c0_i32_1 = arith.constant 0 : i32
    return %arg0, %c0_i32, %c0_i32_0 : i32, i32, i32
  }
}

module attributes {stable_mosaic.version = 11 : i64} {
  func.func @_conv3x3_in_lrelu_kernel(%arg0: i32, %arg1: memref<32x288xbf16, #tpu.memory_space<vmem>>, %arg2: memref<1x288x16xbf16, #tpu.memory_space<vmem>>, %arg3: memref<1x32x16xf32, #tpu.memory_space<vmem>>) attributes {dimension_semantics = [#tpu.dimension_semantics<parallel>], iteration_bounds = array<i64: 8>, scalar_prefetch = 0 : i64, scratch_operands = 0 : i64, tpu.core_type = #tpu.core_type<tc>, window_params = [{pipeline_mode = #tpu.pipeline_mode<synchronous>, transform_indices = @transform_0, window_bounds = array<i64: 32, 288>}, {transform_indices = @transform_1, window_bounds = array<i64: 1, 288, 16>}, {transform_indices = @transform_2, window_bounds = array<i64: 1, 32, 16>}]} {
    %c0 = arith.constant 0 : index
    %c0_0 = arith.constant 0 : index
    %0 = vector.load %arg1[%c0, %c0_0] : memref<32x288xbf16, #tpu.memory_space<vmem>>, vector<32x288xbf16>
    %c0_1 = arith.constant 0 : index
    %c0_2 = arith.constant 0 : index
    %c0_3 = arith.constant 0 : index
    %1 = vector.load %arg2[%c0_1, %c0_2, %c0_3] : memref<1x288x16xbf16, #tpu.memory_space<vmem>>, vector<1x288x16xbf16>
    %2 = vector.shape_cast %1 : vector<1x288x16xbf16> to vector<288x16xbf16>
    %cst = arith.constant dense<0.000000e+00> : vector<32x16xf32>
    %3 = tpu.matmul %0, %2, %cst {dimension_numbers = #tpu.dot_dimension_numbers<[1], [0], [0], [1], [0, 0, 1, 1], [], []>} : vector<32x288xbf16>, vector<288x16xbf16>, vector<32x16xf32> -> vector<32x16xf32>
    %cst_4 = arith.constant dense<0.000000e+00> : vector<32xf32>
    %4 = vector.multi_reduction <add>, %3, %cst_4 [1] : vector<32x16xf32> to vector<32xf32>
    %5 = vector.shape_cast %4 : vector<32xf32> to vector<32x1xf32>
    %cst_5 = arith.constant 1.600000e+01 : f32
    %6 = vector.broadcast %cst_5 : f32 to vector<32x1xf32>
    %7 = arith.divf %5, %6 : vector<32x1xf32>
    %8 = arith.mulf %3, %3 : vector<32x16xf32>
    %cst_6 = arith.constant dense<0.000000e+00> : vector<32xf32>
    %9 = vector.multi_reduction <add>, %8, %cst_6 [1] : vector<32x16xf32> to vector<32xf32>
    %10 = vector.shape_cast %9 : vector<32xf32> to vector<32x1xf32>
    %cst_7 = arith.constant 1.600000e+01 : f32
    %11 = vector.broadcast %cst_7 : f32 to vector<32x1xf32>
    %12 = arith.divf %10, %11 : vector<32x1xf32>
    %13 = arith.mulf %7, %7 : vector<32x1xf32>
    %14 = arith.subf %12, %13 : vector<32x1xf32>
    %cst_8 = arith.constant 0.000000e+00 : f32
    %15 = vector.broadcast %cst_8 : f32 to vector<32x1xf32>
    %16 = arith.maximumf %14, %15 : vector<32x1xf32>
    %17 = vector.broadcast %7 : vector<32x1xf32> to vector<32x16xf32>
    %18 = arith.subf %3, %17 : vector<32x16xf32>
    %cst_9 = arith.constant 9.99999974E-6 : f32
    %19 = vector.broadcast %cst_9 : f32 to vector<32x1xf32>
    %20 = arith.addf %16, %19 : vector<32x1xf32>
    %21 = math.rsqrt %20 : vector<32x1xf32>
    %22 = vector.broadcast %21 : vector<32x1xf32> to vector<32x16xf32>
    %23 = arith.mulf %18, %22 : vector<32x16xf32>
    %cst_10 = arith.constant 0.000000e+00 : f32
    %24 = vector.broadcast %cst_10 : f32 to vector<32x16xf32>
    %25 = arith.cmpf oge, %23, %24 : vector<32x16xf32>
    %cst_11 = arith.constant 2.000000e-01 : f32
    %26 = vector.broadcast %cst_11 : f32 to vector<32x16xf32>
    %27 = arith.mulf %26, %23 : vector<32x16xf32>
    %28 = arith.select %25, %23, %27 : vector<32x16xi1>, vector<32x16xf32>
    %c0_12 = arith.constant 0 : index
    %c0_13 = arith.constant 0 : index
    %c0_14 = arith.constant 0 : index
    %29 = vector.load %arg3[%c0_12, %c0_13, %c0_14] : memref<1x32x16xf32, #tpu.memory_space<vmem>>, vector<1x32x16xf32>
    %30 = vector.shape_cast %29 : vector<1x32x16xf32> to vector<32x16xf32>
    %31 = vector.shape_cast %28 : vector<32x16xf32> to vector<1x32x16xf32>
    tpu.vector_store %arg3[%c0_12, %c0_13, %c0_14], %31 {strides = array<i32>} : memref<1x32x16xf32, #tpu.memory_space<vmem>>, vector<1x32x16xf32>,
    return
  }
  func.func @transform_0(%arg0: i32) -> (i32, i32) {
    %c0_i32 = arith.constant 0 : i32
    %c0_i32_0 = arith.constant 0 : i32
    %c0_i32_1 = arith.constant 0 : i32
    return %c0_i32, %c0_i32_0 : i32, i32
  }
  func.func @transform_1(%arg0: i32) -> (i32, i32, i32) {
    %c0_i32 = arith.constant 0 : i32
    %c0_i32_0 = arith.constant 0 : i32
    %c0_i32_1 = arith.constant 0 : i32
    return %arg0, %c0_i32, %c0_i32_0 : i32, i32, i32
  }
  func.func @transform_2(%arg0: i32) -> (i32, i32, i32) {
    %c0_i32 = arith.constant 0 : i32
    %c0_i32_0 = arith.constant 0 : i32
    %c0_i32_1 = arith.constant 0 : i32
    return %arg0, %c0_i32, %c0_i32_0 : i32, i32, i32
  }
}

module attributes {stable_mosaic.version = 11 : i64} {
  func.func @_conv3x3_in_lrelu_kernel(%arg0: i32, %arg1: memref<64x288xbf16, #tpu.memory_space<vmem>>, %arg2: memref<1x288x4xbf16, #tpu.memory_space<vmem>>, %arg3: memref<1x64x4xf32, #tpu.memory_space<vmem>>) attributes {dimension_semantics = [#tpu.dimension_semantics<parallel>], iteration_bounds = array<i64: 8>, scalar_prefetch = 0 : i64, scratch_operands = 0 : i64, tpu.core_type = #tpu.core_type<tc>, window_params = [{pipeline_mode = #tpu.pipeline_mode<synchronous>, transform_indices = @transform_0, window_bounds = array<i64: 64, 288>}, {transform_indices = @transform_1, window_bounds = array<i64: 1, 288, 4>}, {transform_indices = @transform_2, window_bounds = array<i64: 1, 64, 4>}]} {
    %c0 = arith.constant 0 : index
    %c0_0 = arith.constant 0 : index
    %0 = vector.load %arg1[%c0, %c0_0] : memref<64x288xbf16, #tpu.memory_space<vmem>>, vector<64x288xbf16>
    %c0_1 = arith.constant 0 : index
    %c0_2 = arith.constant 0 : index
    %c0_3 = arith.constant 0 : index
    %1 = vector.load %arg2[%c0_1, %c0_2, %c0_3] : memref<1x288x4xbf16, #tpu.memory_space<vmem>>, vector<1x288x4xbf16>
    %2 = vector.shape_cast %1 : vector<1x288x4xbf16> to vector<288x4xbf16>
    %cst = arith.constant dense<0.000000e+00> : vector<64x4xf32>
    %3 = tpu.matmul %0, %2, %cst {dimension_numbers = #tpu.dot_dimension_numbers<[1], [0], [0], [1], [0, 0, 1, 1], [], []>} : vector<64x288xbf16>, vector<288x4xbf16>, vector<64x4xf32> -> vector<64x4xf32>
    %cst_4 = arith.constant dense<0.000000e+00> : vector<64xf32>
    %4 = vector.multi_reduction <add>, %3, %cst_4 [1] : vector<64x4xf32> to vector<64xf32>
    %5 = vector.shape_cast %4 : vector<64xf32> to vector<64x1xf32>
    %cst_5 = arith.constant 4.000000e+00 : f32
    %6 = vector.broadcast %cst_5 : f32 to vector<64x1xf32>
    %7 = arith.divf %5, %6 : vector<64x1xf32>
    %8 = arith.mulf %3, %3 : vector<64x4xf32>
    %cst_6 = arith.constant dense<0.000000e+00> : vector<64xf32>
    %9 = vector.multi_reduction <add>, %8, %cst_6 [1] : vector<64x4xf32> to vector<64xf32>
    %10 = vector.shape_cast %9 : vector<64xf32> to vector<64x1xf32>
    %cst_7 = arith.constant 4.000000e+00 : f32
    %11 = vector.broadcast %cst_7 : f32 to vector<64x1xf32>
    %12 = arith.divf %10, %11 : vector<64x1xf32>
    %13 = arith.mulf %7, %7 : vector<64x1xf32>
    %14 = arith.subf %12, %13 : vector<64x1xf32>
    %cst_8 = arith.constant 0.000000e+00 : f32
    %15 = vector.broadcast %cst_8 : f32 to vector<64x1xf32>
    %16 = arith.maximumf %14, %15 : vector<64x1xf32>
    %17 = vector.broadcast %7 : vector<64x1xf32> to vector<64x4xf32>
    %18 = arith.subf %3, %17 : vector<64x4xf32>
    %cst_9 = arith.constant 9.99999974E-6 : f32
    %19 = vector.broadcast %cst_9 : f32 to vector<64x1xf32>
    %20 = arith.addf %16, %19 : vector<64x1xf32>
    %21 = math.rsqrt %20 : vector<64x1xf32>
    %22 = vector.broadcast %21 : vector<64x1xf32> to vector<64x4xf32>
    %23 = arith.mulf %18, %22 : vector<64x4xf32>
    %cst_10 = arith.constant 0.000000e+00 : f32
    %24 = vector.broadcast %cst_10 : f32 to vector<64x4xf32>
    %25 = arith.cmpf oge, %23, %24 : vector<64x4xf32>
    %cst_11 = arith.constant 2.000000e-01 : f32
    %26 = vector.broadcast %cst_11 : f32 to vector<64x4xf32>
    %27 = arith.mulf %26, %23 : vector<64x4xf32>
    %28 = arith.select %25, %23, %27 : vector<64x4xi1>, vector<64x4xf32>
    %c0_12 = arith.constant 0 : index
    %c0_13 = arith.constant 0 : index
    %c0_14 = arith.constant 0 : index
    %29 = vector.load %arg3[%c0_12, %c0_13, %c0_14] : memref<1x64x4xf32, #tpu.memory_space<vmem>>, vector<1x64x4xf32>
    %30 = vector.shape_cast %29 : vector<1x64x4xf32> to vector<64x4xf32>
    %31 = vector.shape_cast %28 : vector<64x4xf32> to vector<1x64x4xf32>
    tpu.vector_store %arg3[%c0_12, %c0_13, %c0_14], %31 {strides = array<i32>} : memref<1x64x4xf32, #tpu.memory_space<vmem>>, vector<1x64x4xf32>,
    return
  }
  func.func @transform_0(%arg0: i32) -> (i32, i32) {
    %c0_i32 = arith.constant 0 : i32
    %c0_i32_0 = arith.constant 0 : i32
    %c0_i32_1 = arith.constant 0 : i32
    return %c0_i32, %c0_i32_0 : i32, i32
  }
  func.func @transform_1(%arg0: i32) -> (i32, i32, i32) {
    %c0_i32 = arith.constant 0 : i32
    %c0_i32_0 = arith.constant 0 : i32
    %c0_i32_1 = arith.constant 0 : i32
    return %arg0, %c0_i32, %c0_i32_0 : i32, i32, i32
  }
  func.func @transform_2(%arg0: i32) -> (i32, i32, i32) {
    %c0_i32 = arith.constant 0 : i32
    %c0_i32_0 = arith.constant 0 : i32
    %c0_i32_1 = arith.constant 0 : i32
    return %arg0, %c0_i32, %c0_i32_0 : i32, i32, i32
  }
}

module attributes {stable_mosaic.version = 11 : i64} {
  func.func @_conv3x3_in_lrelu_kernel(%arg0: i32, %arg1: memref<64x576xbf16, #tpu.memory_space<vmem>>, %arg2: memref<1x576x4xbf16, #tpu.memory_space<vmem>>, %arg3: memref<1x64x4xf32, #tpu.memory_space<vmem>>) attributes {dimension_semantics = [#tpu.dimension_semantics<parallel>], iteration_bounds = array<i64: 8>, scalar_prefetch = 0 : i64, scratch_operands = 0 : i64, tpu.core_type = #tpu.core_type<tc>, window_params = [{pipeline_mode = #tpu.pipeline_mode<synchronous>, transform_indices = @transform_0, window_bounds = array<i64: 64, 576>}, {transform_indices = @transform_1, window_bounds = array<i64: 1, 576, 4>}, {transform_indices = @transform_2, window_bounds = array<i64: 1, 64, 4>}]} {
    %c0 = arith.constant 0 : index
    %c0_0 = arith.constant 0 : index
    %0 = vector.load %arg1[%c0, %c0_0] : memref<64x576xbf16, #tpu.memory_space<vmem>>, vector<64x576xbf16>
    %c0_1 = arith.constant 0 : index
    %c0_2 = arith.constant 0 : index
    %c0_3 = arith.constant 0 : index
    %1 = vector.load %arg2[%c0_1, %c0_2, %c0_3] : memref<1x576x4xbf16, #tpu.memory_space<vmem>>, vector<1x576x4xbf16>
    %2 = vector.shape_cast %1 : vector<1x576x4xbf16> to vector<576x4xbf16>
    %cst = arith.constant dense<0.000000e+00> : vector<64x4xf32>
    %3 = tpu.matmul %0, %2, %cst {dimension_numbers = #tpu.dot_dimension_numbers<[1], [0], [0], [1], [0, 0, 1, 1], [], []>} : vector<64x576xbf16>, vector<576x4xbf16>, vector<64x4xf32> -> vector<64x4xf32>
    %cst_4 = arith.constant dense<0.000000e+00> : vector<64xf32>
    %4 = vector.multi_reduction <add>, %3, %cst_4 [1] : vector<64x4xf32> to vector<64xf32>
    %5 = vector.shape_cast %4 : vector<64xf32> to vector<64x1xf32>
    %cst_5 = arith.constant 4.000000e+00 : f32
    %6 = vector.broadcast %cst_5 : f32 to vector<64x1xf32>
    %7 = arith.divf %5, %6 : vector<64x1xf32>
    %8 = arith.mulf %3, %3 : vector<64x4xf32>
    %cst_6 = arith.constant dense<0.000000e+00> : vector<64xf32>
    %9 = vector.multi_reduction <add>, %8, %cst_6 [1] : vector<64x4xf32> to vector<64xf32>
    %10 = vector.shape_cast %9 : vector<64xf32> to vector<64x1xf32>
    %cst_7 = arith.constant 4.000000e+00 : f32
    %11 = vector.broadcast %cst_7 : f32 to vector<64x1xf32>
    %12 = arith.divf %10, %11 : vector<64x1xf32>
    %13 = arith.mulf %7, %7 : vector<64x1xf32>
    %14 = arith.subf %12, %13 : vector<64x1xf32>
    %cst_8 = arith.constant 0.000000e+00 : f32
    %15 = vector.broadcast %cst_8 : f32 to vector<64x1xf32>
    %16 = arith.maximumf %14, %15 : vector<64x1xf32>
    %17 = vector.broadcast %7 : vector<64x1xf32> to vector<64x4xf32>
    %18 = arith.subf %3, %17 : vector<64x4xf32>
    %cst_9 = arith.constant 9.99999974E-6 : f32
    %19 = vector.broadcast %cst_9 : f32 to vector<64x1xf32>
    %20 = arith.addf %16, %19 : vector<64x1xf32>
    %21 = math.rsqrt %20 : vector<64x1xf32>
    %22 = vector.broadcast %21 : vector<64x1xf32> to vector<64x4xf32>
    %23 = arith.mulf %18, %22 : vector<64x4xf32>
    %cst_10 = arith.constant 0.000000e+00 : f32
    %24 = vector.broadcast %cst_10 : f32 to vector<64x4xf32>
    %25 = arith.cmpf oge, %23, %24 : vector<64x4xf32>
    %cst_11 = arith.constant 2.000000e-01 : f32
    %26 = vector.broadcast %cst_11 : f32 to vector<64x4xf32>
    %27 = arith.mulf %26, %23 : vector<64x4xf32>
    %28 = arith.select %25, %23, %27 : vector<64x4xi1>, vector<64x4xf32>
    %c0_12 = arith.constant 0 : index
    %c0_13 = arith.constant 0 : index
    %c0_14 = arith.constant 0 : index
    %29 = vector.load %arg3[%c0_12, %c0_13, %c0_14] : memref<1x64x4xf32, #tpu.memory_space<vmem>>, vector<1x64x4xf32>
    %30 = vector.shape_cast %29 : vector<1x64x4xf32> to vector<64x4xf32>
    %31 = vector.shape_cast %28 : vector<64x4xf32> to vector<1x64x4xf32>
    tpu.vector_store %arg3[%c0_12, %c0_13, %c0_14], %31 {strides = array<i32>} : memref<1x64x4xf32, #tpu.memory_space<vmem>>, vector<1x64x4xf32>,
    return
  }
  func.func @transform_0(%arg0: i32) -> (i32, i32) {
    %c0_i32 = arith.constant 0 : i32
    %c0_i32_0 = arith.constant 0 : i32
    %c0_i32_1 = arith.constant 0 : i32
    return %c0_i32, %c0_i32_0 : i32, i32
  }
  func.func @transform_1(%arg0: i32) -> (i32, i32, i32) {
    %c0_i32 = arith.constant 0 : i32
    %c0_i32_0 = arith.constant 0 : i32
    %c0_i32_1 = arith.constant 0 : i32
    return %arg0, %c0_i32, %c0_i32_0 : i32, i32, i32
  }
  func.func @transform_2(%arg0: i32) -> (i32, i32, i32) {
    %c0_i32 = arith.constant 0 : i32
    %c0_i32_0 = arith.constant 0 : i32
    %c0_i32_1 = arith.constant 0 : i32
    return %arg0, %c0_i32, %c0_i32_0 : i32, i32, i32
  }
}

module attributes {stable_mosaic.version = 11 : i64} {
  func.func @_conv3x3_in_lrelu_kernel(%arg0: i32, %arg1: memref<128x576xbf16, #tpu.memory_space<vmem>>, %arg2: memref<1x576x1xbf16, #tpu.memory_space<vmem>>, %arg3: memref<1x128x1xf32, #tpu.memory_space<vmem>>) attributes {dimension_semantics = [#tpu.dimension_semantics<parallel>], iteration_bounds = array<i64: 8>, scalar_prefetch = 0 : i64, scratch_operands = 0 : i64, tpu.core_type = #tpu.core_type<tc>, window_params = [{pipeline_mode = #tpu.pipeline_mode<synchronous>, transform_indices = @transform_0, window_bounds = array<i64: 128, 576>}, {transform_indices = @transform_1, window_bounds = array<i64: 1, 576, 1>}, {transform_indices = @transform_2, window_bounds = array<i64: 1, 128, 1>}]} {
    %c0 = arith.constant 0 : index
    %c0_0 = arith.constant 0 : index
    %0 = vector.load %arg1[%c0, %c0_0] : memref<128x576xbf16, #tpu.memory_space<vmem>>, vector<128x576xbf16>
    %c0_1 = arith.constant 0 : index
    %c0_2 = arith.constant 0 : index
    %c0_3 = arith.constant 0 : index
    %1 = vector.load %arg2[%c0_1, %c0_2, %c0_3] : memref<1x576x1xbf16, #tpu.memory_space<vmem>>, vector<1x576x1xbf16>
    %2 = vector.shape_cast %1 : vector<1x576x1xbf16> to vector<576x1xbf16>
    %cst = arith.constant dense<0.000000e+00> : vector<128x1xf32>
    %3 = tpu.matmul %0, %2, %cst {dimension_numbers = #tpu.dot_dimension_numbers<[1], [0], [0], [1], [0, 0, 1, 1], [], []>} : vector<128x576xbf16>, vector<576x1xbf16>, vector<128x1xf32> -> vector<128x1xf32>
    %cst_4 = arith.constant dense<0.000000e+00> : vector<128xf32>
    %4 = vector.multi_reduction <add>, %3, %cst_4 [1] : vector<128x1xf32> to vector<128xf32>
    %5 = vector.shape_cast %4 : vector<128xf32> to vector<128x1xf32>
    %cst_5 = arith.constant 1.000000e+00 : f32
    %6 = vector.broadcast %cst_5 : f32 to vector<128x1xf32>
    %7 = arith.divf %5, %6 : vector<128x1xf32>
    %8 = arith.mulf %3, %3 : vector<128x1xf32>
    %cst_6 = arith.constant dense<0.000000e+00> : vector<128xf32>
    %9 = vector.multi_reduction <add>, %8, %cst_6 [1] : vector<128x1xf32> to vector<128xf32>
    %10 = vector.shape_cast %9 : vector<128xf32> to vector<128x1xf32>
    %cst_7 = arith.constant 1.000000e+00 : f32
    %11 = vector.broadcast %cst_7 : f32 to vector<128x1xf32>
    %12 = arith.divf %10, %11 : vector<128x1xf32>
    %13 = arith.mulf %7, %7 : vector<128x1xf32>
    %14 = arith.subf %12, %13 : vector<128x1xf32>
    %cst_8 = arith.constant 0.000000e+00 : f32
    %15 = vector.broadcast %cst_8 : f32 to vector<128x1xf32>
    %16 = arith.maximumf %14, %15 : vector<128x1xf32>
    %17 = arith.subf %3, %7 : vector<128x1xf32>
    %cst_9 = arith.constant 9.99999974E-6 : f32
    %18 = vector.broadcast %cst_9 : f32 to vector<128x1xf32>
    %19 = arith.addf %16, %18 : vector<128x1xf32>
    %20 = math.rsqrt %19 : vector<128x1xf32>
    %21 = arith.mulf %17, %20 : vector<128x1xf32>
    %cst_10 = arith.constant 0.000000e+00 : f32
    %22 = vector.broadcast %cst_10 : f32 to vector<128x1xf32>
    %23 = arith.cmpf oge, %21, %22 : vector<128x1xf32>
    %cst_11 = arith.constant 2.000000e-01 : f32
    %24 = vector.broadcast %cst_11 : f32 to vector<128x1xf32>
    %25 = arith.mulf %24, %21 : vector<128x1xf32>
    %26 = arith.select %23, %21, %25 : vector<128x1xi1>, vector<128x1xf32>
    %c0_12 = arith.constant 0 : index
    %c0_13 = arith.constant 0 : index
    %c0_14 = arith.constant 0 : index
    %27 = vector.load %arg3[%c0_12, %c0_13, %c0_14] : memref<1x128x1xf32, #tpu.memory_space<vmem>>, vector<1x128x1xf32>
    %28 = vector.shape_cast %27 : vector<1x128x1xf32> to vector<128x1xf32>
    %29 = vector.shape_cast %26 : vector<128x1xf32> to vector<1x128x1xf32>
    tpu.vector_store %arg3[%c0_12, %c0_13, %c0_14], %29 {strides = array<i32>} : memref<1x128x1xf32, #tpu.memory_space<vmem>>, vector<1x128x1xf32>,
    return
  }
  func.func @transform_0(%arg0: i32) -> (i32, i32) {
    %c0_i32 = arith.constant 0 : i32
    %c0_i32_0 = arith.constant 0 : i32
    %c0_i32_1 = arith.constant 0 : i32
    return %c0_i32, %c0_i32_0 : i32, i32
  }
  func.func @transform_1(%arg0: i32) -> (i32, i32, i32) {
    %c0_i32 = arith.constant 0 : i32
    %c0_i32_0 = arith.constant 0 : i32
    %c0_i32_1 = arith.constant 0 : i32
    return %arg0, %c0_i32, %c0_i32_0 : i32, i32, i32
  }
  func.func @transform_2(%arg0: i32) -> (i32, i32, i32) {
    %c0_i32 = arith.constant 0 : i32
    %c0_i32_0 = arith.constant 0 : i32
    %c0_i32_1 = arith.constant 0 : i32
    return %arg0, %c0_i32, %c0_i32_0 : i32, i32, i32
  }
}

module attributes {stable_mosaic.version = 11 : i64} {
  func.func @_conv3x3_in_lrelu_kernel(%arg0: i32, %arg1: memref<128x1152xbf16, #tpu.memory_space<vmem>>, %arg2: memref<1x1152x1xbf16, #tpu.memory_space<vmem>>, %arg3: memref<1x128x1xf32, #tpu.memory_space<vmem>>) attributes {dimension_semantics = [#tpu.dimension_semantics<parallel>], iteration_bounds = array<i64: 8>, scalar_prefetch = 0 : i64, scratch_operands = 0 : i64, tpu.core_type = #tpu.core_type<tc>, window_params = [{pipeline_mode = #tpu.pipeline_mode<synchronous>, transform_indices = @transform_0, window_bounds = array<i64: 128, 1152>}, {transform_indices = @transform_1, window_bounds = array<i64: 1, 1152, 1>}, {transform_indices = @transform_2, window_bounds = array<i64: 1, 128, 1>}]} {
    %c0 = arith.constant 0 : index
    %c0_0 = arith.constant 0 : index
    %0 = vector.load %arg1[%c0, %c0_0] : memref<128x1152xbf16, #tpu.memory_space<vmem>>, vector<128x1152xbf16>
    %c0_1 = arith.constant 0 : index
    %c0_2 = arith.constant 0 : index
    %c0_3 = arith.constant 0 : index
    %1 = vector.load %arg2[%c0_1, %c0_2, %c0_3] : memref<1x1152x1xbf16, #tpu.memory_space<vmem>>, vector<1x1152x1xbf16>
    %2 = vector.shape_cast %1 : vector<1x1152x1xbf16> to vector<1152x1xbf16>
    %cst = arith.constant dense<0.000000e+00> : vector<128x1xf32>
    %3 = tpu.matmul %0, %2, %cst {dimension_numbers = #tpu.dot_dimension_numbers<[1], [0], [0], [1], [0, 0, 1, 1], [], []>} : vector<128x1152xbf16>, vector<1152x1xbf16>, vector<128x1xf32> -> vector<128x1xf32>
    %cst_4 = arith.constant dense<0.000000e+00> : vector<128xf32>
    %4 = vector.multi_reduction <add>, %3, %cst_4 [1] : vector<128x1xf32> to vector<128xf32>
    %5 = vector.shape_cast %4 : vector<128xf32> to vector<128x1xf32>
    %cst_5 = arith.constant 1.000000e+00 : f32
    %6 = vector.broadcast %cst_5 : f32 to vector<128x1xf32>
    %7 = arith.divf %5, %6 : vector<128x1xf32>
    %8 = arith.mulf %3, %3 : vector<128x1xf32>
    %cst_6 = arith.constant dense<0.000000e+00> : vector<128xf32>
    %9 = vector.multi_reduction <add>, %8, %cst_6 [1] : vector<128x1xf32> to vector<128xf32>
    %10 = vector.shape_cast %9 : vector<128xf32> to vector<128x1xf32>
    %cst_7 = arith.constant 1.000000e+00 : f32
    %11 = vector.broadcast %cst_7 : f32 to vector<128x1xf32>
    %12 = arith.divf %10, %11 : vector<128x1xf32>
    %13 = arith.mulf %7, %7 : vector<128x1xf32>
    %14 = arith.subf %12, %13 : vector<128x1xf32>
    %cst_8 = arith.constant 0.000000e+00 : f32
    %15 = vector.broadcast %cst_8 : f32 to vector<128x1xf32>
    %16 = arith.maximumf %14, %15 : vector<128x1xf32>
    %17 = arith.subf %3, %7 : vector<128x1xf32>
    %cst_9 = arith.constant 9.99999974E-6 : f32
    %18 = vector.broadcast %cst_9 : f32 to vector<128x1xf32>
    %19 = arith.addf %16, %18 : vector<128x1xf32>
    %20 = math.rsqrt %19 : vector<128x1xf32>
    %21 = arith.mulf %17, %20 : vector<128x1xf32>
    %cst_10 = arith.constant 0.000000e+00 : f32
    %22 = vector.broadcast %cst_10 : f32 to vector<128x1xf32>
    %23 = arith.cmpf oge, %21, %22 : vector<128x1xf32>
    %cst_11 = arith.constant 2.000000e-01 : f32
    %24 = vector.broadcast %cst_11 : f32 to vector<128x1xf32>
    %25 = arith.mulf %24, %21 : vector<128x1xf32>
    %26 = arith.select %23, %21, %25 : vector<128x1xi1>, vector<128x1xf32>
    %c0_12 = arith.constant 0 : index
    %c0_13 = arith.constant 0 : index
    %c0_14 = arith.constant 0 : index
    %27 = vector.load %arg3[%c0_12, %c0_13, %c0_14] : memref<1x128x1xf32, #tpu.memory_space<vmem>>, vector<1x128x1xf32>
    %28 = vector.shape_cast %27 : vector<1x128x1xf32> to vector<128x1xf32>
    %29 = vector.shape_cast %26 : vector<128x1xf32> to vector<1x128x1xf32>
    tpu.vector_store %arg3[%c0_12, %c0_13, %c0_14], %29 {strides = array<i32>} : memref<1x128x1xf32, #tpu.memory_space<vmem>>, vector<1x128x1xf32>,
    return
  }
  func.func @transform_0(%arg0: i32) -> (i32, i32) {
    %c0_i32 = arith.constant 0 : i32
    %c0_i32_0 = arith.constant 0 : i32
    %c0_i32_1 = arith.constant 0 : i32
    return %c0_i32, %c0_i32_0 : i32, i32
  }
  func.func @transform_1(%arg0: i32) -> (i32, i32, i32) {
    %c0_i32 = arith.constant 0 : i32
    %c0_i32_0 = arith.constant 0 : i32
    %c0_i32_1 = arith.constant 0 : i32
    return %arg0, %c0_i32, %c0_i32_0 : i32, i32, i32
  }
  func.func @transform_2(%arg0: i32) -> (i32, i32, i32) {
    %c0_i32 = arith.constant 0 : i32
    %c0_i32_0 = arith.constant 0 : i32
    %c0_i32_1 = arith.constant 0 : i32
    return %arg0, %c0_i32, %c0_i32_0 : i32, i32, i32
  }
}

module attributes {stable_mosaic.version = 11 : i64} {
  func.func @_convT2x2_in_lrelu_kernel(%arg0: i32, %arg1: memref<4x64x128xbf16, #tpu.memory_space<vmem>>, %arg2: memref<1x128x1xbf16, #tpu.memory_space<vmem>>, %arg3: memref<1x4x64x1xf32, #tpu.memory_space<vmem>>) attributes {dimension_semantics = [#tpu.dimension_semantics<parallel>], iteration_bounds = array<i64: 8>, scalar_prefetch = 0 : i64, scratch_operands = 0 : i64, tpu.core_type = #tpu.core_type<tc>, window_params = [{pipeline_mode = #tpu.pipeline_mode<synchronous>, transform_indices = @transform_0, window_bounds = array<i64: 4, 64, 128>}, {transform_indices = @transform_1, window_bounds = array<i64: 1, 128, 1>}, {transform_indices = @transform_2, window_bounds = array<i64: 1, 4, 64, 1>}]} {
    %c0 = arith.constant 0 : index
    %c0_0 = arith.constant 0 : index
    %c0_1 = arith.constant 0 : index
    %0 = vector.load %arg2[%c0, %c0_0, %c0_1] : memref<1x128x1xbf16, #tpu.memory_space<vmem>>, vector<1x128x1xbf16>
    %1 = vector.shape_cast %0 : vector<1x128x1xbf16> to vector<128x1xbf16>
    %c0_2 = arith.constant 0 : index
    %c0_3 = arith.constant 0 : index
    %c0_4 = arith.constant 0 : index
    %2 = vector.load %arg1[%c0_2, %c0_3, %c0_4] : memref<4x64x128xbf16, #tpu.memory_space<vmem>>, vector<1x64x128xbf16>
    %3 = vector.shape_cast %2 : vector<1x64x128xbf16> to vector<64x128xbf16>
    %cst = arith.constant dense<0.000000e+00> : vector<64x1xf32>
    %4 = tpu.matmul %3, %1, %cst {dimension_numbers = #tpu.dot_dimension_numbers<[1], [0], [0], [1], [0, 0, 1, 1], [], []>} : vector<64x128xbf16>, vector<128x1xbf16>, vector<64x1xf32> -> vector<64x1xf32>
    %c1 = arith.constant 1 : index
    %c0_5 = arith.constant 0 : index
    %c0_6 = arith.constant 0 : index
    %5 = vector.load %arg1[%c1, %c0_5, %c0_6] : memref<4x64x128xbf16, #tpu.memory_space<vmem>>, vector<1x64x128xbf16>
    %6 = vector.shape_cast %5 : vector<1x64x128xbf16> to vector<64x128xbf16>
    %cst_7 = arith.constant dense<0.000000e+00> : vector<64x1xf32>
    %7 = tpu.matmul %6, %1, %cst_7 {dimension_numbers = #tpu.dot_dimension_numbers<[1], [0], [0], [1], [0, 0, 1, 1], [], []>} : vector<64x128xbf16>, vector<128x1xbf16>, vector<64x1xf32> -> vector<64x1xf32>
    %c2 = arith.constant 2 : index
    %c0_8 = arith.constant 0 : index
    %c0_9 = arith.constant 0 : index
    %8 = vector.load %arg1[%c2, %c0_8, %c0_9] : memref<4x64x128xbf16, #tpu.memory_space<vmem>>, vector<1x64x128xbf16>
    %9 = vector.shape_cast %8 : vector<1x64x128xbf16> to vector<64x128xbf16>
    %cst_10 = arith.constant dense<0.000000e+00> : vector<64x1xf32>
    %10 = tpu.matmul %9, %1, %cst_10 {dimension_numbers = #tpu.dot_dimension_numbers<[1], [0], [0], [1], [0, 0, 1, 1], [], []>} : vector<64x128xbf16>, vector<128x1xbf16>, vector<64x1xf32> -> vector<64x1xf32>
    %c3 = arith.constant 3 : index
    %c0_11 = arith.constant 0 : index
    %c0_12 = arith.constant 0 : index
    %11 = vector.load %arg1[%c3, %c0_11, %c0_12] : memref<4x64x128xbf16, #tpu.memory_space<vmem>>, vector<1x64x128xbf16>
    %12 = vector.shape_cast %11 : vector<1x64x128xbf16> to vector<64x128xbf16>
    %cst_13 = arith.constant dense<0.000000e+00> : vector<64x1xf32>
    %13 = tpu.matmul %12, %1, %cst_13 {dimension_numbers = #tpu.dot_dimension_numbers<[1], [0], [0], [1], [0, 0, 1, 1], [], []>} : vector<64x128xbf16>, vector<128x1xbf16>, vector<64x1xf32> -> vector<64x1xf32>
    %cst_14 = arith.constant dense<0.000000e+00> : vector<64xf32>
    %14 = vector.multi_reduction <add>, %4, %cst_14 [1] : vector<64x1xf32> to vector<64xf32>
    %15 = vector.shape_cast %14 : vector<64xf32> to vector<64x1xf32>
    %cst_15 = arith.constant dense<0.000000e+00> : vector<64xf32>
    %16 = vector.multi_reduction <add>, %7, %cst_15 [1] : vector<64x1xf32> to vector<64xf32>
    %17 = vector.shape_cast %16 : vector<64xf32> to vector<64x1xf32>
    %cst_16 = arith.constant dense<0.000000e+00> : vector<64xf32>
    %18 = vector.multi_reduction <add>, %10, %cst_16 [1] : vector<64x1xf32> to vector<64xf32>
    %19 = vector.shape_cast %18 : vector<64xf32> to vector<64x1xf32>
    %cst_17 = arith.constant dense<0.000000e+00> : vector<64xf32>
    %20 = vector.multi_reduction <add>, %13, %cst_17 [1] : vector<64x1xf32> to vector<64xf32>
    %21 = vector.shape_cast %20 : vector<64xf32> to vector<64x1xf32>
    %22 = arith.mulf %4, %4 : vector<64x1xf32>
    %cst_18 = arith.constant dense<0.000000e+00> : vector<64xf32>
    %23 = vector.multi_reduction <add>, %22, %cst_18 [1] : vector<64x1xf32> to vector<64xf32>
    %24 = vector.shape_cast %23 : vector<64xf32> to vector<64x1xf32>
    %25 = arith.mulf %7, %7 : vector<64x1xf32>
    %cst_19 = arith.constant dense<0.000000e+00> : vector<64xf32>
    %26 = vector.multi_reduction <add>, %25, %cst_19 [1] : vector<64x1xf32> to vector<64xf32>
    %27 = vector.shape_cast %26 : vector<64xf32> to vector<64x1xf32>
    %28 = arith.mulf %10, %10 : vector<64x1xf32>
    %cst_20 = arith.constant dense<0.000000e+00> : vector<64xf32>
    %29 = vector.multi_reduction <add>, %28, %cst_20 [1] : vector<64x1xf32> to vector<64xf32>
    %30 = vector.shape_cast %29 : vector<64xf32> to vector<64x1xf32>
    %31 = arith.mulf %13, %13 : vector<64x1xf32>
    %cst_21 = arith.constant dense<0.000000e+00> : vector<64xf32>
    %32 = vector.multi_reduction <add>, %31, %cst_21 [1] : vector<64x1xf32> to vector<64xf32>
    %33 = vector.shape_cast %32 : vector<64xf32> to vector<64x1xf32>
    %34 = arith.addf %15, %17 : vector<64x1xf32>
    %35 = arith.addf %34, %19 : vector<64x1xf32>
    %36 = arith.addf %35, %21 : vector<64x1xf32>
    %37 = arith.addf %24, %27 : vector<64x1xf32>
    %38 = arith.addf %37, %30 : vector<64x1xf32>
    %39 = arith.addf %38, %33 : vector<64x1xf32>
    %cst_22 = arith.constant 4.000000e+00 : f32
    %40 = vector.broadcast %cst_22 : f32 to vector<64x1xf32>
    %41 = arith.divf %36, %40 : vector<64x1xf32>
    %cst_23 = arith.constant 4.000000e+00 : f32
    %42 = vector.broadcast %cst_23 : f32 to vector<64x1xf32>
    %43 = arith.divf %39, %42 : vector<64x1xf32>
    %44 = arith.mulf %41, %41 : vector<64x1xf32>
    %45 = arith.subf %43, %44 : vector<64x1xf32>
    %cst_24 = arith.constant 0.000000e+00 : f32
    %46 = vector.broadcast %cst_24 : f32 to vector<64x1xf32>
    %47 = arith.maximumf %45, %46 : vector<64x1xf32>
    %cst_25 = arith.constant 9.99999974E-6 : f32
    %48 = vector.broadcast %cst_25 : f32 to vector<64x1xf32>
    %49 = arith.addf %47, %48 : vector<64x1xf32>
    %50 = math.rsqrt %49 : vector<64x1xf32>
    %51 = arith.subf %4, %41 : vector<64x1xf32>
    %52 = arith.mulf %51, %50 : vector<64x1xf32>
    %cst_26 = arith.constant 0.000000e+00 : f32
    %53 = vector.broadcast %cst_26 : f32 to vector<64x1xf32>
    %54 = arith.cmpf oge, %52, %53 : vector<64x1xf32>
    %cst_27 = arith.constant 2.000000e-01 : f32
    %55 = vector.broadcast %cst_27 : f32 to vector<64x1xf32>
    %56 = arith.mulf %55, %52 : vector<64x1xf32>
    %57 = arith.select %54, %52, %56 : vector<64x1xi1>, vector<64x1xf32>
    %c0_28 = arith.constant 0 : index
    %c0_29 = arith.constant 0 : index
    %c0_30 = arith.constant 0 : index
    %c0_31 = arith.constant 0 : index
    %58 = vector.load %arg3[%c0_28, %c0_29, %c0_30, %c0_31] : memref<1x4x64x1xf32, #tpu.memory_space<vmem>>, vector<1x1x64x1xf32>
    %59 = vector.shape_cast %58 : vector<1x1x64x1xf32> to vector<64x1xf32>
    %60 = vector.shape_cast %57 : vector<64x1xf32> to vector<1x1x64x1xf32>
    tpu.vector_store %arg3[%c0_28, %c0_29, %c0_30, %c0_31], %60 {strides = array<i32>} : memref<1x4x64x1xf32, #tpu.memory_space<vmem>>, vector<1x1x64x1xf32>,
    %61 = arith.subf %7, %41 : vector<64x1xf32>
    %62 = arith.mulf %61, %50 : vector<64x1xf32>
    %cst_32 = arith.constant 0.000000e+00 : f32
    %63 = vector.broadcast %cst_32 : f32 to vector<64x1xf32>
    %64 = arith.cmpf oge, %62, %63 : vector<64x1xf32>
    %cst_33 = arith.constant 2.000000e-01 : f32
    %65 = vector.broadcast %cst_33 : f32 to vector<64x1xf32>
    %66 = arith.mulf %65, %62 : vector<64x1xf32>
    %67 = arith.select %64, %62, %66 : vector<64x1xi1>, vector<64x1xf32>
    %c0_34 = arith.constant 0 : index
    %c1_35 = arith.constant 1 : index
    %c0_36 = arith.constant 0 : index
    %c0_37 = arith.constant 0 : index
    %68 = vector.load %arg3[%c0_34, %c1_35, %c0_36, %c0_37] : memref<1x4x64x1xf32, #tpu.memory_space<vmem>>, vector<1x1x64x1xf32>
    %69 = vector.shape_cast %68 : vector<1x1x64x1xf32> to vector<64x1xf32>
    %70 = vector.shape_cast %67 : vector<64x1xf32> to vector<1x1x64x1xf32>
    tpu.vector_store %arg3[%c0_34, %c1_35, %c0_36, %c0_37], %70 {strides = array<i32>} : memref<1x4x64x1xf32, #tpu.memory_space<vmem>>, vector<1x1x64x1xf32>,
    %71 = arith.subf %10, %41 : vector<64x1xf32>
    %72 = arith.mulf %71, %50 : vector<64x1xf32>
    %cst_38 = arith.constant 0.000000e+00 : f32
    %73 = vector.broadcast %cst_38 : f32 to vector<64x1xf32>
    %74 = arith.cmpf oge, %72, %73 : vector<64x1xf32>
    %cst_39 = arith.constant 2.000000e-01 : f32
    %75 = vector.broadcast %cst_39 : f32 to vector<64x1xf32>
    %76 = arith.mulf %75, %72 : vector<64x1xf32>
    %77 = arith.select %74, %72, %76 : vector<64x1xi1>, vector<64x1xf32>
    %c0_40 = arith.constant 0 : index
    %c2_41 = arith.constant 2 : index
    %c0_42 = arith.constant 0 : index
    %c0_43 = arith.constant 0 : index
    %78 = vector.load %arg3[%c0_40, %c2_41, %c0_42, %c0_43] : memref<1x4x64x1xf32, #tpu.memory_space<vmem>>, vector<1x1x64x1xf32>
    %79 = vector.shape_cast %78 : vector<1x1x64x1xf32> to vector<64x1xf32>
    %80 = vector.shape_cast %77 : vector<64x1xf32> to vector<1x1x64x1xf32>
    tpu.vector_store %arg3[%c0_40, %c2_41, %c0_42, %c0_43], %80 {strides = array<i32>} : memref<1x4x64x1xf32, #tpu.memory_space<vmem>>, vector<1x1x64x1xf32>,
    %81 = arith.subf %13, %41 : vector<64x1xf32>
    %82 = arith.mulf %81, %50 : vector<64x1xf32>
    %cst_44 = arith.constant 0.000000e+00 : f32
    %83 = vector.broadcast %cst_44 : f32 to vector<64x1xf32>
    %84 = arith.cmpf oge, %82, %83 : vector<64x1xf32>
    %cst_45 = arith.constant 2.000000e-01 : f32
    %85 = vector.broadcast %cst_45 : f32 to vector<64x1xf32>
    %86 = arith.mulf %85, %82 : vector<64x1xf32>
    %87 = arith.select %84, %82, %86 : vector<64x1xi1>, vector<64x1xf32>
    %c0_46 = arith.constant 0 : index
    %c3_47 = arith.constant 3 : index
    %c0_48 = arith.constant 0 : index
    %c0_49 = arith.constant 0 : index
    %88 = vector.load %arg3[%c0_46, %c3_47, %c0_48, %c0_49] : memref<1x4x64x1xf32, #tpu.memory_space<vmem>>, vector<1x1x64x1xf32>
    %89 = vector.shape_cast %88 : vector<1x1x64x1xf32> to vector<64x1xf32>
    %90 = vector.shape_cast %87 : vector<64x1xf32> to vector<1x1x64x1xf32>
    tpu.vector_store %arg3[%c0_46, %c3_47, %c0_48, %c0_49], %90 {strides = array<i32>} : memref<1x4x64x1xf32, #tpu.memory_space<vmem>>, vector<1x1x64x1xf32>,
    return
  }
  func.func @transform_0(%arg0: i32) -> (i32, i32, i32) {
    %c0_i32 = arith.constant 0 : i32
    %c0_i32_0 = arith.constant 0 : i32
    %c0_i32_1 = arith.constant 0 : i32
    %c0_i32_2 = arith.constant 0 : i32
    return %c0_i32, %c0_i32_0, %c0_i32_1 : i32, i32, i32
  }
  func.func @transform_1(%arg0: i32) -> (i32, i32, i32) {
    %c0_i32 = arith.constant 0 : i32
    %c0_i32_0 = arith.constant 0 : i32
    %c0_i32_1 = arith.constant 0 : i32
    return %arg0, %c0_i32, %c0_i32_0 : i32, i32, i32
  }
  func.func @transform_2(%arg0: i32) -> (i32, i32, i32, i32) {
    %c0_i32 = arith.constant 0 : i32
    %c0_i32_0 = arith.constant 0 : i32
    %c0_i32_1 = arith.constant 0 : i32
    %c0_i32_2 = arith.constant 0 : i32
    return %arg0, %c0_i32, %c0_i32_0, %c0_i32_1 : i32, i32, i32, i32
  }
}

module attributes {stable_mosaic.version = 11 : i64} {
  func.func @_conv3x3_in_lrelu_kernel(%arg0: i32, %arg1: memref<64x1152xbf16, #tpu.memory_space<vmem>>, %arg2: memref<1x1152x4xbf16, #tpu.memory_space<vmem>>, %arg3: memref<1x64x4xf32, #tpu.memory_space<vmem>>) attributes {dimension_semantics = [#tpu.dimension_semantics<parallel>], iteration_bounds = array<i64: 8>, scalar_prefetch = 0 : i64, scratch_operands = 0 : i64, tpu.core_type = #tpu.core_type<tc>, window_params = [{pipeline_mode = #tpu.pipeline_mode<synchronous>, transform_indices = @transform_0, window_bounds = array<i64: 64, 1152>}, {transform_indices = @transform_1, window_bounds = array<i64: 1, 1152, 4>}, {transform_indices = @transform_2, window_bounds = array<i64: 1, 64, 4>}]} {
    %c0 = arith.constant 0 : index
    %c0_0 = arith.constant 0 : index
    %0 = vector.load %arg1[%c0, %c0_0] : memref<64x1152xbf16, #tpu.memory_space<vmem>>, vector<64x1152xbf16>
    %c0_1 = arith.constant 0 : index
    %c0_2 = arith.constant 0 : index
    %c0_3 = arith.constant 0 : index
    %1 = vector.load %arg2[%c0_1, %c0_2, %c0_3] : memref<1x1152x4xbf16, #tpu.memory_space<vmem>>, vector<1x1152x4xbf16>
    %2 = vector.shape_cast %1 : vector<1x1152x4xbf16> to vector<1152x4xbf16>
    %cst = arith.constant dense<0.000000e+00> : vector<64x4xf32>
    %3 = tpu.matmul %0, %2, %cst {dimension_numbers = #tpu.dot_dimension_numbers<[1], [0], [0], [1], [0, 0, 1, 1], [], []>} : vector<64x1152xbf16>, vector<1152x4xbf16>, vector<64x4xf32> -> vector<64x4xf32>
    %cst_4 = arith.constant dense<0.000000e+00> : vector<64xf32>
    %4 = vector.multi_reduction <add>, %3, %cst_4 [1] : vector<64x4xf32> to vector<64xf32>
    %5 = vector.shape_cast %4 : vector<64xf32> to vector<64x1xf32>
    %cst_5 = arith.constant 4.000000e+00 : f32
    %6 = vector.broadcast %cst_5 : f32 to vector<64x1xf32>
    %7 = arith.divf %5, %6 : vector<64x1xf32>
    %8 = arith.mulf %3, %3 : vector<64x4xf32>
    %cst_6 = arith.constant dense<0.000000e+00> : vector<64xf32>
    %9 = vector.multi_reduction <add>, %8, %cst_6 [1] : vector<64x4xf32> to vector<64xf32>
    %10 = vector.shape_cast %9 : vector<64xf32> to vector<64x1xf32>
    %cst_7 = arith.constant 4.000000e+00 : f32
    %11 = vector.broadcast %cst_7 : f32 to vector<64x1xf32>
    %12 = arith.divf %10, %11 : vector<64x1xf32>
    %13 = arith.mulf %7, %7 : vector<64x1xf32>
    %14 = arith.subf %12, %13 : vector<64x1xf32>
    %cst_8 = arith.constant 0.000000e+00 : f32
    %15 = vector.broadcast %cst_8 : f32 to vector<64x1xf32>
    %16 = arith.maximumf %14, %15 : vector<64x1xf32>
    %17 = vector.broadcast %7 : vector<64x1xf32> to vector<64x4xf32>
    %18 = arith.subf %3, %17 : vector<64x4xf32>
    %cst_9 = arith.constant 9.99999974E-6 : f32
    %19 = vector.broadcast %cst_9 : f32 to vector<64x1xf32>
    %20 = arith.addf %16, %19 : vector<64x1xf32>
    %21 = math.rsqrt %20 : vector<64x1xf32>
    %22 = vector.broadcast %21 : vector<64x1xf32> to vector<64x4xf32>
    %23 = arith.mulf %18, %22 : vector<64x4xf32>
    %cst_10 = arith.constant 0.000000e+00 : f32
    %24 = vector.broadcast %cst_10 : f32 to vector<64x4xf32>
    %25 = arith.cmpf oge, %23, %24 : vector<64x4xf32>
    %cst_11 = arith.constant 2.000000e-01 : f32
    %26 = vector.broadcast %cst_11 : f32 to vector<64x4xf32>
    %27 = arith.mulf %26, %23 : vector<64x4xf32>
    %28 = arith.select %25, %23, %27 : vector<64x4xi1>, vector<64x4xf32>
    %c0_12 = arith.constant 0 : index
    %c0_13 = arith.constant 0 : index
    %c0_14 = arith.constant 0 : index
    %29 = vector.load %arg3[%c0_12, %c0_13, %c0_14] : memref<1x64x4xf32, #tpu.memory_space<vmem>>, vector<1x64x4xf32>
    %30 = vector.shape_cast %29 : vector<1x64x4xf32> to vector<64x4xf32>
    %31 = vector.shape_cast %28 : vector<64x4xf32> to vector<1x64x4xf32>
    tpu.vector_store %arg3[%c0_12, %c0_13, %c0_14], %31 {strides = array<i32>} : memref<1x64x4xf32, #tpu.memory_space<vmem>>, vector<1x64x4xf32>,
    return
  }
  func.func @transform_0(%arg0: i32) -> (i32, i32) {
    %c0_i32 = arith.constant 0 : i32
    %c0_i32_0 = arith.constant 0 : i32
    %c0_i32_1 = arith.constant 0 : i32
    return %c0_i32, %c0_i32_0 : i32, i32
  }
  func.func @transform_1(%arg0: i32) -> (i32, i32, i32) {
    %c0_i32 = arith.constant 0 : i32
    %c0_i32_0 = arith.constant 0 : i32
    %c0_i32_1 = arith.constant 0 : i32
    return %arg0, %c0_i32, %c0_i32_0 : i32, i32, i32
  }
  func.func @transform_2(%arg0: i32) -> (i32, i32, i32) {
    %c0_i32 = arith.constant 0 : i32
    %c0_i32_0 = arith.constant 0 : i32
    %c0_i32_1 = arith.constant 0 : i32
    return %arg0, %c0_i32, %c0_i32_0 : i32, i32, i32
  }
}

module attributes {stable_mosaic.version = 11 : i64} {
  func.func @_convT2x2_in_lrelu_kernel(%arg0: i32, %arg1: memref<4x32x64xbf16, #tpu.memory_space<vmem>>, %arg2: memref<1x64x4xbf16, #tpu.memory_space<vmem>>, %arg3: memref<1x4x32x4xf32, #tpu.memory_space<vmem>>) attributes {dimension_semantics = [#tpu.dimension_semantics<parallel>], iteration_bounds = array<i64: 8>, scalar_prefetch = 0 : i64, scratch_operands = 0 : i64, tpu.core_type = #tpu.core_type<tc>, window_params = [{pipeline_mode = #tpu.pipeline_mode<synchronous>, transform_indices = @transform_0, window_bounds = array<i64: 4, 32, 64>}, {transform_indices = @transform_1, window_bounds = array<i64: 1, 64, 4>}, {transform_indices = @transform_2, window_bounds = array<i64: 1, 4, 32, 4>}]} {
    %c0 = arith.constant 0 : index
    %c0_0 = arith.constant 0 : index
    %c0_1 = arith.constant 0 : index
    %0 = vector.load %arg2[%c0, %c0_0, %c0_1] : memref<1x64x4xbf16, #tpu.memory_space<vmem>>, vector<1x64x4xbf16>
    %1 = vector.shape_cast %0 : vector<1x64x4xbf16> to vector<64x4xbf16>
    %c0_2 = arith.constant 0 : index
    %c0_3 = arith.constant 0 : index
    %c0_4 = arith.constant 0 : index
    %2 = vector.load %arg1[%c0_2, %c0_3, %c0_4] : memref<4x32x64xbf16, #tpu.memory_space<vmem>>, vector<1x32x64xbf16>
    %3 = vector.shape_cast %2 : vector<1x32x64xbf16> to vector<32x64xbf16>
    %cst = arith.constant dense<0.000000e+00> : vector<32x4xf32>
    %4 = tpu.matmul %3, %1, %cst {dimension_numbers = #tpu.dot_dimension_numbers<[1], [0], [0], [1], [0, 0, 1, 1], [], []>} : vector<32x64xbf16>, vector<64x4xbf16>, vector<32x4xf32> -> vector<32x4xf32>
    %c1 = arith.constant 1 : index
    %c0_5 = arith.constant 0 : index
    %c0_6 = arith.constant 0 : index
    %5 = vector.load %arg1[%c1, %c0_5, %c0_6] : memref<4x32x64xbf16, #tpu.memory_space<vmem>>, vector<1x32x64xbf16>
    %6 = vector.shape_cast %5 : vector<1x32x64xbf16> to vector<32x64xbf16>
    %cst_7 = arith.constant dense<0.000000e+00> : vector<32x4xf32>
    %7 = tpu.matmul %6, %1, %cst_7 {dimension_numbers = #tpu.dot_dimension_numbers<[1], [0], [0], [1], [0, 0, 1, 1], [], []>} : vector<32x64xbf16>, vector<64x4xbf16>, vector<32x4xf32> -> vector<32x4xf32>
    %c2 = arith.constant 2 : index
    %c0_8 = arith.constant 0 : index
    %c0_9 = arith.constant 0 : index
    %8 = vector.load %arg1[%c2, %c0_8, %c0_9] : memref<4x32x64xbf16, #tpu.memory_space<vmem>>, vector<1x32x64xbf16>
    %9 = vector.shape_cast %8 : vector<1x32x64xbf16> to vector<32x64xbf16>
    %cst_10 = arith.constant dense<0.000000e+00> : vector<32x4xf32>
    %10 = tpu.matmul %9, %1, %cst_10 {dimension_numbers = #tpu.dot_dimension_numbers<[1], [0], [0], [1], [0, 0, 1, 1], [], []>} : vector<32x64xbf16>, vector<64x4xbf16>, vector<32x4xf32> -> vector<32x4xf32>
    %c3 = arith.constant 3 : index
    %c0_11 = arith.constant 0 : index
    %c0_12 = arith.constant 0 : index
    %11 = vector.load %arg1[%c3, %c0_11, %c0_12] : memref<4x32x64xbf16, #tpu.memory_space<vmem>>, vector<1x32x64xbf16>
    %12 = vector.shape_cast %11 : vector<1x32x64xbf16> to vector<32x64xbf16>
    %cst_13 = arith.constant dense<0.000000e+00> : vector<32x4xf32>
    %13 = tpu.matmul %12, %1, %cst_13 {dimension_numbers = #tpu.dot_dimension_numbers<[1], [0], [0], [1], [0, 0, 1, 1], [], []>} : vector<32x64xbf16>, vector<64x4xbf16>, vector<32x4xf32> -> vector<32x4xf32>
    %cst_14 = arith.constant dense<0.000000e+00> : vector<32xf32>
    %14 = vector.multi_reduction <add>, %4, %cst_14 [1] : vector<32x4xf32> to vector<32xf32>
    %15 = vector.shape_cast %14 : vector<32xf32> to vector<32x1xf32>
    %cst_15 = arith.constant dense<0.000000e+00> : vector<32xf32>
    %16 = vector.multi_reduction <add>, %7, %cst_15 [1] : vector<32x4xf32> to vector<32xf32>
    %17 = vector.shape_cast %16 : vector<32xf32> to vector<32x1xf32>
    %cst_16 = arith.constant dense<0.000000e+00> : vector<32xf32>
    %18 = vector.multi_reduction <add>, %10, %cst_16 [1] : vector<32x4xf32> to vector<32xf32>
    %19 = vector.shape_cast %18 : vector<32xf32> to vector<32x1xf32>
    %cst_17 = arith.constant dense<0.000000e+00> : vector<32xf32>
    %20 = vector.multi_reduction <add>, %13, %cst_17 [1] : vector<32x4xf32> to vector<32xf32>
    %21 = vector.shape_cast %20 : vector<32xf32> to vector<32x1xf32>
    %22 = arith.mulf %4, %4 : vector<32x4xf32>
    %cst_18 = arith.constant dense<0.000000e+00> : vector<32xf32>
    %23 = vector.multi_reduction <add>, %22, %cst_18 [1] : vector<32x4xf32> to vector<32xf32>
    %24 = vector.shape_cast %23 : vector<32xf32> to vector<32x1xf32>
    %25 = arith.mulf %7, %7 : vector<32x4xf32>
    %cst_19 = arith.constant dense<0.000000e+00> : vector<32xf32>
    %26 = vector.multi_reduction <add>, %25, %cst_19 [1] : vector<32x4xf32> to vector<32xf32>
    %27 = vector.shape_cast %26 : vector<32xf32> to vector<32x1xf32>
    %28 = arith.mulf %10, %10 : vector<32x4xf32>
    %cst_20 = arith.constant dense<0.000000e+00> : vector<32xf32>
    %29 = vector.multi_reduction <add>, %28, %cst_20 [1] : vector<32x4xf32> to vector<32xf32>
    %30 = vector.shape_cast %29 : vector<32xf32> to vector<32x1xf32>
    %31 = arith.mulf %13, %13 : vector<32x4xf32>
    %cst_21 = arith.constant dense<0.000000e+00> : vector<32xf32>
    %32 = vector.multi_reduction <add>, %31, %cst_21 [1] : vector<32x4xf32> to vector<32xf32>
    %33 = vector.shape_cast %32 : vector<32xf32> to vector<32x1xf32>
    %34 = arith.addf %15, %17 : vector<32x1xf32>
    %35 = arith.addf %34, %19 : vector<32x1xf32>
    %36 = arith.addf %35, %21 : vector<32x1xf32>
    %37 = arith.addf %24, %27 : vector<32x1xf32>
    %38 = arith.addf %37, %30 : vector<32x1xf32>
    %39 = arith.addf %38, %33 : vector<32x1xf32>
    %cst_22 = arith.constant 1.600000e+01 : f32
    %40 = vector.broadcast %cst_22 : f32 to vector<32x1xf32>
    %41 = arith.divf %36, %40 : vector<32x1xf32>
    %cst_23 = arith.constant 1.600000e+01 : f32
    %42 = vector.broadcast %cst_23 : f32 to vector<32x1xf32>
    %43 = arith.divf %39, %42 : vector<32x1xf32>
    %44 = arith.mulf %41, %41 : vector<32x1xf32>
    %45 = arith.subf %43, %44 : vector<32x1xf32>
    %cst_24 = arith.constant 0.000000e+00 : f32
    %46 = vector.broadcast %cst_24 : f32 to vector<32x1xf32>
    %47 = arith.maximumf %45, %46 : vector<32x1xf32>
    %cst_25 = arith.constant 9.99999974E-6 : f32
    %48 = vector.broadcast %cst_25 : f32 to vector<32x1xf32>
    %49 = arith.addf %47, %48 : vector<32x1xf32>
    %50 = math.rsqrt %49 : vector<32x1xf32>
    %51 = vector.broadcast %41 : vector<32x1xf32> to vector<32x4xf32>
    %52 = arith.subf %4, %51 : vector<32x4xf32>
    %53 = vector.broadcast %50 : vector<32x1xf32> to vector<32x4xf32>
    %54 = arith.mulf %52, %53 : vector<32x4xf32>
    %cst_26 = arith.constant 0.000000e+00 : f32
    %55 = vector.broadcast %cst_26 : f32 to vector<32x4xf32>
    %56 = arith.cmpf oge, %54, %55 : vector<32x4xf32>
    %cst_27 = arith.constant 2.000000e-01 : f32
    %57 = vector.broadcast %cst_27 : f32 to vector<32x4xf32>
    %58 = arith.mulf %57, %54 : vector<32x4xf32>
    %59 = arith.select %56, %54, %58 : vector<32x4xi1>, vector<32x4xf32>
    %c0_28 = arith.constant 0 : index
    %c0_29 = arith.constant 0 : index
    %c0_30 = arith.constant 0 : index
    %c0_31 = arith.constant 0 : index
    %60 = vector.load %arg3[%c0_28, %c0_29, %c0_30, %c0_31] : memref<1x4x32x4xf32, #tpu.memory_space<vmem>>, vector<1x1x32x4xf32>
    %61 = vector.shape_cast %60 : vector<1x1x32x4xf32> to vector<32x4xf32>
    %62 = vector.shape_cast %59 : vector<32x4xf32> to vector<1x1x32x4xf32>
    tpu.vector_store %arg3[%c0_28, %c0_29, %c0_30, %c0_31], %62 {strides = array<i32>} : memref<1x4x32x4xf32, #tpu.memory_space<vmem>>, vector<1x1x32x4xf32>,
    %63 = vector.broadcast %41 : vector<32x1xf32> to vector<32x4xf32>
    %64 = arith.subf %7, %63 : vector<32x4xf32>
    %65 = vector.broadcast %50 : vector<32x1xf32> to vector<32x4xf32>
    %66 = arith.mulf %64, %65 : vector<32x4xf32>
    %cst_32 = arith.constant 0.000000e+00 : f32
    %67 = vector.broadcast %cst_32 : f32 to vector<32x4xf32>
    %68 = arith.cmpf oge, %66, %67 : vector<32x4xf32>
    %cst_33 = arith.constant 2.000000e-01 : f32
    %69 = vector.broadcast %cst_33 : f32 to vector<32x4xf32>
    %70 = arith.mulf %69, %66 : vector<32x4xf32>
    %71 = arith.select %68, %66, %70 : vector<32x4xi1>, vector<32x4xf32>
    %c0_34 = arith.constant 0 : index
    %c1_35 = arith.constant 1 : index
    %c0_36 = arith.constant 0 : index
    %c0_37 = arith.constant 0 : index
    %72 = vector.load %arg3[%c0_34, %c1_35, %c0_36, %c0_37] : memref<1x4x32x4xf32, #tpu.memory_space<vmem>>, vector<1x1x32x4xf32>
    %73 = vector.shape_cast %72 : vector<1x1x32x4xf32> to vector<32x4xf32>
    %74 = vector.shape_cast %71 : vector<32x4xf32> to vector<1x1x32x4xf32>
    tpu.vector_store %arg3[%c0_34, %c1_35, %c0_36, %c0_37], %74 {strides = array<i32>} : memref<1x4x32x4xf32, #tpu.memory_space<vmem>>, vector<1x1x32x4xf32>,
    %75 = vector.broadcast %41 : vector<32x1xf32> to vector<32x4xf32>
    %76 = arith.subf %10, %75 : vector<32x4xf32>
    %77 = vector.broadcast %50 : vector<32x1xf32> to vector<32x4xf32>
    %78 = arith.mulf %76, %77 : vector<32x4xf32>
    %cst_38 = arith.constant 0.000000e+00 : f32
    %79 = vector.broadcast %cst_38 : f32 to vector<32x4xf32>
    %80 = arith.cmpf oge, %78, %79 : vector<32x4xf32>
    %cst_39 = arith.constant 2.000000e-01 : f32
    %81 = vector.broadcast %cst_39 : f32 to vector<32x4xf32>
    %82 = arith.mulf %81, %78 : vector<32x4xf32>
    %83 = arith.select %80, %78, %82 : vector<32x4xi1>, vector<32x4xf32>
    %c0_40 = arith.constant 0 : index
    %c2_41 = arith.constant 2 : index
    %c0_42 = arith.constant 0 : index
    %c0_43 = arith.constant 0 : index
    %84 = vector.load %arg3[%c0_40, %c2_41, %c0_42, %c0_43] : memref<1x4x32x4xf32, #tpu.memory_space<vmem>>, vector<1x1x32x4xf32>
    %85 = vector.shape_cast %84 : vector<1x1x32x4xf32> to vector<32x4xf32>
    %86 = vector.shape_cast %83 : vector<32x4xf32> to vector<1x1x32x4xf32>
    tpu.vector_store %arg3[%c0_40, %c2_41, %c0_42, %c0_43], %86 {strides = array<i32>} : memref<1x4x32x4xf32, #tpu.memory_space<vmem>>, vector<1x1x32x4xf32>,
    %87 = vector.broadcast %41 : vector<32x1xf32> to vector<32x4xf32>
    %88 = arith.subf %13, %87 : vector<32x4xf32>
    %89 = vector.broadcast %50 : vector<32x1xf32> to vector<32x4xf32>
    %90 = arith.mulf %88, %89 : vector<32x4xf32>
    %cst_44 = arith.constant 0.000000e+00 : f32
    %91 = vector.broadcast %cst_44 : f32 to vector<32x4xf32>
    %92 = arith.cmpf oge, %90, %91 : vector<32x4xf32>
    %cst_45 = arith.constant 2.000000e-01 : f32
    %93 = vector.broadcast %cst_45 : f32 to vector<32x4xf32>
    %94 = arith.mulf %93, %90 : vector<32x4xf32>
    %95 = arith.select %92, %90, %94 : vector<32x4xi1>, vector<32x4xf32>
    %c0_46 = arith.constant 0 : index
    %c3_47 = arith.constant 3 : index
    %c0_48 = arith.constant 0 : index
    %c0_49 = arith.constant 0 : index
    %96 = vector.load %arg3[%c0_46, %c3_47, %c0_48, %c0_49] : memref<1x4x32x4xf32, #tpu.memory_space<vmem>>, vector<1x1x32x4xf32>
    %97 = vector.shape_cast %96 : vector<1x1x32x4xf32> to vector<32x4xf32>
    %98 = vector.shape_cast %95 : vector<32x4xf32> to vector<1x1x32x4xf32>
    tpu.vector_store %arg3[%c0_46, %c3_47, %c0_48, %c0_49], %98 {strides = array<i32>} : memref<1x4x32x4xf32, #tpu.memory_space<vmem>>, vector<1x1x32x4xf32>,
    return
  }
  func.func @transform_0(%arg0: i32) -> (i32, i32, i32) {
    %c0_i32 = arith.constant 0 : i32
    %c0_i32_0 = arith.constant 0 : i32
    %c0_i32_1 = arith.constant 0 : i32
    %c0_i32_2 = arith.constant 0 : i32
    return %c0_i32, %c0_i32_0, %c0_i32_1 : i32, i32, i32
  }
  func.func @transform_1(%arg0: i32) -> (i32, i32, i32) {
    %c0_i32 = arith.constant 0 : i32
    %c0_i32_0 = arith.constant 0 : i32
    %c0_i32_1 = arith.constant 0 : i32
    return %arg0, %c0_i32, %c0_i32_0 : i32, i32, i32
  }
  func.func @transform_2(%arg0: i32) -> (i32, i32, i32, i32) {
    %c0_i32 = arith.constant 0 : i32
    %c0_i32_0 = arith.constant 0 : i32
    %c0_i32_1 = arith.constant 0 : i32
    %c0_i32_2 = arith.constant 0 : i32
    return %arg0, %c0_i32, %c0_i32_0, %c0_i32_1 : i32, i32, i32, i32
  }
}

module attributes {stable_mosaic.version = 11 : i64} {
  func.func @_conv3x3_in_lrelu_kernel(%arg0: i32, %arg1: memref<32x576xbf16, #tpu.memory_space<vmem>>, %arg2: memref<1x576x16xbf16, #tpu.memory_space<vmem>>, %arg3: memref<1x32x16xf32, #tpu.memory_space<vmem>>) attributes {dimension_semantics = [#tpu.dimension_semantics<parallel>], iteration_bounds = array<i64: 8>, scalar_prefetch = 0 : i64, scratch_operands = 0 : i64, tpu.core_type = #tpu.core_type<tc>, window_params = [{pipeline_mode = #tpu.pipeline_mode<synchronous>, transform_indices = @transform_0, window_bounds = array<i64: 32, 576>}, {transform_indices = @transform_1, window_bounds = array<i64: 1, 576, 16>}, {transform_indices = @transform_2, window_bounds = array<i64: 1, 32, 16>}]} {
    %c0 = arith.constant 0 : index
    %c0_0 = arith.constant 0 : index
    %0 = vector.load %arg1[%c0, %c0_0] : memref<32x576xbf16, #tpu.memory_space<vmem>>, vector<32x576xbf16>
    %c0_1 = arith.constant 0 : index
    %c0_2 = arith.constant 0 : index
    %c0_3 = arith.constant 0 : index
    %1 = vector.load %arg2[%c0_1, %c0_2, %c0_3] : memref<1x576x16xbf16, #tpu.memory_space<vmem>>, vector<1x576x16xbf16>
    %2 = vector.shape_cast %1 : vector<1x576x16xbf16> to vector<576x16xbf16>
    %cst = arith.constant dense<0.000000e+00> : vector<32x16xf32>
    %3 = tpu.matmul %0, %2, %cst {dimension_numbers = #tpu.dot_dimension_numbers<[1], [0], [0], [1], [0, 0, 1, 1], [], []>} : vector<32x576xbf16>, vector<576x16xbf16>, vector<32x16xf32> -> vector<32x16xf32>
    %cst_4 = arith.constant dense<0.000000e+00> : vector<32xf32>
    %4 = vector.multi_reduction <add>, %3, %cst_4 [1] : vector<32x16xf32> to vector<32xf32>
    %5 = vector.shape_cast %4 : vector<32xf32> to vector<32x1xf32>
    %cst_5 = arith.constant 1.600000e+01 : f32
    %6 = vector.broadcast %cst_5 : f32 to vector<32x1xf32>
    %7 = arith.divf %5, %6 : vector<32x1xf32>
    %8 = arith.mulf %3, %3 : vector<32x16xf32>
    %cst_6 = arith.constant dense<0.000000e+00> : vector<32xf32>
    %9 = vector.multi_reduction <add>, %8, %cst_6 [1] : vector<32x16xf32> to vector<32xf32>
    %10 = vector.shape_cast %9 : vector<32xf32> to vector<32x1xf32>
    %cst_7 = arith.constant 1.600000e+01 : f32
    %11 = vector.broadcast %cst_7 : f32 to vector<32x1xf32>
    %12 = arith.divf %10, %11 : vector<32x1xf32>
    %13 = arith.mulf %7, %7 : vector<32x1xf32>
    %14 = arith.subf %12, %13 : vector<32x1xf32>
    %cst_8 = arith.constant 0.000000e+00 : f32
    %15 = vector.broadcast %cst_8 : f32 to vector<32x1xf32>
    %16 = arith.maximumf %14, %15 : vector<32x1xf32>
    %17 = vector.broadcast %7 : vector<32x1xf32> to vector<32x16xf32>
    %18 = arith.subf %3, %17 : vector<32x16xf32>
    %cst_9 = arith.constant 9.99999974E-6 : f32
    %19 = vector.broadcast %cst_9 : f32 to vector<32x1xf32>
    %20 = arith.addf %16, %19 : vector<32x1xf32>
    %21 = math.rsqrt %20 : vector<32x1xf32>
    %22 = vector.broadcast %21 : vector<32x1xf32> to vector<32x16xf32>
    %23 = arith.mulf %18, %22 : vector<32x16xf32>
    %cst_10 = arith.constant 0.000000e+00 : f32
    %24 = vector.broadcast %cst_10 : f32 to vector<32x16xf32>
    %25 = arith.cmpf oge, %23, %24 : vector<32x16xf32>
    %cst_11 = arith.constant 2.000000e-01 : f32
    %26 = vector.broadcast %cst_11 : f32 to vector<32x16xf32>
    %27 = arith.mulf %26, %23 : vector<32x16xf32>
    %28 = arith.select %25, %23, %27 : vector<32x16xi1>, vector<32x16xf32>
    %c0_12 = arith.constant 0 : index
    %c0_13 = arith.constant 0 : index
    %c0_14 = arith.constant 0 : index
    %29 = vector.load %arg3[%c0_12, %c0_13, %c0_14] : memref<1x32x16xf32, #tpu.memory_space<vmem>>, vector<1x32x16xf32>
    %30 = vector.shape_cast %29 : vector<1x32x16xf32> to vector<32x16xf32>
    %31 = vector.shape_cast %28 : vector<32x16xf32> to vector<1x32x16xf32>
    tpu.vector_store %arg3[%c0_12, %c0_13, %c0_14], %31 {strides = array<i32>} : memref<1x32x16xf32, #tpu.memory_space<vmem>>, vector<1x32x16xf32>,
    return
  }
  func.func @transform_0(%arg0: i32) -> (i32, i32) {
    %c0_i32 = arith.constant 0 : i32
    %c0_i32_0 = arith.constant 0 : i32
    %c0_i32_1 = arith.constant 0 : i32
    return %c0_i32, %c0_i32_0 : i32, i32
  }
  func.func @transform_1(%arg0: i32) -> (i32, i32, i32) {
    %c0_i32 = arith.constant 0 : i32
    %c0_i32_0 = arith.constant 0 : i32
    %c0_i32_1 = arith.constant 0 : i32
    return %arg0, %c0_i32, %c0_i32_0 : i32, i32, i32
  }
  func.func @transform_2(%arg0: i32) -> (i32, i32, i32) {
    %c0_i32 = arith.constant 0 : i32
    %c0_i32_0 = arith.constant 0 : i32
    %c0_i32_1 = arith.constant 0 : i32
    return %arg0, %c0_i32, %c0_i32_0 : i32, i32, i32
  }
}

module attributes {stable_mosaic.version = 11 : i64} {
  func.func @_convT2x2_in_lrelu_kernel(%arg0: i32, %arg1: memref<4x16x32xbf16, #tpu.memory_space<vmem>>, %arg2: memref<1x32x16xbf16, #tpu.memory_space<vmem>>, %arg3: memref<1x4x16x16xf32, #tpu.memory_space<vmem>>) attributes {dimension_semantics = [#tpu.dimension_semantics<parallel>], iteration_bounds = array<i64: 8>, scalar_prefetch = 0 : i64, scratch_operands = 0 : i64, tpu.core_type = #tpu.core_type<tc>, window_params = [{pipeline_mode = #tpu.pipeline_mode<synchronous>, transform_indices = @transform_0, window_bounds = array<i64: 4, 16, 32>}, {transform_indices = @transform_1, window_bounds = array<i64: 1, 32, 16>}, {transform_indices = @transform_2, window_bounds = array<i64: 1, 4, 16, 16>}]} {
    %c0 = arith.constant 0 : index
    %c0_0 = arith.constant 0 : index
    %c0_1 = arith.constant 0 : index
    %0 = vector.load %arg2[%c0, %c0_0, %c0_1] : memref<1x32x16xbf16, #tpu.memory_space<vmem>>, vector<1x32x16xbf16>
    %1 = vector.shape_cast %0 : vector<1x32x16xbf16> to vector<32x16xbf16>
    %c0_2 = arith.constant 0 : index
    %c0_3 = arith.constant 0 : index
    %c0_4 = arith.constant 0 : index
    %2 = vector.load %arg1[%c0_2, %c0_3, %c0_4] : memref<4x16x32xbf16, #tpu.memory_space<vmem>>, vector<1x16x32xbf16>
    %3 = vector.shape_cast %2 : vector<1x16x32xbf16> to vector<16x32xbf16>
    %cst = arith.constant dense<0.000000e+00> : vector<16x16xf32>
    %4 = tpu.matmul %3, %1, %cst {dimension_numbers = #tpu.dot_dimension_numbers<[1], [0], [0], [1], [0, 0, 1, 1], [], []>} : vector<16x32xbf16>, vector<32x16xbf16>, vector<16x16xf32> -> vector<16x16xf32>
    %c1 = arith.constant 1 : index
    %c0_5 = arith.constant 0 : index
    %c0_6 = arith.constant 0 : index
    %5 = vector.load %arg1[%c1, %c0_5, %c0_6] : memref<4x16x32xbf16, #tpu.memory_space<vmem>>, vector<1x16x32xbf16>
    %6 = vector.shape_cast %5 : vector<1x16x32xbf16> to vector<16x32xbf16>
    %cst_7 = arith.constant dense<0.000000e+00> : vector<16x16xf32>
    %7 = tpu.matmul %6, %1, %cst_7 {dimension_numbers = #tpu.dot_dimension_numbers<[1], [0], [0], [1], [0, 0, 1, 1], [], []>} : vector<16x32xbf16>, vector<32x16xbf16>, vector<16x16xf32> -> vector<16x16xf32>
    %c2 = arith.constant 2 : index
    %c0_8 = arith.constant 0 : index
    %c0_9 = arith.constant 0 : index
    %8 = vector.load %arg1[%c2, %c0_8, %c0_9] : memref<4x16x32xbf16, #tpu.memory_space<vmem>>, vector<1x16x32xbf16>
    %9 = vector.shape_cast %8 : vector<1x16x32xbf16> to vector<16x32xbf16>
    %cst_10 = arith.constant dense<0.000000e+00> : vector<16x16xf32>
    %10 = tpu.matmul %9, %1, %cst_10 {dimension_numbers = #tpu.dot_dimension_numbers<[1], [0], [0], [1], [0, 0, 1, 1], [], []>} : vector<16x32xbf16>, vector<32x16xbf16>, vector<16x16xf32> -> vector<16x16xf32>
    %c3 = arith.constant 3 : index
    %c0_11 = arith.constant 0 : index
    %c0_12 = arith.constant 0 : index
    %11 = vector.load %arg1[%c3, %c0_11, %c0_12] : memref<4x16x32xbf16, #tpu.memory_space<vmem>>, vector<1x16x32xbf16>
    %12 = vector.shape_cast %11 : vector<1x16x32xbf16> to vector<16x32xbf16>
    %cst_13 = arith.constant dense<0.000000e+00> : vector<16x16xf32>
    %13 = tpu.matmul %12, %1, %cst_13 {dimension_numbers = #tpu.dot_dimension_numbers<[1], [0], [0], [1], [0, 0, 1, 1], [], []>} : vector<16x32xbf16>, vector<32x16xbf16>, vector<16x16xf32> -> vector<16x16xf32>
    %cst_14 = arith.constant dense<0.000000e+00> : vector<16xf32>
    %14 = vector.multi_reduction <add>, %4, %cst_14 [1] : vector<16x16xf32> to vector<16xf32>
    %15 = vector.shape_cast %14 : vector<16xf32> to vector<16x1xf32>
    %cst_15 = arith.constant dense<0.000000e+00> : vector<16xf32>
    %16 = vector.multi_reduction <add>, %7, %cst_15 [1] : vector<16x16xf32> to vector<16xf32>
    %17 = vector.shape_cast %16 : vector<16xf32> to vector<16x1xf32>
    %cst_16 = arith.constant dense<0.000000e+00> : vector<16xf32>
    %18 = vector.multi_reduction <add>, %10, %cst_16 [1] : vector<16x16xf32> to vector<16xf32>
    %19 = vector.shape_cast %18 : vector<16xf32> to vector<16x1xf32>
    %cst_17 = arith.constant dense<0.000000e+00> : vector<16xf32>
    %20 = vector.multi_reduction <add>, %13, %cst_17 [1] : vector<16x16xf32> to vector<16xf32>
    %21 = vector.shape_cast %20 : vector<16xf32> to vector<16x1xf32>
    %22 = arith.mulf %4, %4 : vector<16x16xf32>
    %cst_18 = arith.constant dense<0.000000e+00> : vector<16xf32>
    %23 = vector.multi_reduction <add>, %22, %cst_18 [1] : vector<16x16xf32> to vector<16xf32>
    %24 = vector.shape_cast %23 : vector<16xf32> to vector<16x1xf32>
    %25 = arith.mulf %7, %7 : vector<16x16xf32>
    %cst_19 = arith.constant dense<0.000000e+00> : vector<16xf32>
    %26 = vector.multi_reduction <add>, %25, %cst_19 [1] : vector<16x16xf32> to vector<16xf32>
    %27 = vector.shape_cast %26 : vector<16xf32> to vector<16x1xf32>
    %28 = arith.mulf %10, %10 : vector<16x16xf32>
    %cst_20 = arith.constant dense<0.000000e+00> : vector<16xf32>
    %29 = vector.multi_reduction <add>, %28, %cst_20 [1] : vector<16x16xf32> to vector<16xf32>
    %30 = vector.shape_cast %29 : vector<16xf32> to vector<16x1xf32>
    %31 = arith.mulf %13, %13 : vector<16x16xf32>
    %cst_21 = arith.constant dense<0.000000e+00> : vector<16xf32>
    %32 = vector.multi_reduction <add>, %31, %cst_21 [1] : vector<16x16xf32> to vector<16xf32>
    %33 = vector.shape_cast %32 : vector<16xf32> to vector<16x1xf32>
    %34 = arith.addf %15, %17 : vector<16x1xf32>
    %35 = arith.addf %34, %19 : vector<16x1xf32>
    %36 = arith.addf %35, %21 : vector<16x1xf32>
    %37 = arith.addf %24, %27 : vector<16x1xf32>
    %38 = arith.addf %37, %30 : vector<16x1xf32>
    %39 = arith.addf %38, %33 : vector<16x1xf32>
    %cst_22 = arith.constant 6.400000e+01 : f32
    %40 = vector.broadcast %cst_22 : f32 to vector<16x1xf32>
    %41 = arith.divf %36, %40 : vector<16x1xf32>
    %cst_23 = arith.constant 6.400000e+01 : f32
    %42 = vector.broadcast %cst_23 : f32 to vector<16x1xf32>
    %43 = arith.divf %39, %42 : vector<16x1xf32>
    %44 = arith.mulf %41, %41 : vector<16x1xf32>
    %45 = arith.subf %43, %44 : vector<16x1xf32>
    %cst_24 = arith.constant 0.000000e+00 : f32
    %46 = vector.broadcast %cst_24 : f32 to vector<16x1xf32>
    %47 = arith.maximumf %45, %46 : vector<16x1xf32>
    %cst_25 = arith.constant 9.99999974E-6 : f32
    %48 = vector.broadcast %cst_25 : f32 to vector<16x1xf32>
    %49 = arith.addf %47, %48 : vector<16x1xf32>
    %50 = math.rsqrt %49 : vector<16x1xf32>
    %51 = vector.broadcast %41 : vector<16x1xf32> to vector<16x16xf32>
    %52 = arith.subf %4, %51 : vector<16x16xf32>
    %53 = vector.broadcast %50 : vector<16x1xf32> to vector<16x16xf32>
    %54 = arith.mulf %52, %53 : vector<16x16xf32>
    %cst_26 = arith.constant 0.000000e+00 : f32
    %55 = vector.broadcast %cst_26 : f32 to vector<16x16xf32>
    %56 = arith.cmpf oge, %54, %55 : vector<16x16xf32>
    %cst_27 = arith.constant 2.000000e-01 : f32
    %57 = vector.broadcast %cst_27 : f32 to vector<16x16xf32>
    %58 = arith.mulf %57, %54 : vector<16x16xf32>
    %59 = arith.select %56, %54, %58 : vector<16x16xi1>, vector<16x16xf32>
    %c0_28 = arith.constant 0 : index
    %c0_29 = arith.constant 0 : index
    %c0_30 = arith.constant 0 : index
    %c0_31 = arith.constant 0 : index
    %60 = vector.load %arg3[%c0_28, %c0_29, %c0_30, %c0_31] : memref<1x4x16x16xf32, #tpu.memory_space<vmem>>, vector<1x1x16x16xf32>
    %61 = vector.shape_cast %60 : vector<1x1x16x16xf32> to vector<16x16xf32>
    %62 = vector.shape_cast %59 : vector<16x16xf32> to vector<1x1x16x16xf32>
    tpu.vector_store %arg3[%c0_28, %c0_29, %c0_30, %c0_31], %62 {strides = array<i32>} : memref<1x4x16x16xf32, #tpu.memory_space<vmem>>, vector<1x1x16x16xf32>,
    %63 = vector.broadcast %41 : vector<16x1xf32> to vector<16x16xf32>
    %64 = arith.subf %7, %63 : vector<16x16xf32>
    %65 = vector.broadcast %50 : vector<16x1xf32> to vector<16x16xf32>
    %66 = arith.mulf %64, %65 : vector<16x16xf32>
    %cst_32 = arith.constant 0.000000e+00 : f32
    %67 = vector.broadcast %cst_32 : f32 to vector<16x16xf32>
    %68 = arith.cmpf oge, %66, %67 : vector<16x16xf32>
    %cst_33 = arith.constant 2.000000e-01 : f32
    %69 = vector.broadcast %cst_33 : f32 to vector<16x16xf32>
    %70 = arith.mulf %69, %66 : vector<16x16xf32>
    %71 = arith.select %68, %66, %70 : vector<16x16xi1>, vector<16x16xf32>
    %c0_34 = arith.constant 0 : index
    %c1_35 = arith.constant 1 : index
    %c0_36 = arith.constant 0 : index
    %c0_37 = arith.constant 0 : index
    %72 = vector.load %arg3[%c0_34, %c1_35, %c0_36, %c0_37] : memref<1x4x16x16xf32, #tpu.memory_space<vmem>>, vector<1x1x16x16xf32>
    %73 = vector.shape_cast %72 : vector<1x1x16x16xf32> to vector<16x16xf32>
    %74 = vector.shape_cast %71 : vector<16x16xf32> to vector<1x1x16x16xf32>
    tpu.vector_store %arg3[%c0_34, %c1_35, %c0_36, %c0_37], %74 {strides = array<i32>} : memref<1x4x16x16xf32, #tpu.memory_space<vmem>>, vector<1x1x16x16xf32>,
    %75 = vector.broadcast %41 : vector<16x1xf32> to vector<16x16xf32>
    %76 = arith.subf %10, %75 : vector<16x16xf32>
    %77 = vector.broadcast %50 : vector<16x1xf32> to vector<16x16xf32>
    %78 = arith.mulf %76, %77 : vector<16x16xf32>
    %cst_38 = arith.constant 0.000000e+00 : f32
    %79 = vector.broadcast %cst_38 : f32 to vector<16x16xf32>
    %80 = arith.cmpf oge, %78, %79 : vector<16x16xf32>
    %cst_39 = arith.constant 2.000000e-01 : f32
    %81 = vector.broadcast %cst_39 : f32 to vector<16x16xf32>
    %82 = arith.mulf %81, %78 : vector<16x16xf32>
    %83 = arith.select %80, %78, %82 : vector<16x16xi1>, vector<16x16xf32>
    %c0_40 = arith.constant 0 : index
    %c2_41 = arith.constant 2 : index
    %c0_42 = arith.constant 0 : index
    %c0_43 = arith.constant 0 : index
    %84 = vector.load %arg3[%c0_40, %c2_41, %c0_42, %c0_43] : memref<1x4x16x16xf32, #tpu.memory_space<vmem>>, vector<1x1x16x16xf32>
    %85 = vector.shape_cast %84 : vector<1x1x16x16xf32> to vector<16x16xf32>
    %86 = vector.shape_cast %83 : vector<16x16xf32> to vector<1x1x16x16xf32>
    tpu.vector_store %arg3[%c0_40, %c2_41, %c0_42, %c0_43], %86 {strides = array<i32>} : memref<1x4x16x16xf32, #tpu.memory_space<vmem>>, vector<1x1x16x16xf32>,
    %87 = vector.broadcast %41 : vector<16x1xf32> to vector<16x16xf32>
    %88 = arith.subf %13, %87 : vector<16x16xf32>
    %89 = vector.broadcast %50 : vector<16x1xf32> to vector<16x16xf32>
    %90 = arith.mulf %88, %89 : vector<16x16xf32>
    %cst_44 = arith.constant 0.000000e+00 : f32
    %91 = vector.broadcast %cst_44 : f32 to vector<16x16xf32>
    %92 = arith.cmpf oge, %90, %91 : vector<16x16xf32>
    %cst_45 = arith.constant 2.000000e-01 : f32
    %93 = vector.broadcast %cst_45 : f32 to vector<16x16xf32>
    %94 = arith.mulf %93, %90 : vector<16x16xf32>
    %95 = arith.select %92, %90, %94 : vector<16x16xi1>, vector<16x16xf32>
    %c0_46 = arith.constant 0 : index
    %c3_47 = arith.constant 3 : index
    %c0_48 = arith.constant 0 : index
    %c0_49 = arith.constant 0 : index
    %96 = vector.load %arg3[%c0_46, %c3_47, %c0_48, %c0_49] : memref<1x4x16x16xf32, #tpu.memory_space<vmem>>, vector<1x1x16x16xf32>
    %97 = vector.shape_cast %96 : vector<1x1x16x16xf32> to vector<16x16xf32>
    %98 = vector.shape_cast %95 : vector<16x16xf32> to vector<1x1x16x16xf32>
    tpu.vector_store %arg3[%c0_46, %c3_47, %c0_48, %c0_49], %98 {strides = array<i32>} : memref<1x4x16x16xf32, #tpu.memory_space<vmem>>, vector<1x1x16x16xf32>,
    return
  }
  func.func @transform_0(%arg0: i32) -> (i32, i32, i32) {
    %c0_i32 = arith.constant 0 : i32
    %c0_i32_0 = arith.constant 0 : i32
    %c0_i32_1 = arith.constant 0 : i32
    %c0_i32_2 = arith.constant 0 : i32
    return %c0_i32, %c0_i32_0, %c0_i32_1 : i32, i32, i32
  }
  func.func @transform_1(%arg0: i32) -> (i32, i32, i32) {
    %c0_i32 = arith.constant 0 : i32
    %c0_i32_0 = arith.constant 0 : i32
    %c0_i32_1 = arith.constant 0 : i32
    return %arg0, %c0_i32, %c0_i32_0 : i32, i32, i32
  }
  func.func @transform_2(%arg0: i32) -> (i32, i32, i32, i32) {
    %c0_i32 = arith.constant 0 : i32
    %c0_i32_0 = arith.constant 0 : i32
    %c0_i32_1 = arith.constant 0 : i32
    %c0_i32_2 = arith.constant 0 : i32
    return %arg0, %c0_i32, %c0_i32_0, %c0_i32_1 : i32, i32, i32, i32
  }
}

module attributes {stable_mosaic.version = 11 : i64} {
  func.func @_conv3x3_in_lrelu_kernel(%arg0: i32, %arg1: memref<16x288xbf16, #tpu.memory_space<vmem>>, %arg2: memref<1x288x64xbf16, #tpu.memory_space<vmem>>, %arg3: memref<1x16x64xf32, #tpu.memory_space<vmem>>) attributes {dimension_semantics = [#tpu.dimension_semantics<parallel>], iteration_bounds = array<i64: 8>, scalar_prefetch = 0 : i64, scratch_operands = 0 : i64, tpu.core_type = #tpu.core_type<tc>, window_params = [{pipeline_mode = #tpu.pipeline_mode<synchronous>, transform_indices = @transform_0, window_bounds = array<i64: 16, 288>}, {transform_indices = @transform_1, window_bounds = array<i64: 1, 288, 64>}, {transform_indices = @transform_2, window_bounds = array<i64: 1, 16, 64>}]} {
    %c0 = arith.constant 0 : index
    %c0_0 = arith.constant 0 : index
    %0 = vector.load %arg1[%c0, %c0_0] : memref<16x288xbf16, #tpu.memory_space<vmem>>, vector<16x288xbf16>
    %c0_1 = arith.constant 0 : index
    %c0_2 = arith.constant 0 : index
    %c0_3 = arith.constant 0 : index
    %1 = vector.load %arg2[%c0_1, %c0_2, %c0_3] : memref<1x288x64xbf16, #tpu.memory_space<vmem>>, vector<1x288x64xbf16>
    %2 = vector.shape_cast %1 : vector<1x288x64xbf16> to vector<288x64xbf16>
    %cst = arith.constant dense<0.000000e+00> : vector<16x64xf32>
    %3 = tpu.matmul %0, %2, %cst {dimension_numbers = #tpu.dot_dimension_numbers<[1], [0], [0], [1], [0, 0, 1, 1], [], []>} : vector<16x288xbf16>, vector<288x64xbf16>, vector<16x64xf32> -> vector<16x64xf32>
    %cst_4 = arith.constant dense<0.000000e+00> : vector<16xf32>
    %4 = vector.multi_reduction <add>, %3, %cst_4 [1] : vector<16x64xf32> to vector<16xf32>
    %5 = vector.shape_cast %4 : vector<16xf32> to vector<16x1xf32>
    %cst_5 = arith.constant 6.400000e+01 : f32
    %6 = vector.broadcast %cst_5 : f32 to vector<16x1xf32>
    %7 = arith.divf %5, %6 : vector<16x1xf32>
    %8 = arith.mulf %3, %3 : vector<16x64xf32>
    %cst_6 = arith.constant dense<0.000000e+00> : vector<16xf32>
    %9 = vector.multi_reduction <add>, %8, %cst_6 [1] : vector<16x64xf32> to vector<16xf32>
    %10 = vector.shape_cast %9 : vector<16xf32> to vector<16x1xf32>
    %cst_7 = arith.constant 6.400000e+01 : f32
    %11 = vector.broadcast %cst_7 : f32 to vector<16x1xf32>
    %12 = arith.divf %10, %11 : vector<16x1xf32>
    %13 = arith.mulf %7, %7 : vector<16x1xf32>
    %14 = arith.subf %12, %13 : vector<16x1xf32>
    %cst_8 = arith.constant 0.000000e+00 : f32
    %15 = vector.broadcast %cst_8 : f32 to vector<16x1xf32>
    %16 = arith.maximumf %14, %15 : vector<16x1xf32>
    %17 = vector.broadcast %7 : vector<16x1xf32> to vector<16x64xf32>
    %18 = arith.subf %3, %17 : vector<16x64xf32>
    %cst_9 = arith.constant 9.99999974E-6 : f32
    %19 = vector.broadcast %cst_9 : f32 to vector<16x1xf32>
    %20 = arith.addf %16, %19 : vector<16x1xf32>
    %21 = math.rsqrt %20 : vector<16x1xf32>
    %22 = vector.broadcast %21 : vector<16x1xf32> to vector<16x64xf32>
    %23 = arith.mulf %18, %22 : vector<16x64xf32>
    %cst_10 = arith.constant 0.000000e+00 : f32
    %24 = vector.broadcast %cst_10 : f32 to vector<16x64xf32>
    %25 = arith.cmpf oge, %23, %24 : vector<16x64xf32>
    %cst_11 = arith.constant 2.000000e-01 : f32
    %26 = vector.broadcast %cst_11 : f32 to vector<16x64xf32>
    %27 = arith.mulf %26, %23 : vector<16x64xf32>
    %28 = arith.select %25, %23, %27 : vector<16x64xi1>, vector<16x64xf32>
    %c0_12 = arith.constant 0 : index
    %c0_13 = arith.constant 0 : index
    %c0_14 = arith.constant 0 : index
    %29 = vector.load %arg3[%c0_12, %c0_13, %c0_14] : memref<1x16x64xf32, #tpu.memory_space<vmem>>, vector<1x16x64xf32>
    %30 = vector.shape_cast %29 : vector<1x16x64xf32> to vector<16x64xf32>
    %31 = vector.shape_cast %28 : vector<16x64xf32> to vector<1x16x64xf32>
    tpu.vector_store %arg3[%c0_12, %c0_13, %c0_14], %31 {strides = array<i32>} : memref<1x16x64xf32, #tpu.memory_space<vmem>>, vector<1x16x64xf32>,
    return
  }
  func.func @transform_0(%arg0: i32) -> (i32, i32) {
    %c0_i32 = arith.constant 0 : i32
    %c0_i32_0 = arith.constant 0 : i32
    %c0_i32_1 = arith.constant 0 : i32
    return %c0_i32, %c0_i32_0 : i32, i32
  }
  func.func @transform_1(%arg0: i32) -> (i32, i32, i32) {
    %c0_i32 = arith.constant 0 : i32
    %c0_i32_0 = arith.constant 0 : i32
    %c0_i32_1 = arith.constant 0 : i32
    return %arg0, %c0_i32, %c0_i32_0 : i32, i32, i32
  }
  func.func @transform_2(%arg0: i32) -> (i32, i32, i32) {
    %c0_i32 = arith.constant 0 : i32
    %c0_i32_0 = arith.constant 0 : i32
    %c0_i32_1 = arith.constant 0 : i32
    return %arg0, %c0_i32, %c0_i32_0 : i32, i32, i32
  }
}

module attributes {stable_mosaic.version = 11 : i64} {
  func.func @_convT2x2_in_lrelu_kernel(%arg0: i32, %arg1: memref<4x8x16xbf16, #tpu.memory_space<vmem>>, %arg2: memref<1x16x64xbf16, #tpu.memory_space<vmem>>, %arg3: memref<1x4x8x64xf32, #tpu.memory_space<vmem>>) attributes {dimension_semantics = [#tpu.dimension_semantics<parallel>], iteration_bounds = array<i64: 8>, scalar_prefetch = 0 : i64, scratch_operands = 0 : i64, tpu.core_type = #tpu.core_type<tc>, window_params = [{pipeline_mode = #tpu.pipeline_mode<synchronous>, transform_indices = @transform_0, window_bounds = array<i64: 4, 8, 16>}, {transform_indices = @transform_1, window_bounds = array<i64: 1, 16, 64>}, {transform_indices = @transform_2, window_bounds = array<i64: 1, 4, 8, 64>}]} {
    %c0 = arith.constant 0 : index
    %c0_0 = arith.constant 0 : index
    %c0_1 = arith.constant 0 : index
    %0 = vector.load %arg2[%c0, %c0_0, %c0_1] : memref<1x16x64xbf16, #tpu.memory_space<vmem>>, vector<1x16x64xbf16>
    %1 = vector.shape_cast %0 : vector<1x16x64xbf16> to vector<16x64xbf16>
    %c0_2 = arith.constant 0 : index
    %c0_3 = arith.constant 0 : index
    %c0_4 = arith.constant 0 : index
    %2 = vector.load %arg1[%c0_2, %c0_3, %c0_4] : memref<4x8x16xbf16, #tpu.memory_space<vmem>>, vector<1x8x16xbf16>
    %3 = vector.shape_cast %2 : vector<1x8x16xbf16> to vector<8x16xbf16>
    %cst = arith.constant dense<0.000000e+00> : vector<8x64xf32>
    %4 = tpu.matmul %3, %1, %cst {dimension_numbers = #tpu.dot_dimension_numbers<[1], [0], [0], [1], [0, 0, 1, 1], [], []>} : vector<8x16xbf16>, vector<16x64xbf16>, vector<8x64xf32> -> vector<8x64xf32>
    %c1 = arith.constant 1 : index
    %c0_5 = arith.constant 0 : index
    %c0_6 = arith.constant 0 : index
    %5 = vector.load %arg1[%c1, %c0_5, %c0_6] : memref<4x8x16xbf16, #tpu.memory_space<vmem>>, vector<1x8x16xbf16>
    %6 = vector.shape_cast %5 : vector<1x8x16xbf16> to vector<8x16xbf16>
    %cst_7 = arith.constant dense<0.000000e+00> : vector<8x64xf32>
    %7 = tpu.matmul %6, %1, %cst_7 {dimension_numbers = #tpu.dot_dimension_numbers<[1], [0], [0], [1], [0, 0, 1, 1], [], []>} : vector<8x16xbf16>, vector<16x64xbf16>, vector<8x64xf32> -> vector<8x64xf32>
    %c2 = arith.constant 2 : index
    %c0_8 = arith.constant 0 : index
    %c0_9 = arith.constant 0 : index
    %8 = vector.load %arg1[%c2, %c0_8, %c0_9] : memref<4x8x16xbf16, #tpu.memory_space<vmem>>, vector<1x8x16xbf16>
    %9 = vector.shape_cast %8 : vector<1x8x16xbf16> to vector<8x16xbf16>
    %cst_10 = arith.constant dense<0.000000e+00> : vector<8x64xf32>
    %10 = tpu.matmul %9, %1, %cst_10 {dimension_numbers = #tpu.dot_dimension_numbers<[1], [0], [0], [1], [0, 0, 1, 1], [], []>} : vector<8x16xbf16>, vector<16x64xbf16>, vector<8x64xf32> -> vector<8x64xf32>
    %c3 = arith.constant 3 : index
    %c0_11 = arith.constant 0 : index
    %c0_12 = arith.constant 0 : index
    %11 = vector.load %arg1[%c3, %c0_11, %c0_12] : memref<4x8x16xbf16, #tpu.memory_space<vmem>>, vector<1x8x16xbf16>
    %12 = vector.shape_cast %11 : vector<1x8x16xbf16> to vector<8x16xbf16>
    %cst_13 = arith.constant dense<0.000000e+00> : vector<8x64xf32>
    %13 = tpu.matmul %12, %1, %cst_13 {dimension_numbers = #tpu.dot_dimension_numbers<[1], [0], [0], [1], [0, 0, 1, 1], [], []>} : vector<8x16xbf16>, vector<16x64xbf16>, vector<8x64xf32> -> vector<8x64xf32>
    %cst_14 = arith.constant dense<0.000000e+00> : vector<8xf32>
    %14 = vector.multi_reduction <add>, %4, %cst_14 [1] : vector<8x64xf32> to vector<8xf32>
    %15 = vector.shape_cast %14 : vector<8xf32> to vector<8x1xf32>
    %cst_15 = arith.constant dense<0.000000e+00> : vector<8xf32>
    %16 = vector.multi_reduction <add>, %7, %cst_15 [1] : vector<8x64xf32> to vector<8xf32>
    %17 = vector.shape_cast %16 : vector<8xf32> to vector<8x1xf32>
    %cst_16 = arith.constant dense<0.000000e+00> : vector<8xf32>
    %18 = vector.multi_reduction <add>, %10, %cst_16 [1] : vector<8x64xf32> to vector<8xf32>
    %19 = vector.shape_cast %18 : vector<8xf32> to vector<8x1xf32>
    %cst_17 = arith.constant dense<0.000000e+00> : vector<8xf32>
    %20 = vector.multi_reduction <add>, %13, %cst_17 [1] : vector<8x64xf32> to vector<8xf32>
    %21 = vector.shape_cast %20 : vector<8xf32> to vector<8x1xf32>
    %22 = arith.mulf %4, %4 : vector<8x64xf32>
    %cst_18 = arith.constant dense<0.000000e+00> : vector<8xf32>
    %23 = vector.multi_reduction <add>, %22, %cst_18 [1] : vector<8x64xf32> to vector<8xf32>
    %24 = vector.shape_cast %23 : vector<8xf32> to vector<8x1xf32>
    %25 = arith.mulf %7, %7 : vector<8x64xf32>
    %cst_19 = arith.constant dense<0.000000e+00> : vector<8xf32>
    %26 = vector.multi_reduction <add>, %25, %cst_19 [1] : vector<8x64xf32> to vector<8xf32>
    %27 = vector.shape_cast %26 : vector<8xf32> to vector<8x1xf32>
    %28 = arith.mulf %10, %10 : vector<8x64xf32>
    %cst_20 = arith.constant dense<0.000000e+00> : vector<8xf32>
    %29 = vector.multi_reduction <add>, %28, %cst_20 [1] : vector<8x64xf32> to vector<8xf32>
    %30 = vector.shape_cast %29 : vector<8xf32> to vector<8x1xf32>
    %31 = arith.mulf %13, %13 : vector<8x64xf32>
    %cst_21 = arith.constant dense<0.000000e+00> : vector<8xf32>
    %32 = vector.multi_reduction <add>, %31, %cst_21 [1] : vector<8x64xf32> to vector<8xf32>
    %33 = vector.shape_cast %32 : vector<8xf32> to vector<8x1xf32>
    %34 = arith.addf %15, %17 : vector<8x1xf32>
    %35 = arith.addf %34, %19 : vector<8x1xf32>
    %36 = arith.addf %35, %21 : vector<8x1xf32>
    %37 = arith.addf %24, %27 : vector<8x1xf32>
    %38 = arith.addf %37, %30 : vector<8x1xf32>
    %39 = arith.addf %38, %33 : vector<8x1xf32>
    %cst_22 = arith.constant 2.560000e+02 : f32
    %40 = vector.broadcast %cst_22 : f32 to vector<8x1xf32>
    %41 = arith.divf %36, %40 : vector<8x1xf32>
    %cst_23 = arith.constant 2.560000e+02 : f32
    %42 = vector.broadcast %cst_23 : f32 to vector<8x1xf32>
    %43 = arith.divf %39, %42 : vector<8x1xf32>
    %44 = arith.mulf %41, %41 : vector<8x1xf32>
    %45 = arith.subf %43, %44 : vector<8x1xf32>
    %cst_24 = arith.constant 0.000000e+00 : f32
    %46 = vector.broadcast %cst_24 : f32 to vector<8x1xf32>
    %47 = arith.maximumf %45, %46 : vector<8x1xf32>
    %cst_25 = arith.constant 9.99999974E-6 : f32
    %48 = vector.broadcast %cst_25 : f32 to vector<8x1xf32>
    %49 = arith.addf %47, %48 : vector<8x1xf32>
    %50 = math.rsqrt %49 : vector<8x1xf32>
    %51 = vector.broadcast %41 : vector<8x1xf32> to vector<8x64xf32>
    %52 = arith.subf %4, %51 : vector<8x64xf32>
    %53 = vector.broadcast %50 : vector<8x1xf32> to vector<8x64xf32>
    %54 = arith.mulf %52, %53 : vector<8x64xf32>
    %cst_26 = arith.constant 0.000000e+00 : f32
    %55 = vector.broadcast %cst_26 : f32 to vector<8x64xf32>
    %56 = arith.cmpf oge, %54, %55 : vector<8x64xf32>
    %cst_27 = arith.constant 2.000000e-01 : f32
    %57 = vector.broadcast %cst_27 : f32 to vector<8x64xf32>
    %58 = arith.mulf %57, %54 : vector<8x64xf32>
    %59 = arith.select %56, %54, %58 : vector<8x64xi1>, vector<8x64xf32>
    %c0_28 = arith.constant 0 : index
    %c0_29 = arith.constant 0 : index
    %c0_30 = arith.constant 0 : index
    %c0_31 = arith.constant 0 : index
    %60 = vector.load %arg3[%c0_28, %c0_29, %c0_30, %c0_31] : memref<1x4x8x64xf32, #tpu.memory_space<vmem>>, vector<1x1x8x64xf32>
    %61 = vector.shape_cast %60 : vector<1x1x8x64xf32> to vector<8x64xf32>
    %62 = vector.shape_cast %59 : vector<8x64xf32> to vector<1x1x8x64xf32>
    tpu.vector_store %arg3[%c0_28, %c0_29, %c0_30, %c0_31], %62 {strides = array<i32>} : memref<1x4x8x64xf32, #tpu.memory_space<vmem>>, vector<1x1x8x64xf32>,
    %63 = vector.broadcast %41 : vector<8x1xf32> to vector<8x64xf32>
    %64 = arith.subf %7, %63 : vector<8x64xf32>
    %65 = vector.broadcast %50 : vector<8x1xf32> to vector<8x64xf32>
    %66 = arith.mulf %64, %65 : vector<8x64xf32>
    %cst_32 = arith.constant 0.000000e+00 : f32
    %67 = vector.broadcast %cst_32 : f32 to vector<8x64xf32>
    %68 = arith.cmpf oge, %66, %67 : vector<8x64xf32>
    %cst_33 = arith.constant 2.000000e-01 : f32
    %69 = vector.broadcast %cst_33 : f32 to vector<8x64xf32>
    %70 = arith.mulf %69, %66 : vector<8x64xf32>
    %71 = arith.select %68, %66, %70 : vector<8x64xi1>, vector<8x64xf32>
    %c0_34 = arith.constant 0 : index
    %c1_35 = arith.constant 1 : index
    %c0_36 = arith.constant 0 : index
    %c0_37 = arith.constant 0 : index
    %72 = vector.load %arg3[%c0_34, %c1_35, %c0_36, %c0_37] : memref<1x4x8x64xf32, #tpu.memory_space<vmem>>, vector<1x1x8x64xf32>
    %73 = vector.shape_cast %72 : vector<1x1x8x64xf32> to vector<8x64xf32>
    %74 = vector.shape_cast %71 : vector<8x64xf32> to vector<1x1x8x64xf32>
    tpu.vector_store %arg3[%c0_34, %c1_35, %c0_36, %c0_37], %74 {strides = array<i32>} : memref<1x4x8x64xf32, #tpu.memory_space<vmem>>, vector<1x1x8x64xf32>,
    %75 = vector.broadcast %41 : vector<8x1xf32> to vector<8x64xf32>
    %76 = arith.subf %10, %75 : vector<8x64xf32>
    %77 = vector.broadcast %50 : vector<8x1xf32> to vector<8x64xf32>
    %78 = arith.mulf %76, %77 : vector<8x64xf32>
    %cst_38 = arith.constant 0.000000e+00 : f32
    %79 = vector.broadcast %cst_38 : f32 to vector<8x64xf32>
    %80 = arith.cmpf oge, %78, %79 : vector<8x64xf32>
    %cst_39 = arith.constant 2.000000e-01 : f32
    %81 = vector.broadcast %cst_39 : f32 to vector<8x64xf32>
    %82 = arith.mulf %81, %78 : vector<8x64xf32>
    %83 = arith.select %80, %78, %82 : vector<8x64xi1>, vector<8x64xf32>
    %c0_40 = arith.constant 0 : index
    %c2_41 = arith.constant 2 : index
    %c0_42 = arith.constant 0 : index
    %c0_43 = arith.constant 0 : index
    %84 = vector.load %arg3[%c0_40, %c2_41, %c0_42, %c0_43] : memref<1x4x8x64xf32, #tpu.memory_space<vmem>>, vector<1x1x8x64xf32>
    %85 = vector.shape_cast %84 : vector<1x1x8x64xf32> to vector<8x64xf32>
    %86 = vector.shape_cast %83 : vector<8x64xf32> to vector<1x1x8x64xf32>
    tpu.vector_store %arg3[%c0_40, %c2_41, %c0_42, %c0_43], %86 {strides = array<i32>} : memref<1x4x8x64xf32, #tpu.memory_space<vmem>>, vector<1x1x8x64xf32>,
    %87 = vector.broadcast %41 : vector<8x1xf32> to vector<8x64xf32>
    %88 = arith.subf %13, %87 : vector<8x64xf32>
    %89 = vector.broadcast %50 : vector<8x1xf32> to vector<8x64xf32>
    %90 = arith.mulf %88, %89 : vector<8x64xf32>
    %cst_44 = arith.constant 0.000000e+00 : f32
    %91 = vector.broadcast %cst_44 : f32 to vector<8x64xf32>
    %92 = arith.cmpf oge, %90, %91 : vector<8x64xf32>
    %cst_45 = arith.constant 2.000000e-01 : f32
    %93 = vector.broadcast %cst_45 : f32 to vector<8x64xf32>
    %94 = arith.mulf %93, %90 : vector<8x64xf32>
    %95 = arith.select %92, %90, %94 : vector<8x64xi1>, vector<8x64xf32>
    %c0_46 = arith.constant 0 : index
    %c3_47 = arith.constant 3 : index
    %c0_48 = arith.constant 0 : index
    %c0_49 = arith.constant 0 : index
    %96 = vector.load %arg3[%c0_46, %c3_47, %c0_48, %c0_49] : memref<1x4x8x64xf32, #tpu.memory_space<vmem>>, vector<1x1x8x64xf32>
    %97 = vector.shape_cast %96 : vector<1x1x8x64xf32> to vector<8x64xf32>
    %98 = vector.shape_cast %95 : vector<8x64xf32> to vector<1x1x8x64xf32>
    tpu.vector_store %arg3[%c0_46, %c3_47, %c0_48, %c0_49], %98 {strides = array<i32>} : memref<1x4x8x64xf32, #tpu.memory_space<vmem>>, vector<1x1x8x64xf32>,
    return
  }
  func.func @transform_0(%arg0: i32) -> (i32, i32, i32) {
    %c0_i32 = arith.constant 0 : i32
    %c0_i32_0 = arith.constant 0 : i32
    %c0_i32_1 = arith.constant 0 : i32
    %c0_i32_2 = arith.constant 0 : i32
    return %c0_i32, %c0_i32_0, %c0_i32_1 : i32, i32, i32
  }
  func.func @transform_1(%arg0: i32) -> (i32, i32, i32) {
    %c0_i32 = arith.constant 0 : i32
    %c0_i32_0 = arith.constant 0 : i32
    %c0_i32_1 = arith.constant 0 : i32
    return %arg0, %c0_i32, %c0_i32_0 : i32, i32, i32
  }
  func.func @transform_2(%arg0: i32) -> (i32, i32, i32, i32) {
    %c0_i32 = arith.constant 0 : i32
    %c0_i32_0 = arith.constant 0 : i32
    %c0_i32_1 = arith.constant 0 : i32
    %c0_i32_2 = arith.constant 0 : i32
    return %arg0, %c0_i32, %c0_i32_0, %c0_i32_1 : i32, i32, i32, i32
  }
}

module attributes {stable_mosaic.version = 11 : i64} {
  func.func @_conv3x3_in_lrelu_kernel(%arg0: i32, %arg1: memref<8x144xbf16, #tpu.memory_space<vmem>>, %arg2: memref<1x144x256xbf16, #tpu.memory_space<vmem>>, %arg3: memref<1x8x256xf32, #tpu.memory_space<vmem>>) attributes {dimension_semantics = [#tpu.dimension_semantics<parallel>], iteration_bounds = array<i64: 8>, scalar_prefetch = 0 : i64, scratch_operands = 0 : i64, tpu.core_type = #tpu.core_type<tc>, window_params = [{pipeline_mode = #tpu.pipeline_mode<synchronous>, transform_indices = @transform_0, window_bounds = array<i64: 8, 144>}, {transform_indices = @transform_1, window_bounds = array<i64: 1, 144, 256>}, {transform_indices = @transform_2, window_bounds = array<i64: 1, 8, 256>}]} {
    %c0 = arith.constant 0 : index
    %c0_0 = arith.constant 0 : index
    %0 = vector.load %arg1[%c0, %c0_0] : memref<8x144xbf16, #tpu.memory_space<vmem>>, vector<8x144xbf16>
    %c0_1 = arith.constant 0 : index
    %c0_2 = arith.constant 0 : index
    %c0_3 = arith.constant 0 : index
    %1 = vector.load %arg2[%c0_1, %c0_2, %c0_3] : memref<1x144x256xbf16, #tpu.memory_space<vmem>>, vector<1x144x256xbf16>
    %2 = vector.shape_cast %1 : vector<1x144x256xbf16> to vector<144x256xbf16>
    %cst = arith.constant dense<0.000000e+00> : vector<8x256xf32>
    %3 = tpu.matmul %0, %2, %cst {dimension_numbers = #tpu.dot_dimension_numbers<[1], [0], [0], [1], [0, 0, 1, 1], [], []>} : vector<8x144xbf16>, vector<144x256xbf16>, vector<8x256xf32> -> vector<8x256xf32>
    %cst_4 = arith.constant dense<0.000000e+00> : vector<8xf32>
    %4 = vector.multi_reduction <add>, %3, %cst_4 [1] : vector<8x256xf32> to vector<8xf32>
    %5 = vector.shape_cast %4 : vector<8xf32> to vector<8x1xf32>
    %cst_5 = arith.constant 2.560000e+02 : f32
    %6 = vector.broadcast %cst_5 : f32 to vector<8x1xf32>
    %7 = arith.divf %5, %6 : vector<8x1xf32>
    %8 = arith.mulf %3, %3 : vector<8x256xf32>
    %cst_6 = arith.constant dense<0.000000e+00> : vector<8xf32>
    %9 = vector.multi_reduction <add>, %8, %cst_6 [1] : vector<8x256xf32> to vector<8xf32>
    %10 = vector.shape_cast %9 : vector<8xf32> to vector<8x1xf32>
    %cst_7 = arith.constant 2.560000e+02 : f32
    %11 = vector.broadcast %cst_7 : f32 to vector<8x1xf32>
    %12 = arith.divf %10, %11 : vector<8x1xf32>
    %13 = arith.mulf %7, %7 : vector<8x1xf32>
    %14 = arith.subf %12, %13 : vector<8x1xf32>
    %cst_8 = arith.constant 0.000000e+00 : f32
    %15 = vector.broadcast %cst_8 : f32 to vector<8x1xf32>
    %16 = arith.maximumf %14, %15 : vector<8x1xf32>
    %17 = vector.broadcast %7 : vector<8x1xf32> to vector<8x256xf32>
    %18 = arith.subf %3, %17 : vector<8x256xf32>
    %cst_9 = arith.constant 9.99999974E-6 : f32
    %19 = vector.broadcast %cst_9 : f32 to vector<8x1xf32>
    %20 = arith.addf %16, %19 : vector<8x1xf32>
    %21 = math.rsqrt %20 : vector<8x1xf32>
    %22 = vector.broadcast %21 : vector<8x1xf32> to vector<8x256xf32>
    %23 = arith.mulf %18, %22 : vector<8x256xf32>
    %cst_10 = arith.constant 0.000000e+00 : f32
    %24 = vector.broadcast %cst_10 : f32 to vector<8x256xf32>
    %25 = arith.cmpf oge, %23, %24 : vector<8x256xf32>
    %cst_11 = arith.constant 2.000000e-01 : f32
    %26 = vector.broadcast %cst_11 : f32 to vector<8x256xf32>
    %27 = arith.mulf %26, %23 : vector<8x256xf32>
    %28 = arith.select %25, %23, %27 : vector<8x256xi1>, vector<8x256xf32>
    %c0_12 = arith.constant 0 : index
    %c0_13 = arith.constant 0 : index
    %c0_14 = arith.constant 0 : index
    %29 = vector.load %arg3[%c0_12, %c0_13, %c0_14] : memref<1x8x256xf32, #tpu.memory_space<vmem>>, vector<1x8x256xf32>
    %30 = vector.shape_cast %29 : vector<1x8x256xf32> to vector<8x256xf32>
    %31 = vector.shape_cast %28 : vector<8x256xf32> to vector<1x8x256xf32>
    tpu.vector_store %arg3[%c0_12, %c0_13, %c0_14], %31 {strides = array<i32>} : memref<1x8x256xf32, #tpu.memory_space<vmem>>, vector<1x8x256xf32>,
    return
  }
  func.func @transform_0(%arg0: i32) -> (i32, i32) {
    %c0_i32 = arith.constant 0 : i32
    %c0_i32_0 = arith.constant 0 : i32
    %c0_i32_1 = arith.constant 0 : i32
    return %c0_i32, %c0_i32_0 : i32, i32
  }
  func.func @transform_1(%arg0: i32) -> (i32, i32, i32) {
    %c0_i32 = arith.constant 0 : i32
    %c0_i32_0 = arith.constant 0 : i32
    %c0_i32_1 = arith.constant 0 : i32
    return %arg0, %c0_i32, %c0_i32_0 : i32, i32, i32
  }
  func.func @transform_2(%arg0: i32) -> (i32, i32, i32) {
    %c0_i32 = arith.constant 0 : i32
    %c0_i32_0 = arith.constant 0 : i32
    %c0_i32_1 = arith.constant 0 : i32
    return %arg0, %c0_i32, %c0_i32_0 : i32, i32, i32
  }
}

module attributes {stable_mosaic.version = 11 : i64} {
  func.func @_conv1x1_bias_kernel(%arg0: i32, %arg1: memref<2x8xbf16, #tpu.memory_space<vmem>>, %arg2: memref<2x1xf32, #tpu.memory_space<vmem>>, %arg3: memref<1x8x256xbf16, #tpu.memory_space<vmem>>, %arg4: memref<1x2x256xf32, #tpu.memory_space<vmem>>) attributes {dimension_semantics = [#tpu.dimension_semantics<parallel>], iteration_bounds = array<i64: 8>, scalar_prefetch = 0 : i64, scratch_operands = 0 : i64, tpu.core_type = #tpu.core_type<tc>, window_params = [{pipeline_mode = #tpu.pipeline_mode<synchronous>, transform_indices = @transform_0, window_bounds = array<i64: 2, 8>}, {pipeline_mode = #tpu.pipeline_mode<synchronous>, transform_indices = @transform_1, window_bounds = array<i64: 2, 1>}, {transform_indices = @transform_2, window_bounds = array<i64: 1, 8, 256>}, {transform_indices = @transform_3, window_bounds = array<i64: 1, 2, 256>}]} {
    %c0 = arith.constant 0 : index
    %c0_0 = arith.constant 0 : index
    %0 = vector.load %arg1[%c0, %c0_0] : memref<2x8xbf16, #tpu.memory_space<vmem>>, vector<2x8xbf16>
    %c0_1 = arith.constant 0 : index
    %c0_2 = arith.constant 0 : index
    %c0_3 = arith.constant 0 : index
    %1 = vector.load %arg3[%c0_1, %c0_2, %c0_3] : memref<1x8x256xbf16, #tpu.memory_space<vmem>>, vector<1x8x256xbf16>
    %2 = vector.shape_cast %1 : vector<1x8x256xbf16> to vector<8x256xbf16>
    %cst = arith.constant dense<0.000000e+00> : vector<2x256xf32>
    %3 = tpu.matmul %0, %2, %cst {dimension_numbers = #tpu.dot_dimension_numbers<[1], [0], [0], [1], [0, 0, 1, 1], [], []>} : vector<2x8xbf16>, vector<8x256xbf16>, vector<2x256xf32> -> vector<2x256xf32>
    %c0_4 = arith.constant 0 : index
    %c0_5 = arith.constant 0 : index
    %4 = vector.load %arg2[%c0_4, %c0_5] : memref<2x1xf32, #tpu.memory_space<vmem>>, vector<2x1xf32>
    %5 = vector.broadcast %4 : vector<2x1xf32> to vector<2x256xf32>
    %6 = arith.addf %3, %5 : vector<2x256xf32>
    %c0_6 = arith.constant 0 : index
    %c0_7 = arith.constant 0 : index
    %c0_8 = arith.constant 0 : index
    %7 = vector.load %arg4[%c0_6, %c0_7, %c0_8] : memref<1x2x256xf32, #tpu.memory_space<vmem>>, vector<1x2x256xf32>
    %8 = vector.shape_cast %7 : vector<1x2x256xf32> to vector<2x256xf32>
    %9 = vector.shape_cast %6 : vector<2x256xf32> to vector<1x2x256xf32>
    tpu.vector_store %arg4[%c0_6, %c0_7, %c0_8], %9 {strides = array<i32>} : memref<1x2x256xf32, #tpu.memory_space<vmem>>, vector<1x2x256xf32>,
    return
  }
  func.func @transform_0(%arg0: i32) -> (i32, i32) {
    %c0_i32 = arith.constant 0 : i32
    %c0_i32_0 = arith.constant 0 : i32
    %c0_i32_1 = arith.constant 0 : i32
    return %c0_i32, %c0_i32_0 : i32, i32
  }
  func.func @transform_1(%arg0: i32) -> (i32, i32) {
    %c0_i32 = arith.constant 0 : i32
    %c0_i32_0 = arith.constant 0 : i32
    %c0_i32_1 = arith.constant 0 : i32
    return %c0_i32, %c0_i32_0 : i32, i32
  }
  func.func @transform_2(%arg0: i32) -> (i32, i32, i32) {
    %c0_i32 = arith.constant 0 : i32
    %c0_i32_0 = arith.constant 0 : i32
    %c0_i32_1 = arith.constant 0 : i32
    return %arg0, %c0_i32, %c0_i32_0 : i32, i32, i32
  }
  func.func @transform_3(%arg0: i32) -> (i32, i32, i32) {
    %c0_i32 = arith.constant 0 : i32
    %c0_i32_0 = arith.constant 0 : i32
    %c0_i32_1 = arith.constant 0 : i32
    return %arg0, %c0_i32, %c0_i32_0 : i32, i32, i32
  }
}

module attributes {stable_mosaic.version = 11 : i64} {
  func.func @_rss_div_kernel(%arg0: i32, %arg1: memref<8x512xf32, #tpu.memory_space<vmem>>, %arg2: memref<8x512xf32, #tpu.memory_space<vmem>>) attributes {dimension_semantics = [#tpu.dimension_semantics<arbitrary>], iteration_bounds = array<i64: 1>, scalar_prefetch = 0 : i64, scratch_operands = 0 : i64, tpu.core_type = #tpu.core_type<tc>, window_params = [{pipeline_mode = #tpu.pipeline_mode<synchronous>, transform_indices = @transform_0, window_bounds = array<i64: 8, 512>}, {pipeline_mode = #tpu.pipeline_mode<synchronous>, transform_indices = @transform_1, window_bounds = array<i64: 8, 512>}]} {
    %c0 = arith.constant 0 : index
    %c0_0 = arith.constant 0 : index
    %0 = vector.load %arg1[%c0, %c0_0] : memref<8x512xf32, #tpu.memory_space<vmem>>, vector<8x512xf32>
    %1 = arith.mulf %0, %0 : vector<8x512xf32>
    %cst = arith.constant dense<0.000000e+00> : vector<512xf32>
    %2 = vector.multi_reduction <add>, %1, %cst [0] : vector<8x512xf32> to vector<512xf32>
    %3 = vector.shape_cast %2 : vector<512xf32> to vector<1x512xf32>
    %4 = math.rsqrt %3 : vector<1x512xf32>
    %5 = vector.broadcast %4 : vector<1x512xf32> to vector<8x512xf32>
    %6 = arith.mulf %0, %5 : vector<8x512xf32>
    %c0_1 = arith.constant 0 : index
    %c0_2 = arith.constant 0 : index
    %7 = vector.load %arg2[%c0_1, %c0_2] : memref<8x512xf32, #tpu.memory_space<vmem>>, vector<8x512xf32>
    tpu.vector_store %arg2[%c0_1, %c0_2], %6 {strides = array<i32>} : memref<8x512xf32, #tpu.memory_space<vmem>>, vector<8x512xf32>,
    return
  }
  func.func @transform_0(%arg0: i32) -> (i32, i32) {
    %c0_i32 = arith.constant 0 : i32
    %c0_i32_0 = arith.constant 0 : i32
    %c0_i32_1 = arith.constant 0 : i32
    return %c0_i32, %c0_i32_0 : i32, i32
  }
  func.func @transform_1(%arg0: i32) -> (i32, i32) {
    %c0_i32 = arith.constant 0 : i32
    %c0_i32_0 = arith.constant 0 : i32
    %c0_i32_1 = arith.constant 0 : i32
    return %c0_i32, %c0_i32_0 : i32, i32
  }
}

</mosaic_0001>

<bundles_post_ra>
// kernel: run.25
= control target key start
LH: loop header
LB: loop body
LE: loop exit
PB: predicated region body
PF: predicated region fallthrough
CT: control target
= control target key end

     0   :  { %14 = vsyncpa [#allocation3], 0  ;;  %s1528_s0 = inlined_call_operand.hbm [shape: bf16[16,16], index: 0, kind: input, shape index: {}, may-alias: {0,2}]   ;;  %s1529_s1 = inlined_call_operand.hbm [shape: bf16[16,16], index: 1, kind: input, shape index: {}, may-alias: {1,3}]   ;;  %s1530_s2 = inlined_call_operand.hbm [shape: bf16[16,16], index: 2, kind: input, shape index: {}, may-alias: {0,2}]   ;;  %s1531_s3 = inlined_call_operand.hbm [shape: bf16[16,16], index: 3, kind: input, shape index: {}, may-alias: {1,3}]   ;;  %s1532_s4 = inlined_call_operand.vmem [shape: f32[8,1,16], index: 4, kind: input, shape index: {}]   ;;  %s1533_s5 = inlined_call_operand.vmem [shape: f32[8,16,16], index: 5, kind: input, shape index: {}]   ;;  %s1534_s6 = inlined_call_operand.vmem [shape: f32[8,16,16], index: 6, kind: input, shape index: {}]   ;;  %s1535_s7 = inlined_call_operand.vmem [shape: f32[8,16,16], index: 7, kind: output, shape index: {0}]   ;;  %s1536_s8 = inlined_call_operand.vmem [shape: f32[8,16,16], index: 8, kind: output, shape index: {1}]  }
   0x1   :  { %15 = vsyncpa [#allocation5], 0 }
   0x2   :  { %16 = vsyncpa [#allocation8], 0  ;;  %s1315_s27 = smov 0  }
   0x3 LB: > { %s1321_s28 = sadd.s32 4294967295, %s1260_s27   ;;  %p963_p0 = scmp.ge.s32.totalorder %s1260_s27, 1  ;;  %s1260_s27 = sphi %s1315_s27, %s22_s27  }
   0x4   : > { %p241_p1 = scmp.lt.s32.totalorder %s1260_s27, 9  ;;  %p1537_p2 = scmp.eq.s32.totalorder %s1321_s28, 0 }
   0x5   : > { %s1262_s30 = smov [#allocation4]   ;;  %s1263_s10 = smov [#allocation2]  }
   0x6   : > { %p1326_p3 = pnand %p963_p0, %p241_p1  ;;  %s266_s9 = sshll.u32 %s1262_s30, 4  ;;  %s1330_s9 = int_to_ptr.vmem [resolvable:$true] %s266_s9 }
   0x7   : > { %s253_s11 = sshll.u32 %s1263_s10, 4  ;;  %s1264_s13 = smov [#allocation6]   ;;  %s1334_s11 = int_to_ptr.vmem [resolvable:$true] %s253_s11 }
   0x8   : > { %s1539_s29 = scalar_select %p1326_p3, 1, 0 }
   0x9   : > { %p1089_p4 = pneg %p1326_p3  ;;  %s279_s14 = sshll.u32 %s1264_s13, 4  ;;  %s1342_s14 = int_to_ptr.vmem [resolvable:$true] %s279_s14 }
   0xa   : > { %s1265_s15 = smov [#allocation7]   ;;  %s1130_s19 = scalar_lea.hbm %s1529_s1, 128 }
   0xb   : > { %p1338_p5 = pnand %p1537_p2, %p1089_p4  ;;  %s1344_s16 = sshll.u32 %s1265_s15, 4  ;;  %s293_s16 = int_to_ptr.vmem [resolvable:$true] %s1344_s16 }
   0xc   : > { %p1131_p6 = scmp.ne.s32.totalorder %s1529_s1, %s1130_s19  ;;  %p1137_p10 = scmp.lt.u32.totalorder %s1130_s19, %s1529_s1 }
   0xd   : > { %p1354_p7 = pneg %p1338_p5 }
   0xf   : > { %p1133_p8 = pnand %p1354_p7, %p1131_p6 }
  0x11   : > { %p1134_p9 = pneg %p1133_p8 }
  0x13   : > { %p1139_p11 = pnand %p1137_p10, %p1134_p9 }
  0x15   : > { %1142 = shalt.err (!%p1139_p11)
}
  0x16   : > { %s1143_s25 = scalar_lea.vmem %s1330_s9, 128  ;;  %p1151_p1 = scmp.lt.s32.totalorder %s1330_s9, %s1330_s9 }
  0x17   : > { %p1144_p12 = scmp.ne.s32.totalorder %s1330_s9, %s1143_s25  ;;  %p1152_p4 = scmp.lt.s32.totalorder %s1143_s25, %s1143_s25 }
  0x19   : > { %p1146_p13 = pnand %p1144_p12, %p1354_p7  ;;  %p1153_p6 = por %p1152_p4, %p1151_p1 }
  0x1b   : > { %p1147_p0 = pneg %p1146_p13 }
  0x1d   : > { %p1154_p8 = pnand %p1153_p6, %p1147_p0 }
  0x1f   : > { %1157 = shalt.err (!%p1154_p8)
}
  0x20   : > { %s1266_s26 = smov 64   ;;  %s1267_s30 = smov 4  }
  0x21   : > { %1095 = dma.hbm_to_vmem [thread:$0]  (!%p1338_p5), %s1529_s1, 128, %s1330_s9, [#allocation5], %s1266_s26, %s1266_s26, %s1267_s30  }
  0x22   : > { %s1158_s18 = scalar_lea.hbm %s1528_s0, 128 }
  0x23   : > { %p1159_p9 = scmp.ne.s32.totalorder %s1528_s0, %s1158_s18  ;;  %p1165_p12 = scmp.lt.u32.totalorder %s1158_s18, %s1528_s0 }
  0x25   : > { %p1161_p10 = pnand %p1159_p9, %p1354_p7 }
  0x27   : > { %p1162_p11 = pneg %p1161_p10 }
  0x29   : > { %p1167_p13 = pnand %p1165_p12, %p1162_p11 }
  0x2b   : > { %1170 = shalt.err (!%p1167_p13)
}
  0x2c   : > { %s1171_s9 = scalar_lea.vmem %s1334_s11, 128  ;;  %p1179_p6 = scmp.lt.s32.totalorder %s1334_s11, %s1334_s11 }
  0x2d   : > { %p1172_p0 = scmp.ne.s32.totalorder %s1334_s11, %s1171_s9  ;;  %p1180_p8 = scmp.lt.s32.totalorder %s1171_s9, %s1171_s9 }
  0x2f   : > { %p1174_p1 = pnand %p1172_p0, %p1354_p7  ;;  %p1181_p9 = por %p1180_p8, %p1179_p6 }
  0x31   : > { %p1175_p4 = pneg %p1174_p1 }
  0x33   : > { %p1182_p10 = pnand %p1181_p9, %p1175_p4 }
  0x35   : > { %1185 = shalt.err (!%p1182_p10)
}
  0x36   : > { %1092 = dma.hbm_to_vmem [thread:$0]  (!%p1338_p5), %s1528_s0, 128, %s1334_s11, [#allocation3], %s1266_s26, %s1266_s26, %s1267_s30  }
  0x37   : > { %s1186_s15 = scalar_lea.hbm %s1530_s2, 128 }
  0x38   : > { %p1187_p11 = scmp.ne.s32.totalorder %s1530_s2, %s1186_s15  ;;  %p1193_p0 = scmp.lt.u32.totalorder %s1186_s15, %s1530_s2 }
  0x3a   : > { %p1189_p12 = pnand %p1187_p11, %p1354_p7 }
  0x3c   : > { %p1190_p13 = pneg %p1189_p12 }
  0x3e   : > { %p1195_p1 = pnand %p1193_p0, %p1190_p13 }
  0x40   : > { %1198 = shalt.err (!%p1195_p1)
}
  0x41   : > { %s1199_s11 = scalar_lea.vmem %s1342_s14, 128  ;;  %p1207_p9 = scmp.lt.s32.totalorder %s1342_s14, %s1342_s14 }
  0x42   : > { %p1200_p4 = scmp.ne.s32.totalorder %s1342_s14, %s1199_s11  ;;  %p1208_p10 = scmp.lt.s32.totalorder %s1199_s11, %s1199_s11 }
  0x44   : > { %p1202_p6 = pnand %p1200_p4, %p1354_p7  ;;  %p1209_p11 = por %p1208_p10, %p1207_p9 }
  0x46   : > { %p1203_p8 = pneg %p1202_p6 }
  0x48   : > { %p1210_p12 = pnand %p1209_p11, %p1203_p8 }
  0x4a   : > { %1213 = shalt.err (!%p1210_p12)
}
  0x4b   : > { %1098 = dma.hbm_to_vmem [thread:$0]  (!%p1338_p5), %s1530_s2, 128, %s1342_s14, [#allocation5], %s1266_s26, %s1266_s26, %s1267_s30  }
  0x4c   : > { %s1214_s25 = scalar_lea.hbm %s1531_s3, 128 }
  0x4d   : > { %p1215_p13 = scmp.ne.s32.totalorder %s1531_s3, %s1214_s25  ;;  %p1221_p4 = scmp.lt.u32.totalorder %s1214_s25, %s1531_s3 }
  0x4f   : > { %p1217_p0 = pnand %p1215_p13, %p1354_p7 }
  0x51   : > { %p1218_p1 = pneg %p1217_p0 }
  0x53   : > { %p1223_p6 = pnand %p1221_p4, %p1218_p1 }
  0x55   : > { %1226 = shalt.err (!%p1223_p6)
}
  0x56   : > { %s1227_s18 = scalar_lea.vmem %s293_s16, 128  ;;  %p1235_p11 = scmp.lt.s32.totalorder %s293_s16, %s293_s16 }
  0x57   : > { %p1228_p8 = scmp.ne.s32.totalorder %s293_s16, %s1227_s18  ;;  %p1236_p12 = scmp.lt.s32.totalorder %s1227_s18, %s1227_s18 }
  0x59   : > { %p1230_p9 = pnand %p1228_p8, %p1354_p7  ;;  %p1237_p2 = por %p1236_p12, %p1235_p11 }
  0x5b   : > { %p1231_p10 = pneg %p1230_p9 }
  0x5d   : > { %p1238_p3 = pnand %p1237_p2, %p1231_p10 }
  0x5f   : > { %1241 = shalt.err (!%p1238_p3)
}
  0x60   : > { %1101 = dma.hbm_to_vmem [thread:$0]  (!%p1338_p5), %s1531_s3, 128, %s293_s16, [#allocation8], %s1266_s26, %s1266_s26, %s1267_s30  }
  0x61   : > { %p1542_p13 = scmp.ne.s32.totalorder %s1539_s29, 0 }
  0x62   : > { %p1543_p7 = scmp.eq.s32.totalorder (!%p1542_p13), %s1321_s28, 0 }
  0x63   : > { %330 = sbr.rel (%p1542_p13) target bundleno = 582 (0x246), region = 48 }
  0x6a   : > { %1247 = dma.done.wait (%p1543_p7), [#allocation3], 128   ;;  %p1544_p0 = pmov %p1543_p7 }
  0x6c   : > { %1249 = vsyncadd (%p1544_p0), [#allocation3], 4294967168  ;;  %p1545_p2 = pmov %p1544_p0 }
  0x6d   : > { %p1546_p3 = pmov %p1544_p0 }
  0x6e   : > { %1251 = dma.done.wait (%p1545_p2), [#allocation5], 256  }
  0x6f   : > { %1253 = vsyncadd (%p1546_p3), [#allocation5], 4294967040  ;;  %p1547_p1 = pmov %p1544_p0 }
  0x70   : > { %p1548_p5 = pmov %p1544_p0 }
  0x71   : > { %1255 = dma.done.wait (%p1547_p1), [#allocation8], 128  }
  0x72   : > { %1257 = vsyncadd (%p1548_p5), [#allocation8], 4294967168  ;;  %p389_p4 = scmp.lt.s32.totalorder %s1321_s28, 7  ;;  %v1268_v0 = vmov 0.0   ;;  %vm1269_vm0 = vmmov 0   ;;  %v1126_v6 = vld [vmem:[#allocation2] sm:$0xff]  }
  0x73   : > { %1017 = vmatprep.subr.bf16.mxu1 %v1268_v0  ;;  %1029 = vmatprep.subr.bf16.mxu0 %v1268_v0  ;;  %v1127_v7 = vld [vmem:[#allocation4] sm:$0xff]   ;;  %vm439_vm1 = vcmask 130048   ;;  %v1128_v14 = vld [vmem:[#allocation6] sm:$0xff]   ;;  %v1129_v26 = vld [vmem:[#allocation7] sm:$0xff]  }
  0x74   : > { %s1550_s28 = smov (!%p389_p4, %s1321_s28), 7  ;;  %1019 = vmatprep.mubr.msk.bf16.mxu1 %vm1269_vm0, %v1268_v0  ;;  %1031 = vmatprep.mubr.msk.bf16.mxu0 %vm1269_vm0, %v1268_v0 }
  0x75   : > { %s391_s16 = scalar_lea.vmem %s1532_s4, %s1550_s28  ;;  %s1477_s22 = sshll.u32 %s1550_s28, 4 }
  0x76   : > { %s396_s20 = scalar_lea.vmem %s1533_s5, %s1477_s22  ;;  %v982_v1 = vld [vmem:[%s391_s16] ss:$0 sm:$0xff]  ;;  %s401_s23 = scalar_lea.vmem %s1534_s6, %s1477_s22 }
  0x77   : > { %v414_v2 = vld [vmem:[%s396_s20] sm:$0xff]  ;;  %v415_v3 = vld [vmem:[%s396_s20 + $0x8] sm:$0xff]  ;;  %s406_s24 = scalar_lea.vmem %s1535_s7, %s1477_s22  ;;  %s411_s13 = scalar_lea.vmem %s1536_s8, %s1477_s22 }
  0x78   : > { %v422_v4 = vmul.f32 %v982_v1, %v414_v2  ;;  %v423_v5 = vmul.f32 %v982_v1, %v415_v3  ;;  %v425_v9 = vld [vmem:[%s401_s23] sm:$0xff]  ;;  %v426_v10 = vld [vmem:[%s401_s23 + $0x8] sm:$0xff] }
  0x79   : > { %v427_v11 = vmul.f32 %v982_v1, %v425_v9  ;;  %v428_v12 = vmul.f32 %v982_v1, %v426_v10 }
  0x7a   : > { %v424_v8 = vpack.c.bf16 %v423_v5, %v422_v4 }
  0x7b   : > { %v429_v13 = vpack.c.bf16 %v428_v12, %v427_v11 }
  0x7c   : > { %1018 = vmatpush3.bf16.msra.mxu1 %v424_v8  ;;  %1030 = vmatpush3.bf16.msra.mxu0 %v424_v8 }
  0x7d   : > { %1035 = vmatprep.subr.bf16.mxu0 %v1268_v0  ;;  %1023 = vmatprep.subr.bf16.mxu1 %v1268_v0 }
  0x7f   : > { %1020 = vmatmul.mubr.msk.bf16.vlgmr.msra.gmra.mrb[0].mxu1 %vm439_vm1, %v1126_v6  ;;  %1032 = vmatmul.mubr.msk.bf16.vlgmr.msra.gmra.mrb[0].mxu0 %vm439_vm1, %v1127_v7 }
  0x80   : > { %1036 = vmatpush3.bf16.msra.mxu0 %v429_v13  ;;  %1024 = vmatpush3.bf16.msra.mxu1 %v429_v13 }
  0x81   : > { %1025 = vmatprep.mubr.msk.bf16.mxu1 %vm1269_vm0, %v1268_v0  ;;  %1037 = vmatprep.mubr.msk.bf16.mxu0 %vm1269_vm0, %v1268_v0 }
  0x82   : > { %1053 = vmatprep.subr.bf16.mxu0 %v1268_v0  ;;  %1041 = vmatprep.subr.bf16.mxu1 %v1268_v0 }
  0x87   : > { %1026 = vmatmul.mubr.msk.bf16.vlgmr.msra.gmra.mrb[4].mxu1 %vm439_vm1, %v1127_v7 }
  0x88   : > { %1043 = vmatprep.mubr.msk.bf16.mxu1 %vm1269_vm0, %v1268_v0  ;;  %1042 = vmatpush3.bf16.msra.mxu1 %v1128_v14 }
  0x89   : > { %1047 = vmatprep.subr.bf16.mxu1 %v1268_v0 }
  0x8b   : > { %1038 = vmatmul.mubr.msk.bf16.vlgmr.msra.gmra.mrb[0].mxu0 %vm439_vm1, %v1126_v6 }
  0x8c   : > { %1055 = vmatprep.mubr.msk.bf16.mxu0 %vm1269_vm0, %v1268_v0  ;;  %1054 = vmatpush3.bf16.msra.mxu0 %v1128_v14 }
  0x8d   : > { %1059 = vmatprep.subr.bf16.mxu0 %v1268_v0 }
 0x152   : > { %v477_v15 = vpop.f32.mrb[0].mxu1 }
 0x153   : > { %v1021_v16 = vpop.f32.mrb[1].mxu1 }
 0x154   : > { %v480_v17 = vpop.f32.mrb[2].mxu1 }
 0x155   : > { %v1022_v18 = vpop.f32.mrb[3].mxu1 }
 0x15a   : > { %v526_v19 = vpop.f32.mrb[4].mxu1 }
 0x15b   : > { %v533_v20 = vsub.f32 %v477_v15, %v526_v19  ;;  %v1027_v21 = vpop.f32.mrb[5].mxu1 }
 0x15c   : > { %v529_v22 = vpop.f32.mrb[6].mxu1 }
 0x15d   : > { %v534_v23 = vsub.f32 %v480_v17, %v529_v22  ;;  %v1028_v24 = vpop.f32.mrb[7].mxu1 }
 0x15e   : > { %v610_v25 = vpop.f32.mrb[0].mxu0 }
 0x15f   : > { %v617_v27 = vpack.c.bf16 %v534_v23, %v533_v20  ;;  %v1039_v28 = vpop.f32.mrb[1].mxu0 }
 0x160   : > { %v613_v29 = vpop.f32.mrb[2].mxu0 }
 0x161   : > { %v618_v30 = vpack.c.bf16 %v613_v29, %v610_v25  ;;  %v1040_v31 = vpop.f32.mrb[3].mxu0  ;;  %1044 = vmatmul.mubr.msk.bf16.vlgmr.msra.gmra.mrb[8].mxu1 %vm439_vm1, %v617_v27 }
 0x162   : > { %1048 = vmatpush3.bf16.msra.mxu1 %v1129_v26  ;;  %1049 = vmatprep.mubr.msk.bf16.mxu1 %vm1269_vm0, %v1268_v0 }
 0x163   : > { %1056 = vmatmul.mubr.msk.bf16.vlgmr.msra.gmra.mrb[4].mxu0 %vm439_vm1, %v618_v30 }
 0x164   : > { %1060 = vmatpush3.bf16.msra.mxu0 %v1129_v26  ;;  %1061 = vmatprep.mubr.msk.bf16.mxu0 %vm1269_vm0, %v1268_v0 }
 0x169   : > { %1050 = vmatmul.mubr.msk.bf16.vlgmr.msra.gmra.mrb[12].mxu1 %vm439_vm1, %v618_v30 }
 0x16f   : > { %1062 = vmatmul.mubr.msk.bf16.vlgmr.msra.gmra.mrb[4].mxu0 %vm439_vm1, %v617_v27 }
 0x234   : > { %v666_v32 = vpop.f32.mrb[8].mxu1 }
 0x235   : > { %v1045_v33 = vpop.f32.mrb[9].mxu1 }
 0x236   : > { %v669_v34 = vpop.f32.mrb[10].mxu1 }
 0x237   : > { %v1046_v35 = vpop.f32.mrb[11].mxu1 }
 0x23c   : > { %v716_v36 = vpop.f32.mrb[12].mxu1 }
 0x23d   : > { %v723_v37 = vsub.f32 %v666_v32, %v716_v36  ;;  %v1051_v38 = vpop.f32.mrb[13].mxu1 }
 0x23e   : > { %v719_v39 = vpop.f32.mrb[14].mxu1 }
 0x23f   : > { %725 = vst.msk [vmem:[%s406_s24] sm:$0xff] %vm439_vm1, %v723_v37  ;;  %v724_v40 = vsub.f32 %v669_v34, %v719_v39  ;;  %v1052_v41 = vpop.f32.mrb[15].mxu1 }
 0x241   : > { %726 = vst.msk [vmem:[%s406_s24 + $0x8] sm:$0xff] %vm439_vm1, %v724_v40 }
 0x242   : > { %v802_v42 = vpop.f32.mrb[4].mxu0 }
 0x243   : > { %809 = vst.msk [vmem:[%s411_s13] sm:$0xff] %vm439_vm1, %v802_v42  ;;  %v1063_v43 = vpop.f32.mrb[5].mxu0 }
 0x244   : > { %v805_v44 = vpop.f32.mrb[6].mxu0 }
 0x245   : > { %810 = vst.msk [vmem:[%s411_s13 + $0x8] sm:$0xff] %vm439_vm1, %v805_v44  ;;  %v1064_v45 = vpop.f32.mrb[7].mxu0 }
 0x246 PF: > { %s22_s27 = sadd.s32 1, %s1260_s27  }
 0x247   : > { %p19_p6 = scmp.ge.s32.totalorder %s22_s27, 10  }
 0x249   :  { %21 = sbr.rel (!%p19_p6) target bundleno = 3 (0x3), region = 113 }
 0x250   :  { %848 = vsyncpa [#allocation3], 1 }
 0x251   :  { %850 = vsyncpa [#allocation3 + $0x1], 1 }
 0x252   :  { %851 = vsyncpa [#allocation5], 1 }
 0x253   :  { %852 = vsyncpa [#allocation8], 1 }

// kernel: run.26
= control target key start
LH: loop header
LB: loop body
LE: loop exit
PB: predicated region body
PF: predicated region fallthrough
CT: control target
= control target key end

     0   :  { %s357_s9 = smov 0   ;;  %s381_s0 = inlined_call_operand.vmem [shape: bf16[8,18], index: 0, kind: input, shape index: {}]   ;;  %s382_s1 = inlined_call_operand.vmem [shape: bf16[8,18,256], index: 1, kind: input, shape index: {}]   ;;  %s383_s2 = inlined_call_operand.vmem [shape: f32[8,8,256], index: 2, kind: output, shape index: {}]  }
   0x1 LB: > { %s299_s10 = sadd.s32 4294967295, %s339_s9   ;;  %p303_p0 = scmp.ge.s32.totalorder %s339_s9, 1  ;;  %s339_s9 = sphi %s357_s9, %s12_s9  }
   0x2   : > { %p112_p1 = scmp.lt.s32.totalorder %s339_s9, 9 }
   0x4   : > { %p113_p2 = pnand %p303_p0, %p112_p1 }
   0x5   : > { %p134_p3 = scmp.lt.s32.totalorder (!%p113_p2), %s299_s10, 7  ;;  %v341_v0 = vmov (!%p113_p2), 0   ;;  %vm168_vm0 = vcmask (!%p113_p2), 1040384   ;;  %v145_v7 = vld [vmem:[%s381_s0] sm:$0xf] (!%p113_p2)  ;;  %vm164_vm1 = vcmask (!%p113_p2), 146432  }
   0x6   : > { %116 = sbr.rel (%p113_p2) target bundleno = 412 (0x19c), region = 28  ;;  %207 = vmatprep.mubr.bf16.mxu0 (!%p113_p2), %v341_v0 }
   0xd   : > { %s385_s10 = smov (!%p134_p3, %s299_s10), 7 }
   0xe   : > { %s316_s11 = smul.u32 24, %s385_s10  ;;  %s315_s17 = sshll.u32 %s385_s10, 4 }
   0xf   : > { %s143_s20 = scalar_lea.vmem %s383_s2, %s315_s17 }
  0x10   : > { %s138_s14 = scalar_lea.vmem %s382_s1, %s316_s11 }
  0x11   : > { %v148_v1 = vld [vmem:[%s138_s14 + $0x10] sm:$0x11]  ;;  %v326_v2 = vld [vmem:[%s138_s14 + $0x4] ss:$8 sps:$4 sm:$0xff]   ;;  %v329_v4 = vld [vmem:[%s138_s14] ss:$8 sps:$4 sm:$0xff]  }
  0x12   : > { %v310_v3 = vcombine.high %v148_v1, %v148_v1  ;;  %v309_v5 = vcombine.low %v148_v1, %v148_v1  ;;  %175 = vmatprep.subr.bf16.mxu0 %v326_v2 }
  0x13   : > { %176 = vmatpush1.bf16.msra.mxu0 %v329_v4 }
  0x14   : > { %311 = vmatprep.subr.msk.bf16.mxu0 %vm168_vm0, %v310_v3  ;;  %v170_v6 = vsel %vm168_vm0, %v309_v5, 0 }
  0x17   : > { %178 = vmatpush1.bf16.msra.mxu0 %v170_v6 }
  0x1a   : > { %312 = vmatmul.mubr.msk.bf16.vlgmr.msra.gmra.mrb[0].mxu0 %vm164_vm1, %v145_v7 }
  0xed   : > { %v209_v8 = vpop.f32.mrb[0].mxu0 }
  0xee   : > { %v211_v9 = vpop.f32.mrb[1].mxu0  ;;  %v221_v10 = vmul.f32 %v209_v8, %v209_v8 }
  0xef   : > { %v213_v11 = vpop.f32.mrb[2].mxu0  ;;  %v216_v12 = vadd.f32 %v211_v9, %v209_v8  ;;  %v222_v13 = vmul.f32 %v211_v9, %v211_v9 }
  0xf0   : > { %v214_v14 = vpop.f32.mrb[3].mxu0 }
  0xf1   : > { %217 = vadd.xlane.f32.xlu0 %v216_v12  ;;  %v223_v15 = vadd.f32 %v222_v13, %v221_v10 }
  0xf5   : > { %224 = vadd.xlane.f32.xlu0 %v223_v15 }
 0x17e   : > { %v218_v16 = vpop.xlane.xlu0 %217 }
 0x17f   : > { %v220_v17 = vmul.f32 0.00390625, %v218_v16 }
 0x181   : > { %v227_v19 = vmul.f32 %v220_v17, %v220_v17  ;;  %v230_v24 = vsub.f32 %v209_v8, %v220_v17  ;;  %v231_v25 = vsub.f32 %v211_v9, %v220_v17 }
 0x182   : > { %v225_v18 = vpop.xlane.xlu0 %224 }
 0x183   : > { %v226_v20 = vmul.f32 0.00390625, %v225_v18 }
 0x185   : > { %v228_v21 = vsub.f32 %v226_v20, %v227_v19 }
 0x187   : > { %v229_v22 = vmax.f32 %v228_v21, 0.0 }
 0x189   : > { %v232_v23 = vadd.f32 1e-05, %v229_v22 }
 0x18b   : > { %331 = vrsqrt.f32 %v232_v23 }
 0x195   : > { %v332_v26 = vpop.eup %331 }
 0x196   : > { %v234_v27 = vmul.f32 %v332_v26, %v230_v24  ;;  %v235_v28 = vmul.f32 %v332_v26, %v231_v25 }
 0x198   : > { %vm236_vm2 = vcmp.ge.f32.partialorder %v234_v27, 0.0  ;;  %vm237_vm3 = vcmp.ge.f32.partialorder %v235_v28, 0.0  ;;  %v238_v29 = vmul.f32 0.2, %v234_v27  ;;  %v239_v30 = vmul.f32 0.2, %v235_v28 }
 0x19a   : > { %v240_v31 = vsel %vm236_vm2, %v234_v27, %v238_v29  ;;  %v241_v32 = vsel %vm237_vm3, %v235_v28, %v239_v30 }
 0x19b   : > { %242 = vst [vmem:[%s143_s20] sm:$0xff] %v240_v31  ;;  %243 = vst [vmem:[%s143_s20 + $0x8] sm:$0xff] %v241_v32 }
 0x19c PF: > { %s12_s9 = sadd.s32 1, %s339_s9  }
 0x19d   : > { %p9_p4 = scmp.ge.s32.totalorder %s12_s9, 10  }
 0x19f   :  { %11 = sbr.rel (!%p9_p4) target bundleno = 1 (0x1), region = 58 }

// kernel: run.27
= control target key start
LH: loop header
LB: loop body
LE: loop exit
PB: predicated region body
PF: predicated region fallthrough
CT: control target
= control target key end

     0   :  { %s408_s9 = smov 0   ;;  %s432_s0 = inlined_call_operand.vmem [shape: bf16[8,72], index: 0, kind: input, shape index: {}]   ;;  %s433_s1 = inlined_call_operand.vmem [shape: bf16[8,72,256], index: 1, kind: input, shape index: {}]   ;;  %s434_s2 = inlined_call_operand.vmem [shape: f32[8,8,256], index: 2, kind: output, shape index: {}]  }
   0x1 LB: > { %s335_s10 = sadd.s32 4294967295, %s390_s9   ;;  %p339_p0 = scmp.ge.s32.totalorder %s390_s9, 1  ;;  %s390_s9 = sphi %s408_s9, %s12_s9  }
   0x2   : > { %p112_p1 = scmp.lt.s32.totalorder %s390_s9, 9 }
   0x4   : > { %p113_p2 = pnand %p339_p0, %p112_p1 }
   0x5   : > { %p134_p3 = scmp.lt.s32.totalorder (!%p113_p2), %s335_s10, 7  ;;  %v392_v0 = vmov (!%p113_p2), 0   ;;  %vm204_vm0 = vcmask (!%p113_p2), 1043456   ;;  %v145_v13 = vld [vmem:[%s432_s0] sm:$0xf] (!%p113_p2)  ;;  %vm200_vm1 = vcmask (!%p113_p2), 588800  }
   0x6   : > { %116 = sbr.rel (%p113_p2) target bundleno = 424 (0x1a8), region = 28  ;;  %243 = vmatprep.mubr.bf16.mxu0 (!%p113_p2), %v392_v0 }
   0xd   : > { %s436_s10 = smov (!%p134_p3, %s335_s10), 7 }
   0xe   : > { %s358_s11 = smul.u32 72, %s436_s10  ;;  %s357_s17 = sshll.u32 %s436_s10, 4 }
   0xf   : > { %s143_s20 = scalar_lea.vmem %s434_s2, %s357_s17 }
  0x10   : > { %s138_s14 = scalar_lea.vmem %s433_s1, %s358_s11 }
  0x11   : > { %v368_v1 = vld [vmem:[%s138_s14 + $0x4] ss:$8 sps:$4 sm:$0xff]   ;;  %v370_v2 = vld [vmem:[%s138_s14] ss:$8 sps:$4 sm:$0xff]   ;;  %v371_v3 = vld [vmem:[%s138_s14 + $0x14] ss:$8 sps:$4 sm:$0xff]  }
  0x12   : > { %211 = vmatprep.subr.bf16.mxu0 %v368_v1  ;;  %v373_v4 = vld [vmem:[%s138_s14 + $0x10] ss:$8 sps:$4 sm:$0xff]   ;;  %v374_v5 = vld [vmem:[%s138_s14 + $0x24] ss:$8 sps:$4 sm:$0xff]   ;;  %v376_v6 = vld [vmem:[%s138_s14 + $0x20] ss:$8 sps:$4 sm:$0xff]  }
  0x13   : > { %212 = vmatpush1.bf16.msra.mxu0 %v370_v2  ;;  %v377_v7 = vld [vmem:[%s138_s14 + $0x34] ss:$8 sps:$4 sm:$0xff]   ;;  %v154_v8 = vld [vmem:[%s138_s14 + $0x40] sm:$0xff]  ;;  %v379_v9 = vld [vmem:[%s138_s14 + $0x30] ss:$8 sps:$4 sm:$0xff]  }
  0x14   : > { %213 = vmatprep.subr.bf16.mxu0 %v371_v3  ;;  %v352_v10 = vcombine.high %v154_v8, %v154_v8  ;;  %v351_v11 = vcombine.low %v154_v8, %v154_v8 }
  0x16   : > { %v206_v12 = vsel %vm204_vm0, %v351_v11, 0 }
  0x17   : > { %214 = vmatpush1.bf16.msra.mxu0 %v373_v4 }
  0x18   : > { %215 = vmatprep.subr.bf16.mxu0 %v374_v5 }
  0x1b   : > { %216 = vmatpush1.bf16.msra.mxu0 %v376_v6 }
  0x1c   : > { %217 = vmatprep.subr.bf16.mxu0 %v377_v7 }
  0x1f   : > { %218 = vmatpush1.bf16.msra.mxu0 %v379_v9 }
  0x20   : > { %353 = vmatprep.subr.msk.bf16.mxu0 %vm204_vm0, %v352_v10 }
  0x23   : > { %220 = vmatpush1.bf16.msra.mxu0 %v206_v12 }
  0x26   : > { %354 = vmatmul.mubr.msk.bf16.vlgmr.msra.gmra.mrb[0].mxu0 %vm200_vm1, %v145_v13 }
  0xf9   : > { %v245_v14 = vpop.f32.mrb[0].mxu0 }
  0xfa   : > { %v247_v15 = vpop.f32.mrb[1].mxu0  ;;  %v257_v16 = vmul.f32 %v245_v14, %v245_v14 }
  0xfb   : > { %v249_v17 = vpop.f32.mrb[2].mxu0  ;;  %v252_v18 = vadd.f32 %v247_v15, %v245_v14  ;;  %v258_v19 = vmul.f32 %v247_v15, %v247_v15 }
  0xfc   : > { %v250_v20 = vpop.f32.mrb[3].mxu0 }
  0xfd   : > { %253 = vadd.xlane.f32.xlu0 %v252_v18  ;;  %v259_v21 = vadd.f32 %v258_v19, %v257_v16 }
 0x101   : > { %260 = vadd.xlane.f32.xlu0 %v259_v21 }
 0x18a   : > { %v254_v22 = vpop.xlane.xlu0 %253 }
 0x18b   : > { %v256_v23 = vmul.f32 0.00390625, %v254_v22 }
 0x18d   : > { %v263_v25 = vmul.f32 %v256_v23, %v256_v23  ;;  %v266_v30 = vsub.f32 %v245_v14, %v256_v23  ;;  %v267_v31 = vsub.f32 %v247_v15, %v256_v23 }
 0x18e   : > { %v261_v24 = vpop.xlane.xlu0 %260 }
 0x18f   : > { %v262_v26 = vmul.f32 0.00390625, %v261_v24 }
 0x191   : > { %v264_v27 = vsub.f32 %v262_v26, %v263_v25 }
 0x193   : > { %v265_v28 = vmax.f32 %v264_v27, 0.0 }
 0x195   : > { %v268_v29 = vadd.f32 1e-05, %v265_v28 }
 0x197   : > { %382 = vrsqrt.f32 %v268_v29 }
 0x1a1   : > { %v383_v32 = vpop.eup %382 }
 0x1a2   : > { %v270_v33 = vmul.f32 %v383_v32, %v266_v30  ;;  %v271_v34 = vmul.f32 %v383_v32, %v267_v31 }
 0x1a4   : > { %vm272_vm2 = vcmp.ge.f32.partialorder %v270_v33, 0.0  ;;  %vm273_vm3 = vcmp.ge.f32.partialorder %v271_v34, 0.0  ;;  %v274_v35 = vmul.f32 0.2, %v270_v33  ;;  %v275_v36 = vmul.f32 0.2, %v271_v34 }
 0x1a6   : > { %v276_v37 = vsel %vm272_vm2, %v270_v33, %v274_v35  ;;  %v277_v38 = vsel %vm273_vm3, %v271_v34, %v275_v36 }
 0x1a7   : > { %278 = vst [vmem:[%s143_s20] sm:$0xff] %v276_v37  ;;  %279 = vst [vmem:[%s143_s20 + $0x8] sm:$0xff] %v277_v38 }
 0x1a8 PF: > { %s12_s9 = sadd.s32 1, %s390_s9  }
 0x1a9   : > { %p9_p4 = scmp.ge.s32.totalorder %s12_s9, 10  }
 0x1ab   :  { %11 = sbr.rel (!%p9_p4) target bundleno = 1 (0x1), region = 58 }

// kernel: run.28
= control target key start
LH: loop header
LB: loop body
LE: loop exit
PB: predicated region body
PF: predicated region fallthrough
CT: control target
= control target key end

     0   :  { %s418_s9 = smov 0   ;;  %s448_s0 = inlined_call_operand.vmem [shape: bf16[16,72], index: 0, kind: input, shape index: {}]   ;;  %s449_s1 = inlined_call_operand.vmem [shape: bf16[8,72,64], index: 1, kind: input, shape index: {}]   ;;  %s450_s2 = inlined_call_operand.vmem [shape: f32[8,16,64], index: 2, kind: output, shape index: {}]  }
   0x1 LB: > { %s334_s10 = sadd.s32 4294967295, %s399_s9   ;;  %p338_p0 = scmp.ge.s32.totalorder %s399_s9, 1  ;;  %s399_s9 = sphi %s418_s9, %s12_s9  }
   0x2   : > { %p112_p1 = scmp.lt.s32.totalorder %s399_s9, 9 }
   0x4   : > { %p113_p2 = pnand %p338_p0, %p112_p1 }
   0x5   : > { %p134_p3 = scmp.lt.s32.totalorder (!%p113_p2), %s334_s10, 7  ;;  %v401_v0 = vmov (!%p113_p2), 0.0   ;;  %vm402_vm0 = vmmov (!%p113_p2), 0   ;;  %vm192_vm1 = vcmask (!%p113_p2), 1043456   ;;  %v388_v7 = vld [vmem:[%s448_s0] sm:$0xff] (!%p113_p2)   ;;  %vm188_vm2 = vcmask (!%p113_p2), 588800  }
   0x6   : > { %116 = sbr.rel (%p113_p2) target bundleno = 423 (0x1a7), region = 28  ;;  %358 = vmatprep.subr.bf16.mxu0 (!%p113_p2), %v401_v0  ;;  %368 = vmatprep.mubr.msk.bf16.mxu0 (!%p113_p2), %vm402_vm0, %v401_v0  ;;  %vm237_vm3 = vcmask (!%p113_p2), 523264  }
   0xd   : > { %s452_s10 = smov (!%p134_p3, %s334_s10), 7 }
   0xe   : > { %s372_s11 = smul.u32 36, %s452_s10  ;;  %s351_s17 = sshll.u32 %s452_s10, 4 }
   0xf   : > { %s143_s20 = scalar_lea.vmem %s450_s2, %s351_s17 }
  0x10   : > { %s138_s14 = scalar_lea.vmem %s449_s1, %s372_s11 }
  0x11   : > { %v383_v1 = vld [vmem:[%s138_s14] sm:$0xff]   ;;  %v384_v2 = vld [vmem:[%s138_s14 + $0x8] sm:$0xff]   ;;  %v385_v3 = vld [vmem:[%s138_s14 + $0x10] sm:$0xff]  }
  0x12   : > { %359 = vmatpush3.bf16.msra.mxu0 %v383_v1  ;;  %v386_v4 = vld [vmem:[%s138_s14 + $0x18] sm:$0xff]   ;;  %v387_v5 = vld [vmem:[%s138_s14 + $0x20] ss:$0 sps:$4 sm:$0xff]  }
  0x13   : > { %360 = vmatprep.subr.bf16.mxu0 %v401_v0  ;;  %v194_v6 = vsel %vm192_vm1, %v387_v5, 0 }
  0x16   : > { %361 = vmatpush3.bf16.msra.mxu0 %v384_v2 }
  0x17   : > { %362 = vmatprep.subr.bf16.mxu0 %v401_v0 }
  0x1a   : > { %363 = vmatpush3.bf16.msra.mxu0 %v385_v3 }
  0x1b   : > { %364 = vmatprep.subr.bf16.mxu0 %v401_v0 }
  0x1e   : > { %365 = vmatpush3.bf16.msra.mxu0 %v386_v4 }
  0x1f   : > { %366 = vmatprep.subr.bf16.mxu0 %v401_v0 }
  0x22   : > { %367 = vmatpush3.bf16.msra.mxu0 %v194_v6 }
  0x25   : > { %369 = vmatmul.mubr.msk.bf16.vlgmr.msra.gmra.mrb[0].mxu0 %vm188_vm2, %v388_v7 }
  0xf8   : > { %v230_v8 = vpop.f32.mrb[0].mxu0 }
  0xf9   : > { %v370_v9 = vpop.f32.mrb[1].mxu0  ;;  %v238_v10 = vsel %vm237_vm3, %v230_v8, 0.0  ;;  %v247_v11 = vmul.f32 %v230_v8, %v230_v8 }
  0xfa   : > { %239 = vadd.xlane.f32.xlu0 %v238_v10  ;;  %v233_v12 = vpop.f32.mrb[2].mxu0 }
  0xfb   : > { %v371_v13 = vpop.f32.mrb[3].mxu0  ;;  %v249_v14 = vsel %vm237_vm3, %v247_v11, 0.0  ;;  %v248_v15 = vmul.f32 %v233_v12, %v233_v12  ;;  %v241_v16 = vsel %vm237_vm3, %v233_v12, 0.0 }
  0xfc   : > { %250 = vadd.xlane.f32.xlu1 %v249_v14 }
  0xfd   : > { %v252_v17 = vsel %vm237_vm3, %v248_v15, 0.0 }
  0xfe   : > { %242 = vadd.xlane.f32.xlu0 %v241_v16 }
 0x100   : > { %253 = vadd.xlane.f32.xlu1 %v252_v17 }
 0x187   : > { %v240_v18 = vpop.xlane.xlu0 %239 }
 0x188   : > { %v245_v19 = vmul.f32 0.015625, %v240_v18 }
 0x189   : > { %v251_v20 = vpop.xlane.xlu1 %250 }
 0x18a   : > { %v257_v21 = vmul.f32 %v245_v19, %v245_v19  ;;  %v255_v22 = vmul.f32 0.015625, %v251_v20  ;;  %v263_v34 = vsub.f32 %v230_v8, %v245_v19 }
 0x18b   : > { %v243_v23 = vpop.xlane.xlu0 %242 }
 0x18c   : > { %v259_v24 = vsub.f32 %v255_v22, %v257_v21  ;;  %v246_v25 = vmul.f32 0.015625, %v243_v23 }
 0x18d   : > { %v254_v26 = vpop.xlane.xlu1 %253 }
 0x18e   : > { %v261_v27 = vmax.f32 %v259_v24, 0.0  ;;  %v258_v28 = vmul.f32 %v246_v25, %v246_v25  ;;  %v256_v29 = vmul.f32 0.015625, %v254_v26  ;;  %v264_v38 = vsub.f32 %v233_v12, %v246_v25 }
 0x190   : > { %v265_v30 = vadd.f32 1e-05, %v261_v27  ;;  %v260_v31 = vsub.f32 %v256_v29, %v258_v28 }
 0x192   : > { %389 = vrsqrt.f32 %v265_v30  ;;  %v262_v32 = vmax.f32 %v260_v31, 0.0 }
 0x194   : > { %v266_v33 = vadd.f32 1e-05, %v262_v32 }
 0x196   : > { %391 = vrsqrt.f32 %v266_v33 }
 0x19c   : > { %v390_v35 = vpop.eup %389 }
 0x19d   : > { %v269_v36 = vmul.f32 %v390_v35, %v263_v34 }
 0x19f   : > { %vm271_vm4 = vcmp.ge.f32.partialorder %v269_v36, 0.0  ;;  %v273_v37 = vmul.f32 0.2, %v269_v36 }
 0x1a0   : > { %v392_v39 = vpop.eup %391 }
 0x1a1   : > { %v275_v40 = vsel %vm271_vm4, %v269_v36, %v273_v37  ;;  %v270_v41 = vmul.f32 %v392_v39, %v264_v38 }
 0x1a2   : > { %277 = vst.msk [vmem:[%s143_s20] sm:$0xff] %vm237_vm3, %v275_v40 }
 0x1a3   : > { %vm272_vm5 = vcmp.ge.f32.partialorder %v270_v41, 0.0  ;;  %v274_v42 = vmul.f32 0.2, %v270_v41 }
 0x1a5   : > { %v276_v43 = vsel %vm272_vm5, %v270_v41, %v274_v42 }
 0x1a6   : > { %278 = vst.msk [vmem:[%s143_s20 + $0x8] sm:$0xff] %vm237_vm3, %v276_v43 }
 0x1a7 PF: > { %s12_s9 = sadd.s32 1, %s399_s9  }
 0x1a8   : > { %p9_p4 = scmp.ge.s32.totalorder %s12_s9, 10  }
 0x1aa   :  { %11 = sbr.rel (!%p9_p4) target bundleno = 1 (0x1), region = 58 }

// kernel: run.29
= control target key start
LH: loop header
LB: loop body
LE: loop exit
PB: predicated region body
PF: predicated region fallthrough
CT: control target
= control target key end

     0   :  { %s443_s9 = smov 0   ;;  %s476_s0 = inlined_call_operand.vmem [shape: bf16[16,144], index: 0, kind: input, shape index: {}]   ;;  %s477_s1 = inlined_call_operand.vmem [shape: bf16[8,144,64], index: 1, kind: input, shape index: {}]   ;;  %s478_s2 = inlined_call_operand.vmem [shape: f32[8,16,64], index: 2, kind: output, shape index: {}]  }
   0x1 LB: > { %s370_s10 = sadd.s32 4294967295, %s425_s9   ;;  %p374_p0 = scmp.ge.s32.totalorder %s425_s9, 1  ;;  %s425_s9 = sphi %s443_s9, %s12_s9  }
   0x2   : > { %p112_p1 = scmp.lt.s32.totalorder %s425_s9, 9 }
   0x4   : > { %p113_p2 = pnand %p374_p0, %p112_p1 }
   0x5   : > { %p134_p3 = scmp.lt.s32.totalorder (!%p113_p2), %s370_s10, 7  ;;  %v427_v0 = vmov (!%p113_p2), 0   ;;  %v414_v1 = vld [vmem:[%s476_s0 + $0x4] ss:$8 sps:$4 sm:$0xff] (!%p113_p2)   ;;  %vm228_vm0 = vcmask (!%p113_p2), 130048   ;;  %vm273_vm1 = vcmask (!%p113_p2), 523264  }
   0x6   : > { %116 = sbr.rel (%p113_p2) target bundleno = 439 (0x1b7), region = 28  ;;  %232 = vmatprep.subr.bf16.mxu0 (!%p113_p2), %v427_v0  ;;  %389 = vmatprep.mubr.msk.bf16.mxu0 (!%p113_p2), %vm228_vm0, %v414_v1  ;;  %v412_v11 = vld [vmem:[%s476_s0] ss:$8 sps:$4 sm:$0xff] (!%p113_p2)  }
   0xd   : > { %s480_s10 = smov (!%p134_p3, %s370_s10), 7 }
   0xe   : > { %s393_s13 = smul.u32 72, %s480_s10  ;;  %s392_s19 = sshll.u32 %s480_s10, 4 }
   0xf   : > { %s143_s22 = scalar_lea.vmem %s478_s2, %s392_s19 }
  0x10   : > { %s138_s16 = scalar_lea.vmem %s477_s1, %s393_s13 }
  0x11   : > { %v403_v2 = vld [vmem:[%s138_s16] sm:$0xff]   ;;  %v404_v3 = vld [vmem:[%s138_s16 + $0x8] sm:$0xff]   ;;  %v405_v4 = vld [vmem:[%s138_s16 + $0x10] sm:$0xff]  }
  0x12   : > { %233 = vmatpush1.bf16.msra.mxu0 %v403_v2  ;;  %v406_v5 = vld [vmem:[%s138_s16 + $0x18] sm:$0xff]   ;;  %v407_v6 = vld [vmem:[%s138_s16 + $0x20] sm:$0xff]   ;;  %v408_v7 = vld [vmem:[%s138_s16 + $0x28] sm:$0xff]  }
  0x13   : > { %234 = vmatprep.subr.bf16.mxu0 %v427_v0  ;;  %v409_v8 = vld [vmem:[%s138_s16 + $0x30] sm:$0xff]   ;;  %v410_v9 = vld [vmem:[%s138_s16 + $0x38] sm:$0xff]   ;;  %v411_v10 = vld [vmem:[%s138_s16 + $0x40] sm:$0xff]  }
  0x16   : > { %235 = vmatpush1.bf16.msra.mxu0 %v404_v3 }
  0x17   : > { %236 = vmatprep.subr.bf16.mxu0 %v427_v0 }
  0x1a   : > { %237 = vmatpush1.bf16.msra.mxu0 %v405_v4 }
  0x1b   : > { %238 = vmatprep.subr.bf16.mxu0 %v427_v0 }
  0x1e   : > { %239 = vmatpush1.bf16.msra.mxu0 %v406_v5 }
  0x1f   : > { %240 = vmatprep.subr.bf16.mxu0 %v427_v0 }
  0x22   : > { %241 = vmatpush1.bf16.msra.mxu0 %v407_v6 }
  0x23   : > { %242 = vmatprep.subr.bf16.mxu0 %v427_v0 }
  0x26   : > { %243 = vmatpush1.bf16.msra.mxu0 %v408_v7 }
  0x27   : > { %244 = vmatprep.subr.bf16.mxu0 %v427_v0 }
  0x2a   : > { %245 = vmatpush1.bf16.msra.mxu0 %v409_v8 }
  0x2b   : > { %246 = vmatprep.subr.bf16.mxu0 %v427_v0 }
  0x2e   : > { %247 = vmatpush1.bf16.msra.mxu0 %v410_v9 }
  0x2f   : > { %248 = vmatprep.subr.bf16.mxu0 %v427_v0 }
  0x32   : > { %249 = vmatpush1.bf16.msra.mxu0 %v411_v10 }
  0x35   : > { %265 = vmatmul.mubr.bf16.vlgmr.msra.gmra.mrb[0].mxu0 %v412_v11 }
 0x108   : > { %v266_v12 = vpop.f32.mrb[0].mxu0 }
 0x109   : > { %v268_v13 = vpop.f32.mrb[1].mxu0  ;;  %v274_v14 = vsel %vm273_vm1, %v266_v12, 0.0  ;;  %v283_v15 = vmul.f32 %v266_v12, %v266_v12 }
 0x10a   : > { %275 = vadd.xlane.f32.xlu0 %v274_v14  ;;  %v269_v16 = vpop.f32.mrb[2].mxu0 }
 0x10b   : > { %v271_v17 = vpop.f32.mrb[3].mxu0  ;;  %v285_v18 = vsel %vm273_vm1, %v283_v15, 0.0  ;;  %v284_v19 = vmul.f32 %v269_v16, %v269_v16  ;;  %v277_v20 = vsel %vm273_vm1, %v269_v16, 0.0 }
 0x10c   : > { %286 = vadd.xlane.f32.xlu1 %v285_v18 }
 0x10d   : > { %v288_v21 = vsel %vm273_vm1, %v284_v19, 0.0 }
 0x10e   : > { %278 = vadd.xlane.f32.xlu0 %v277_v20 }
 0x110   : > { %289 = vadd.xlane.f32.xlu1 %v288_v21 }
 0x197   : > { %v276_v22 = vpop.xlane.xlu0 %275 }
 0x198   : > { %v281_v23 = vmul.f32 0.015625, %v276_v22 }
 0x199   : > { %v287_v24 = vpop.xlane.xlu1 %286 }
 0x19a   : > { %v293_v25 = vmul.f32 %v281_v23, %v281_v23  ;;  %v291_v26 = vmul.f32 0.015625, %v287_v24  ;;  %v299_v38 = vsub.f32 %v266_v12, %v281_v23 }
 0x19b   : > { %v279_v27 = vpop.xlane.xlu0 %278 }
 0x19c   : > { %v295_v28 = vsub.f32 %v291_v26, %v293_v25  ;;  %v282_v29 = vmul.f32 0.015625, %v279_v27 }
 0x19d   : > { %v290_v30 = vpop.xlane.xlu1 %289 }
 0x19e   : > { %v297_v31 = vmax.f32 %v295_v28, 0.0  ;;  %v294_v32 = vmul.f32 %v282_v29, %v282_v29  ;;  %v292_v33 = vmul.f32 0.015625, %v290_v30  ;;  %v300_v42 = vsub.f32 %v269_v16, %v282_v29 }
 0x1a0   : > { %v301_v34 = vadd.f32 1e-05, %v297_v31  ;;  %v296_v35 = vsub.f32 %v292_v33, %v294_v32 }
 0x1a2   : > { %415 = vrsqrt.f32 %v301_v34  ;;  %v298_v36 = vmax.f32 %v296_v35, 0.0 }
 0x1a4   : > { %v302_v37 = vadd.f32 1e-05, %v298_v36 }
 0x1a6   : > { %417 = vrsqrt.f32 %v302_v37 }
 0x1ac   : > { %v416_v39 = vpop.eup %415 }
 0x1ad   : > { %v305_v40 = vmul.f32 %v416_v39, %v299_v38 }
 0x1af   : > { %vm307_vm2 = vcmp.ge.f32.partialorder %v305_v40, 0.0  ;;  %v309_v41 = vmul.f32 0.2, %v305_v40 }
 0x1b0   : > { %v418_v43 = vpop.eup %417 }
 0x1b1   : > { %v311_v44 = vsel %vm307_vm2, %v305_v40, %v309_v41  ;;  %v306_v45 = vmul.f32 %v418_v43, %v300_v42 }
 0x1b2   : > { %313 = vst.msk [vmem:[%s143_s22] sm:$0xff] %vm273_vm1, %v311_v44 }
 0x1b3   : > { %vm308_vm3 = vcmp.ge.f32.partialorder %v306_v45, 0.0  ;;  %v310_v46 = vmul.f32 0.2, %v306_v45 }
 0x1b5   : > { %v312_v47 = vsel %vm308_vm3, %v306_v45, %v310_v46 }
 0x1b6   : > { %314 = vst.msk [vmem:[%s143_s22 + $0x8] sm:$0xff] %vm273_vm1, %v312_v47 }
 0x1b7 PF: > { %s12_s9 = sadd.s32 1, %s425_s9  }
 0x1b8   : > { %p9_p4 = scmp.ge.s32.totalorder %s12_s9, 10  }
 0x1ba   :  { %11 = sbr.rel (!%p9_p4) target bundleno = 1 (0x1), region = 58 }

// kernel: run.30
= control target key start
LH: loop header
LB: loop body
LE: loop exit
PB: predicated region body
PF: predicated region fallthrough
CT: control target
= control target key end

     0   :  { %s532_s9 = smov 0   ;;  %s608_s0 = inlined_call_operand.vmem [shape: bf16[32,144], index: 0, kind: input, shape index: {}]   ;;  %s609_s1 = inlined_call_operand.vmem [shape: bf16[8,144,16], index: 1, kind: input, shape index: {}]   ;;  %s610_s2 = inlined_call_operand.vmem [shape: f32[8,32,16], index: 2, kind: output, shape index: {}]  }
   0x1 LB: > { %s431_s10 = sadd.s32 4294967295, %s514_s9   ;;  %p435_p0 = scmp.ge.s32.totalorder %s514_s9, 1  ;;  %s514_s9 = sphi %s532_s9, %s12_s9  }
   0x2   : > { %p112_p1 = scmp.lt.s32.totalorder %s514_s9, 9 }
   0x4   : > { %p113_p2 = pnand %p435_p0, %p112_p1 }
   0x5   : > { %p134_p3 = scmp.lt.s32.totalorder (!%p113_p2), %s431_s10, 7  ;;  %v516_v0 = vmov (!%p113_p2), 0   ;;  %v496_v1 = vld [vmem:[%s608_s0 + $0x4] ss:$8 sps:$4 sm:$0xff] (!%p113_p2)   ;;  %vm239_vm0 = vcmask (!%p113_p2), 130048  }
   0x6   : > { %116 = sbr.rel (%p113_p2) target bundleno = 446 (0x1be), region = 28  ;;  %246 = vmatprep.subr.bf16.mxu0 (!%p113_p2), %v516_v0  ;;  %457 = vmatprep.subr.bf16.mxu1 (!%p113_p2), %v516_v0  ;;  %v499_v2 = vld [vmem:[%s608_s0 + $0x14] ss:$8 sps:$4 sm:$0xff] (!%p113_p2)   ;;  %v494_v12 = vld [vmem:[%s608_s0] ss:$8 sps:$4 sm:$0xff] (!%p113_p2)  }
   0x7   : > { %452 = vmatprep.mubr.msk.bf16.mxu0 (!%p113_p2), %vm239_vm0, %v496_v1  ;;  %453 = vmatprep.mubr.msk.bf16.mxu1 (!%p113_p2), %vm239_vm0, %v499_v2  ;;  %v497_v13 = vld [vmem:[%s608_s0 + $0x10] ss:$8 sps:$4 sm:$0xff] (!%p113_p2)  }
   0xd   : > { %s612_s10 = smov (!%p134_p3, %s431_s10), 7 }
   0xe   : > { %s475_s15 = smul.u32 72, %s612_s10  ;;  %s456_s23 = sshll.u32 %s612_s10, 5 }
   0xf   : > { %s143_s26 = scalar_lea.vmem %s610_s2, %s456_s23 }
  0x10   : > { %s554_s18 = scalar_lea.vmem %s609_s1, %s475_s15 }
  0x11   : > { %v485_v3 = vld [vmem:[%s554_s18] sm:$0xff]   ;;  %v486_v4 = vld [vmem:[%s554_s18 + $0x8] sm:$0xff]   ;;  %v487_v5 = vld [vmem:[%s554_s18 + $0x10] sm:$0xff]  }
  0x12   : > { %247 = vmatpush1.bf16.msra.mxu0 %v485_v3  ;;  %466 = vmatpush1.bf16.msra.mxu1 %v485_v3  ;;  %v488_v6 = vld [vmem:[%s554_s18 + $0x18] sm:$0xff]   ;;  %v489_v7 = vld [vmem:[%s554_s18 + $0x20] sm:$0xff]   ;;  %v490_v8 = vld [vmem:[%s554_s18 + $0x28] sm:$0xff]  }
  0x13   : > { %248 = vmatprep.subr.bf16.mxu0 %v516_v0  ;;  %458 = vmatprep.subr.bf16.mxu1 %v516_v0  ;;  %v491_v9 = vld [vmem:[%s554_s18 + $0x30] sm:$0xff]   ;;  %v492_v10 = vld [vmem:[%s554_s18 + $0x38] sm:$0xff]   ;;  %v493_v11 = vld [vmem:[%s554_s18 + $0x40] sm:$0xff]  }
  0x16   : > { %249 = vmatpush1.bf16.msra.mxu0 %v486_v4  ;;  %467 = vmatpush1.bf16.msra.mxu1 %v486_v4 }
  0x17   : > { %250 = vmatprep.subr.bf16.mxu0 %v516_v0  ;;  %459 = vmatprep.subr.bf16.mxu1 %v516_v0 }
  0x1a   : > { %251 = vmatpush1.bf16.msra.mxu0 %v487_v5  ;;  %468 = vmatpush1.bf16.msra.mxu1 %v487_v5 }
  0x1b   : > { %252 = vmatprep.subr.bf16.mxu0 %v516_v0  ;;  %460 = vmatprep.subr.bf16.mxu1 %v516_v0 }
  0x1e   : > { %253 = vmatpush1.bf16.msra.mxu0 %v488_v6  ;;  %469 = vmatpush1.bf16.msra.mxu1 %v488_v6 }
  0x1f   : > { %254 = vmatprep.subr.bf16.mxu0 %v516_v0  ;;  %461 = vmatprep.subr.bf16.mxu1 %v516_v0 }
  0x22   : > { %255 = vmatpush1.bf16.msra.mxu0 %v489_v7  ;;  %470 = vmatpush1.bf16.msra.mxu1 %v489_v7 }
  0x23   : > { %256 = vmatprep.subr.bf16.mxu0 %v516_v0  ;;  %462 = vmatprep.subr.bf16.mxu1 %v516_v0 }
  0x26   : > { %257 = vmatpush1.bf16.msra.mxu0 %v490_v8  ;;  %471 = vmatpush1.bf16.msra.mxu1 %v490_v8 }
  0x27   : > { %258 = vmatprep.subr.bf16.mxu0 %v516_v0  ;;  %463 = vmatprep.subr.bf16.mxu1 %v516_v0 }
  0x2a   : > { %259 = vmatpush1.bf16.msra.mxu0 %v491_v9  ;;  %472 = vmatpush1.bf16.msra.mxu1 %v491_v9 }
  0x2b   : > { %260 = vmatprep.subr.bf16.mxu0 %v516_v0  ;;  %464 = vmatprep.subr.bf16.mxu1 %v516_v0 }
  0x2e   : > { %261 = vmatpush1.bf16.msra.mxu0 %v492_v10  ;;  %473 = vmatpush1.bf16.msra.mxu1 %v492_v10 }
  0x2f   : > { %262 = vmatprep.subr.bf16.mxu0 %v516_v0  ;;  %465 = vmatprep.subr.bf16.mxu1 %v516_v0 }
  0x32   : > { %263 = vmatpush1.bf16.msra.mxu0 %v493_v11  ;;  %474 = vmatpush1.bf16.msra.mxu1 %v493_v11 }
  0x35   : > { %279 = vmatmul.mubr.bf16.vlgmr.msra.gmra.mrb[0].mxu0 %v494_v12  ;;  %287 = vmatmul.mubr.bf16.vlgmr.msra.gmra.mrb[0].mxu1 %v497_v13 }
 0x108   : > { %v571_v14 = vpop.f32.mrb[0].mxu0  ;;  %v573_v15 = vpop.f32.mrb[0].mxu1 }
 0x109   : > { %v282_v16 = vpop.f32.mrb[1].mxu0  ;;  %v290_v17 = vpop.f32.mrb[1].mxu1  ;;  %v301_v18 = vsel %vm239_vm0, %v573_v15, 0.0  ;;  %v295_v19 = vsel %vm239_vm0, %v571_v14, 0.0  ;;  %v312_v27 = vmul.f32 %v571_v14, %v571_v14  ;;  %v314_v31 = vmul.f32 %v573_v15, %v573_v15 }
 0x10a   : > { %302 = vadd.xlane.f32.xlu1 %v301_v18  ;;  %v579_v20 = vpop.f32.mrb[2].mxu1  ;;  %296 = vadd.xlane.f32.xlu0 %v295_v19  ;;  %v283_v21 = vpop.f32.mrb[2].mxu0 }
 0x10b   : > { %v285_v22 = vpop.f32.mrb[3].mxu0  ;;  %v293_v23 = vpop.f32.mrb[3].mxu1  ;;  %v304_v24 = vsel %vm239_vm0, %v579_v20, 0.0  ;;  %v298_v25 = vsel %vm239_vm0, %v283_v21, 0.0  ;;  %v313_v26 = vmul.f32 %v283_v21, %v283_v21  ;;  %v316_v29 = vsel %vm239_vm0, %v312_v27, 0.0 }
 0x10c   : > { %v315_v30 = vmul.f32 %v579_v20, %v579_v20  ;;  %v322_v33 = vsel %vm239_vm0, %v314_v31, 0.0 }
 0x10d   : > { %v319_v28 = vsel %vm239_vm0, %v313_v26, 0.0 }
 0x10e   : > { %305 = vadd.xlane.f32.xlu1 %v304_v24  ;;  %299 = vadd.xlane.f32.xlu0 %v298_v25  ;;  %v325_v32 = vsel %vm239_vm0, %v315_v30, 0.0 }
 0x112   : > { %320 = vadd.xlane.f32.xlu1 %v319_v28  ;;  %317 = vadd.xlane.f32.xlu0 %v316_v29 }
 0x116   : > { %326 = vadd.xlane.f32.xlu1 %v325_v32  ;;  %323 = vadd.xlane.f32.xlu0 %v322_v33 }
 0x197   : > { %v303_v34 = vpop.xlane.xlu1 %302  ;;  %v297_v35 = vpop.xlane.xlu0 %296 }
 0x198   : > { %v308_v38 = vmul.f32 0.0625, %v297_v35  ;;  %v310_v40 = vmul.f32 0.0625, %v303_v34 }
 0x19a   : > { %v332_v44 = vmul.f32 %v308_v38, %v308_v38  ;;  %v334_v50 = vmul.f32 %v310_v40, %v310_v40  ;;  %v344_v4 = vsub.f32 %v571_v14, %v308_v38  ;;  %v346_v11 = vsub.f32 %v573_v15, %v310_v40 }
 0x19b   : > { %v306_v36 = vpop.xlane.xlu1 %305  ;;  %v300_v37 = vpop.xlane.xlu0 %299 }
 0x19c   : > { %v309_v39 = vmul.f32 0.0625, %v300_v37  ;;  %v311_v41 = vmul.f32 0.0625, %v306_v36 }
 0x19e   : > { %v333_v45 = vmul.f32 %v309_v39, %v309_v39  ;;  %v335_v51 = vmul.f32 %v311_v41, %v311_v41  ;;  %v345_v2 = vsub.f32 %v283_v21, %v309_v39  ;;  %v347_v8 = vsub.f32 %v579_v20, %v311_v41 }
 0x19f   : > { %v321_v42 = vpop.xlane.xlu1 %320  ;;  %v318_v43 = vpop.xlane.xlu0 %317 }
 0x1a0   : > { %v329_v46 = vmul.f32 0.0625, %v321_v42  ;;  %v328_v47 = vmul.f32 0.0625, %v318_v43 }
 0x1a2   : > { %v337_v48 = vsub.f32 %v329_v46, %v333_v45  ;;  %v336_v49 = vsub.f32 %v328_v47, %v332_v44 }
 0x1a3   : > { %v327_v52 = vpop.xlane.xlu1 %326  ;;  %v324_v53 = vpop.xlane.xlu0 %323 }
 0x1a4   : > { %v341_v54 = vmax.f32 %v337_v48, 0.0  ;;  %v340_v55 = vmax.f32 %v336_v49, 0.0  ;;  %v331_v56 = vmul.f32 0.0625, %v327_v52  ;;  %v330_v57 = vmul.f32 0.0625, %v324_v53 }
 0x1a6   : > { %v349_v58 = vadd.f32 1e-05, %v341_v54  ;;  %v348_v59 = vadd.f32 1e-05, %v340_v55  ;;  %v339_v60 = vsub.f32 %v331_v56, %v335_v51  ;;  %v338_v61 = vsub.f32 %v330_v57, %v334_v50 }
 0x1a8   : > { %500 = vrsqrt.f32 %v349_v58  ;;  %v343_v62 = vmax.f32 %v339_v60, 0.0  ;;  %v342_v63 = vmax.f32 %v338_v61, 0.0 }
 0x1a9   : > { %502 = vrsqrt.f32 %v348_v59 }
 0x1aa   : > { %v351_v0 = vadd.f32 1e-05, %v343_v62  ;;  %v350_v1 = vadd.f32 1e-05, %v342_v63 }
 0x1ac   : > { %504 = vrsqrt.f32 %v351_v0 }
 0x1ad   : > { %506 = vrsqrt.f32 %v350_v1 }
 0x1b2   : > { %v501_v3 = vpop.eup %500 }
 0x1b3   : > { %v503_v5 = vpop.eup %502  ;;  %v357_v6 = vmul.f32 %v501_v3, %v345_v2 }
 0x1b4   : > { %v356_v7 = vmul.f32 %v503_v5, %v344_v4 }
 0x1b5   : > { %vm361_vm1 = vcmp.ge.f32.partialorder %v357_v6, 0.0  ;;  %v365_v9 = vmul.f32 0.2, %v357_v6 }
 0x1b6   : > { %v505_v10 = vpop.eup %504  ;;  %vm360_vm2 = vcmp.ge.f32.partialorder %v356_v7, 0.0  ;;  %v364_v12 = vmul.f32 0.2, %v356_v7 }
 0x1b7   : > { %v507_v13 = vpop.eup %506  ;;  %v369_v16 = vsel %vm361_vm1, %v357_v6, %v365_v9  ;;  %v359_v14 = vmul.f32 %v505_v10, %v347_v8 }
 0x1b8   : > { %373 = vst.msk [vmem:[%s143_s26 + $0x8] sm:$0xff] %vm239_vm0, %v369_v16  ;;  %v368_v17 = vsel %vm360_vm2, %v356_v7, %v364_v12  ;;  %v358_v18 = vmul.f32 %v507_v13, %v346_v11 }
 0x1b9   : > { %372 = vst.msk [vmem:[%s143_s26] sm:$0xff] %vm239_vm0, %v368_v17  ;;  %vm363_vm3 = vcmp.ge.f32.partialorder %v359_v14, 0.0  ;;  %v367_v19 = vmul.f32 0.2, %v359_v14 }
 0x1ba   : > { %vm362_vm4 = vcmp.ge.f32.partialorder %v358_v18, 0.0  ;;  %v366_v20 = vmul.f32 0.2, %v358_v18 }
 0x1bb   : > { %v371_v21 = vsel %vm363_vm3, %v359_v14, %v367_v19 }
 0x1bc   : > { %375 = vst.msk [vmem:[%s143_s26 + $0x18] sm:$0xff] %vm239_vm0, %v371_v21  ;;  %v370_v22 = vsel %vm362_vm4, %v358_v18, %v366_v20 }
 0x1bd   : > { %374 = vst.msk [vmem:[%s143_s26 + $0x10] sm:$0xff] %vm239_vm0, %v370_v22 }
 0x1be PF: > { %s12_s9 = sadd.s32 1, %s514_s9  }
 0x1bf   : > { %p9_p4 = scmp.ge.s32.totalorder %s12_s9, 10  }
 0x1c1   :  { %11 = sbr.rel (!%p9_p4) target bundleno = 1 (0x1), region = 58 }

// kernel: run.31
= control target key start
LH: loop header
LB: loop body
LE: loop exit
PB: predicated region body
PF: predicated region fallthrough
CT: control target
= control target key end

     0   :  { %s712_s9 = smov 0   ;;  %s809_s0 = inlined_call_operand.vmem [shape: bf16[32,288], index: 0, kind: input, shape index: {}]   ;;  %s810_s1 = inlined_call_operand.vmem [shape: bf16[8,288,16], index: 1, kind: input, shape index: {}]   ;;  %s811_s2 = inlined_call_operand.vmem [shape: f32[8,32,16], index: 2, kind: output, shape index: {}]  }
   0x1 LB: > { %s569_s10 = sadd.s32 4294967295, %s695_s9   ;;  %p573_p0 = scmp.ge.s32.totalorder %s695_s9, 1  ;;  %s695_s9 = sphi %s712_s9, %s12_s9  }
   0x2   : > { %p112_p1 = scmp.lt.s32.totalorder %s695_s9, 9 }
   0x4   : > { %p113_p2 = pnand %p573_p0, %p112_p1 }
   0x5   : > { %p134_p3 = scmp.lt.s32.totalorder (!%p113_p2), %s569_s10, 7  ;;  %vm327_vm0 = vcmask (!%p113_p2), 261120   ;;  %v673_v0 = vld [vmem:[%s809_s0 + $0x8] ss:$12 sps:$4 sm:$0xff] (!%p113_p2)   ;;  %v676_v1 = vld [vmem:[%s809_s0 + $0x4] ss:$12 sps:$4 sm:$0xff] (!%p113_p2)  }
   0x6   : > { %116 = sbr.rel (%p113_p2) target bundleno = 451 (0x1c3), region = 28  ;;  %642 = vmatprep.mubr.msk.bf16.mxu1 (!%p113_p2), %vm327_vm0, %v673_v0  ;;  %366 = vmatprep.mubr.bf16.mxu0 (!%p113_p2), %v676_v1  ;;  %v677_v15 = vld [vmem:[%s809_s0 + $0x20] ss:$12 sps:$4 sm:$0xff] (!%p113_p2)   ;;  %v678_v22 = vld [vmem:[%s809_s0 + $0x1c] ss:$12 sps:$4 sm:$0xff] (!%p113_p2)   ;;  %vm432_vm1 = vcmask (!%p113_p2), 130048  }
   0x7   : > { %v674_v21 = vld [vmem:[%s809_s0] ss:$12 sps:$4 sm:$0xff] (!%p113_p2)   ;;  %v680_v23 = vld [vmem:[%s809_s0 + $0x18] ss:$12 sps:$4 sm:$0xff] (!%p113_p2)  }
   0xd   : > { %s813_s10 = smov (!%p134_p3, %s569_s10), 7 }
   0xe   : > { %s646_s15 = smul.u32 144, %s813_s10  ;;  %s605_s27 = sshll.u32 %s813_s10, 5 }
   0xf   : > { %s143_s30 = scalar_lea.vmem %s811_s2, %s605_s27 }
  0x10   : > { %s733_s18 = scalar_lea.vmem %s810_s1, %s646_s15 }
  0x11   : > { %v655_v2 = vld [vmem:[%s733_s18 + $0x40] sm:$0xff]   ;;  %v657_v4 = vld [vmem:[%s733_s18 + $0x48] sm:$0xff]   ;;  %v659_v6 = vld [vmem:[%s733_s18 + $0x50] sm:$0xff]  }
  0x12   : > { %v656_v3 = vld [vmem:[%s733_s18] sm:$0xff]   ;;  %606 = vmatprep.subr.bf16.mxu0 %v655_v2  ;;  %v658_v5 = vld [vmem:[%s733_s18 + $0x8] sm:$0xff]   ;;  %v660_v7 = vld [vmem:[%s733_s18 + $0x10] sm:$0xff]  }
  0x13   : > { %607 = vmatpush3.bf16.msra.mxu0 %v656_v3  ;;  %v661_v8 = vld [vmem:[%s733_s18 + $0x58] sm:$0xff]   ;;  %v663_v10 = vld [vmem:[%s733_s18 + $0x60] sm:$0xff]   ;;  %v670_v13 = vld [vmem:[%s733_s18 + $0x88] sm:$0xff]  }
  0x14   : > { %608 = vmatprep.subr.bf16.mxu0 %v657_v4  ;;  %v662_v9 = vld [vmem:[%s733_s18 + $0x18] sm:$0xff]   ;;  %v667_v11 = vld [vmem:[%s733_s18 + $0x80] sm:$0xff]   ;;  %v665_v14 = vld [vmem:[%s733_s18 + $0x68] sm:$0xff]  }
  0x15   : > { %v664_v12 = vld [vmem:[%s733_s18 + $0x20] sm:$0xff]   ;;  %638 = vmatprep.subr.bf16.mxu1 %v667_v11  ;;  %v666_v16 = vld [vmem:[%s733_s18 + $0x28] sm:$0xff]   ;;  %v668_v17 = vld [vmem:[%s733_s18 + $0x70] sm:$0xff]  }
  0x16   : > { %639 = vmatpush3.bf16.msra.mxu1 %v667_v11  ;;  %v669_v18 = vld [vmem:[%s733_s18 + $0x30] sm:$0xff]   ;;  %v671_v19 = vld [vmem:[%s733_s18 + $0x78] sm:$0xff]  }
  0x17   : > { %609 = vmatpush3.bf16.msra.mxu0 %v658_v5  ;;  %640 = vmatprep.subr.bf16.mxu1 %v670_v13  ;;  %v672_v20 = vld [vmem:[%s733_s18 + $0x38] sm:$0xff]  }
  0x18   : > { %610 = vmatprep.subr.bf16.mxu0 %v659_v6 }
  0x1a   : > { %641 = vmatpush3.bf16.msra.mxu1 %v670_v13 }
  0x1b   : > { %611 = vmatpush3.bf16.msra.mxu0 %v660_v7 }
  0x1c   : > { %612 = vmatprep.subr.bf16.mxu0 %v661_v8 }
  0x1d   : > { %643 = vmatmul.mubr.msk.bf16.vlgmr.msra.gmra.mrb[0].mxu1 %vm327_vm0, %v677_v15 }
  0x1f   : > { %613 = vmatpush3.bf16.msra.mxu0 %v662_v9 }
  0x20   : > { %614 = vmatprep.subr.bf16.mxu0 %v663_v10 }
  0x23   : > { %615 = vmatpush3.bf16.msra.mxu0 %v664_v12 }
  0x24   : > { %616 = vmatprep.subr.bf16.mxu0 %v665_v14 }
  0x27   : > { %617 = vmatpush3.bf16.msra.mxu0 %v666_v16 }
  0x28   : > { %618 = vmatprep.subr.bf16.mxu0 %v668_v17 }
  0x2b   : > { %619 = vmatpush3.bf16.msra.mxu0 %v669_v18 }
  0x2c   : > { %620 = vmatprep.subr.bf16.mxu0 %v671_v19 }
  0x2f   : > { %621 = vmatpush3.bf16.msra.mxu0 %v672_v20 }
  0x32   : > { %367 = vmatmul.mubr.bf16.vlgmr.msra.gmra.mrb[0].mxu0 %v674_v21 }
  0x33   : > { %374 = vmatprep.mubr.bf16.mxu0 %v678_v22 }
  0x3a   : > { %375 = vmatmul.mubr.bf16.gmra.mrb[4].mxu0 %v680_v23 }
  0xf0   : > { %v644_v24 = vpop.f32.mrb[0].mxu1 }
  0xf1   : > { %v417_v25 = vpop.f32.mrb[1].mxu1 }
  0xf2   : > { %v645_v26 = vpop.f32.mrb[2].mxu1 }
  0xf3   : > { %v420_v27 = vpop.f32.mrb[3].mxu1 }
 0x105   : > { %v622_v28 = vpop.f32.mrb[0].mxu0 }
 0x106   : > { %v623_v29 = vpop.f32.mrb[1].mxu0 }
 0x107   : > { %v624_v30 = vadd.f32 %v623_v29, %v622_v28  ;;  %v625_v31 = vpop.f32.mrb[2].mxu0 }
 0x108   : > { %v626_v32 = vpop.f32.mrb[3].mxu0 }
 0x109   : > { %v766_v33 = vadd.f32 %v624_v30, %v417_v25  ;;  %v627_v34 = vadd.f32 %v626_v32, %v625_v31 }
 0x10b   : > { %v768_v35 = vadd.f32 %v627_v34, %v420_v27  ;;  %v433_v36 = vsel %vm432_vm1, %v766_v33, 0.0  ;;  %v450_v44 = vmul.f32 %v766_v33, %v766_v33 }
 0x10c   : > { %434 = vadd.xlane.f32.xlu0 %v433_v36 }
 0x10d   : > { %v628_v37 = vpop.f32.mrb[4].mxu0  ;;  %v451_v38 = vmul.f32 %v768_v35, %v768_v35  ;;  %v436_v43 = vsel %vm432_vm1, %v768_v35, 0.0  ;;  %v454_v50 = vsel %vm432_vm1, %v450_v44, 0.0 }
 0x10e   : > { %v629_v39 = vpop.f32.mrb[5].mxu0 }
 0x10f   : > { %v630_v40 = vadd.f32 %v629_v39, %v628_v37  ;;  %v631_v41 = vpop.f32.mrb[6].mxu0  ;;  %v457_v42 = vsel %vm432_vm1, %v451_v38, 0.0 }
 0x110   : > { %v632_v45 = vpop.f32.mrb[7].mxu0  ;;  %458 = vadd.xlane.f32.xlu1 %v457_v42  ;;  %437 = vadd.xlane.f32.xlu0 %v436_v43 }
 0x111   : > { %v779_v46 = vadd.f32 %v644_v24, %v630_v40  ;;  %v633_v47 = vadd.f32 %v632_v45, %v631_v41 }
 0x113   : > { %v781_v48 = vadd.f32 %v645_v26, %v633_v47  ;;  %v439_v49 = vsel %vm432_vm1, %v779_v46, 0.0  ;;  %v452_v51 = vmul.f32 %v779_v46, %v779_v46 }
 0x114   : > { %440 = vadd.xlane.f32.xlu1 %v439_v49  ;;  %455 = vadd.xlane.f32.xlu0 %v454_v50 }
 0x115   : > { %v442_v52 = vsel %vm432_vm1, %v781_v48, 0.0  ;;  %v460_v53 = vsel %vm432_vm1, %v452_v51, 0.0  ;;  %v453_v54 = vmul.f32 %v781_v48, %v781_v48 }
 0x117   : > { %v463_v55 = vsel %vm432_vm1, %v453_v54, 0.0 }
 0x118   : > { %443 = vadd.xlane.f32.xlu1 %v442_v52  ;;  %461 = vadd.xlane.f32.xlu0 %v460_v53 }
 0x11c   : > { %464 = vadd.xlane.f32.xlu1 %v463_v55 }
 0x199   : > { %v435_v56 = vpop.xlane.xlu0 %434 }
 0x19a   : > { %v446_v59 = vmul.f32 0.0625, %v435_v56 }
 0x19c   : > { %v470_v1 = vmul.f32 %v446_v59, %v446_v59  ;;  %v482_v26 = vsub.f32 %v766_v33, %v446_v59 }
 0x19d   : > { %v459_v57 = vpop.xlane.xlu1 %458  ;;  %v438_v58 = vpop.xlane.xlu0 %437 }
 0x19e   : > { %v447_v60 = vmul.f32 0.0625, %v438_v58  ;;  %v467_v61 = vmul.f32 0.0625, %v459_v57 }
 0x1a0   : > { %v471_v62 = vmul.f32 %v447_v60, %v447_v60  ;;  %v483_v24 = vsub.f32 %v768_v35, %v447_v60 }
 0x1a1   : > { %v441_v63 = vpop.xlane.xlu1 %440  ;;  %v456_v0 = vpop.xlane.xlu0 %455 }
 0x1a2   : > { %v475_v2 = vsub.f32 %v467_v61, %v471_v62  ;;  %v466_v3 = vmul.f32 0.0625, %v456_v0  ;;  %v448_v4 = vmul.f32 0.0625, %v441_v63 }
 0x1a4   : > { %v479_v5 = vmax.f32 %v475_v2, 0.0  ;;  %v474_v6 = vsub.f32 %v466_v3, %v470_v1  ;;  %v472_v13 = vmul.f32 %v448_v4, %v448_v4  ;;  %v484_v34 = vsub.f32 %v779_v46, %v448_v4 }
 0x1a5   : > { %v444_v7 = vpop.xlane.xlu1 %443  ;;  %v462_v8 = vpop.xlane.xlu0 %461 }
 0x1a6   : > { %v487_v9 = vadd.f32 1e-05, %v479_v5  ;;  %v478_v10 = vmax.f32 %v474_v6, 0.0  ;;  %v449_v11 = vmul.f32 0.0625, %v444_v7  ;;  %v468_v12 = vmul.f32 0.0625, %v462_v8 }
 0x1a8   : > { %681 = vrsqrt.f32 %v487_v9  ;;  %v486_v14 = vadd.f32 1e-05, %v478_v10  ;;  %v476_v15 = vsub.f32 %v468_v12, %v472_v13  ;;  %v473_v17 = vmul.f32 %v449_v11, %v449_v11 }
 0x1a9   : > { %v465_v16 = vpop.xlane.xlu1 %464  ;;  %v485_v37 = vsub.f32 %v781_v48, %v449_v11 }
 0x1aa   : > { %683 = vrsqrt.f32 %v486_v14  ;;  %v469_v18 = vmul.f32 0.0625, %v465_v16  ;;  %v480_v19 = vmax.f32 %v476_v15, 0.0 }
 0x1ac   : > { %v477_v20 = vsub.f32 %v469_v18, %v473_v17  ;;  %v488_v21 = vadd.f32 1e-05, %v480_v19 }
 0x1ae   : > { %v481_v22 = vmax.f32 %v477_v20, 0.0  ;;  %685 = vrsqrt.f32 %v488_v21 }
 0x1b0   : > { %v489_v23 = vadd.f32 1e-05, %v481_v22 }
 0x1b2   : > { %v682_v25 = vpop.eup %681  ;;  %687 = vrsqrt.f32 %v489_v23 }
 0x1b3   : > { %v495_v27 = vmul.f32 %v682_v25, %v483_v24 }
 0x1b4   : > { %v684_v28 = vpop.eup %683 }
 0x1b5   : > { %vm499_vm2 = vcmp.ge.f32.partialorder %v495_v27, 0.0  ;;  %v503_v29 = vmul.f32 0.2, %v495_v27  ;;  %v494_v30 = vmul.f32 %v684_v28, %v482_v26 }
 0x1b7   : > { %v507_v31 = vsel %vm499_vm2, %v495_v27, %v503_v29  ;;  %vm498_vm3 = vcmp.ge.f32.partialorder %v494_v30, 0.0  ;;  %v502_v32 = vmul.f32 0.2, %v494_v30 }
 0x1b8   : > { %511 = vst.msk [vmem:[%s143_s30 + $0x8] sm:$0xff] %vm432_vm1, %v507_v31  ;;  %v686_v35 = vpop.eup %685 }
 0x1b9   : > { %v506_v36 = vsel %vm498_vm3, %v494_v30, %v502_v32  ;;  %v496_v33 = vmul.f32 %v686_v35, %v484_v34 }
 0x1ba   : > { %510 = vst.msk [vmem:[%s143_s30] sm:$0xff] %vm432_vm1, %v506_v36 }
 0x1bb   : > { %vm500_vm4 = vcmp.ge.f32.partialorder %v496_v33, 0.0  ;;  %v504_v39 = vmul.f32 0.2, %v496_v33 }
 0x1bc   : > { %v688_v38 = vpop.eup %687 }
 0x1bd   : > { %v497_v40 = vmul.f32 %v688_v38, %v485_v37  ;;  %v508_v41 = vsel %vm500_vm4, %v496_v33, %v504_v39 }
 0x1be   : > { %512 = vst.msk [vmem:[%s143_s30 + $0x10] sm:$0xff] %vm432_vm1, %v508_v41 }
 0x1bf   : > { %vm501_vm5 = vcmp.ge.f32.partialorder %v497_v40, 0.0  ;;  %v505_v42 = vmul.f32 0.2, %v497_v40 }
 0x1c1   : > { %v509_v43 = vsel %vm501_vm5, %v497_v40, %v505_v42 }
 0x1c2   : > { %513 = vst.msk [vmem:[%s143_s30 + $0x18] sm:$0xff] %vm432_vm1, %v509_v43 }
 0x1c3 PF: > { %s12_s9 = sadd.s32 1, %s695_s9  }
 0x1c4   : > { %p9_p4 = scmp.ge.s32.totalorder %s12_s9, 10  }
 0x1c6   :  { %11 = sbr.rel (!%p9_p4) target bundleno = 1 (0x1), region = 58 }

// kernel: run.32
= control target key start
LH: loop header
LB: loop body
LE: loop exit
PB: predicated region body
PF: predicated region fallthrough
CT: control target
= control target key end

     0   :  { %s926_s9 = smov 0   ;;  %s1124_s0 = inlined_call_operand.vmem [shape: bf16[64,288], index: 0, kind: input, shape index: {}]   ;;  %s1125_s1 = inlined_call_operand.vmem [shape: bf16[8,288,4], index: 1, kind: input, shape index: {}]   ;;  %s1126_s2 = inlined_call_operand.vmem [shape: f32[8,64,4], index: 2, kind: output, shape index: {}]  }
   0x1 LB: > { %s725_s10 = sadd.s32 4294967295, %s909_s9   ;;  %p729_p0 = scmp.ge.s32.totalorder %s909_s9, 1  ;;  %s909_s9 = sphi %s926_s9, %s12_s9  }
   0x2   : > { %p112_p1 = scmp.lt.s32.totalorder %s909_s9, 9 }
   0x4   : > { %p113_p2 = pnand %p729_p0, %p112_p1 }
   0x5   : > { %p134_p3 = scmp.lt.s32.totalorder (!%p113_p2), %s725_s10, 7  ;;  %v871_v0 = vld [vmem:[%s1124_s0 + $0x4] ss:$12 sps:$4 sm:$0xff] (!%p113_p2)   ;;  %v874_v1 = vld [vmem:[%s1124_s0 + $0x4c] ss:$12 sps:$4 sm:$0xff] (!%p113_p2)   ;;  %vm365_vm0 = vcmask (!%p113_p2), 261120  }
   0x6   : > { %116 = sbr.rel (%p113_p2) target bundleno = 471 (0x1d7), region = 28  ;;  %410 = vmatprep.mubr.bf16.mxu0 (!%p113_p2), %v871_v0  ;;  %434 = vmatprep.mubr.bf16.mxu1 (!%p113_p2), %v874_v1  ;;  %v869_v19 = vld [vmem:[%s1124_s0] ss:$12 sps:$4 sm:$0xff] (!%p113_p2)   ;;  %v872_v20 = vld [vmem:[%s1124_s0 + $0x48] ss:$12 sps:$4 sm:$0xff] (!%p113_p2)   ;;  %vm508_vm1 = vcmask (!%p113_p2), 31744  }
   0x7   : > { %v877_v21 = vld [vmem:[%s1124_s0 + $0x1c] ss:$12 sps:$4 sm:$0xff] (!%p113_p2)   ;;  %v880_v24 = vld [vmem:[%s1124_s0 + $0x18] ss:$12 sps:$4 sm:$0xff] (!%p113_p2)   ;;  %v881_v25 = vld [vmem:[%s1124_s0 + $0x20] ss:$12 sps:$4 sm:$0xff] (!%p113_p2)  }
   0x8   : > { %v879_v23 = vld [vmem:[%s1124_s0 + $0x8] ss:$12 sps:$4 sm:$0xff] (!%p113_p2)   ;;  %v882_v26 = vld [vmem:[%s1124_s0 + $0x38] ss:$12 sps:$4 sm:$0xff] (!%p113_p2)   ;;  %v883_v28 = vld [vmem:[%s1124_s0 + $0x50] ss:$12 sps:$4 sm:$0xff] (!%p113_p2)  }
   0x9   : > { %v884_v27 = vld [vmem:[%s1124_s0 + $0x34] ss:$12 sps:$4 sm:$0xff] (!%p113_p2)   ;;  %v886_v29 = vld [vmem:[%s1124_s0 + $0x30] ss:$12 sps:$4 sm:$0xff] (!%p113_p2)  }
   0xd   : > { %s1128_s10 = smov (!%p134_p3, %s725_s10), 7 }
   0xe   : > { %s844_s15 = smul.u32 144, %s1128_s10  ;;  %s769_s13 = sshll.u32 %s1128_s10, 6 }
  0x10   : > { %s946_s18 = scalar_lea.vmem %s1125_s1, %s844_s15  ;;  %s1093_s15 = scalar_lea.vmem %s1126_s2, %s769_s13 }
  0x11   : > { %v853_v2 = vld [vmem:[%s946_s18 + $0x40] sm:$0xff]   ;;  %v855_v4 = vld [vmem:[%s946_s18 + $0x48] sm:$0xff]   ;;  %v857_v6 = vld [vmem:[%s946_s18 + $0x50] sm:$0xff]  }
  0x12   : > { %v854_v3 = vld [vmem:[%s946_s18] sm:$0xff]   ;;  %770 = vmatprep.subr.bf16.mxu0 %v853_v2  ;;  %828 = vmatprep.subr.bf16.mxu1 %v853_v2  ;;  %v856_v5 = vld [vmem:[%s946_s18 + $0x8] sm:$0xff]   ;;  %v858_v7 = vld [vmem:[%s946_s18 + $0x10] sm:$0xff]  }
  0x13   : > { %771 = vmatpush3.bf16.msra.mxu0 %v854_v3  ;;  %836 = vmatpush3.bf16.msra.mxu1 %v854_v3  ;;  %v859_v8 = vld [vmem:[%s946_s18 + $0x58] sm:$0xff]   ;;  %v861_v10 = vld [vmem:[%s946_s18 + $0x60] sm:$0xff]   ;;  %v863_v12 = vld [vmem:[%s946_s18 + $0x68] sm:$0xff]  }
  0x14   : > { %772 = vmatprep.subr.bf16.mxu0 %v855_v4  ;;  %829 = vmatprep.subr.bf16.mxu1 %v855_v4  ;;  %v860_v9 = vld [vmem:[%s946_s18 + $0x18] sm:$0xff]   ;;  %v862_v11 = vld [vmem:[%s946_s18 + $0x20] sm:$0xff]   ;;  %v864_v13 = vld [vmem:[%s946_s18 + $0x28] sm:$0xff]  }
  0x15   : > { %v865_v14 = vld [vmem:[%s946_s18 + $0x70] sm:$0xff]   ;;  %v867_v16 = vld [vmem:[%s946_s18 + $0x78] sm:$0xff]   ;;  %v875_v18 = vld [vmem:[%s946_s18 + $0x80] sm:$0xff]  }
  0x16   : > { %v866_v15 = vld [vmem:[%s946_s18 + $0x30] sm:$0xff]   ;;  %v868_v17 = vld [vmem:[%s946_s18 + $0x38] sm:$0xff]   ;;  %v876_v22 = vld [vmem:[%s946_s18 + $0x88] sm:$0xff]  }
  0x17   : > { %773 = vmatpush3.bf16.msra.mxu0 %v856_v5  ;;  %837 = vmatpush3.bf16.msra.mxu1 %v856_v5 }
  0x18   : > { %774 = vmatprep.subr.bf16.mxu0 %v857_v6  ;;  %830 = vmatprep.subr.bf16.mxu1 %v857_v6 }
  0x1b   : > { %775 = vmatpush3.bf16.msra.mxu0 %v858_v7  ;;  %838 = vmatpush3.bf16.msra.mxu1 %v858_v7 }
  0x1c   : > { %776 = vmatprep.subr.bf16.mxu0 %v859_v8  ;;  %831 = vmatprep.subr.bf16.mxu1 %v859_v8 }
  0x1f   : > { %777 = vmatpush3.bf16.msra.mxu0 %v860_v9  ;;  %839 = vmatpush3.bf16.msra.mxu1 %v860_v9 }
  0x20   : > { %778 = vmatprep.subr.bf16.mxu0 %v861_v10  ;;  %832 = vmatprep.subr.bf16.mxu1 %v861_v10 }
  0x23   : > { %779 = vmatpush3.bf16.msra.mxu0 %v862_v11  ;;  %840 = vmatpush3.bf16.msra.mxu1 %v862_v11 }
  0x24   : > { %780 = vmatprep.subr.bf16.mxu0 %v863_v12  ;;  %833 = vmatprep.subr.bf16.mxu1 %v863_v12 }
  0x27   : > { %781 = vmatpush3.bf16.msra.mxu0 %v864_v13  ;;  %841 = vmatpush3.bf16.msra.mxu1 %v864_v13 }
  0x28   : > { %782 = vmatprep.subr.bf16.mxu0 %v865_v14  ;;  %834 = vmatprep.subr.bf16.mxu1 %v865_v14 }
  0x2b   : > { %783 = vmatpush3.bf16.msra.mxu0 %v866_v15  ;;  %842 = vmatpush3.bf16.msra.mxu1 %v866_v15 }
  0x2c   : > { %784 = vmatprep.subr.bf16.mxu0 %v867_v16  ;;  %835 = vmatprep.subr.bf16.mxu1 %v867_v16 }
  0x2f   : > { %785 = vmatpush3.bf16.msra.mxu0 %v868_v17  ;;  %843 = vmatpush3.bf16.msra.mxu1 %v868_v17 }
  0x30   : > { %816 = vmatprep.subr.bf16.mxu1 %v875_v18 }
  0x32   : > { %411 = vmatmul.mubr.bf16.vlgmr.msra.gmra.mrb[0].mxu0 %v869_v19  ;;  %435 = vmatmul.mubr.bf16.vlgmr.msra.gmra.mrb[0].mxu1 %v872_v20 }
  0x33   : > { %817 = vmatpush3.bf16.msra.mxu1 %v875_v18  ;;  %418 = vmatprep.mubr.bf16.mxu0 %v877_v21 }
  0x34   : > { %818 = vmatprep.subr.bf16.mxu1 %v876_v22  ;;  %820 = vmatprep.mubr.msk.bf16.mxu1 %vm365_vm0, %v879_v23 }
  0x37   : > { %819 = vmatpush3.bf16.msra.mxu1 %v876_v22 }
  0x3a   : > { %419 = vmatmul.mubr.bf16.gmra.mrb[4].mxu0 %v880_v24  ;;  %821 = vmatmul.mubr.msk.bf16.vlgmr.msra.gmra.mrb[4].mxu1 %vm365_vm0, %v881_v25 }
  0x3b   : > { %824 = vmatprep.mubr.msk.bf16.mxu1 %vm365_vm0, %v882_v26  ;;  %426 = vmatprep.mubr.bf16.mxu0 %v884_v27 }
  0x42   : > { %825 = vmatmul.mubr.msk.bf16.gmra.mrb[8].mxu1 %vm365_vm0, %v883_v28  ;;  %427 = vmatmul.mubr.bf16.gmra.mrb[8].mxu0 %v886_v29 }
 0x105   : > { %v786_v30 = vpop.f32.mrb[0].mxu0  ;;  %v804_v31 = vpop.f32.mrb[0].mxu1 }
 0x106   : > { %v787_v32 = vpop.f32.mrb[1].mxu0  ;;  %v805_v33 = vpop.f32.mrb[1].mxu1 }
 0x107   : > { %v788_v34 = vadd.f32 %v787_v32, %v786_v30  ;;  %v806_v35 = vadd.f32 %v805_v33, %v804_v31  ;;  %v789_v36 = vpop.f32.mrb[2].mxu0  ;;  %v807_v37 = vpop.f32.mrb[2].mxu1 }
 0x108   : > { %v790_v38 = vpop.f32.mrb[3].mxu0  ;;  %v808_v39 = vpop.f32.mrb[3].mxu1 }
 0x109   : > { %v791_v40 = vadd.f32 %v790_v38, %v789_v36  ;;  %v809_v41 = vadd.f32 %v808_v39, %v807_v37 }
 0x10d   : > { %v792_v42 = vpop.f32.mrb[4].mxu0  ;;  %v822_v43 = vpop.f32.mrb[4].mxu1 }
 0x10e   : > { %v793_v44 = vpop.f32.mrb[5].mxu0  ;;  %v477_v45 = vpop.f32.mrb[5].mxu1 }
 0x10f   : > { %v794_v46 = vadd.f32 %v793_v44, %v792_v42  ;;  %v1000_v47 = vadd.f32 %v788_v34, %v477_v45  ;;  %v795_v48 = vpop.f32.mrb[6].mxu0  ;;  %v823_v49 = vpop.f32.mrb[6].mxu1 }
 0x110   : > { %v796_v50 = vpop.f32.mrb[7].mxu0  ;;  %v480_v51 = vpop.f32.mrb[7].mxu1 }
 0x111   : > { %v1002_v52 = vadd.f32 %v822_v43, %v794_v46  ;;  %v797_v53 = vadd.f32 %v796_v50, %v795_v48  ;;  %v1004_v54 = vadd.f32 %v791_v40, %v480_v51  ;;  %v509_v55 = vsel %vm508_vm1, %v1000_v47, 0.0 }
 0x112   : > { %510 = vadd.xlane.f32.xlu0 %v509_v55  ;;  %v542_v61 = vmul.f32 %v1000_v47, %v1000_v47 }
 0x113   : > { %v1008_v56 = vadd.f32 %v823_v49, %v797_v53  ;;  %v515_v57 = vsel %vm508_vm1, %v1002_v52, 0.0  ;;  %v512_v59 = vsel %vm508_vm1, %v1004_v54, 0.0  ;;  %v543_v5 = vmul.f32 %v1004_v54, %v1004_v54 }
 0x114   : > { %516 = vadd.xlane.f32.xlu1 %v515_v57  ;;  %v550_v10 = vsel %vm508_vm1, %v542_v61, 0.0  ;;  %v544_v12 = vmul.f32 %v1002_v52, %v1002_v52 }
 0x115   : > { %v826_v58 = vpop.f32.mrb[8].mxu1  ;;  %v798_v60 = vpop.f32.mrb[8].mxu0  ;;  %v518_v2 = vsel %vm508_vm1, %v1008_v56, 0.0  ;;  %v553_v13 = vsel %vm508_vm1, %v543_v5, 0.0  ;;  %v545_v15 = vmul.f32 %v1008_v56, %v1008_v56 }
 0x116   : > { %v1016_v62 = vadd.f32 %v826_v58, %v806_v35  ;;  %v493_v63 = vpop.f32.mrb[9].mxu1  ;;  %513 = vadd.xlane.f32.xlu0 %v512_v59  ;;  %v799_v0 = vpop.f32.mrb[9].mxu0  ;;  %v556_v16 = vsel %vm508_vm1, %v544_v12, 0.0 }
 0x117   : > { %v827_v1 = vpop.f32.mrb[10].mxu1  ;;  %v800_v3 = vadd.f32 %v799_v0, %v798_v60  ;;  %v801_v4 = vpop.f32.mrb[10].mxu0  ;;  %v559_v17 = vsel %vm508_vm1, %v545_v15, 0.0 }
 0x118   : > { %v1022_v6 = vadd.f32 %v827_v1, %v809_v41  ;;  %519 = vadd.xlane.f32.xlu1 %v518_v2  ;;  %v802_v7 = vpop.f32.mrb[11].mxu0  ;;  %v496_v8 = vpop.f32.mrb[11].mxu1  ;;  %v527_v18 = vsel %vm508_vm1, %v1016_v62, 0.0  ;;  %v548_v25 = vmul.f32 %v1016_v62, %v1016_v62 }
 0x119   : > { %v1024_v9 = vadd.f32 %v800_v3, %v493_v63  ;;  %v803_v11 = vadd.f32 %v802_v7, %v801_v4 }
 0x11a   : > { %551 = vadd.xlane.f32.xlu0 %v550_v10  ;;  %v530_v19 = vsel %vm508_vm1, %v1022_v6, 0.0  ;;  %v549_v27 = vmul.f32 %v1022_v6, %v1022_v6  ;;  %v568_v28 = vsel %vm508_vm1, %v548_v25, 0.0 }
 0x11b   : > { %v1030_v14 = vadd.f32 %v803_v11, %v496_v8  ;;  %v521_v20 = vsel %vm508_vm1, %v1024_v9, 0.0  ;;  %v546_v21 = vmul.f32 %v1024_v9, %v1024_v9 }
 0x11c   : > { %554 = vadd.xlane.f32.xlu1 %v553_v13  ;;  %v571_v29 = vsel %vm508_vm1, %v549_v27, 0.0 }
 0x11d   : > { %v524_v22 = vsel %vm508_vm1, %v1030_v14, 0.0  ;;  %v547_v23 = vmul.f32 %v1030_v14, %v1030_v14  ;;  %v562_v24 = vsel %vm508_vm1, %v546_v21, 0.0 }
 0x11e   : > { %557 = vadd.xlane.f32.xlu0 %v556_v16 }
 0x11f   : > { %v565_v26 = vsel %vm508_vm1, %v547_v23, 0.0 }
 0x120   : > { %560 = vadd.xlane.f32.xlu1 %v559_v17 }
 0x122   : > { %528 = vadd.xlane.f32.xlu0 %v527_v18 }
 0x124   : > { %531 = vadd.xlane.f32.xlu1 %v530_v19 }
 0x126   : > { %522 = vadd.xlane.f32.xlu0 %v521_v20 }
 0x128   : > { %525 = vadd.xlane.f32.xlu1 %v524_v22 }
 0x12a   : > { %563 = vadd.xlane.f32.xlu0 %v562_v24 }
 0x12c   : > { %566 = vadd.xlane.f32.xlu1 %v565_v26 }
 0x12e   : > { %569 = vadd.xlane.f32.xlu0 %v568_v28 }
 0x130   : > { %572 = vadd.xlane.f32.xlu1 %v571_v29 }
 0x19f   : > { %v511_v30 = vpop.xlane.xlu0 %510 }
 0x1a0   : > { %v534_v33 = vmul.f32 0.25, %v511_v30 }
 0x1a1   : > { %v517_v31 = vpop.xlane.xlu1 %516 }
 0x1a2   : > { %v582_v37 = vmul.f32 %v534_v33, %v534_v33  ;;  %v1058_v38 = vmul.f32 0.25, %v517_v31  ;;  %v606_v16 = vsub.f32 %v1000_v47, %v534_v33 }
 0x1a3   : > { %v514_v32 = vpop.xlane.xlu0 %513 }
 0x1a4   : > { %v1056_v35 = vmul.f32 0.25, %v514_v32  ;;  %v584_v46 = vmul.f32 %v1058_v38, %v1058_v38  ;;  %v608_v23 = vsub.f32 %v1002_v52, %v1058_v38 }
 0x1a5   : > { %v520_v34 = vpop.xlane.xlu1 %519 }
 0x1a6   : > { %v1060_v40 = vmul.f32 0.25, %v520_v34  ;;  %v583_v42 = vmul.f32 %v1056_v35, %v1056_v35  ;;  %v607_v24 = vsub.f32 %v1004_v54, %v1056_v35 }
 0x1a7   : > { %v552_v36 = vpop.xlane.xlu0 %551 }
 0x1a8   : > { %v574_v39 = vmul.f32 0.25, %v552_v36  ;;  %v585_v51 = vmul.f32 %v1060_v40, %v1060_v40  ;;  %v609_v25 = vsub.f32 %v1008_v56, %v1060_v40 }
 0x1a9   : > { %v555_v41 = vpop.xlane.xlu1 %554 }
 0x1aa   : > { %v590_v43 = vsub.f32 %v574_v39, %v582_v37  ;;  %v575_v44 = vmul.f32 0.25, %v555_v41 }
 0x1ab   : > { %v558_v45 = vpop.xlane.xlu0 %557 }
 0x1ac   : > { %v598_v48 = vmax.f32 %v590_v43, 0.0  ;;  %v591_v49 = vsub.f32 %v575_v44, %v583_v42  ;;  %v576_v50 = vmul.f32 0.25, %v558_v45 }
 0x1ad   : > { %v561_v53 = vpop.xlane.xlu1 %560 }
 0x1ae   : > { %v614_v55 = vadd.f32 1e-05, %v598_v48  ;;  %v599_v57 = vmax.f32 %v591_v49, 0.0  ;;  %v592_v58 = vsub.f32 %v576_v50, %v584_v46  ;;  %v577_v59 = vmul.f32 0.25, %v561_v53 }
 0x1af   : > { %v529_v60 = vpop.xlane.xlu0 %528 }
 0x1b0   : > { %887 = vrsqrt.f32 %v614_v55  ;;  %v615_v61 = vadd.f32 1e-05, %v599_v57  ;;  %v600_v63 = vmax.f32 %v592_v58, 0.0  ;;  %v593_v0 = vsub.f32 %v577_v59, %v585_v51 }
 0x1b1   : > { %v532_v1 = vpop.xlane.xlu1 %531  ;;  %v1072_v12 = vmul.f32 0.25, %v529_v60 }
 0x1b2   : > { %889 = vrsqrt.f32 %v615_v61  ;;  %v616_v2 = vadd.f32 1e-05, %v600_v63  ;;  %v601_v3 = vmax.f32 %v593_v0, 0.0  ;;  %v1077_v17 = vmul.f32 0.25, %v532_v1 }
 0x1b3   : > { %v523_v4 = vpop.xlane.xlu0 %522  ;;  %v588_v28 = vmul.f32 %v1072_v12, %v1072_v12  ;;  %v612_v0 = vsub.f32 %v1016_v62, %v1072_v12 }
 0x1b4   : > { %891 = vrsqrt.f32 %v616_v2  ;;  %v617_v5 = vadd.f32 1e-05, %v601_v3  ;;  %v1068_v7 = vmul.f32 0.25, %v523_v4  ;;  %v589_v56 = vmul.f32 %v1077_v17, %v1077_v17 }
 0x1b5   : > { %v526_v8 = vpop.xlane.xlu1 %525  ;;  %v613_v4 = vsub.f32 %v1022_v6, %v1077_v17 }
 0x1b6   : > { %893 = vrsqrt.f32 %v617_v5  ;;  %v1070_v10 = vmul.f32 0.25, %v526_v8  ;;  %v586_v13 = vmul.f32 %v1068_v7, %v1068_v7  ;;  %v610_v58 = vsub.f32 %v1024_v9, %v1068_v7 }
 0x1b7   : > { %v564_v11 = vpop.xlane.xlu0 %563 }
 0x1b8   : > { %v578_v15 = vmul.f32 0.25, %v564_v11  ;;  %v587_v20 = vmul.f32 %v1070_v10, %v1070_v10  ;;  %v611_v60 = vsub.f32 %v1030_v14, %v1070_v10 }
 0x1b9   : > { %v567_v18 = vpop.xlane.xlu1 %566 }
 0x1ba   : > { %v888_v19 = vpop.eup %887  ;;  %v594_v21 = vsub.f32 %v578_v15, %v586_v13  ;;  %v579_v22 = vmul.f32 0.25, %v567_v18 }
 0x1bb   : > { %v630_v47 = vmul.f32 %v888_v19, %v606_v16  ;;  %v570_v26 = vpop.xlane.xlu0 %569 }
 0x1bc   : > { %v890_v27 = vpop.eup %889  ;;  %v602_v29 = vmax.f32 %v594_v21, 0.0  ;;  %v595_v30 = vsub.f32 %v579_v22, %v587_v20  ;;  %v580_v31 = vmul.f32 0.25, %v570_v26 }
 0x1bd   : > { %vm638_vm2 = vcmp.ge.f32.partialorder %v630_v47, 0.0  ;;  %v646_v52 = vmul.f32 0.2, %v630_v47  ;;  %v631_v54 = vmul.f32 %v890_v27, %v607_v24  ;;  %v573_v32 = vpop.xlane.xlu1 %572 }
 0x1be   : > { %v892_v33 = vpop.eup %891  ;;  %v618_v34 = vadd.f32 1e-05, %v602_v29  ;;  %v603_v35 = vmax.f32 %v595_v30, 0.0  ;;  %v596_v36 = vsub.f32 %v580_v31, %v588_v28  ;;  %v581_v37 = vmul.f32 0.25, %v573_v32 }
 0x1bf   : > { %v654_v38 = vsel %vm638_vm2, %v630_v47, %v646_v52  ;;  %vm639_vm3 = vcmp.ge.f32.partialorder %v631_v54, 0.0  ;;  %v647_v39 = vmul.f32 0.2, %v631_v54  ;;  %v632_v40 = vmul.f32 %v892_v33, %v608_v23 }
 0x1c0   : > { %v894_v41 = vpop.eup %893  ;;  %662 = vst.msk [vmem:[%s1093_s15] sm:$0xff] %vm508_vm1, %v654_v38  ;;  %895 = vrsqrt.f32 %v618_v34  ;;  %v619_v42 = vadd.f32 1e-05, %v603_v35  ;;  %v604_v43 = vmax.f32 %v596_v36, 0.0  ;;  %v597_v44 = vsub.f32 %v581_v37, %v589_v56 }
 0x1c1   : > { %v655_v45 = vsel %vm639_vm3, %v631_v54, %v647_v39  ;;  %vm640_vm4 = vcmp.ge.f32.partialorder %v632_v40, 0.0  ;;  %v648_v46 = vmul.f32 0.2, %v632_v40  ;;  %v633_v48 = vmul.f32 %v894_v41, %v609_v25 }
 0x1c2   : > { %663 = vst.msk [vmem:[%s1093_s15 + $0x8] sm:$0xff] %vm508_vm1, %v655_v45  ;;  %897 = vrsqrt.f32 %v619_v42  ;;  %v620_v49 = vadd.f32 1e-05, %v604_v43  ;;  %v605_v50 = vmax.f32 %v597_v44, 0.0 }
 0x1c3   : > { %v656_v51 = vsel %vm640_vm4, %v632_v40, %v648_v46  ;;  %vm641_vm5 = vcmp.ge.f32.partialorder %v633_v48, 0.0  ;;  %v649_v53 = vmul.f32 0.2, %v633_v48 }
 0x1c4   : > { %664 = vst.msk [vmem:[%s1093_s15 + $0x10] sm:$0xff] %vm508_vm1, %v656_v51  ;;  %899 = vrsqrt.f32 %v620_v49  ;;  %v621_v55 = vadd.f32 1e-05, %v605_v50 }
 0x1c5   : > { %v657_v57 = vsel %vm641_vm5, %v633_v48, %v649_v53 }
 0x1c6   : > { %665 = vst.msk [vmem:[%s1093_s15 + $0x18] sm:$0xff] %vm508_vm1, %v657_v57  ;;  %901 = vrsqrt.f32 %v621_v55 }
 0x1ca   : > { %v896_v59 = vpop.eup %895 }
 0x1cb   : > { %v634_v61 = vmul.f32 %v896_v59, %v610_v58 }
 0x1cc   : > { %v898_v63 = vpop.eup %897 }
 0x1cd   : > { %vm642_vm6 = vcmp.ge.f32.partialorder %v634_v61, 0.0  ;;  %v650_v1 = vmul.f32 0.2, %v634_v61  ;;  %v635_v2 = vmul.f32 %v898_v63, %v611_v60 }
 0x1ce   : > { %v900_v3 = vpop.eup %899 }
 0x1cf   : > { %v658_v9 = vsel %vm642_vm6, %v634_v61, %v650_v1  ;;  %vm643_vm7 = vcmp.ge.f32.partialorder %v635_v2, 0.0  ;;  %v651_v5 = vmul.f32 0.2, %v635_v2  ;;  %v636_v7 = vmul.f32 %v900_v3, %v612_v0 }
 0x1d0   : > { %v902_v14 = vpop.eup %901  ;;  %666 = vst.msk [vmem:[%s1093_s15 + $0x20] sm:$0xff] %vm508_vm1, %v658_v9 }
 0x1d1   : > { %v659_v8 = vsel %vm643_vm7, %v635_v2, %v651_v5  ;;  %vm644_vm8 = vcmp.ge.f32.partialorder %v636_v7, 0.0  ;;  %v652_v62 = vmul.f32 0.2, %v636_v7  ;;  %v637_v10 = vmul.f32 %v902_v14, %v613_v4 }
 0x1d2   : > { %667 = vst.msk [vmem:[%s1093_s15 + $0x28] sm:$0xff] %vm508_vm1, %v659_v8 }
 0x1d3   : > { %v660_v11 = vsel %vm644_vm8, %v636_v7, %v652_v62  ;;  %vm645_vm9 = vcmp.ge.f32.partialorder %v637_v10, 0.0  ;;  %v653_v12 = vmul.f32 0.2, %v637_v10 }
 0x1d4   : > { %668 = vst.msk [vmem:[%s1093_s15 + $0x30] sm:$0xff] %vm508_vm1, %v660_v11 }
 0x1d5   : > { %v661_v6 = vsel %vm645_vm9, %v637_v10, %v653_v12 }
 0x1d6   : > { %669 = vst.msk [vmem:[%s1093_s15 + $0x38] sm:$0xff] %vm508_vm1, %v661_v6 }
 0x1d7 PF: > { %s12_s9 = sadd.s32 1, %s909_s9  }
 0x1d8   : > { %p9_p4 = scmp.ge.s32.totalorder %s12_s9, 10  }
 0x1da   :  { %11 = sbr.rel (!%p9_p4) target bundleno = 1 (0x1), region = 58 }

// kernel: run.33
= control target key start
LH: loop header
LB: loop body
LE: loop exit
PB: predicated region body
PF: predicated region fallthrough
CT: control target
= control target key end

     0   :  { %s1277_s9 = smov 0   ;;  %s1513_s0 = inlined_call_operand.vmem [shape: bf16[64,576], index: 0, kind: input, shape index: {}]   ;;  %s1514_s1 = inlined_call_operand.vmem [shape: bf16[8,576,4], index: 1, kind: input, shape index: {}]   ;;  %s1515_s2 = inlined_call_operand.vmem [shape: f32[8,64,4], index: 2, kind: output, shape index: {}]  }
   0x1 LB: > { %s982_s10 = sadd.s32 4294967295, %s1260_s9   ;;  %p986_p0 = scmp.ge.s32.totalorder %s1260_s9, 1  ;;  %s1260_s9 = sphi %s1277_s9, %s12_s9  }
   0x2   : > { %p112_p1 = scmp.lt.s32.totalorder %s1260_s9, 9 }
   0x4   : > { %p113_p2 = pnand %p986_p0, %p112_p1 }
   0x5   : > { %p134_p3 = scmp.lt.s32.totalorder (!%p113_p2), %s982_s10, 7  ;;  %v1208_v0 = vld [vmem:[%s1513_s0 + $0x4] ss:$20 sps:$4 sm:$0xff] (!%p113_p2)   ;;  %v1211_v1 = vld [vmem:[%s1513_s0 + $0xc] ss:$20 sps:$4 sm:$0xff] (!%p113_p2)   ;;  %vm557_vm0 = vcmask (!%p113_p2), 523264  }
   0x6   : > { %116 = sbr.rel (%p113_p2) target bundleno = 494 (0x1ee), region = 28  ;;  %602 = vmatprep.mubr.bf16.mxu0 (!%p113_p2), %v1208_v0  ;;  %667 = vmatprep.mubr.bf16.mxu1 (!%p113_p2), %v1211_v1  ;;  %v1206_v32 = vld [vmem:[%s1513_s0] ss:$20 sps:$4 sm:$0xff] (!%p113_p2)   ;;  %v1209_v34 = vld [vmem:[%s1513_s0 + $0x8] ss:$20 sps:$4 sm:$0xff] (!%p113_p2)   ;;  %vm765_vm1 = vcmask (!%p113_p2), 31744  }
   0x7   : > { %v1213_v37 = vld [vmem:[%s1513_s0 + $0x2c] ss:$20 sps:$4 sm:$0xff] (!%p113_p2)   ;;  %v1215_v38 = vld [vmem:[%s1513_s0 + $0x34] ss:$20 sps:$4 sm:$0xff] (!%p113_p2)   ;;  %v1218_v42 = vld [vmem:[%s1513_s0 + $0x30] ss:$20 sps:$4 sm:$0xff] (!%p113_p2)  }
   0x8   : > { %v1217_v41 = vld [vmem:[%s1513_s0 + $0x28] ss:$20 sps:$4 sm:$0xff] (!%p113_p2)   ;;  %v1224_v46 = vld [vmem:[%s1513_s0 + $0x50] ss:$20 sps:$4 sm:$0xff] (!%p113_p2)   ;;  %v1225_v47 = vld [vmem:[%s1513_s0 + $0x58] ss:$20 sps:$4 sm:$0xff] (!%p113_p2)  }
   0x9   : > { %v1220_v43 = vld [vmem:[%s1513_s0 + $0x54] ss:$20 sps:$4 sm:$0xff] (!%p113_p2)   ;;  %v1222_v44 = vld [vmem:[%s1513_s0 + $0x5c] ss:$20 sps:$4 sm:$0xff] (!%p113_p2)   ;;  %v1229_v49 = vld [vmem:[%s1513_s0 + $0x84] ss:$20 sps:$4 sm:$0xff] (!%p113_p2)  }
   0xa   : > { %v1227_v48 = vld [vmem:[%s1513_s0 + $0x7c] ss:$20 sps:$4 sm:$0xff] (!%p113_p2)   ;;  %v1231_v50 = vld [vmem:[%s1513_s0 + $0x78] ss:$20 sps:$4 sm:$0xff] (!%p113_p2)   ;;  %v1232_v51 = vld [vmem:[%s1513_s0 + $0x80] ss:$20 sps:$4 sm:$0xff] (!%p113_p2)  }
   0xb   : > { %v1234_v52 = vld [vmem:[%s1513_s0 + $0x10] ss:$20 sps:$4 sm:$0xff] (!%p113_p2)   ;;  %v1235_v53 = vld [vmem:[%s1513_s0 + $0x60] ss:$20 sps:$4 sm:$0xff] (!%p113_p2)   ;;  %v1236_v54 = vld [vmem:[%s1513_s0 + $0x38] ss:$20 sps:$4 sm:$0xff] (!%p113_p2)  }
   0xc   : > { %v1237_v55 = vld [vmem:[%s1513_s0 + $0x88] ss:$20 sps:$4 sm:$0xff] (!%p113_p2)  }
   0xd   : > { %s1517_s10 = smov (!%p134_p3, %s982_s10), 7 }
   0xe   : > { %s1165_s15 = smul.u32 288, %s1517_s10  ;;  %s1052_s29 = sshll.u32 %s1517_s10, 6 }
   0xf   : > { %s1480_s4 = scalar_lea.vmem %s1515_s2, %s1052_s29 }
  0x10   : > { %s1297_s18 = scalar_lea.vmem %s1514_s1, %s1165_s15 }
  0x11   : > { %v1174_v2 = vld [vmem:[%s1297_s18 + $0x40] sm:$0xff]   ;;  %v1178_v6 = vld [vmem:[%s1297_s18 + $0x48] sm:$0xff]   ;;  %v1182_v10 = vld [vmem:[%s1297_s18 + $0x50] sm:$0xff]  }
  0x12   : > { %v1175_v3 = vld [vmem:[%s1297_s18 + $0xc0] sm:$0xff]   ;;  %1053 = vmatprep.subr.bf16.mxu0 %v1174_v2  ;;  %v1179_v7 = vld [vmem:[%s1297_s18 + $0xc8] sm:$0xff]   ;;  %v1183_v11 = vld [vmem:[%s1297_s18 + $0xd0] sm:$0xff]  }
  0x13   : > { %v1176_v4 = vld [vmem:[%s1297_s18] sm:$0xff]   ;;  %1093 = vmatprep.subr.bf16.mxu1 %v1175_v3  ;;  %v1180_v8 = vld [vmem:[%s1297_s18 + $0x8] sm:$0xff]   ;;  %v1184_v12 = vld [vmem:[%s1297_s18 + $0x10] sm:$0xff]  }
  0x14   : > { %v1177_v5 = vld [vmem:[%s1297_s18 + $0x80] sm:$0xff]   ;;  %1054 = vmatpush3.bf16.msra.mxu0 %v1176_v4  ;;  %v1181_v9 = vld [vmem:[%s1297_s18 + $0x88] sm:$0xff]   ;;  %v1185_v13 = vld [vmem:[%s1297_s18 + $0x90] sm:$0xff]  }
  0x15   : > { %1094 = vmatpush3.bf16.msra.mxu1 %v1177_v5  ;;  %1055 = vmatprep.subr.bf16.mxu0 %v1178_v6  ;;  %v1186_v14 = vld [vmem:[%s1297_s18 + $0x58] sm:$0xff]   ;;  %v1190_v18 = vld [vmem:[%s1297_s18 + $0x60] sm:$0xff]   ;;  %v1194_v22 = vld [vmem:[%s1297_s18 + $0x68] sm:$0xff]  }
  0x16   : > { %1095 = vmatprep.subr.bf16.mxu1 %v1179_v7  ;;  %v1187_v15 = vld [vmem:[%s1297_s18 + $0xd8] sm:$0xff]   ;;  %v1191_v19 = vld [vmem:[%s1297_s18 + $0xe0] sm:$0xff]   ;;  %v1195_v23 = vld [vmem:[%s1297_s18 + $0xe8] sm:$0xff]  }
  0x17   : > { %v1188_v16 = vld [vmem:[%s1297_s18 + $0x18] sm:$0xff]   ;;  %v1192_v20 = vld [vmem:[%s1297_s18 + $0x20] sm:$0xff]   ;;  %v1196_v24 = vld [vmem:[%s1297_s18 + $0x28] sm:$0xff]  }
  0x18   : > { %1056 = vmatpush3.bf16.msra.mxu0 %v1180_v8  ;;  %v1189_v17 = vld [vmem:[%s1297_s18 + $0x98] sm:$0xff]   ;;  %v1193_v21 = vld [vmem:[%s1297_s18 + $0xa0] sm:$0xff]   ;;  %v1197_v25 = vld [vmem:[%s1297_s18 + $0xa8] sm:$0xff]  }
  0x19   : > { %1096 = vmatpush3.bf16.msra.mxu1 %v1181_v9  ;;  %1057 = vmatprep.subr.bf16.mxu0 %v1182_v10  ;;  %v1198_v26 = vld [vmem:[%s1297_s18 + $0x70] sm:$0xff]   ;;  %v1202_v30 = vld [vmem:[%s1297_s18 + $0x78] sm:$0xff]   ;;  %v1212_v36 = vld [vmem:[%s1297_s18 + $0x100] sm:$0xff]  }
  0x1a   : > { %1097 = vmatprep.subr.bf16.mxu1 %v1183_v11  ;;  %v1199_v27 = vld [vmem:[%s1297_s18 + $0xf0] sm:$0xff]   ;;  %v1203_v31 = vld [vmem:[%s1297_s18 + $0xf8] sm:$0xff]   ;;  %v1219_v39 = vld [vmem:[%s1297_s18 + $0x108] sm:$0xff]  }
  0x1b   : > { %v1200_v28 = vld [vmem:[%s1297_s18 + $0x30] sm:$0xff]   ;;  %v1204_v33 = vld [vmem:[%s1297_s18 + $0x38] sm:$0xff]  }
  0x1c   : > { %1058 = vmatpush3.bf16.msra.mxu0 %v1184_v12  ;;  %v1201_v29 = vld [vmem:[%s1297_s18 + $0xb0] sm:$0xff]   ;;  %v1205_v35 = vld [vmem:[%s1297_s18 + $0xb8] sm:$0xff]  }
  0x1d   : > { %1098 = vmatpush3.bf16.msra.mxu1 %v1185_v13  ;;  %1059 = vmatprep.subr.bf16.mxu0 %v1186_v14  ;;  %v1226_v40 = vld [vmem:[%s1297_s18 + $0x110] sm:$0xff]   ;;  %v1233_v45 = vld [vmem:[%s1297_s18 + $0x118] sm:$0xff]  }
  0x1e   : > { %1099 = vmatprep.subr.bf16.mxu1 %v1187_v15 }
  0x20   : > { %1060 = vmatpush3.bf16.msra.mxu0 %v1188_v16 }
  0x21   : > { %1100 = vmatpush3.bf16.msra.mxu1 %v1189_v17  ;;  %1061 = vmatprep.subr.bf16.mxu0 %v1190_v18 }
  0x22   : > { %1101 = vmatprep.subr.bf16.mxu1 %v1191_v19 }
  0x24   : > { %1062 = vmatpush3.bf16.msra.mxu0 %v1192_v20 }
  0x25   : > { %1102 = vmatpush3.bf16.msra.mxu1 %v1193_v21  ;;  %1063 = vmatprep.subr.bf16.mxu0 %v1194_v22 }
  0x26   : > { %1103 = vmatprep.subr.bf16.mxu1 %v1195_v23 }
  0x28   : > { %1064 = vmatpush3.bf16.msra.mxu0 %v1196_v24 }
  0x29   : > { %1104 = vmatpush3.bf16.msra.mxu1 %v1197_v25  ;;  %1065 = vmatprep.subr.bf16.mxu0 %v1198_v26 }
  0x2a   : > { %1105 = vmatprep.subr.bf16.mxu1 %v1199_v27 }
  0x2c   : > { %1066 = vmatpush3.bf16.msra.mxu0 %v1200_v28 }
  0x2d   : > { %1106 = vmatpush3.bf16.msra.mxu1 %v1201_v29  ;;  %1067 = vmatprep.subr.bf16.mxu0 %v1202_v30 }
  0x2e   : > { %1107 = vmatprep.subr.bf16.mxu1 %v1203_v31 }
  0x30   : > { %1068 = vmatpush3.bf16.msra.mxu0 %v1204_v33 }
  0x31   : > { %1108 = vmatpush3.bf16.msra.mxu1 %v1205_v35  ;;  %1141 = vmatprep.subr.bf16.mxu0 %v1212_v36 }
  0x32   : > { %1157 = vmatprep.subr.bf16.mxu1 %v1212_v36 }
  0x33   : > { %603 = vmatmul.mubr.bf16.vlgmr.msra.gmra.mrb[0].mxu0 %v1206_v32 }
  0x34   : > { %668 = vmatmul.mubr.bf16.vlgmr.msra.gmra.mrb[0].mxu1 %v1209_v34  ;;  %1142 = vmatpush3.bf16.msra.mxu0 %v1212_v36 }
  0x35   : > { %1161 = vmatpush3.bf16.msra.mxu1 %v1212_v36  ;;  %610 = vmatprep.mubr.bf16.mxu0 %v1213_v37 }
  0x36   : > { %675 = vmatprep.mubr.bf16.mxu1 %v1215_v38  ;;  %1143 = vmatprep.subr.bf16.mxu0 %v1219_v39 }
  0x37   : > { %1158 = vmatprep.subr.bf16.mxu1 %v1219_v39 }
  0x38   : > { %1144 = vmatpush3.bf16.msra.mxu0 %v1219_v39 }
  0x39   : > { %1162 = vmatpush3.bf16.msra.mxu1 %v1219_v39  ;;  %1145 = vmatprep.subr.bf16.mxu0 %v1226_v40 }
  0x3a   : > { %1159 = vmatprep.subr.bf16.mxu1 %v1226_v40 }
  0x3b   : > { %611 = vmatmul.mubr.bf16.gmra.mrb[4].mxu0 %v1217_v41 }
  0x3c   : > { %676 = vmatmul.mubr.bf16.gmra.mrb[4].mxu1 %v1218_v42  ;;  %618 = vmatprep.mubr.bf16.mxu0 %v1220_v43 }
  0x3d   : > { %683 = vmatprep.mubr.bf16.mxu1 %v1222_v44  ;;  %1146 = vmatpush3.bf16.msra.mxu0 %v1226_v40 }
  0x3e   : > { %1163 = vmatpush3.bf16.msra.mxu1 %v1226_v40  ;;  %1147 = vmatprep.subr.bf16.mxu0 %v1233_v45 }
  0x3f   : > { %1160 = vmatprep.subr.bf16.mxu1 %v1233_v45 }
  0x41   : > { %1148 = vmatpush3.bf16.msra.mxu0 %v1233_v45 }
  0x42   : > { %1164 = vmatpush3.bf16.msra.mxu1 %v1233_v45 }
  0x43   : > { %619 = vmatmul.mubr.bf16.gmra.mrb[8].mxu0 %v1224_v46 }
  0x44   : > { %684 = vmatmul.mubr.bf16.gmra.mrb[8].mxu1 %v1225_v47  ;;  %626 = vmatprep.mubr.bf16.mxu0 %v1227_v48 }
  0x45   : > { %691 = vmatprep.mubr.bf16.mxu1 %v1229_v49 }
  0x4b   : > { %627 = vmatmul.mubr.bf16.gmra.mrb[12].mxu0 %v1231_v50 }
  0x4c   : > { %692 = vmatmul.mubr.bf16.gmra.mrb[12].mxu1 %v1232_v51  ;;  %1149 = vmatprep.mubr.msk.bf16.mxu0 %vm557_vm0, %v1234_v52 }
  0x4d   : > { %1153 = vmatprep.mubr.msk.bf16.mxu1 %vm557_vm0, %v1235_v53 }
  0x53   : > { %1150 = vmatmul.mubr.msk.bf16.vlgmr.msra.gmra.mrb[16].mxu0 %vm557_vm0, %v1236_v54 }
  0x54   : > { %1154 = vmatmul.mubr.msk.bf16.vlgmr.msra.gmra.mrb[16].mxu1 %vm557_vm0, %v1237_v55 }
 0x106   : > { %v1069_v56 = vpop.f32.mrb[0].mxu0 }
 0x107   : > { %v1109_v57 = vpop.f32.mrb[0].mxu1  ;;  %v1070_v58 = vpop.f32.mrb[1].mxu0 }
 0x108   : > { %v1071_v59 = vadd.f32 %v1070_v58, %v1069_v56  ;;  %v1110_v60 = vpop.f32.mrb[1].mxu1  ;;  %v1072_v61 = vpop.f32.mrb[2].mxu0 }
 0x109   : > { %v1111_v62 = vadd.f32 %v1110_v60, %v1109_v57  ;;  %v1112_v63 = vpop.f32.mrb[2].mxu1  ;;  %v1073_v0 = vpop.f32.mrb[3].mxu0 }
 0x10a   : > { %v1074_v1 = vadd.f32 %v1073_v0, %v1072_v61  ;;  %v1113_v2 = vpop.f32.mrb[3].mxu1 }
 0x10b   : > { %v1114_v3 = vadd.f32 %v1113_v2, %v1112_v63  ;;  %v670_v4 = vadd.f32 %v1111_v62, %v1071_v59 }
 0x10d   : > { %v673_v5 = vadd.f32 %v1114_v3, %v1074_v1 }
 0x10e   : > { %v1075_v6 = vpop.f32.mrb[4].mxu0 }
 0x10f   : > { %v1115_v7 = vpop.f32.mrb[4].mxu1  ;;  %v1076_v8 = vpop.f32.mrb[5].mxu0 }
 0x110   : > { %v1077_v9 = vadd.f32 %v1076_v8, %v1075_v6  ;;  %v1116_v10 = vpop.f32.mrb[5].mxu1  ;;  %v1078_v11 = vpop.f32.mrb[6].mxu0 }
 0x111   : > { %v1117_v12 = vadd.f32 %v1116_v10, %v1115_v7  ;;  %v1118_v13 = vpop.f32.mrb[6].mxu1  ;;  %v1079_v14 = vpop.f32.mrb[7].mxu0 }
 0x112   : > { %v1080_v15 = vadd.f32 %v1079_v14, %v1078_v11  ;;  %v1119_v16 = vpop.f32.mrb[7].mxu1 }
 0x113   : > { %v1120_v17 = vadd.f32 %v1119_v16, %v1118_v13  ;;  %v678_v18 = vadd.f32 %v1117_v12, %v1077_v9 }
 0x115   : > { %v681_v19 = vadd.f32 %v1120_v17, %v1080_v15 }
 0x116   : > { %v1081_v20 = vpop.f32.mrb[8].mxu0 }
 0x117   : > { %v1121_v21 = vpop.f32.mrb[8].mxu1  ;;  %v1082_v22 = vpop.f32.mrb[9].mxu0 }
 0x118   : > { %v1083_v23 = vadd.f32 %v1082_v22, %v1081_v20  ;;  %v1122_v24 = vpop.f32.mrb[9].mxu1  ;;  %v1084_v25 = vpop.f32.mrb[10].mxu0 }
 0x119   : > { %v1123_v26 = vadd.f32 %v1122_v24, %v1121_v21  ;;  %v1124_v27 = vpop.f32.mrb[10].mxu1  ;;  %v1085_v28 = vpop.f32.mrb[11].mxu0 }
 0x11a   : > { %v1086_v29 = vadd.f32 %v1085_v28, %v1084_v25  ;;  %v1125_v30 = vpop.f32.mrb[11].mxu1 }
 0x11b   : > { %v1126_v31 = vadd.f32 %v1125_v30, %v1124_v27  ;;  %v686_v32 = vadd.f32 %v1123_v26, %v1083_v23 }
 0x11d   : > { %v689_v33 = vadd.f32 %v1126_v31, %v1086_v29 }
 0x11e   : > { %v1087_v34 = vpop.f32.mrb[12].mxu0 }
 0x11f   : > { %v1127_v35 = vpop.f32.mrb[12].mxu1  ;;  %v1088_v36 = vpop.f32.mrb[13].mxu0 }
 0x120   : > { %v1089_v37 = vadd.f32 %v1088_v36, %v1087_v34  ;;  %v1128_v38 = vpop.f32.mrb[13].mxu1  ;;  %v1090_v39 = vpop.f32.mrb[14].mxu0 }
 0x121   : > { %v1129_v40 = vadd.f32 %v1128_v38, %v1127_v35  ;;  %v1130_v41 = vpop.f32.mrb[14].mxu1  ;;  %v1091_v42 = vpop.f32.mrb[15].mxu0 }
 0x122   : > { %v1092_v43 = vadd.f32 %v1091_v42, %v1090_v39  ;;  %v1131_v44 = vpop.f32.mrb[15].mxu1 }
 0x123   : > { %v1132_v45 = vadd.f32 %v1131_v44, %v1130_v41  ;;  %v694_v46 = vadd.f32 %v1129_v40, %v1089_v37 }
 0x125   : > { %v697_v47 = vadd.f32 %v1132_v45, %v1092_v43 }
 0x126   : > { %v1151_v48 = vpop.f32.mrb[16].mxu0 }
 0x127   : > { %v1389_v49 = vadd.f32 %v1151_v48, %v678_v18  ;;  %v1155_v50 = vpop.f32.mrb[16].mxu1  ;;  %v734_v51 = vpop.f32.mrb[17].mxu0 }
 0x128   : > { %v1391_v52 = vadd.f32 %v1155_v50, %v694_v46  ;;  %v1393_v53 = vadd.f32 %v734_v51, %v670_v4  ;;  %v750_v54 = vpop.f32.mrb[17].mxu1  ;;  %v1152_v55 = vpop.f32.mrb[18].mxu0 }
 0x129   : > { %v1395_v56 = vadd.f32 %v750_v54, %v686_v32  ;;  %v1397_v57 = vadd.f32 %v1152_v55, %v681_v19  ;;  %v1156_v58 = vpop.f32.mrb[18].mxu1  ;;  %v737_v59 = vpop.f32.mrb[19].mxu0  ;;  %v772_v60 = vsel %vm765_vm1, %v1389_v49, 0.0  ;;  %v801_v6 = vmul.f32 %v1389_v49, %v1389_v49 }
 0x12a   : > { %v1401_v61 = vadd.f32 %v1156_v58, %v697_v47  ;;  %v1403_v62 = vadd.f32 %v737_v59, %v673_v5  ;;  %v753_v63 = vpop.f32.mrb[19].mxu1  ;;  %v784_v0 = vsel %vm765_vm1, %v1391_v52, 0.0  ;;  %773 = vadd.xlane.f32.xlu1 %v772_v60  ;;  %v766_v3 = vsel %vm765_vm1, %v1393_v53, 0.0 }
 0x12b   : > { %v1407_v1 = vadd.f32 %v753_v63, %v689_v33  ;;  %785 = vadd.xlane.f32.xlu0 %v784_v0  ;;  %v775_v2 = vsel %vm765_vm1, %v1397_v57, 0.0  ;;  %v778_v5 = vsel %vm765_vm1, %v1395_v56, 0.0  ;;  %v802_v8 = vmul.f32 %v1397_v57, %v1397_v57 }
 0x12c   : > { %v787_v4 = vsel %vm765_vm1, %v1401_v61, 0.0  ;;  %v813_v9 = vsel %vm765_vm1, %v801_v6, 0.0  ;;  %v800_v11 = vmul.f32 %v1403_v62, %v1403_v62  ;;  %v769_v12 = vsel %vm765_vm1, %v1403_v62, 0.0 }
 0x12d   : > { %v781_v7 = vsel %vm765_vm1, %v1407_v1, 0.0  ;;  %v816_v10 = vsel %vm765_vm1, %v802_v8, 0.0  ;;  %v799_v13 = vmul.f32 %v1393_v53, %v1393_v53  ;;  %v804_v15 = vmul.f32 %v1407_v1, %v1407_v1 }
 0x12e   : > { %776 = vadd.xlane.f32.xlu1 %v775_v2  ;;  %v810_v14 = vsel %vm765_vm1, %v800_v11, 0.0  ;;  %v803_v17 = vmul.f32 %v1395_v56, %v1395_v56  ;;  %v806_v19 = vmul.f32 %v1401_v61, %v1401_v61  ;;  %v805_v21 = vmul.f32 %v1391_v52, %v1391_v52 }
 0x12f   : > { %767 = vadd.xlane.f32.xlu0 %v766_v3  ;;  %v807_v16 = vsel %vm765_vm1, %v799_v13, 0.0  ;;  %v822_v18 = vsel %vm765_vm1, %v804_v15, 0.0 }
 0x130   : > { %v819_v20 = vsel %vm765_vm1, %v803_v17, 0.0  ;;  %v828_v22 = vsel %vm765_vm1, %v806_v19, 0.0  ;;  %v825_v23 = vsel %vm765_vm1, %v805_v21, 0.0 }
 0x132   : > { %788 = vadd.xlane.f32.xlu1 %v787_v4 }
 0x133   : > { %779 = vadd.xlane.f32.xlu0 %v778_v5 }
 0x136   : > { %782 = vadd.xlane.f32.xlu1 %v781_v7 }
 0x137   : > { %814 = vadd.xlane.f32.xlu0 %v813_v9 }
 0x13a   : > { %817 = vadd.xlane.f32.xlu1 %v816_v10 }
 0x13b   : > { %770 = vadd.xlane.f32.xlu0 %v769_v12 }
 0x13e   : > { %811 = vadd.xlane.f32.xlu1 %v810_v14 }
 0x13f   : > { %808 = vadd.xlane.f32.xlu0 %v807_v16 }
 0x142   : > { %823 = vadd.xlane.f32.xlu1 %v822_v18 }
 0x143   : > { %820 = vadd.xlane.f32.xlu0 %v819_v20 }
 0x146   : > { %829 = vadd.xlane.f32.xlu1 %v828_v22 }
 0x147   : > { %826 = vadd.xlane.f32.xlu0 %v825_v23 }
 0x1b7   : > { %v774_v24 = vpop.xlane.xlu1 %773 }
 0x1b8   : > { %v786_v25 = vpop.xlane.xlu0 %785  ;;  %v793_v30 = vmul.f32 0.25, %v774_v24 }
 0x1b9   : > { %v1465_v8 = vmul.f32 0.25, %v786_v25 }
 0x1ba   : > { %v841_v34 = vmul.f32 %v793_v30, %v793_v30  ;;  %v865_v24 = vsub.f32 %v1389_v49, %v793_v30 }
 0x1bb   : > { %v777_v26 = vpop.xlane.xlu1 %776  ;;  %v845_v21 = vmul.f32 %v1465_v8, %v1465_v8 }
 0x1bc   : > { %v768_v27 = vpop.xlane.xlu0 %767  ;;  %v1445_v32 = vmul.f32 0.25, %v777_v26 }
 0x1bd   : > { %v1449_v41 = vmul.f32 0.25, %v768_v27 }
 0x1be   : > { %v842_v38 = vmul.f32 %v1445_v32, %v1445_v32 }
 0x1bf   : > { %v789_v28 = vpop.xlane.xlu1 %788  ;;  %v839_v55 = vmul.f32 %v1449_v41, %v1449_v41 }
 0x1c0   : > { %v780_v29 = vpop.xlane.xlu0 %779  ;;  %v1461_v0 = vmul.f32 0.25, %v789_v28 }
 0x1c1   : > { %v1459_v58 = vmul.f32 0.25, %v780_v29 }
 0x1c2   : > { %v846_v17 = vmul.f32 %v1461_v0, %v1461_v0 }
 0x1c3   : > { %v783_v31 = vpop.xlane.xlu1 %782  ;;  %v843_v9 = vmul.f32 %v1459_v58, %v1459_v58 }
 0x1c4   : > { %v815_v33 = vpop.xlane.xlu0 %814  ;;  %v1453_v47 = vmul.f32 0.25, %v783_v31 }
 0x1c5   : > { %v833_v35 = vmul.f32 0.25, %v815_v33 }
 0x1c6   : > { %v844_v4 = vmul.f32 %v1453_v47, %v1453_v47 }
 0x1c7   : > { %v849_v36 = vsub.f32 %v833_v35, %v841_v34  ;;  %v818_v37 = vpop.xlane.xlu1 %817  ;;  %v866_v34 = vsub.f32 %v1397_v57, %v1445_v32 }
 0x1c8   : > { %v834_v39 = vmul.f32 0.25, %v818_v37  ;;  %v771_v40 = vpop.xlane.xlu0 %770 }
 0x1c9   : > { %v857_v42 = vmax.f32 %v849_v36, 0.0  ;;  %v1451_v43 = vmul.f32 0.25, %v771_v40 }
 0x1ca   : > { %v850_v44 = vsub.f32 %v834_v39, %v842_v38 }
 0x1cb   : > { %v873_v45 = vadd.f32 1e-05, %v857_v42  ;;  %v812_v46 = vpop.xlane.xlu1 %811  ;;  %v840_v50 = vmul.f32 %v1451_v43, %v1451_v43  ;;  %v864_v32 = vsub.f32 %v1403_v62, %v1451_v43  ;;  %v863_v42 = vsub.f32 %v1393_v53, %v1449_v41 }
 0x1cc   : > { %v858_v48 = vmax.f32 %v850_v44, 0.0  ;;  %v832_v51 = vmul.f32 0.25, %v812_v46  ;;  %v809_v54 = vpop.xlane.xlu0 %808  ;;  %v867_v62 = vsub.f32 %v1395_v56, %v1459_v58  ;;  %v869_v56 = vsub.f32 %v1391_v52, %v1465_v8 }
 0x1cd   : > { %1238 = vrsqrt.f32 %v873_v45  ;;  %v831_v59 = vmul.f32 0.25, %v809_v54 }
 0x1ce   : > { %v874_v60 = vadd.f32 1e-05, %v858_v48  ;;  %v848_v63 = vsub.f32 %v832_v51, %v840_v50  ;;  %v868_v50 = vsub.f32 %v1407_v1, %v1453_v47  ;;  %v870_v1 = vsub.f32 %v1401_v61, %v1461_v0 }
 0x1cf   : > { %v847_v2 = vsub.f32 %v831_v59, %v839_v55  ;;  %v824_v3 = vpop.xlane.xlu1 %823 }
 0x1d0   : > { %1240 = vrsqrt.f32 %v874_v60  ;;  %v856_v5 = vmax.f32 %v848_v63, 0.0  ;;  %v836_v6 = vmul.f32 0.25, %v824_v3  ;;  %v821_v7 = vpop.xlane.xlu0 %820 }
 0x1d1   : > { %v855_v10 = vmax.f32 %v847_v2, 0.0  ;;  %v835_v11 = vmul.f32 0.25, %v821_v7 }
 0x1d2   : > { %v872_v12 = vadd.f32 1e-05, %v856_v5  ;;  %v852_v13 = vsub.f32 %v836_v6, %v844_v4 }
 0x1d3   : > { %v871_v14 = vadd.f32 1e-05, %v855_v10  ;;  %v851_v15 = vsub.f32 %v835_v11, %v843_v9  ;;  %v830_v16 = vpop.xlane.xlu1 %829 }
 0x1d4   : > { %1242 = vrsqrt.f32 %v872_v12  ;;  %v860_v18 = vmax.f32 %v852_v13, 0.0  ;;  %v838_v19 = vmul.f32 0.25, %v830_v16  ;;  %v827_v20 = vpop.xlane.xlu0 %826 }
 0x1d5   : > { %1244 = vrsqrt.f32 %v871_v14  ;;  %v859_v22 = vmax.f32 %v851_v15, 0.0  ;;  %v837_v23 = vmul.f32 0.25, %v827_v20 }
 0x1d6   : > { %v876_v25 = vadd.f32 1e-05, %v860_v18  ;;  %v854_v26 = vsub.f32 %v838_v19, %v846_v17 }
 0x1d7   : > { %v1239_v27 = vpop.eup %1238  ;;  %v875_v28 = vadd.f32 1e-05, %v859_v22  ;;  %v853_v29 = vsub.f32 %v837_v23, %v845_v21 }
 0x1d8   : > { %v889_v31 = vmul.f32 %v1239_v27, %v865_v24  ;;  %1246 = vrsqrt.f32 %v876_v25  ;;  %v862_v33 = vmax.f32 %v854_v26, 0.0 }
 0x1d9   : > { %1248 = vrsqrt.f32 %v875_v28  ;;  %v861_v35 = vmax.f32 %v853_v29, 0.0 }
 0x1da   : > { %v1241_v36 = vpop.eup %1240  ;;  %vm897_vm2 = vcmp.ge.f32.partialorder %v889_v31, 0.0  ;;  %v905_v49 = vmul.f32 0.2, %v889_v31  ;;  %v878_v30 = vadd.f32 1e-05, %v862_v33 }
 0x1db   : > { %v890_v37 = vmul.f32 %v1241_v36, %v866_v34  ;;  %v877_v38 = vadd.f32 1e-05, %v861_v35 }
 0x1dc   : > { %v913_v39 = vsel %vm897_vm2, %v889_v31, %v905_v49  ;;  %1250 = vrsqrt.f32 %v878_v30 }
 0x1dd   : > { %921 = vst.msk [vmem:[%s1480_s4 + $0x10] sm:$0xff] %vm765_vm1, %v913_v39  ;;  %vm898_vm3 = vcmp.ge.f32.partialorder %v890_v37, 0.0  ;;  %v906_v57 = vmul.f32 0.2, %v890_v37  ;;  %1252 = vrsqrt.f32 %v877_v38 }
 0x1de   : > { %v1243_v40 = vpop.eup %1242 }
 0x1df   : > { %v1245_v44 = vpop.eup %1244  ;;  %v914_v45 = vsel %vm898_vm3, %v890_v37, %v906_v57  ;;  %v888_v46 = vmul.f32 %v1243_v40, %v864_v32 }
 0x1e0   : > { %922 = vst.msk [vmem:[%s1480_s4 + $0x18] sm:$0xff] %vm765_vm1, %v914_v45  ;;  %v887_v48 = vmul.f32 %v1245_v44, %v863_v42 }
 0x1e1   : > { %vm896_vm4 = vcmp.ge.f32.partialorder %v888_v46, 0.0  ;;  %v904_v51 = vmul.f32 0.2, %v888_v46 }
 0x1e2   : > { %v1247_v54 = vpop.eup %1246  ;;  %vm895_vm5 = vcmp.ge.f32.partialorder %v887_v48, 0.0  ;;  %v903_v43 = vmul.f32 0.2, %v887_v48 }
 0x1e3   : > { %v1249_v53 = vpop.eup %1248  ;;  %v912_v41 = vsel %vm896_vm4, %v888_v46, %v904_v51  ;;  %v892_v55 = vmul.f32 %v1247_v54, %v868_v50 }
 0x1e4   : > { %920 = vst.msk [vmem:[%s1480_s4 + $0x8] sm:$0xff] %vm765_vm1, %v912_v41  ;;  %v911_v59 = vsel %vm895_vm5, %v887_v48, %v903_v43  ;;  %v891_v60 = vmul.f32 %v1249_v53, %v867_v62 }
 0x1e5   : > { %919 = vst.msk [vmem:[%s1480_s4] sm:$0xff] %vm765_vm1, %v911_v59  ;;  %vm900_vm6 = vcmp.ge.f32.partialorder %v892_v55, 0.0  ;;  %v908_v47 = vmul.f32 0.2, %v892_v55 }
 0x1e6   : > { %v1251_v63 = vpop.eup %1250  ;;  %vm899_vm7 = vcmp.ge.f32.partialorder %v891_v60, 0.0  ;;  %v907_v58 = vmul.f32 0.2, %v891_v60 }
 0x1e7   : > { %v1253_v2 = vpop.eup %1252  ;;  %v916_v3 = vsel %vm900_vm6, %v892_v55, %v908_v47  ;;  %v894_v4 = vmul.f32 %v1251_v63, %v870_v1 }
 0x1e8   : > { %924 = vst.msk [vmem:[%s1480_s4 + $0x28] sm:$0xff] %vm765_vm1, %v916_v3  ;;  %v915_v5 = vsel %vm899_vm7, %v891_v60, %v907_v58  ;;  %v893_v6 = vmul.f32 %v1253_v2, %v869_v56 }
 0x1e9   : > { %923 = vst.msk [vmem:[%s1480_s4 + $0x20] sm:$0xff] %vm765_vm1, %v915_v5  ;;  %vm902_vm8 = vcmp.ge.f32.partialorder %v894_v4, 0.0  ;;  %v910_v61 = vmul.f32 0.2, %v894_v4 }
 0x1ea   : > { %vm901_vm9 = vcmp.ge.f32.partialorder %v893_v6, 0.0  ;;  %v909_v0 = vmul.f32 0.2, %v893_v6 }
 0x1eb   : > { %v918_v7 = vsel %vm902_vm8, %v894_v4, %v910_v61 }
 0x1ec   : > { %926 = vst.msk [vmem:[%s1480_s4 + $0x38] sm:$0xff] %vm765_vm1, %v918_v7  ;;  %v917_v52 = vsel %vm901_vm9, %v893_v6, %v909_v0 }
 0x1ed   : > { %925 = vst.msk [vmem:[%s1480_s4 + $0x30] sm:$0xff] %vm765_vm1, %v917_v52 }
 0x1ee PF: > { %s12_s9 = sadd.s32 1, %s1260_s9  }
 0x1ef   : > { %p9_p4 = scmp.ge.s32.totalorder %s12_s9, 10  }
 0x1f1   :  { %11 = sbr.rel (!%p9_p4) target bundleno = 1 (0x1), region = 58 }

// kernel: run.34
= control target key start
LH: loop header
LB: loop body
LE: loop exit
PB: predicated region body
PF: predicated region fallthrough
CT: control target
= control target key end

     0   :  { %s1700_s9 = smov 0   ;;  %s2062_s0 = inlined_call_operand.vmem [shape: bf16[128,576], index: 0, kind: input, shape index: {}]   ;;  %s2063_s1 = inlined_call_operand.vmem [shape: bf16[8,576,1], index: 1, kind: input, shape index: {}]   ;;  %s2064_s2 = inlined_call_operand.vmem [shape: f32[8,128,1], index: 2, kind: output, shape index: {}]  }
   0x1 LB: > { %s1277_s10 = sadd.s32 4294967295, %s1683_s9   ;;  %p1281_p0 = scmp.ge.s32.totalorder %s1683_s9, 1  ;;  %s1683_s9 = sphi %s1700_s9, %s12_s9  }
   0x2   : > { %p112_p1 = scmp.lt.s32.totalorder %s1683_s9, 9 }
   0x4   : > { %p113_p2 = pnand %p1281_p0, %p112_p1 }
   0x5   : > { %p134_p3 = scmp.lt.s32.totalorder (!%p113_p2), %s1277_s10, 7  ;;  %v1587_v0 = vld [vmem:[%s2062_s0 + $0x4] ss:$20 sps:$4 sm:$0xff] (!%p113_p2)   ;;  %v1590_v1 = vld [vmem:[%s2062_s0 + $0xc] ss:$20 sps:$4 sm:$0xff] (!%p113_p2)   ;;  %vm681_vm0 = vcmask (!%p113_p2), 523264  }
   0x6   : > { %116 = sbr.rel (%p113_p2) target bundleno = 387 (0x183), region = 28  ;;  %738 = vmatprep.mubr.bf16.mxu0 (!%p113_p2), %v1587_v0  ;;  %835 = vmatprep.mubr.bf16.mxu1 (!%p113_p2), %v1590_v1  ;;  %v1585_v32 = vld [vmem:[%s2062_s0] ss:$20 sps:$4 sm:$0xff] (!%p113_p2)   ;;  %v1588_v34 = vld [vmem:[%s2062_s0 + $0x8] ss:$20 sps:$4 sm:$0xff] (!%p113_p2)   ;;  %vm1205_vm1 = vcmask (!%p113_p2), 7168  }
   0x7   : > { %v1592_v37 = vld [vmem:[%s2062_s0 + $0x2c] ss:$20 sps:$4 sm:$0xff] (!%p113_p2)   ;;  %v1594_v38 = vld [vmem:[%s2062_s0 + $0x34] ss:$20 sps:$4 sm:$0xff] (!%p113_p2)   ;;  %v1597_v41 = vld [vmem:[%s2062_s0 + $0x30] ss:$20 sps:$4 sm:$0xff] (!%p113_p2)  }
   0x8   : > { %v1596_v40 = vld [vmem:[%s2062_s0 + $0x28] ss:$20 sps:$4 sm:$0xff] (!%p113_p2)   ;;  %v1602_v45 = vld [vmem:[%s2062_s0 + $0x50] ss:$20 sps:$4 sm:$0xff] (!%p113_p2)   ;;  %v1603_v46 = vld [vmem:[%s2062_s0 + $0x58] ss:$20 sps:$4 sm:$0xff] (!%p113_p2)  }
   0x9   : > { %v1598_v42 = vld [vmem:[%s2062_s0 + $0x54] ss:$20 sps:$4 sm:$0xff] (!%p113_p2)   ;;  %v1600_v43 = vld [vmem:[%s2062_s0 + $0x5c] ss:$20 sps:$4 sm:$0xff] (!%p113_p2)   ;;  %v1607_v49 = vld [vmem:[%s2062_s0 + $0x84] ss:$20 sps:$4 sm:$0xff] (!%p113_p2)  }
   0xa   : > { %v1605_v48 = vld [vmem:[%s2062_s0 + $0x7c] ss:$20 sps:$4 sm:$0xff] (!%p113_p2)   ;;  %v1609_v50 = vld [vmem:[%s2062_s0 + $0x78] ss:$20 sps:$4 sm:$0xff] (!%p113_p2)   ;;  %v1610_v51 = vld [vmem:[%s2062_s0 + $0x80] ss:$20 sps:$4 sm:$0xff] (!%p113_p2)  }
   0xb   : > { %v1611_v52 = vld [vmem:[%s2062_s0 + $0xa4] ss:$20 sps:$4 sm:$0xff] (!%p113_p2)   ;;  %v1613_v53 = vld [vmem:[%s2062_s0 + $0xac] ss:$20 sps:$4 sm:$0xff] (!%p113_p2)   ;;  %v1616_v55 = vld [vmem:[%s2062_s0 + $0xa8] ss:$20 sps:$4 sm:$0xff] (!%p113_p2)  }
   0xc   : > { %v1615_v54 = vld [vmem:[%s2062_s0 + $0xa0] ss:$20 sps:$4 sm:$0xff] (!%p113_p2)   ;;  %v1622_v58 = vld [vmem:[%s2062_s0 + $0xc8] ss:$20 sps:$4 sm:$0xff] (!%p113_p2)   ;;  %v1623_v59 = vld [vmem:[%s2062_s0 + $0xd0] ss:$20 sps:$4 sm:$0xff] (!%p113_p2)  }
   0xd   : > { %s2066_s10 = smov (!%p134_p3, %s1277_s10), 7  ;;  %v1618_v56 = vld [vmem:[%s2062_s0 + $0xcc] ss:$20 sps:$4 sm:$0xff]   ;;  %v1620_v57 = vld [vmem:[%s2062_s0 + $0xd4] ss:$20 sps:$4 sm:$0xff]  }
   0xe   : > { %s1544_s15 = smul.u32 288, %s2066_s10  ;;  %v1624_v60 = vld [vmem:[%s2062_s0 + $0xf4] ss:$20 sps:$4 sm:$0xff]   ;;  %v1626_v61 = vld [vmem:[%s2062_s0 + $0xfc] ss:$20 sps:$4 sm:$0xff]   ;;  %s1371_s17 = sshll.u32 %s2066_s10, 7 }
   0xf   : > { %v1628_v62 = vld [vmem:[%s2062_s0 + $0xf0] ss:$20 sps:$4 sm:$0xff]   ;;  %v1629_v63 = vld [vmem:[%s2062_s0 + $0xf8] ss:$20 sps:$4 sm:$0xff]  }
  0x10   : > { %s1720_s18 = scalar_lea.vmem %s2063_s1, %s1544_s15  ;;  %v1631_v0 = vld [vmem:[%s2062_s0 + $0x11c] ss:$20 sps:$4 sm:$0xff]   ;;  %v1633_v1 = vld [vmem:[%s2062_s0 + $0x124] ss:$20 sps:$4 sm:$0xff]  }
  0x11   : > { %v1553_v2 = vld [vmem:[%s1720_s18 + $0x40] sm:$0xff]   ;;  %v1557_v6 = vld [vmem:[%s1720_s18 + $0x48] sm:$0xff]   ;;  %v1561_v10 = vld [vmem:[%s1720_s18 + $0x50] sm:$0xff]  }
  0x12   : > { %v1554_v3 = vld [vmem:[%s1720_s18 + $0xc0] sm:$0xff]   ;;  %1372 = vmatprep.subr.bf16.mxu0 %v1553_v2  ;;  %v1558_v7 = vld [vmem:[%s1720_s18 + $0xc8] sm:$0xff]   ;;  %v1562_v11 = vld [vmem:[%s1720_s18 + $0xd0] sm:$0xff]  }
  0x13   : > { %v1555_v4 = vld [vmem:[%s1720_s18] sm:$0xff]   ;;  %1436 = vmatprep.subr.bf16.mxu1 %v1554_v3  ;;  %v1559_v8 = vld [vmem:[%s1720_s18 + $0x8] sm:$0xff]   ;;  %v1563_v12 = vld [vmem:[%s1720_s18 + $0x10] sm:$0xff]  }
  0x14   : > { %v1556_v5 = vld [vmem:[%s1720_s18 + $0x80] sm:$0xff]   ;;  %1373 = vmatpush3.bf16.msra.mxu0 %v1555_v4  ;;  %v1560_v9 = vld [vmem:[%s1720_s18 + $0x88] sm:$0xff]   ;;  %v1564_v13 = vld [vmem:[%s1720_s18 + $0x90] sm:$0xff]  }
  0x15   : > { %1437 = vmatpush3.bf16.msra.mxu1 %v1556_v5  ;;  %1374 = vmatprep.subr.bf16.mxu0 %v1557_v6  ;;  %v1565_v14 = vld [vmem:[%s1720_s18 + $0x58] sm:$0xff]   ;;  %v1569_v18 = vld [vmem:[%s1720_s18 + $0x60] sm:$0xff]   ;;  %v1573_v22 = vld [vmem:[%s1720_s18 + $0x68] sm:$0xff]  }
  0x16   : > { %1438 = vmatprep.subr.bf16.mxu1 %v1558_v7  ;;  %v1566_v15 = vld [vmem:[%s1720_s18 + $0xd8] sm:$0xff]   ;;  %v1570_v19 = vld [vmem:[%s1720_s18 + $0xe0] sm:$0xff]   ;;  %v1574_v23 = vld [vmem:[%s1720_s18 + $0xe8] sm:$0xff]  }
  0x17   : > { %v1567_v16 = vld [vmem:[%s1720_s18 + $0x18] sm:$0xff]   ;;  %v1571_v20 = vld [vmem:[%s1720_s18 + $0x20] sm:$0xff]   ;;  %v1575_v24 = vld [vmem:[%s1720_s18 + $0x28] sm:$0xff]  }
  0x18   : > { %1375 = vmatpush3.bf16.msra.mxu0 %v1559_v8  ;;  %v1568_v17 = vld [vmem:[%s1720_s18 + $0x98] sm:$0xff]   ;;  %v1572_v21 = vld [vmem:[%s1720_s18 + $0xa0] sm:$0xff]   ;;  %v1576_v25 = vld [vmem:[%s1720_s18 + $0xa8] sm:$0xff]  }
  0x19   : > { %1439 = vmatpush3.bf16.msra.mxu1 %v1560_v9  ;;  %1376 = vmatprep.subr.bf16.mxu0 %v1561_v10  ;;  %v1577_v26 = vld [vmem:[%s1720_s18 + $0x70] sm:$0xff]   ;;  %v1581_v30 = vld [vmem:[%s1720_s18 + $0x78] sm:$0xff]   ;;  %v1591_v36 = vld [vmem:[%s1720_s18 + $0x100] sm:$0xff]  }
  0x1a   : > { %1440 = vmatprep.subr.bf16.mxu1 %v1562_v11  ;;  %v1578_v27 = vld [vmem:[%s1720_s18 + $0xf0] sm:$0xff]   ;;  %v1582_v31 = vld [vmem:[%s1720_s18 + $0xf8] sm:$0xff]   ;;  %v1604_v39 = vld [vmem:[%s1720_s18 + $0x108] sm:$0xff]  }
  0x1b   : > { %v1579_v28 = vld [vmem:[%s1720_s18 + $0x30] sm:$0xff]   ;;  %v1583_v33 = vld [vmem:[%s1720_s18 + $0x38] sm:$0xff]  }
  0x1c   : > { %1377 = vmatpush3.bf16.msra.mxu0 %v1563_v12  ;;  %v1580_v29 = vld [vmem:[%s1720_s18 + $0xb0] sm:$0xff]   ;;  %v1584_v35 = vld [vmem:[%s1720_s18 + $0xb8] sm:$0xff]  }
  0x1d   : > { %1441 = vmatpush3.bf16.msra.mxu1 %v1564_v13  ;;  %1378 = vmatprep.subr.bf16.mxu0 %v1565_v14  ;;  %v1617_v44 = vld [vmem:[%s1720_s18 + $0x110] sm:$0xff]   ;;  %v1630_v47 = vld [vmem:[%s1720_s18 + $0x118] sm:$0xff]   ;;  %s1996_s18 = scalar_lea.vmem %s2064_s2, %s1371_s17 }
  0x1e   : > { %1442 = vmatprep.subr.bf16.mxu1 %v1566_v15  ;;  %v1635_v2 = vld [vmem:[%s2062_s0 + $0x118] ss:$20 sps:$4 sm:$0xff]   ;;  %v1636_v3 = vld [vmem:[%s2062_s0 + $0x120] ss:$20 sps:$4 sm:$0xff]   ;;  %v1637_v4 = vld [vmem:[%s2062_s0 + $0x10] ss:$20 sps:$4 sm:$0xff]  }
  0x1f   : > { %v1638_v5 = vld [vmem:[%s2062_s0 + $0xb0] ss:$20 sps:$4 sm:$0xff]   ;;  %v1639_v6 = vld [vmem:[%s2062_s0 + $0x38] ss:$20 sps:$4 sm:$0xff]   ;;  %v1641_v8 = vld [vmem:[%s2062_s0 + $0x60] ss:$20 sps:$4 sm:$0xff]  }
  0x20   : > { %1379 = vmatpush3.bf16.msra.mxu0 %v1567_v16  ;;  %v1640_v7 = vld [vmem:[%s2062_s0 + $0xd8] ss:$20 sps:$4 sm:$0xff]   ;;  %v1642_v9 = vld [vmem:[%s2062_s0 + $0x100] ss:$20 sps:$4 sm:$0xff]   ;;  %v1643_v10 = vld [vmem:[%s2062_s0 + $0x88] ss:$20 sps:$4 sm:$0xff]  }
  0x21   : > { %1443 = vmatpush3.bf16.msra.mxu1 %v1568_v17  ;;  %1380 = vmatprep.subr.bf16.mxu0 %v1569_v18  ;;  %v1644_v11 = vld [vmem:[%s2062_s0 + $0x128] ss:$20 sps:$4 sm:$0xff]  }
  0x22   : > { %1444 = vmatprep.subr.bf16.mxu1 %v1570_v19 }
  0x24   : > { %1381 = vmatpush3.bf16.msra.mxu0 %v1571_v20 }
  0x25   : > { %1445 = vmatpush3.bf16.msra.mxu1 %v1572_v21  ;;  %1382 = vmatprep.subr.bf16.mxu0 %v1573_v22 }
  0x26   : > { %1446 = vmatprep.subr.bf16.mxu1 %v1574_v23 }
  0x28   : > { %1383 = vmatpush3.bf16.msra.mxu0 %v1575_v24 }
  0x29   : > { %1447 = vmatpush3.bf16.msra.mxu1 %v1576_v25  ;;  %1384 = vmatprep.subr.bf16.mxu0 %v1577_v26 }
  0x2a   : > { %1448 = vmatprep.subr.bf16.mxu1 %v1578_v27 }
  0x2c   : > { %1385 = vmatpush3.bf16.msra.mxu0 %v1579_v28 }
  0x2d   : > { %1449 = vmatpush3.bf16.msra.mxu1 %v1580_v29  ;;  %1386 = vmatprep.subr.bf16.mxu0 %v1581_v30 }
  0x2e   : > { %1450 = vmatprep.subr.bf16.mxu1 %v1582_v31 }
  0x30   : > { %1387 = vmatpush3.bf16.msra.mxu0 %v1583_v33 }
  0x31   : > { %1451 = vmatpush3.bf16.msra.mxu1 %v1584_v35  ;;  %1512 = vmatprep.subr.bf16.mxu0 %v1591_v36 }
  0x32   : > { %1536 = vmatprep.subr.bf16.mxu1 %v1591_v36 }
  0x33   : > { %739 = vmatmul.mubr.bf16.vlgmr.msra.gmra.mrb[0].mxu0 %v1585_v32 }
  0x34   : > { %836 = vmatmul.mubr.bf16.vlgmr.msra.gmra.mrb[0].mxu1 %v1588_v34  ;;  %1513 = vmatpush3.bf16.msra.mxu0 %v1591_v36 }
  0x35   : > { %1540 = vmatpush3.bf16.msra.mxu1 %v1591_v36  ;;  %746 = vmatprep.mubr.bf16.mxu0 %v1592_v37 }
  0x36   : > { %843 = vmatprep.mubr.bf16.mxu1 %v1594_v38  ;;  %1514 = vmatprep.subr.bf16.mxu0 %v1604_v39 }
  0x37   : > { %1537 = vmatprep.subr.bf16.mxu1 %v1604_v39 }
  0x38   : > { %1515 = vmatpush3.bf16.msra.mxu0 %v1604_v39 }
  0x39   : > { %1541 = vmatpush3.bf16.msra.mxu1 %v1604_v39  ;;  %1516 = vmatprep.subr.bf16.mxu0 %v1617_v44 }
  0x3a   : > { %1538 = vmatprep.subr.bf16.mxu1 %v1617_v44 }
  0x3b   : > { %747 = vmatmul.mubr.bf16.gmra.mrb[4].mxu0 %v1596_v40 }
  0x3c   : > { %844 = vmatmul.mubr.bf16.gmra.mrb[4].mxu1 %v1597_v41  ;;  %754 = vmatprep.mubr.bf16.mxu0 %v1598_v42 }
  0x3d   : > { %851 = vmatprep.mubr.bf16.mxu1 %v1600_v43  ;;  %1517 = vmatpush3.bf16.msra.mxu0 %v1617_v44 }
  0x3e   : > { %1542 = vmatpush3.bf16.msra.mxu1 %v1617_v44  ;;  %1518 = vmatprep.subr.bf16.mxu0 %v1630_v47 }
  0x3f   : > { %1539 = vmatprep.subr.bf16.mxu1 %v1630_v47 }
  0x41   : > { %1519 = vmatpush3.bf16.msra.mxu0 %v1630_v47 }
  0x42   : > { %1543 = vmatpush3.bf16.msra.mxu1 %v1630_v47 }
  0x43   : > { %755 = vmatmul.mubr.bf16.gmra.mrb[8].mxu0 %v1602_v45 }
  0x44   : > { %852 = vmatmul.mubr.bf16.gmra.mrb[8].mxu1 %v1603_v46  ;;  %762 = vmatprep.mubr.bf16.mxu0 %v1605_v48 }
  0x45   : > { %859 = vmatprep.mubr.bf16.mxu1 %v1607_v49 }
  0x4b   : > { %763 = vmatmul.mubr.bf16.gmra.mrb[12].mxu0 %v1609_v50 }
  0x4c   : > { %860 = vmatmul.mubr.bf16.gmra.mrb[12].mxu1 %v1610_v51  ;;  %770 = vmatprep.mubr.bf16.mxu0 %v1611_v52 }
  0x4d   : > { %867 = vmatprep.mubr.bf16.mxu1 %v1613_v53 }
  0x53   : > { %771 = vmatmul.mubr.bf16.gmra.mrb[16].mxu0 %v1615_v54 }
  0x54   : > { %868 = vmatmul.mubr.bf16.gmra.mrb[16].mxu1 %v1616_v55  ;;  %778 = vmatprep.mubr.bf16.mxu0 %v1618_v56 }
  0x55   : > { %875 = vmatprep.mubr.bf16.mxu1 %v1620_v57 }
  0x5b   : > { %779 = vmatmul.mubr.bf16.gmra.mrb[20].mxu0 %v1622_v58 }
  0x5c   : > { %876 = vmatmul.mubr.bf16.gmra.mrb[20].mxu1 %v1623_v59  ;;  %786 = vmatprep.mubr.bf16.mxu0 %v1624_v60 }
  0x5d   : > { %883 = vmatprep.mubr.bf16.mxu1 %v1626_v61 }
  0x63   : > { %787 = vmatmul.mubr.bf16.gmra.mrb[24].mxu0 %v1628_v62 }
  0x64   : > { %884 = vmatmul.mubr.bf16.gmra.mrb[24].mxu1 %v1629_v63  ;;  %794 = vmatprep.mubr.bf16.mxu0 %v1631_v0 }
  0x65   : > { %891 = vmatprep.mubr.bf16.mxu1 %v1633_v1 }
  0x6b   : > { %795 = vmatmul.mubr.bf16.gmra.mrb[28].mxu0 %v1635_v2 }
  0x6c   : > { %892 = vmatmul.mubr.bf16.gmra.mrb[28].mxu1 %v1636_v3  ;;  %1520 = vmatprep.mubr.msk.bf16.mxu0 %vm681_vm0, %v1637_v4 }
  0x6d   : > { %1528 = vmatprep.mubr.msk.bf16.mxu1 %vm681_vm0, %v1638_v5 }
  0x73   : > { %1521 = vmatmul.mubr.msk.bf16.vlgmr.msra.gmra.mrb[32].mxu0 %vm681_vm0, %v1639_v6 }
  0x74   : > { %1529 = vmatmul.mubr.msk.bf16.vlgmr.msra.gmra.mrb[32].mxu1 %vm681_vm0, %v1640_v7  ;;  %1524 = vmatprep.mubr.msk.bf16.mxu0 %vm681_vm0, %v1641_v8 }
  0x75   : > { %1532 = vmatprep.mubr.msk.bf16.mxu1 %vm681_vm0, %v1642_v9 }
  0x7b   : > { %1525 = vmatmul.mubr.msk.bf16.gmra.mrb[36].mxu0 %vm681_vm0, %v1643_v10 }
  0x7c   : > { %1533 = vmatmul.mubr.msk.bf16.gmra.mrb[36].mxu1 %vm681_vm0, %v1644_v11 }
 0x106   : > { %v1388_v12 = vpop.f32.mrb[0].mxu0 }
 0x107   : > { %v1452_v13 = vpop.f32.mrb[0].mxu1  ;;  %v1389_v14 = vpop.f32.mrb[1].mxu0 }
 0x108   : > { %v1390_v15 = vadd.f32 %v1389_v14, %v1388_v12  ;;  %v1453_v16 = vpop.f32.mrb[1].mxu1  ;;  %v1391_v17 = vpop.f32.mrb[2].mxu0 }
 0x109   : > { %v1454_v18 = vadd.f32 %v1453_v16, %v1452_v13  ;;  %v1455_v19 = vpop.f32.mrb[2].mxu1  ;;  %v1392_v20 = vpop.f32.mrb[3].mxu0 }
 0x10a   : > { %v1393_v21 = vadd.f32 %v1392_v20, %v1391_v17  ;;  %v1456_v22 = vpop.f32.mrb[3].mxu1 }
 0x10b   : > { %v1457_v23 = vadd.f32 %v1456_v22, %v1455_v19  ;;  %v1880_v24 = vadd.f32 %v1454_v18, %v1390_v15 }
 0x10d   : > { %v1882_v25 = vadd.f32 %v1457_v23, %v1393_v21 }
 0x10e   : > { %v1394_v26 = vpop.f32.mrb[4].mxu0 }
 0x10f   : > { %v1458_v27 = vpop.f32.mrb[4].mxu1  ;;  %v1395_v28 = vpop.f32.mrb[5].mxu0 }
 0x110   : > { %v1396_v29 = vadd.f32 %v1395_v28, %v1394_v26  ;;  %v1459_v30 = vpop.f32.mrb[5].mxu1  ;;  %v1397_v31 = vpop.f32.mrb[6].mxu0 }
 0x111   : > { %v1460_v32 = vadd.f32 %v1459_v30, %v1458_v27  ;;  %v1461_v33 = vpop.f32.mrb[6].mxu1  ;;  %v1398_v34 = vpop.f32.mrb[7].mxu0 }
 0x112   : > { %v1399_v35 = vadd.f32 %v1398_v34, %v1397_v31  ;;  %v1462_v36 = vpop.f32.mrb[7].mxu1 }
 0x113   : > { %v1463_v37 = vadd.f32 %v1462_v36, %v1461_v33  ;;  %v1884_v38 = vadd.f32 %v1460_v32, %v1396_v29 }
 0x115   : > { %v1886_v39 = vadd.f32 %v1463_v37, %v1399_v35 }
 0x116   : > { %v1400_v40 = vpop.f32.mrb[8].mxu0 }
 0x117   : > { %v1464_v41 = vpop.f32.mrb[8].mxu1  ;;  %v1401_v42 = vpop.f32.mrb[9].mxu0 }
 0x118   : > { %v1402_v43 = vadd.f32 %v1401_v42, %v1400_v40  ;;  %v1465_v44 = vpop.f32.mrb[9].mxu1  ;;  %v1403_v45 = vpop.f32.mrb[10].mxu0 }
 0x119   : > { %v1466_v46 = vadd.f32 %v1465_v44, %v1464_v41  ;;  %v1467_v47 = vpop.f32.mrb[10].mxu1  ;;  %v1404_v48 = vpop.f32.mrb[11].mxu0 }
 0x11a   : > { %v1405_v49 = vadd.f32 %v1404_v48, %v1403_v45  ;;  %v1468_v50 = vpop.f32.mrb[11].mxu1 }
 0x11b   : > { %v1469_v51 = vadd.f32 %v1468_v50, %v1467_v47  ;;  %v1888_v52 = vadd.f32 %v1466_v46, %v1402_v43 }
 0x11d   : > { %v1890_v53 = vadd.f32 %v1469_v51, %v1405_v49 }
 0x11e   : > { %v1406_v54 = vpop.f32.mrb[12].mxu0 }
 0x11f   : > { %v1470_v55 = vpop.f32.mrb[12].mxu1  ;;  %v1407_v56 = vpop.f32.mrb[13].mxu0 }
 0x120   : > { %v1408_v57 = vadd.f32 %v1407_v56, %v1406_v54  ;;  %v1471_v58 = vpop.f32.mrb[13].mxu1  ;;  %v1409_v59 = vpop.f32.mrb[14].mxu0 }
 0x121   : > { %v1472_v60 = vadd.f32 %v1471_v58, %v1470_v55  ;;  %v1473_v61 = vpop.f32.mrb[14].mxu1  ;;  %v1410_v62 = vpop.f32.mrb[15].mxu0 }
 0x122   : > { %v1411_v63 = vadd.f32 %v1410_v62, %v1409_v59  ;;  %v1474_v0 = vpop.f32.mrb[15].mxu1 }
 0x123   : > { %v1475_v1 = vadd.f32 %v1474_v0, %v1473_v61  ;;  %v1892_v2 = vadd.f32 %v1472_v60, %v1408_v57 }
 0x125   : > { %v1894_v3 = vadd.f32 %v1475_v1, %v1411_v63 }
 0x126   : > { %v1412_v4 = vpop.f32.mrb[16].mxu0 }
 0x127   : > { %v1476_v5 = vpop.f32.mrb[16].mxu1  ;;  %v1413_v6 = vpop.f32.mrb[17].mxu0 }
 0x128   : > { %v1414_v7 = vadd.f32 %v1413_v6, %v1412_v4  ;;  %v1477_v8 = vpop.f32.mrb[17].mxu1  ;;  %v1415_v9 = vpop.f32.mrb[18].mxu0 }
 0x129   : > { %v1478_v10 = vadd.f32 %v1477_v8, %v1476_v5  ;;  %v1479_v11 = vpop.f32.mrb[18].mxu1  ;;  %v1416_v12 = vpop.f32.mrb[19].mxu0 }
 0x12a   : > { %v1417_v13 = vadd.f32 %v1416_v12, %v1415_v9  ;;  %v1480_v14 = vpop.f32.mrb[19].mxu1 }
 0x12b   : > { %v1481_v15 = vadd.f32 %v1480_v14, %v1479_v11  ;;  %v870_v16 = vadd.f32 %v1478_v10, %v1414_v7 }
 0x12d   : > { %v1896_v17 = vadd.f32 %v1481_v15, %v1417_v13 }
 0x12e   : > { %v1418_v18 = vpop.f32.mrb[20].mxu0 }
 0x12f   : > { %v1482_v19 = vpop.f32.mrb[20].mxu1  ;;  %v1419_v20 = vpop.f32.mrb[21].mxu0 }
 0x130   : > { %v1420_v21 = vadd.f32 %v1419_v20, %v1418_v18  ;;  %v1483_v22 = vpop.f32.mrb[21].mxu1  ;;  %v1421_v23 = vpop.f32.mrb[22].mxu0 }
 0x131   : > { %v1484_v26 = vadd.f32 %v1483_v22, %v1482_v19  ;;  %v1485_v27 = vpop.f32.mrb[22].mxu1  ;;  %v1422_v28 = vpop.f32.mrb[23].mxu0 }
 0x132   : > { %v1423_v29 = vadd.f32 %v1422_v28, %v1421_v23  ;;  %v1486_v30 = vpop.f32.mrb[23].mxu1 }
 0x133   : > { %v1487_v31 = vadd.f32 %v1486_v30, %v1485_v27  ;;  %v878_v32 = vadd.f32 %v1484_v26, %v1420_v21 }
 0x135   : > { %v881_v33 = vadd.f32 %v1487_v31, %v1423_v29 }
 0x136   : > { %v1424_v34 = vpop.f32.mrb[24].mxu0 }
 0x137   : > { %v1488_v35 = vpop.f32.mrb[24].mxu1  ;;  %v1425_v36 = vpop.f32.mrb[25].mxu0 }
 0x138   : > { %v1426_v37 = vadd.f32 %v1425_v36, %v1424_v34  ;;  %v1489_v40 = vpop.f32.mrb[25].mxu1  ;;  %v1427_v41 = vpop.f32.mrb[26].mxu0 }
 0x139   : > { %v1490_v42 = vadd.f32 %v1489_v40, %v1488_v35  ;;  %v1491_v43 = vpop.f32.mrb[26].mxu1  ;;  %v1428_v44 = vpop.f32.mrb[27].mxu0 }
 0x13a   : > { %v1429_v45 = vadd.f32 %v1428_v44, %v1427_v41  ;;  %v1492_v46 = vpop.f32.mrb[27].mxu1 }
 0x13b   : > { %v1493_v47 = vadd.f32 %v1492_v46, %v1491_v43  ;;  %v1898_v48 = vadd.f32 %v1490_v42, %v1426_v37 }
 0x13d   : > { %v1900_v49 = vadd.f32 %v1493_v47, %v1429_v45 }
 0x13e   : > { %v1430_v50 = vpop.f32.mrb[28].mxu0 }
 0x13f   : > { %v1494_v51 = vpop.f32.mrb[28].mxu1  ;;  %v1431_v54 = vpop.f32.mrb[29].mxu0 }
 0x140   : > { %v1432_v55 = vadd.f32 %v1431_v54, %v1430_v50  ;;  %v1495_v56 = vpop.f32.mrb[29].mxu1  ;;  %v1433_v57 = vpop.f32.mrb[30].mxu0 }
 0x141   : > { %v1496_v58 = vadd.f32 %v1495_v56, %v1494_v51  ;;  %v1497_v59 = vpop.f32.mrb[30].mxu1  ;;  %v1434_v60 = vpop.f32.mrb[31].mxu0 }
 0x142   : > { %v1435_v61 = vadd.f32 %v1434_v60, %v1433_v57  ;;  %v1498_v62 = vpop.f32.mrb[31].mxu1 }
 0x143   : > { %v1499_v63 = vadd.f32 %v1498_v62, %v1497_v59  ;;  %v894_v0 = vadd.f32 %v1496_v58, %v1432_v55 }
 0x145   : > { %v1902_v1 = vadd.f32 %v1499_v63, %v1435_v61 }
 0x146   : > { %v1522_v4 = vpop.f32.mrb[32].mxu0 }
 0x147   : > { %v1905_v5 = vadd.f32 %v1522_v4, %v1884_v38  ;;  %v1530_v6 = vpop.f32.mrb[32].mxu1  ;;  %v934_v7 = vpop.f32.mrb[33].mxu0 }
 0x148   : > { %v1907_v8 = vadd.f32 %v1530_v6, %v878_v32  ;;  %v1910_v9 = vadd.f32 %v934_v7, %v1880_v24  ;;  %v966_v10 = vpop.f32.mrb[33].mxu1  ;;  %v1523_v11 = vpop.f32.mrb[34].mxu0 }
 0x149   : > { %v1015_v12 = vmul.f32 %v1905_v5, %v1905_v5  ;;  %v1914_v13 = vadd.f32 %v966_v10, %v870_v16  ;;  %v1917_v14 = vadd.f32 %v1523_v11, %v1886_v39  ;;  %v1531_v15 = vpop.f32.mrb[34].mxu1  ;;  %v937_v38 = vpop.f32.mrb[35].mxu0  ;;  %v1095_v30 = vsub.f32 %v1905_v5, %v1905_v5 }
 0x14a   : > { %v1023_v18 = vmul.f32 %v1907_v8, %v1907_v8  ;;  %v1013_v19 = vmul.f32 %v1910_v9, %v1910_v9  ;;  %v969_v24 = vpop.f32.mrb[35].mxu1  ;;  %v1927_v39 = vadd.f32 %v1531_v15, %v881_v33  ;;  %v1930_v29 = vadd.f32 %v937_v38, %v1882_v25 }
 0x14b   : > { %v1063_v20 = vsub.f32 %v1015_v12, %v1015_v12  ;;  %v1021_v21 = vmul.f32 %v1914_v13, %v1914_v13  ;;  %v1016_v16 = vmul.f32 %v1917_v14, %v1917_v14  ;;  %v1103_v25 = vsub.f32 %v1907_v8, %v1907_v8 }
 0x14c   : > { %v1071_v22 = vsub.f32 %v1023_v18, %v1023_v18  ;;  %v1061_v23 = vsub.f32 %v1013_v19, %v1013_v19  ;;  %v1024_v34 = vmul.f32 %v1927_v39, %v1927_v39  ;;  %v1014_v33 = vmul.f32 %v1930_v29, %v1930_v29 }
 0x14d   : > { %v1079_v26 = vmax.f32 %v1063_v20, 0.0  ;;  %v1069_v27 = vsub.f32 %v1021_v21, %v1021_v21  ;;  %v1064_v28 = vsub.f32 %v1016_v16, %v1016_v16  ;;  %v1941_v58 = vadd.f32 %v969_v24, %v1896_v17 }
 0x14e   : > { %v1087_v31 = vmax.f32 %v1071_v22, 0.0  ;;  %v1077_v32 = vmax.f32 %v1061_v23, 0.0  ;;  %v1526_v35 = vpop.f32.mrb[36].mxu0  ;;  %v1072_v45 = vsub.f32 %v1024_v34, %v1024_v34  ;;  %v1062_v54 = vsub.f32 %v1014_v33, %v1014_v33 }
 0x14f   : > { %v1111_v36 = vadd.f32 1e-05, %v1079_v26  ;;  %v1085_v37 = vmax.f32 %v1069_v27, 0.0  ;;  %v1080_v40 = vmax.f32 %v1064_v28, 0.0  ;;  %v1534_v41 = vpop.f32.mrb[36].mxu1  ;;  %v950_v42 = vpop.f32.mrb[37].mxu0  ;;  %v1944_v59 = vadd.f32 %v1526_v35, %v1892_v2 }
 0x150   : > { %v1119_v43 = vadd.f32 1e-05, %v1087_v31  ;;  %v1109_v44 = vadd.f32 1e-05, %v1077_v32  ;;  %v982_v46 = vpop.f32.mrb[37].mxu1  ;;  %v1527_v47 = vpop.f32.mrb[38].mxu0  ;;  %v1948_v62 = vadd.f32 %v1534_v41, %v894_v0  ;;  %v1951_v63 = vadd.f32 %v950_v42, %v1888_v52 }
 0x151   : > { %1645 = vrsqrt.f32 %v1111_v36  ;;  %v1117_v50 = vadd.f32 1e-05, %v1085_v37  ;;  %v1112_v51 = vadd.f32 1e-05, %v1080_v40  ;;  %v1535_v55 = vpop.f32.mrb[38].mxu1  ;;  %v953_v56 = vpop.f32.mrb[39].mxu0  ;;  %v1093_v4 = vsub.f32 %v1910_v9, %v1910_v9 }
 0x152   : > { %1647 = vrsqrt.f32 %v1119_v43  ;;  %v1088_v57 = vmax.f32 %v1072_v45, 0.0  ;;  %v1946_v60 = vpop.f32.mrb[39].mxu1  ;;  %v1078_v61 = vmax.f32 %v1062_v54, 0.0  ;;  %v1022_v17 = vmul.f32 %v1941_v58, %v1941_v58 }
 0x153   : > { %1649 = vrsqrt.f32 %v1109_v44  ;;  %v1101_v2 = vsub.f32 %v1914_v13, %v1914_v13  ;;  %v1019_v0 = vmul.f32 %v1944_v59, %v1944_v59  ;;  %v1096_v52 = vsub.f32 %v1917_v14, %v1917_v14 }
 0x154   : > { %1651 = vrsqrt.f32 %v1117_v50  ;;  %v1120_v6 = vadd.f32 1e-05, %v1088_v57  ;;  %v1110_v7 = vadd.f32 1e-05, %v1078_v61  ;;  %v1070_v8 = vsub.f32 %v1022_v17, %v1022_v17 }
 0x155   : > { %1653 = vrsqrt.f32 %v1112_v51  ;;  %v1027_v9 = vmul.f32 %v1948_v62, %v1948_v62  ;;  %v1104_v10 = vsub.f32 %v1927_v39, %v1927_v39  ;;  %v1067_v11 = vsub.f32 %v1019_v0, %v1019_v0 }
 0x156   : > { %1655 = vrsqrt.f32 %v1120_v6  ;;  %v1017_v12 = vmul.f32 %v1951_v63, %v1951_v63  ;;  %v1086_v13 = vmax.f32 %v1070_v8, 0.0  ;;  %v1970_v38 = vadd.f32 %v982_v46, %v1898_v48 }
 0x157   : > { %1657 = vrsqrt.f32 %v1110_v7  ;;  %v1075_v15 = vsub.f32 %v1027_v9, %v1027_v9  ;;  %v1973_v14 = vadd.f32 %v1527_v47, %v1894_v3  ;;  %v1083_v18 = vmax.f32 %v1067_v11, 0.0 }
 0x158   : > { %v1065_v19 = vsub.f32 %v1017_v12, %v1017_v12  ;;  %v1976_v24 = vadd.f32 %v1535_v55, %v1902_v1  ;;  %v1979_v20 = vadd.f32 %v953_v56, %v1890_v53  ;;  %v1094_v21 = vsub.f32 %v1930_v29, %v1930_v29 }
 0x159   : > { %v1118_v16 = vadd.f32 1e-05, %v1086_v13  ;;  %v1091_v22 = vmax.f32 %v1075_v15, 0.0  ;;  %v1025_v48 = vmul.f32 %v1970_v38, %v1970_v38  ;;  %v1102_v3 = vsub.f32 %v1941_v58, %v1941_v58 }
 0x15a   : > { %v1115_v39 = vadd.f32 1e-05, %v1083_v18  ;;  %v1081_v26 = vmax.f32 %v1065_v19, 0.0  ;;  %v1020_v1 = vmul.f32 %v1973_v14, %v1973_v14  ;;  %v1028_v0 = vmul.f32 %v1976_v24, %v1976_v24 }
 0x15b   : > { %v1646_v23 = vpop.eup %1645  ;;  %1659 = vrsqrt.f32 %v1118_v16  ;;  %v1123_v28 = vadd.f32 1e-05, %v1091_v22  ;;  %v1073_v29 = vsub.f32 %v1025_v48, %v1025_v48  ;;  %v1107_v9 = vsub.f32 %v1948_v62, %v1948_v62 }
 0x15c   : > { %v1648_v53 = vpop.eup %1647  ;;  %v1143_v27 = vmul.f32 %v1646_v23, %v1095_v30  ;;  %1661 = vrsqrt.f32 %v1115_v39  ;;  %v1113_v34 = vadd.f32 1e-05, %v1081_v26  ;;  %v1068_v35 = vsub.f32 %v1020_v1, %v1020_v1 }
 0x15d   : > { %v1650_v31 = vpop.eup %1649  ;;  %v1151_v32 = vmul.f32 %v1648_v53, %v1103_v25  ;;  %1663 = vrsqrt.f32 %v1123_v28  ;;  %v1089_v57 = vmax.f32 %v1073_v29, 0.0  ;;  %v1018_v11 = vmul.f32 %v1979_v20, %v1979_v20 }
 0x15e   : > { %v1652_v36 = vpop.eup %1651  ;;  %vm1159_vm2 = vcmp.ge.f32.partialorder %v1143_v27, 0.0  ;;  %v1175_v37 = vmul.f32 0.2, %v1143_v27  ;;  %v1141_v40 = vmul.f32 %v1650_v31, %v1093_v4  ;;  %1665 = vrsqrt.f32 %v1113_v34 }
 0x15f   : > { %v1654_v5 = vpop.eup %1653  ;;  %vm1167_vm3 = vcmp.ge.f32.partialorder %v1151_v32, 0.0  ;;  %v1183_v30 = vmul.f32 0.2, %v1151_v32  ;;  %v1149_v33 = vmul.f32 %v1652_v36, %v1101_v2  ;;  %v1084_v6 = vmax.f32 %v1068_v35, 0.0 }
 0x160   : > { %v1656_v41 = vpop.eup %1655  ;;  %v1191_v42 = vsel %vm1159_vm2, %v1143_v27, %v1175_v37  ;;  %vm1157_vm4 = vcmp.ge.f32.partialorder %v1141_v40, 0.0  ;;  %v1173_v25 = vmul.f32 0.2, %v1141_v40  ;;  %v1144_v43 = vmul.f32 %v1654_v5, %v1096_v52 }
 0x161   : > { %v1658_v44 = vpop.eup %1657  ;;  %1208 = vst.msk [vmem:[%s1996_s18 + $0x10] sm:$0xff] %vm1205_vm1, %v1191_v42  ;;  %v1199_v45 = vsel %vm1167_vm3, %v1151_v32, %v1183_v30  ;;  %vm1165_vm5 = vcmp.ge.f32.partialorder %v1149_v33, 0.0  ;;  %v1181_v46 = vmul.f32 0.2, %v1149_v33  ;;  %v1152_v47 = vmul.f32 %v1656_v41, %v1104_v10 }
 0x162   : > { %1216 = vst.msk [vmem:[%s1996_s18 + $0x50] sm:$0xff] %vm1205_vm1, %v1199_v45  ;;  %v1189_v50 = vsel %vm1157_vm4, %v1141_v40, %v1173_v25  ;;  %vm1160_vm6 = vcmp.ge.f32.partialorder %v1144_v43, 0.0  ;;  %v1176_v51 = vmul.f32 0.2, %v1144_v43  ;;  %v1142_v54 = vmul.f32 %v1658_v44, %v1094_v21 }
 0x163   : > { %1206 = vst.msk [vmem:[%s1996_s18] sm:$0xff] %vm1205_vm1, %v1189_v50  ;;  %v1197_v55 = vsel %vm1165_vm5, %v1149_v33, %v1181_v46  ;;  %vm1168_vm7 = vcmp.ge.f32.partialorder %v1152_v47, 0.0  ;;  %v1184_v56 = vmul.f32 0.2, %v1152_v47  ;;  %v1099_v2 = vsub.f32 %v1944_v59, %v1944_v59 }
 0x164   : > { %1214 = vst.msk [vmem:[%s1996_s18 + $0x40] sm:$0xff] %vm1205_vm1, %v1197_v55  ;;  %v1192_v61 = vsel %vm1160_vm6, %v1144_v43, %v1176_v51  ;;  %vm1158_vm8 = vcmp.ge.f32.partialorder %v1142_v54, 0.0  ;;  %v1174_v4 = vmul.f32 0.2, %v1142_v54  ;;  %v1121_v7 = vadd.f32 1e-05, %v1089_v57 }
 0x165   : > { %1209 = vst.msk [vmem:[%s1996_s18 + $0x18] sm:$0xff] %vm1205_vm1, %v1192_v61  ;;  %v1200_v17 = vsel %vm1168_vm7, %v1152_v47, %v1184_v56  ;;  %v1660_v52 = vpop.eup %1659  ;;  %v1116_v10 = vadd.f32 1e-05, %v1084_v6  ;;  %v1076_v13 = vsub.f32 %v1028_v0, %v1028_v0  ;;  %v2025_v15 = vadd.f32 %v1946_v60, %v1900_v49 }
 0x166   : > { %1217 = vst.msk [vmem:[%s1996_s18 + $0x58] sm:$0xff] %vm1205_vm1, %v1200_v17  ;;  %v1190_v8 = vsel %vm1158_vm8, %v1142_v54, %v1174_v4  ;;  %v1662_v12 = vpop.eup %1661  ;;  %v1150_v59 = vmul.f32 %v1660_v52, %v1102_v3  ;;  %1667 = vrsqrt.f32 %v1121_v7  ;;  %v1097_v62 = vsub.f32 %v1951_v63, %v1951_v63 }
 0x167   : > { %1207 = vst.msk [vmem:[%s1996_s18 + $0x8] sm:$0xff] %vm1205_vm1, %v1190_v8  ;;  %v1664_v18 = vpop.eup %1663  ;;  %v1147_v19 = vmul.f32 %v1662_v12, %v1099_v2  ;;  %1669 = vrsqrt.f32 %v1116_v10  ;;  %v1066_v21 = vsub.f32 %v1018_v11, %v1018_v11  ;;  %v1092_v48 = vmax.f32 %v1076_v13, 0.0 }
 0x168   : > { %v1666_v16 = vpop.eup %1665  ;;  %vm1166_vm9 = vcmp.ge.f32.partialorder %v1150_v59, 0.0  ;;  %v1182_v22 = vmul.f32 0.2, %v1150_v59  ;;  %v1155_v58 = vmul.f32 %v1664_v18, %v1107_v9  ;;  %v1026_v28 = vmul.f32 %v2025_v15, %v2025_v15 }
 0x169   : > { %vm1163_vm10 = vcmp.ge.f32.partialorder %v1147_v19, 0.0  ;;  %v1179_v23 = vmul.f32 0.2, %v1147_v19  ;;  %v1145_v3 = vmul.f32 %v1666_v16, %v1097_v62  ;;  %v1082_v49 = vmax.f32 %v1066_v21, 0.0 }
 0x16a   : > { %v1198_v60 = vsel %vm1166_vm9, %v1150_v59, %v1182_v22  ;;  %vm1171_vm11 = vcmp.ge.f32.partialorder %v1155_v58, 0.0  ;;  %v1187_v39 = vmul.f32 0.2, %v1155_v58  ;;  %v1124_v26 = vadd.f32 1e-05, %v1092_v48 }
 0x16b   : > { %1215 = vst.msk [vmem:[%s1996_s18 + $0x48] sm:$0xff] %vm1205_vm1, %v1198_v60  ;;  %v1195_v63 = vsel %vm1163_vm10, %v1147_v19, %v1179_v23  ;;  %vm1161_vm12 = vcmp.ge.f32.partialorder %v1145_v3, 0.0  ;;  %v1177_v1 = vmul.f32 0.2, %v1145_v3  ;;  %v1114_v53 = vadd.f32 1e-05, %v1082_v49 }
 0x16c   : > { %1212 = vst.msk [vmem:[%s1996_s18 + $0x30] sm:$0xff] %vm1205_vm1, %v1195_v63  ;;  %v1203_v27 = vsel %vm1171_vm11, %v1155_v58, %v1187_v39  ;;  %1671 = vrsqrt.f32 %v1124_v26  ;;  %v1074_v31 = vsub.f32 %v1026_v28, %v1026_v28  ;;  %v1105_v32 = vsub.f32 %v1970_v38, %v1970_v38 }
 0x16d   : > { %1220 = vst.msk [vmem:[%s1996_s18 + $0x70] sm:$0xff] %vm1205_vm1, %v1203_v27  ;;  %v1193_v29 = vsel %vm1161_vm12, %v1145_v3, %v1177_v1  ;;  %1673 = vrsqrt.f32 %v1114_v53  ;;  %v1100_v35 = vsub.f32 %v1973_v14, %v1973_v14  ;;  %v1108_v38 = vsub.f32 %v1976_v24, %v1976_v24 }
 0x16e   : > { %1210 = vst.msk [vmem:[%s1996_s18 + $0x20] sm:$0xff] %vm1205_vm1, %v1193_v29  ;;  %v1090_v36 = vmax.f32 %v1074_v31, 0.0  ;;  %v1098_v43 = vsub.f32 %v1979_v20, %v1979_v20  ;;  %v1106_v54 = vsub.f32 %v2025_v15, %v2025_v15 }
 0x170   : > { %v1668_v34 = vpop.eup %1667  ;;  %v1122_v30 = vadd.f32 1e-05, %v1090_v36 }
 0x171   : > { %v1670_v37 = vpop.eup %1669  ;;  %v1153_v40 = vmul.f32 %v1668_v34, %v1105_v32 }
 0x172   : > { %v1148_v5 = vmul.f32 %v1670_v37, %v1100_v35  ;;  %1675 = vrsqrt.f32 %v1122_v30 }
 0x173   : > { %vm1169_vm13 = vcmp.ge.f32.partialorder %v1153_v40, 0.0  ;;  %v1185_v33 = vmul.f32 0.2, %v1153_v40 }
 0x174   : > { %vm1164_vm14 = vcmp.ge.f32.partialorder %v1148_v5, 0.0  ;;  %v1180_v41 = vmul.f32 0.2, %v1148_v5 }
 0x175   : > { %v1201_v42 = vsel %vm1169_vm13, %v1153_v40, %v1185_v33 }
 0x176   : > { %v1672_v25 = vpop.eup %1671  ;;  %1218 = vst.msk [vmem:[%s1996_s18 + $0x60] sm:$0xff] %vm1205_vm1, %v1201_v42  ;;  %v1196_v14 = vsel %vm1164_vm14, %v1148_v5, %v1180_v41 }
 0x177   : > { %v1674_v44 = vpop.eup %1673  ;;  %1213 = vst.msk [vmem:[%s1996_s18 + $0x38] sm:$0xff] %vm1205_vm1, %v1196_v14  ;;  %v1156_v45 = vmul.f32 %v1672_v25, %v1108_v38 }
 0x178   : > { %v1146_v46 = vmul.f32 %v1674_v44, %v1098_v43 }
 0x179   : > { %vm1172_vm15 = vcmp.ge.f32.partialorder %v1156_v45, 0.0  ;;  %v1188_v47 = vmul.f32 0.2, %v1156_v45 }
 0x17a   : > { %vm1162_vm0 = vcmp.ge.f32.partialorder %v1146_v46, 0.0  ;;  %v1178_v50 = vmul.f32 0.2, %v1146_v46 }
 0x17b   : > { %v1204_v51 = vsel %vm1172_vm15, %v1156_v45, %v1188_v47 }
 0x17c   : > { %1221 = vst.msk [vmem:[%s1996_s18 + $0x78] sm:$0xff] %vm1205_vm1, %v1204_v51  ;;  %v1194_v24 = vsel %vm1162_vm0, %v1146_v46, %v1178_v50  ;;  %v1676_v20 = vpop.eup %1675 }
 0x17d   : > { %1211 = vst.msk [vmem:[%s1996_s18 + $0x28] sm:$0xff] %vm1205_vm1, %v1194_v24  ;;  %v1154_v55 = vmul.f32 %v1676_v20, %v1106_v54 }
 0x17f   : > { %vm1170_vm2 = vcmp.ge.f32.partialorder %v1154_v55, 0.0  ;;  %v1186_v56 = vmul.f32 0.2, %v1154_v55 }
 0x181   : > { %v1202_v57 = vsel %vm1170_vm2, %v1154_v55, %v1186_v56 }
 0x182   : > { %1219 = vst.msk [vmem:[%s1996_s18 + $0x68] sm:$0xff] %vm1205_vm1, %v1202_v57 }
 0x183 PF: > { %s12_s9 = sadd.s32 1, %s1683_s9  }
 0x184   : > { %p9_p4 = scmp.ge.s32.totalorder %s12_s9, 10  }
 0x186   :  { %11 = sbr.rel (!%p9_p4) target bundleno = 1 (0x1), region = 58 }

// kernel: run.35
= control target key start
LH: loop header
LB: loop body
LE: loop exit
PB: predicated region body
PF: predicated region fallthrough
CT: control target
= control target key end

     0   :  { %s2649_s9 = smov 0   ;;  %s3183_s0 = inlined_call_operand.vmem [shape: bf16[128,1152], index: 0, kind: input, shape index: {}]   ;;  %s3184_s1 = inlined_call_operand.vmem [shape: bf16[8,1152,1], index: 1, kind: input, shape index: {}]   ;;  %s3185_s2 = inlined_call_operand.vmem [shape: f32[8,128,1], index: 2, kind: output, shape index: {}]  }
   0x1 LB: > { %s1934_s10 = sadd.s32 4294967295, %s2632_s9   ;;  %p1938_p0 = scmp.ge.s32.totalorder %s2632_s9, 1  ;;  %s2632_s9 = sphi %s2649_s9, %s12_s9  }
   0x2   : > { %p112_p1 = scmp.lt.s32.totalorder %s2632_s9, 9 }
   0x4   : > { %p113_p2 = pnand %p1938_p0, %p112_p1 }
   0x5   : > { %p134_p3 = scmp.lt.s32.totalorder (!%p113_p2), %s1934_s10, 7  ;;  %v2452_v0 = vld [vmem:[%s3183_s0 + $0x4] ss:$36 sps:$4 sm:$0xff] (!%p113_p2)   ;;  %v2455_v1 = vld [vmem:[%s3183_s0 + $0xc] ss:$36 sps:$4 sm:$0xff] (!%p113_p2)   ;;  %vm1862_vm0 = vcmask (!%p113_p2), 7168  }
   0x6   : > { %116 = sbr.rel (%p113_p2) target bundleno = 451 (0x1c3), region = 28  ;;  %1201 = vmatprep.mubr.bf16.mxu0 (!%p113_p2), %v2452_v0  ;;  %1298 = vmatprep.mubr.bf16.mxu1 (!%p113_p2), %v2455_v1  ;;  %v2450_v32 = vld [vmem:[%s3183_s0] ss:$36 sps:$4 sm:$0xff] (!%p113_p2)   ;;  %v2453_v34 = vld [vmem:[%s3183_s0 + $0x8] ss:$36 sps:$4 sm:$0xff] (!%p113_p2)  }
   0x7   : > { %v2460_v36 = vld [vmem:[%s3183_s0 + $0x4c] ss:$36 sps:$4 sm:$0xff] (!%p113_p2)   ;;  %v2462_v38 = vld [vmem:[%s3183_s0 + $0x54] ss:$36 sps:$4 sm:$0xff] (!%p113_p2)   ;;  %v2472_v49 = vld [vmem:[%s3183_s0 + $0x9c] ss:$36 sps:$4 sm:$0xff] (!%p113_p2)  }
   0x8   : > { %v2464_v43 = vld [vmem:[%s3183_s0 + $0x48] ss:$36 sps:$4 sm:$0xff] (!%p113_p2)   ;;  %v2465_v47 = vld [vmem:[%s3183_s0 + $0x50] ss:$36 sps:$4 sm:$0xff] (!%p113_p2)   ;;  %v2475_v55 = vld [vmem:[%s3183_s0 + $0x98] ss:$36 sps:$4 sm:$0xff] (!%p113_p2)  }
   0x9   : > { %v2470_v48 = vld [vmem:[%s3183_s0 + $0x94] ss:$36 sps:$4 sm:$0xff] (!%p113_p2)   ;;  %v2480_v56 = vld [vmem:[%s3183_s0 + $0xdc] ss:$36 sps:$4 sm:$0xff] (!%p113_p2)   ;;  %v2482_v57 = vld [vmem:[%s3183_s0 + $0xe4] ss:$36 sps:$4 sm:$0xff] (!%p113_p2)  }
   0xa   : > { %v2474_v54 = vld [vmem:[%s3183_s0 + $0x90] ss:$36 sps:$4 sm:$0xff] (!%p113_p2)   ;;  %v2484_v62 = vld [vmem:[%s3183_s0 + $0xd8] ss:$36 sps:$4 sm:$0xff] (!%p113_p2)   ;;  %v2485_v63 = vld [vmem:[%s3183_s0 + $0xe0] ss:$36 sps:$4 sm:$0xff] (!%p113_p2)  }
   0xb   : > { %v2490_v0 = vld [vmem:[%s3183_s0 + $0x124] ss:$36 sps:$4 sm:$0xff] (!%p113_p2)   ;;  %v2492_v1 = vld [vmem:[%s3183_s0 + $0x12c] ss:$36 sps:$4 sm:$0xff] (!%p113_p2)  }
   0xd   : > { %s3187_s10 = smov (!%p134_p3, %s1934_s10), 7 }
   0xe   : > { %s2409_s15 = smul.u32 576, %s3187_s10  ;;  %s2088_s4 = sshll.u32 %s3187_s10, 7 }
   0xf   : > { %s3117_s6 = scalar_lea.vmem %s3185_s2, %s2088_s4 }
  0x10   : > { %s2669_s18 = scalar_lea.vmem %s3184_s1, %s2409_s15 }
  0x11   : > { %v2418_v2 = vld [vmem:[%s2669_s18 + $0x40] sm:$0xff]   ;;  %v2422_v6 = vld [vmem:[%s2669_s18 + $0x48] sm:$0xff]   ;;  %v2426_v10 = vld [vmem:[%s2669_s18 + $0x50] sm:$0xff]  }
  0x12   : > { %v2419_v3 = vld [vmem:[%s2669_s18 + $0xc0] sm:$0xff]   ;;  %2089 = vmatprep.subr.bf16.mxu0 %v2418_v2  ;;  %v2423_v7 = vld [vmem:[%s2669_s18 + $0xc8] sm:$0xff]   ;;  %v2427_v11 = vld [vmem:[%s2669_s18 + $0xd0] sm:$0xff]  }
  0x13   : > { %v2420_v4 = vld [vmem:[%s2669_s18] sm:$0xff]   ;;  %2153 = vmatprep.subr.bf16.mxu1 %v2419_v3  ;;  %v2424_v8 = vld [vmem:[%s2669_s18 + $0x8] sm:$0xff]   ;;  %v2428_v12 = vld [vmem:[%s2669_s18 + $0x10] sm:$0xff]  }
  0x14   : > { %v2421_v5 = vld [vmem:[%s2669_s18 + $0x80] sm:$0xff]   ;;  %2090 = vmatpush3.bf16.msra.mxu0 %v2420_v4  ;;  %v2425_v9 = vld [vmem:[%s2669_s18 + $0x88] sm:$0xff]   ;;  %v2429_v13 = vld [vmem:[%s2669_s18 + $0x90] sm:$0xff]  }
  0x15   : > { %2154 = vmatpush3.bf16.msra.mxu1 %v2421_v5  ;;  %2091 = vmatprep.subr.bf16.mxu0 %v2422_v6  ;;  %v2430_v14 = vld [vmem:[%s2669_s18 + $0x58] sm:$0xff]   ;;  %v2434_v18 = vld [vmem:[%s2669_s18 + $0x60] sm:$0xff]   ;;  %v2438_v22 = vld [vmem:[%s2669_s18 + $0x68] sm:$0xff]  }
  0x16   : > { %2155 = vmatprep.subr.bf16.mxu1 %v2423_v7  ;;  %v2431_v15 = vld [vmem:[%s2669_s18 + $0xd8] sm:$0xff]   ;;  %v2435_v19 = vld [vmem:[%s2669_s18 + $0xe0] sm:$0xff]   ;;  %v2439_v23 = vld [vmem:[%s2669_s18 + $0xe8] sm:$0xff]  }
  0x17   : > { %v2432_v16 = vld [vmem:[%s2669_s18 + $0x18] sm:$0xff]   ;;  %v2436_v20 = vld [vmem:[%s2669_s18 + $0x20] sm:$0xff]   ;;  %v2440_v24 = vld [vmem:[%s2669_s18 + $0x28] sm:$0xff]  }
  0x18   : > { %2092 = vmatpush3.bf16.msra.mxu0 %v2424_v8  ;;  %v2433_v17 = vld [vmem:[%s2669_s18 + $0x98] sm:$0xff]   ;;  %v2437_v21 = vld [vmem:[%s2669_s18 + $0xa0] sm:$0xff]   ;;  %v2441_v25 = vld [vmem:[%s2669_s18 + $0xa8] sm:$0xff]  }
  0x19   : > { %2156 = vmatpush3.bf16.msra.mxu1 %v2425_v9  ;;  %2093 = vmatprep.subr.bf16.mxu0 %v2426_v10  ;;  %v2442_v26 = vld [vmem:[%s2669_s18 + $0x70] sm:$0xff]   ;;  %v2446_v30 = vld [vmem:[%s2669_s18 + $0x78] sm:$0xff]   ;;  %v2456_v37 = vld [vmem:[%s2669_s18 + $0x140] sm:$0xff]  }
  0x1a   : > { %2157 = vmatprep.subr.bf16.mxu1 %v2427_v11  ;;  %v2443_v27 = vld [vmem:[%s2669_s18 + $0xf0] sm:$0xff]   ;;  %v2447_v31 = vld [vmem:[%s2669_s18 + $0xf8] sm:$0xff]   ;;  %v2457_v39 = vld [vmem:[%s2669_s18 + $0x1c0] sm:$0xff]  }
  0x1b   : > { %v2444_v28 = vld [vmem:[%s2669_s18 + $0x30] sm:$0xff]   ;;  %v2448_v33 = vld [vmem:[%s2669_s18 + $0x38] sm:$0xff]   ;;  %v2458_v40 = vld [vmem:[%s2669_s18 + $0x100] sm:$0xff]  }
  0x1c   : > { %2094 = vmatpush3.bf16.msra.mxu0 %v2428_v12  ;;  %v2445_v29 = vld [vmem:[%s2669_s18 + $0xb0] sm:$0xff]   ;;  %v2449_v35 = vld [vmem:[%s2669_s18 + $0xb8] sm:$0xff]   ;;  %v2459_v41 = vld [vmem:[%s2669_s18 + $0x180] sm:$0xff]  }
  0x1d   : > { %2158 = vmatpush3.bf16.msra.mxu1 %v2429_v13  ;;  %2095 = vmatprep.subr.bf16.mxu0 %v2430_v14  ;;  %v2466_v42 = vld [vmem:[%s2669_s18 + $0x148] sm:$0xff]   ;;  %v2476_v50 = vld [vmem:[%s2669_s18 + $0x150] sm:$0xff]   ;;  %v2486_v58 = vld [vmem:[%s2669_s18 + $0x158] sm:$0xff]  }
  0x1e   : > { %2159 = vmatprep.subr.bf16.mxu1 %v2431_v15  ;;  %v2467_v44 = vld [vmem:[%s2669_s18 + $0x1c8] sm:$0xff]   ;;  %v2477_v51 = vld [vmem:[%s2669_s18 + $0x1d0] sm:$0xff]   ;;  %v2487_v59 = vld [vmem:[%s2669_s18 + $0x1d8] sm:$0xff]  }
  0x1f   : > { %v2468_v45 = vld [vmem:[%s2669_s18 + $0x108] sm:$0xff]   ;;  %v2478_v52 = vld [vmem:[%s2669_s18 + $0x110] sm:$0xff]   ;;  %v2488_v60 = vld [vmem:[%s2669_s18 + $0x118] sm:$0xff]  }
  0x20   : > { %2096 = vmatpush3.bf16.msra.mxu0 %v2432_v16  ;;  %v2469_v46 = vld [vmem:[%s2669_s18 + $0x188] sm:$0xff]   ;;  %v2479_v53 = vld [vmem:[%s2669_s18 + $0x190] sm:$0xff]   ;;  %v2489_v61 = vld [vmem:[%s2669_s18 + $0x198] sm:$0xff]  }
  0x21   : > { %2160 = vmatpush3.bf16.msra.mxu1 %v2433_v17  ;;  %2097 = vmatprep.subr.bf16.mxu0 %v2434_v18  ;;  %v2496_v2 = vld [vmem:[%s2669_s18 + $0x160] sm:$0xff]   ;;  %v2506_v7 = vld [vmem:[%s2669_s18 + $0x168] sm:$0xff]   ;;  %v2502_v13 = vld [vmem:[%s3183_s0 + $0x174] ss:$36 sps:$4 sm:$0xff]  }
  0x22   : > { %2161 = vmatprep.subr.bf16.mxu1 %v2435_v19  ;;  %v2497_v3 = vld [vmem:[%s2669_s18 + $0x1e0] sm:$0xff]   ;;  %v2495_v8 = vld [vmem:[%s3183_s0 + $0x128] ss:$36 sps:$4 sm:$0xff]   ;;  %v2516_v14 = vld [vmem:[%s2669_s18 + $0x170] sm:$0xff]  }
  0x23   : > { %v2498_v4 = vld [vmem:[%s2669_s18 + $0x120] sm:$0xff]   ;;  %v2500_v9 = vld [vmem:[%s3183_s0 + $0x16c] ss:$36 sps:$4 sm:$0xff]  }
  0x24   : > { %2098 = vmatpush3.bf16.msra.mxu0 %v2436_v20  ;;  %v2499_v5 = vld [vmem:[%s2669_s18 + $0x1a0] sm:$0xff]   ;;  %v2507_v10 = vld [vmem:[%s2669_s18 + $0x1e8] sm:$0xff]   ;;  %v2517_v16 = vld [vmem:[%s2669_s18 + $0x1f0] sm:$0xff]  }
  0x25   : > { %2162 = vmatpush3.bf16.msra.mxu1 %v2437_v21  ;;  %2099 = vmatprep.subr.bf16.mxu0 %v2438_v22  ;;  %v2494_v6 = vld [vmem:[%s3183_s0 + $0x120] ss:$36 sps:$4 sm:$0xff]   ;;  %v2508_v11 = vld [vmem:[%s2669_s18 + $0x128] sm:$0xff]   ;;  %v2505_v17 = vld [vmem:[%s3183_s0 + $0x170] ss:$36 sps:$4 sm:$0xff]  }
  0x26   : > { %2163 = vmatprep.subr.bf16.mxu1 %v2439_v23  ;;  %v2509_v12 = vld [vmem:[%s2669_s18 + $0x1a8] sm:$0xff]   ;;  %v2518_v18 = vld [vmem:[%s2669_s18 + $0x130] sm:$0xff]   ;;  %v2512_v21 = vld [vmem:[%s3183_s0 + $0x1bc] ss:$36 sps:$4 sm:$0xff]  }
  0x27   : > { %v2504_v15 = vld [vmem:[%s3183_s0 + $0x168] ss:$36 sps:$4 sm:$0xff]   ;;  %v2519_v19 = vld [vmem:[%s2669_s18 + $0x1b0] sm:$0xff]   ;;  %v2526_v22 = vld [vmem:[%s2669_s18 + $0x178] sm:$0xff]  }
  0x28   : > { %2100 = vmatpush3.bf16.msra.mxu0 %v2440_v24  ;;  %v2510_v20 = vld [vmem:[%s3183_s0 + $0x1b4] ss:$36 sps:$4 sm:$0xff]  }
  0x29   : > { %2164 = vmatpush3.bf16.msra.mxu1 %v2441_v25  ;;  %2101 = vmatprep.subr.bf16.mxu0 %v2442_v26  ;;  %v2527_v23 = vld [vmem:[%s2669_s18 + $0x1f8] sm:$0xff]   ;;  %v2514_v26 = vld [vmem:[%s3183_s0 + $0x1b0] ss:$36 sps:$4 sm:$0xff]  }
  0x2a   : > { %2165 = vmatprep.subr.bf16.mxu1 %v2443_v27  ;;  %v2528_v24 = vld [vmem:[%s2669_s18 + $0x138] sm:$0xff]  }
  0x2b   : > { %v2529_v25 = vld [vmem:[%s2669_s18 + $0x1b8] sm:$0xff]  }
  0x2c   : > { %2102 = vmatpush3.bf16.msra.mxu0 %v2444_v28  ;;  %v2515_v27 = vld [vmem:[%s3183_s0 + $0x1b8] ss:$36 sps:$4 sm:$0xff]  }
  0x2d   : > { %2166 = vmatpush3.bf16.msra.mxu1 %v2445_v29  ;;  %2103 = vmatprep.subr.bf16.mxu0 %v2446_v30  ;;  %v2520_v28 = vld [vmem:[%s3183_s0 + $0x1fc] ss:$36 sps:$4 sm:$0xff]   ;;  %v2522_v29 = vld [vmem:[%s3183_s0 + $0x204] ss:$36 sps:$4 sm:$0xff]  }
  0x2e   : > { %2167 = vmatprep.subr.bf16.mxu1 %v2447_v31  ;;  %v2536_v30 = vld [vmem:[%s2669_s18 + $0x200] sm:$0xff]   ;;  %v2524_v31 = vld [vmem:[%s3183_s0 + $0x1f8] ss:$36 sps:$4 sm:$0xff]  }
  0x30   : > { %2104 = vmatpush3.bf16.msra.mxu0 %v2448_v33  ;;  %v2532_v33 = vld [vmem:[%s3183_s0 + $0x14] ss:$36 sps:$4 sm:$0xff]  }
  0x31   : > { %2168 = vmatpush3.bf16.msra.mxu1 %v2449_v35  ;;  %2217 = vmatprep.subr.bf16.mxu0 %v2456_v37  ;;  %v2530_v35 = vld [vmem:[%s3183_s0 + $0x10] ss:$36 sps:$4 sm:$0xff]   ;;  %v2537_v37 = vld [vmem:[%s3183_s0 + $0x5c] ss:$36 sps:$4 sm:$0xff]  }
  0x32   : > { %2281 = vmatprep.subr.bf16.mxu1 %v2457_v39  ;;  %v2543_v39 = vld [vmem:[%s2669_s18 + $0x208] sm:$0xff]  }
  0x33   : > { %1202 = vmatmul.mubr.bf16.vlgmr.msra.gmra.mrb[0].mxu0 %v2450_v32  ;;  %v2525_v32 = vld [vmem:[%s3183_s0 + $0x200] ss:$36 sps:$4 sm:$0xff]  }
  0x34   : > { %1299 = vmatmul.mubr.bf16.vlgmr.msra.gmra.mrb[0].mxu1 %v2453_v34  ;;  %2218 = vmatpush3.bf16.msra.mxu0 %v2458_v40  ;;  %v2535_v34 = vld [vmem:[%s3183_s0 + $0x1c] ss:$36 sps:$4 sm:$0xff]   ;;  %v2550_v40 = vld [vmem:[%s2669_s18 + $0x210] sm:$0xff]  }
  0x35   : > { %2282 = vmatpush3.bf16.msra.mxu1 %v2459_v41  ;;  %1209 = vmatprep.mubr.bf16.mxu0 %v2460_v36  ;;  %v2533_v36 = vld [vmem:[%s3183_s0 + $0x18] ss:$36 sps:$4 sm:$0xff]  }
  0x36   : > { %1306 = vmatprep.mubr.bf16.mxu1 %v2462_v38  ;;  %2219 = vmatprep.subr.bf16.mxu0 %v2466_v42  ;;  %v2539_v38 = vld [vmem:[%s3183_s0 + $0x64] ss:$36 sps:$4 sm:$0xff]   ;;  %v2541_v41 = vld [vmem:[%s3183_s0 + $0x58] ss:$36 sps:$4 sm:$0xff]  }
  0x37   : > { %2283 = vmatprep.subr.bf16.mxu1 %v2467_v44  ;;  %v2542_v42 = vld [vmem:[%s3183_s0 + $0x60] ss:$36 sps:$4 sm:$0xff]   ;;  %v2546_v44 = vld [vmem:[%s3183_s0 + $0xac] ss:$36 sps:$4 sm:$0xff]  }
  0x38   : > { %2220 = vmatpush3.bf16.msra.mxu0 %v2468_v45  ;;  %v2557_v45 = vld [vmem:[%s2669_s18 + $0x218] sm:$0xff]  }
  0x39   : > { %2284 = vmatpush3.bf16.msra.mxu1 %v2469_v46  ;;  %2221 = vmatprep.subr.bf16.mxu0 %v2476_v50  ;;  %v2548_v46 = vld [vmem:[%s3183_s0 + $0xa0] ss:$36 sps:$4 sm:$0xff]   ;;  %v2553_v50 = vld [vmem:[%s3183_s0 + $0xf4] ss:$36 sps:$4 sm:$0xff]  }
  0x3a   : > { %2285 = vmatprep.subr.bf16.mxu1 %v2477_v51  ;;  %v2571_v51 = vld [vmem:[%s2669_s18 + $0x228] sm:$0xff]  }
  0x3b   : > { %1210 = vmatmul.mubr.bf16.gmra.mrb[4].mxu0 %v2464_v43  ;;  %v2544_v43 = vld [vmem:[%s3183_s0 + $0xa4] ss:$36 sps:$4 sm:$0xff]  }
  0x3c   : > { %1307 = vmatmul.mubr.bf16.gmra.mrb[4].mxu1 %v2465_v47  ;;  %1217 = vmatprep.mubr.bf16.mxu0 %v2470_v48  ;;  %v2564_v47 = vld [vmem:[%s2669_s18 + $0x220] sm:$0xff]   ;;  %v2549_v48 = vld [vmem:[%s3183_s0 + $0xa8] ss:$36 sps:$4 sm:$0xff]  }
  0x3d   : > { %1314 = vmatprep.mubr.bf16.mxu1 %v2472_v49  ;;  %2222 = vmatpush3.bf16.msra.mxu0 %v2478_v52  ;;  %v2551_v49 = vld [vmem:[%s3183_s0 + $0xec] ss:$36 sps:$4 sm:$0xff]  }
  0x3e   : > { %2286 = vmatpush3.bf16.msra.mxu1 %v2479_v53  ;;  %2223 = vmatprep.subr.bf16.mxu0 %v2486_v58  ;;  %v2578_v52 = vld [vmem:[%s2669_s18 + $0x230] sm:$0xff]   ;;  %v2555_v53 = vld [vmem:[%s3183_s0 + $0xe8] ss:$36 sps:$4 sm:$0xff]  }
  0x3f   : > { %2287 = vmatprep.subr.bf16.mxu1 %v2487_v59  ;;  %v2562_v58 = vld [vmem:[%s3183_s0 + $0x130] ss:$36 sps:$4 sm:$0xff]   ;;  %v2563_v59 = vld [vmem:[%s3183_s0 + $0x138] ss:$36 sps:$4 sm:$0xff]  }
  0x41   : > { %2224 = vmatpush3.bf16.msra.mxu0 %v2488_v60  ;;  %v2565_v60 = vld [vmem:[%s3183_s0 + $0x17c] ss:$36 sps:$4 sm:$0xff]  }
  0x42   : > { %2288 = vmatpush3.bf16.msra.mxu1 %v2489_v61  ;;  %2225 = vmatprep.subr.bf16.mxu0 %v2496_v2  ;;  %v2567_v61 = vld [vmem:[%s3183_s0 + $0x184] ss:$36 sps:$4 sm:$0xff]  }
  0x43   : > { %1218 = vmatmul.mubr.bf16.gmra.mrb[8].mxu0 %v2474_v54  ;;  %2289 = vmatprep.subr.bf16.mxu1 %v2497_v3  ;;  %v2556_v54 = vld [vmem:[%s3183_s0 + $0xf0] ss:$36 sps:$4 sm:$0xff]   ;;  %v2576_v2 = vld [vmem:[%s3183_s0 + $0x1c0] ss:$36 sps:$4 sm:$0xff]   ;;  %v2577_v3 = vld [vmem:[%s3183_s0 + $0x1c8] ss:$36 sps:$4 sm:$0xff]  }
  0x44   : > { %1315 = vmatmul.mubr.bf16.gmra.mrb[8].mxu1 %v2475_v55  ;;  %1225 = vmatprep.mubr.bf16.mxu0 %v2480_v56  ;;  %v2558_v55 = vld [vmem:[%s3183_s0 + $0x134] ss:$36 sps:$4 sm:$0xff]   ;;  %v2560_v56 = vld [vmem:[%s3183_s0 + $0x13c] ss:$36 sps:$4 sm:$0xff]  }
  0x45   : > { %1322 = vmatprep.mubr.bf16.mxu1 %v2482_v57  ;;  %2226 = vmatpush3.bf16.msra.mxu0 %v2498_v4  ;;  %v2585_v57 = vld [vmem:[%s2669_s18 + $0x238] sm:$0xff]   ;;  %v2579_v4 = vld [vmem:[%s3183_s0 + $0x20c] ss:$36 sps:$4 sm:$0xff]  }
  0x46   : > { %2290 = vmatpush3.bf16.msra.mxu1 %v2499_v5  ;;  %2227 = vmatprep.subr.bf16.mxu0 %v2506_v7  ;;  %v2581_v5 = vld [vmem:[%s3183_s0 + $0x214] ss:$36 sps:$4 sm:$0xff]  }
  0x47   : > { %2291 = vmatprep.subr.bf16.mxu1 %v2507_v10  ;;  %v2584_v7 = vld [vmem:[%s3183_s0 + $0x210] ss:$36 sps:$4 sm:$0xff]   ;;  %v2588_v10 = vld [vmem:[%s3183_s0 + $0x68] ss:$36 sps:$4 sm:$0xff]  }
  0x49   : > { %2228 = vmatpush3.bf16.msra.mxu0 %v2508_v11  ;;  %v2589_v11 = vld [vmem:[%s3183_s0 + $0x188] ss:$36 sps:$4 sm:$0xff]  }
  0x4a   : > { %2292 = vmatpush3.bf16.msra.mxu1 %v2509_v12  ;;  %2229 = vmatprep.subr.bf16.mxu0 %v2516_v14  ;;  %v2590_v12 = vld [vmem:[%s3183_s0 + $0xb0] ss:$36 sps:$4 sm:$0xff]   ;;  %v2592_v14 = vld [vmem:[%s3183_s0 + $0xf8] ss:$36 sps:$4 sm:$0xff]  }
  0x4b   : > { %1226 = vmatmul.mubr.bf16.gmra.mrb[12].mxu0 %v2484_v62  ;;  %2293 = vmatprep.subr.bf16.mxu1 %v2517_v16  ;;  %v2569_v62 = vld [vmem:[%s3183_s0 + $0x178] ss:$36 sps:$4 sm:$0xff]  }
  0x4c   : > { %1323 = vmatmul.mubr.bf16.gmra.mrb[12].mxu1 %v2485_v63  ;;  %1233 = vmatprep.mubr.bf16.mxu0 %v2490_v0  ;;  %v2570_v63 = vld [vmem:[%s3183_s0 + $0x180] ss:$36 sps:$4 sm:$0xff]  }
  0x4d   : > { %1330 = vmatprep.mubr.bf16.mxu1 %v2492_v1  ;;  %2230 = vmatpush3.bf16.msra.mxu0 %v2518_v18  ;;  %v2572_v0 = vld [vmem:[%s3183_s0 + $0x1c4] ss:$36 sps:$4 sm:$0xff]   ;;  %v2574_v1 = vld [vmem:[%s3183_s0 + $0x1cc] ss:$36 sps:$4 sm:$0xff]  }
  0x4e   : > { %2294 = vmatpush3.bf16.msra.mxu1 %v2519_v19  ;;  %2231 = vmatprep.subr.bf16.mxu0 %v2526_v22 }
  0x4f   : > { %2295 = vmatprep.subr.bf16.mxu1 %v2527_v23 }
  0x51   : > { %2232 = vmatpush3.bf16.msra.mxu0 %v2528_v24 }
  0x52   : > { %2296 = vmatpush3.bf16.msra.mxu1 %v2529_v25  ;;  %2361 = vmatprep.subr.bf16.mxu0 %v2536_v30 }
  0x53   : > { %1234 = vmatmul.mubr.bf16.gmra.mrb[16].mxu0 %v2494_v6  ;;  %2393 = vmatprep.subr.bf16.mxu1 %v2536_v30  ;;  %v2583_v6 = vld [vmem:[%s3183_s0 + $0x208] ss:$36 sps:$4 sm:$0xff]  }
  0x54   : > { %1331 = vmatmul.mubr.bf16.gmra.mrb[16].mxu1 %v2495_v8  ;;  %1241 = vmatprep.mubr.bf16.mxu0 %v2500_v9  ;;  %v2586_v8 = vld [vmem:[%s3183_s0 + $0x20] ss:$36 sps:$4 sm:$0xff]  }
  0x55   : > { %1338 = vmatprep.mubr.bf16.mxu1 %v2502_v13  ;;  %v2587_v9 = vld [vmem:[%s3183_s0 + $0x140] ss:$36 sps:$4 sm:$0xff]   ;;  %v2591_v13 = vld [vmem:[%s3183_s0 + $0x1d0] ss:$36 sps:$4 sm:$0xff]  }
  0x5b   : > { %1242 = vmatmul.mubr.bf16.gmra.mrb[20].mxu0 %v2504_v15  ;;  %v2593_v15 = vld [vmem:[%s3183_s0 + $0x218] ss:$36 sps:$4 sm:$0xff]  }
  0x5c   : > { %1339 = vmatmul.mubr.bf16.gmra.mrb[20].mxu1 %v2505_v17  ;;  %1249 = vmatprep.mubr.bf16.mxu0 %v2510_v20 }
  0x5d   : > { %1346 = vmatprep.mubr.bf16.mxu1 %v2512_v21 }
  0x63   : > { %1250 = vmatmul.mubr.bf16.gmra.mrb[24].mxu0 %v2514_v26 }
  0x64   : > { %1347 = vmatmul.mubr.bf16.gmra.mrb[24].mxu1 %v2515_v27  ;;  %1257 = vmatprep.mubr.bf16.mxu0 %v2520_v28 }
  0x65   : > { %1354 = vmatprep.mubr.bf16.mxu1 %v2522_v29 }
  0x6b   : > { %1258 = vmatmul.mubr.bf16.gmra.mrb[28].mxu0 %v2524_v31 }
  0x6c   : > { %1355 = vmatmul.mubr.bf16.gmra.mrb[28].mxu1 %v2525_v32  ;;  %1395 = vmatprep.mubr.bf16.mxu0 %v2532_v33 }
  0x6d   : > { %1492 = vmatprep.mubr.bf16.mxu1 %v2535_v34 }
  0x73   : > { %1396 = vmatmul.mubr.bf16.vlgmr.msra.gmra.mrb[32].mxu0 %v2530_v35 }
  0x74   : > { %1493 = vmatmul.mubr.bf16.vlgmr.msra.gmra.mrb[32].mxu1 %v2533_v36  ;;  %2362 = vmatpush3.bf16.msra.mxu0 %v2536_v30 }
  0x75   : > { %2401 = vmatpush3.bf16.msra.mxu1 %v2536_v30  ;;  %1403 = vmatprep.mubr.bf16.mxu0 %v2537_v37 }
  0x76   : > { %1500 = vmatprep.mubr.bf16.mxu1 %v2539_v38  ;;  %2363 = vmatprep.subr.bf16.mxu0 %v2543_v39 }
  0x77   : > { %2394 = vmatprep.subr.bf16.mxu1 %v2543_v39 }
  0x78   : > { %2364 = vmatpush3.bf16.msra.mxu0 %v2543_v39 }
  0x79   : > { %2402 = vmatpush3.bf16.msra.mxu1 %v2543_v39  ;;  %2365 = vmatprep.subr.bf16.mxu0 %v2550_v40 }
  0x7a   : > { %2395 = vmatprep.subr.bf16.mxu1 %v2550_v40 }
  0x7b   : > { %1404 = vmatmul.mubr.bf16.gmra.mrb[36].mxu0 %v2541_v41 }
  0x7c   : > { %1501 = vmatmul.mubr.bf16.gmra.mrb[36].mxu1 %v2542_v42  ;;  %1411 = vmatprep.mubr.bf16.mxu0 %v2544_v43 }
  0x7d   : > { %1508 = vmatprep.mubr.bf16.mxu1 %v2546_v44  ;;  %2366 = vmatpush3.bf16.msra.mxu0 %v2550_v40 }
  0x7e   : > { %2403 = vmatpush3.bf16.msra.mxu1 %v2550_v40  ;;  %2367 = vmatprep.subr.bf16.mxu0 %v2557_v45 }
  0x7f   : > { %2396 = vmatprep.subr.bf16.mxu1 %v2557_v45 }
  0x81   : > { %2368 = vmatpush3.bf16.msra.mxu0 %v2557_v45 }
  0x82   : > { %2404 = vmatpush3.bf16.msra.mxu1 %v2557_v45  ;;  %2369 = vmatprep.subr.bf16.mxu0 %v2564_v47 }
  0x83   : > { %1412 = vmatmul.mubr.bf16.gmra.mrb[40].mxu0 %v2548_v46  ;;  %2397 = vmatprep.subr.bf16.mxu1 %v2564_v47 }
  0x84   : > { %1509 = vmatmul.mubr.bf16.gmra.mrb[40].mxu1 %v2549_v48  ;;  %1419 = vmatprep.mubr.bf16.mxu0 %v2551_v49 }
  0x85   : > { %1516 = vmatprep.mubr.bf16.mxu1 %v2553_v50  ;;  %2370 = vmatpush3.bf16.msra.mxu0 %v2564_v47 }
  0x86   : > { %2405 = vmatpush3.bf16.msra.mxu1 %v2564_v47  ;;  %2371 = vmatprep.subr.bf16.mxu0 %v2571_v51 }
  0x87   : > { %2398 = vmatprep.subr.bf16.mxu1 %v2571_v51 }
  0x89   : > { %2372 = vmatpush3.bf16.msra.mxu0 %v2571_v51 }
  0x8a   : > { %2406 = vmatpush3.bf16.msra.mxu1 %v2571_v51  ;;  %2373 = vmatprep.subr.bf16.mxu0 %v2578_v52 }
  0x8b   : > { %1420 = vmatmul.mubr.bf16.gmra.mrb[44].mxu0 %v2555_v53  ;;  %2399 = vmatprep.subr.bf16.mxu1 %v2578_v52 }
  0x8c   : > { %1517 = vmatmul.mubr.bf16.gmra.mrb[44].mxu1 %v2556_v54  ;;  %1427 = vmatprep.mubr.bf16.mxu0 %v2558_v55 }
  0x8d   : > { %1524 = vmatprep.mubr.bf16.mxu1 %v2560_v56  ;;  %2374 = vmatpush3.bf16.msra.mxu0 %v2578_v52 }
  0x8e   : > { %2407 = vmatpush3.bf16.msra.mxu1 %v2578_v52  ;;  %2375 = vmatprep.subr.bf16.mxu0 %v2585_v57 }
  0x8f   : > { %2400 = vmatprep.subr.bf16.mxu1 %v2585_v57 }
  0x91   : > { %2376 = vmatpush3.bf16.msra.mxu0 %v2585_v57 }
  0x92   : > { %2408 = vmatpush3.bf16.msra.mxu1 %v2585_v57 }
  0x93   : > { %1428 = vmatmul.mubr.bf16.gmra.mrb[48].mxu0 %v2562_v58 }
  0x94   : > { %1525 = vmatmul.mubr.bf16.gmra.mrb[48].mxu1 %v2563_v59  ;;  %1435 = vmatprep.mubr.bf16.mxu0 %v2565_v60 }
  0x95   : > { %1532 = vmatprep.mubr.bf16.mxu1 %v2567_v61 }
  0x9b   : > { %1436 = vmatmul.mubr.bf16.gmra.mrb[52].mxu0 %v2569_v62 }
  0x9c   : > { %1533 = vmatmul.mubr.bf16.gmra.mrb[52].mxu1 %v2570_v63  ;;  %1443 = vmatprep.mubr.bf16.mxu0 %v2572_v0 }
  0x9d   : > { %1540 = vmatprep.mubr.bf16.mxu1 %v2574_v1 }
  0xa3   : > { %1444 = vmatmul.mubr.bf16.gmra.mrb[56].mxu0 %v2576_v2 }
  0xa4   : > { %1541 = vmatmul.mubr.bf16.gmra.mrb[56].mxu1 %v2577_v3  ;;  %1451 = vmatprep.mubr.bf16.mxu0 %v2579_v4 }
  0xa5   : > { %1548 = vmatprep.mubr.bf16.mxu1 %v2581_v5 }
  0xab   : > { %1452 = vmatmul.mubr.bf16.gmra.mrb[60].mxu0 %v2583_v6 }
  0xac   : > { %1549 = vmatmul.mubr.bf16.gmra.mrb[60].mxu1 %v2584_v7  ;;  %2377 = vmatprep.mubr.bf16.mxu0 %v2586_v8 }
  0xad   : > { %2385 = vmatprep.mubr.bf16.mxu1 %v2587_v9 }
  0xb3   : > { %2378 = vmatmul.mubr.bf16.vlgmr.msra.gmra.mrb[64].mxu0 %v2588_v10 }
  0xb4   : > { %2386 = vmatmul.mubr.bf16.vlgmr.msra.gmra.mrb[64].mxu1 %v2589_v11  ;;  %2381 = vmatprep.mubr.bf16.mxu0 %v2590_v12 }
  0xb5   : > { %2389 = vmatprep.mubr.bf16.mxu1 %v2591_v13 }
  0xbb   : > { %2382 = vmatmul.mubr.bf16.gmra.mrb[68].mxu0 %v2592_v14 }
  0xbc   : > { %2390 = vmatmul.mubr.bf16.gmra.mrb[68].mxu1 %v2593_v15 }
 0x106   : > { %v2105_v16 = vpop.f32.mrb[0].mxu0 }
 0x107   : > { %v2169_v17 = vpop.f32.mrb[0].mxu1  ;;  %v2106_v18 = vpop.f32.mrb[1].mxu0 }
 0x108   : > { %v2107_v19 = vadd.f32 %v2106_v18, %v2105_v16  ;;  %v2170_v20 = vpop.f32.mrb[1].mxu1  ;;  %v2108_v21 = vpop.f32.mrb[2].mxu0 }
 0x109   : > { %v2171_v22 = vadd.f32 %v2170_v20, %v2169_v17  ;;  %v2172_v23 = vpop.f32.mrb[2].mxu1  ;;  %v2109_v24 = vpop.f32.mrb[3].mxu0 }
 0x10a   : > { %v2110_v25 = vadd.f32 %v2109_v24, %v2108_v21  ;;  %v2173_v26 = vpop.f32.mrb[3].mxu1 }
 0x10b   : > { %v2953_v27 = vadd.f32 %v2171_v22, %v2107_v19  ;;  %v2174_v28 = vadd.f32 %v2173_v26, %v2172_v23 }
 0x10d   : > { %v2955_v29 = vadd.f32 %v2174_v28, %v2110_v25 }
 0x10e   : > { %v2111_v30 = vpop.f32.mrb[4].mxu0 }
 0x10f   : > { %v2175_v31 = vpop.f32.mrb[4].mxu1  ;;  %v2112_v32 = vpop.f32.mrb[5].mxu0 }
 0x110   : > { %v2113_v33 = vadd.f32 %v2112_v32, %v2111_v30  ;;  %v2176_v34 = vpop.f32.mrb[5].mxu1  ;;  %v2114_v35 = vpop.f32.mrb[6].mxu0 }
 0x111   : > { %v2177_v36 = vadd.f32 %v2176_v34, %v2175_v31  ;;  %v2178_v37 = vpop.f32.mrb[6].mxu1  ;;  %v2115_v38 = vpop.f32.mrb[7].mxu0 }
 0x112   : > { %v2116_v39 = vadd.f32 %v2115_v38, %v2114_v35  ;;  %v2179_v40 = vpop.f32.mrb[7].mxu1 }
 0x113   : > { %v2957_v41 = vadd.f32 %v2177_v36, %v2113_v33  ;;  %v2180_v42 = vadd.f32 %v2179_v40, %v2178_v37 }
 0x115   : > { %v2959_v43 = vadd.f32 %v2180_v42, %v2116_v39 }
 0x116   : > { %v2117_v44 = vpop.f32.mrb[8].mxu0 }
 0x117   : > { %v2181_v45 = vpop.f32.mrb[8].mxu1  ;;  %v2118_v46 = vpop.f32.mrb[9].mxu0 }
 0x118   : > { %v2119_v47 = vadd.f32 %v2118_v46, %v2117_v44  ;;  %v2182_v48 = vpop.f32.mrb[9].mxu1  ;;  %v2120_v49 = vpop.f32.mrb[10].mxu0 }
 0x119   : > { %v2183_v50 = vadd.f32 %v2182_v48, %v2181_v45  ;;  %v2184_v51 = vpop.f32.mrb[10].mxu1  ;;  %v2121_v52 = vpop.f32.mrb[11].mxu0 }
 0x11a   : > { %v2122_v53 = vadd.f32 %v2121_v52, %v2120_v49  ;;  %v2185_v54 = vpop.f32.mrb[11].mxu1 }
 0x11b   : > { %v2961_v55 = vadd.f32 %v2183_v50, %v2119_v47  ;;  %v2186_v56 = vadd.f32 %v2185_v54, %v2184_v51 }
 0x11d   : > { %v2963_v57 = vadd.f32 %v2186_v56, %v2122_v53 }
 0x11e   : > { %v2123_v58 = vpop.f32.mrb[12].mxu0 }
 0x11f   : > { %v2187_v59 = vpop.f32.mrb[12].mxu1  ;;  %v2124_v60 = vpop.f32.mrb[13].mxu0 }
 0x120   : > { %v2125_v61 = vadd.f32 %v2124_v60, %v2123_v58  ;;  %v2188_v62 = vpop.f32.mrb[13].mxu1  ;;  %v2126_v63 = vpop.f32.mrb[14].mxu0 }
 0x121   : > { %v2189_v0 = vadd.f32 %v2188_v62, %v2187_v59  ;;  %v2190_v1 = vpop.f32.mrb[14].mxu1  ;;  %v2127_v2 = vpop.f32.mrb[15].mxu0 }
 0x122   : > { %v2128_v3 = vadd.f32 %v2127_v2, %v2126_v63  ;;  %v2191_v4 = vpop.f32.mrb[15].mxu1 }
 0x123   : > { %v2965_v5 = vadd.f32 %v2189_v0, %v2125_v61  ;;  %v2192_v6 = vadd.f32 %v2191_v4, %v2190_v1 }
 0x125   : > { %v2967_v7 = vadd.f32 %v2192_v6, %v2128_v3 }
 0x126   : > { %v2129_v8 = vpop.f32.mrb[16].mxu0 }
 0x127   : > { %v2193_v9 = vpop.f32.mrb[16].mxu1  ;;  %v2130_v10 = vpop.f32.mrb[17].mxu0 }
 0x128   : > { %v2131_v11 = vadd.f32 %v2130_v10, %v2129_v8  ;;  %v2194_v12 = vpop.f32.mrb[17].mxu1  ;;  %v2132_v13 = vpop.f32.mrb[18].mxu0 }
 0x129   : > { %v2195_v14 = vadd.f32 %v2194_v12, %v2193_v9  ;;  %v2196_v15 = vpop.f32.mrb[18].mxu1  ;;  %v2133_v16 = vpop.f32.mrb[19].mxu0 }
 0x12a   : > { %v2134_v17 = vadd.f32 %v2133_v16, %v2132_v13  ;;  %v2197_v18 = vpop.f32.mrb[19].mxu1 }
 0x12b   : > { %v2969_v19 = vadd.f32 %v2195_v14, %v2131_v11  ;;  %v2198_v20 = vadd.f32 %v2197_v18, %v2196_v15 }
 0x12d   : > { %v2971_v21 = vadd.f32 %v2198_v20, %v2134_v17 }
 0x12e   : > { %v2135_v22 = vpop.f32.mrb[20].mxu0 }
 0x12f   : > { %v2199_v23 = vpop.f32.mrb[20].mxu1  ;;  %v2136_v24 = vpop.f32.mrb[21].mxu0 }
 0x130   : > { %v2137_v25 = vadd.f32 %v2136_v24, %v2135_v22  ;;  %v2200_v26 = vpop.f32.mrb[21].mxu1  ;;  %v2138_v28 = vpop.f32.mrb[22].mxu0 }
 0x131   : > { %v2201_v30 = vadd.f32 %v2200_v26, %v2199_v23  ;;  %v2202_v31 = vpop.f32.mrb[22].mxu1  ;;  %v2139_v32 = vpop.f32.mrb[23].mxu0 }
 0x132   : > { %v2140_v33 = vadd.f32 %v2139_v32, %v2138_v28  ;;  %v2203_v34 = vpop.f32.mrb[23].mxu1 }
 0x133   : > { %v2973_v35 = vadd.f32 %v2201_v30, %v2137_v25  ;;  %v2204_v36 = vadd.f32 %v2203_v34, %v2202_v31 }
 0x135   : > { %v2975_v37 = vadd.f32 %v2204_v36, %v2140_v33 }
 0x136   : > { %v2141_v38 = vpop.f32.mrb[24].mxu0 }
 0x137   : > { %v2205_v39 = vpop.f32.mrb[24].mxu1  ;;  %v2142_v40 = vpop.f32.mrb[25].mxu0 }
 0x138   : > { %v2143_v42 = vadd.f32 %v2142_v40, %v2141_v38  ;;  %v2206_v44 = vpop.f32.mrb[25].mxu1  ;;  %v2144_v45 = vpop.f32.mrb[26].mxu0 }
 0x139   : > { %v2207_v46 = vadd.f32 %v2206_v44, %v2205_v39  ;;  %v2208_v47 = vpop.f32.mrb[26].mxu1  ;;  %v2145_v48 = vpop.f32.mrb[27].mxu0 }
 0x13a   : > { %v2146_v49 = vadd.f32 %v2145_v48, %v2144_v45  ;;  %v2209_v50 = vpop.f32.mrb[27].mxu1 }
 0x13b   : > { %v2977_v51 = vadd.f32 %v2207_v46, %v2143_v42  ;;  %v2210_v52 = vadd.f32 %v2209_v50, %v2208_v47 }
 0x13d   : > { %v2979_v53 = vadd.f32 %v2210_v52, %v2146_v49 }
 0x13e   : > { %v2147_v54 = vpop.f32.mrb[28].mxu0 }
 0x13f   : > { %v2211_v56 = vpop.f32.mrb[28].mxu1  ;;  %v2148_v58 = vpop.f32.mrb[29].mxu0 }
 0x140   : > { %v2149_v59 = vadd.f32 %v2148_v58, %v2147_v54  ;;  %v2212_v60 = vpop.f32.mrb[29].mxu1  ;;  %v2150_v61 = vpop.f32.mrb[30].mxu0 }
 0x141   : > { %v2213_v62 = vadd.f32 %v2212_v60, %v2211_v56  ;;  %v2214_v63 = vpop.f32.mrb[30].mxu1  ;;  %v2151_v0 = vpop.f32.mrb[31].mxu0 }
 0x142   : > { %v2152_v1 = vadd.f32 %v2151_v0, %v2150_v61  ;;  %v2215_v2 = vpop.f32.mrb[31].mxu1 }
 0x143   : > { %v2981_v3 = vadd.f32 %v2213_v62, %v2149_v59  ;;  %v2216_v4 = vadd.f32 %v2215_v2, %v2214_v63 }
 0x145   : > { %v2983_v6 = vadd.f32 %v2216_v4, %v2152_v1 }
 0x146   : > { %v2233_v8 = vpop.f32.mrb[32].mxu0 }
 0x147   : > { %v2297_v9 = vpop.f32.mrb[32].mxu1  ;;  %v2234_v10 = vpop.f32.mrb[33].mxu0 }
 0x148   : > { %v2235_v11 = vadd.f32 %v2234_v10, %v2233_v8  ;;  %v2298_v12 = vpop.f32.mrb[33].mxu1  ;;  %v2236_v13 = vpop.f32.mrb[34].mxu0 }
 0x149   : > { %v2299_v14 = vadd.f32 %v2298_v12, %v2297_v9  ;;  %v2300_v15 = vpop.f32.mrb[34].mxu1  ;;  %v2237_v16 = vpop.f32.mrb[35].mxu0 }
 0x14a   : > { %v1398_v17 = vadd.f32 %v2235_v11, %v2953_v27  ;;  %v2238_v18 = vadd.f32 %v2237_v16, %v2236_v13  ;;  %v2301_v20 = vpop.f32.mrb[35].mxu1 }
 0x14b   : > { %v2302_v22 = vadd.f32 %v2301_v20, %v2300_v15 }
 0x14c   : > { %v1401_v23 = vadd.f32 %v2238_v18, %v2955_v29  ;;  %v2987_v24 = vadd.f32 %v2299_v14, %v1398_v17 }
 0x14e   : > { %v2239_v25 = vpop.f32.mrb[36].mxu0  ;;  %v2989_v26 = vadd.f32 %v2302_v22, %v1401_v23 }
 0x14f   : > { %v2303_v28 = vpop.f32.mrb[36].mxu1  ;;  %v2240_v30 = vpop.f32.mrb[37].mxu0 }
 0x150   : > { %v2241_v31 = vadd.f32 %v2240_v30, %v2239_v25  ;;  %v2304_v32 = vpop.f32.mrb[37].mxu1  ;;  %v2242_v33 = vpop.f32.mrb[38].mxu0 }
 0x151   : > { %v2305_v34 = vadd.f32 %v2304_v32, %v2303_v28  ;;  %v2306_v36 = vpop.f32.mrb[38].mxu1  ;;  %v2243_v38 = vpop.f32.mrb[39].mxu0 }
 0x152   : > { %v1406_v27 = vadd.f32 %v2241_v31, %v2957_v41  ;;  %v2244_v39 = vadd.f32 %v2243_v38, %v2242_v33  ;;  %v2307_v40 = vpop.f32.mrb[39].mxu1 }
 0x153   : > { %v2308_v42 = vadd.f32 %v2307_v40, %v2306_v36 }
 0x154   : > { %v1409_v29 = vadd.f32 %v2244_v39, %v2959_v43  ;;  %v2993_v44 = vadd.f32 %v2305_v34, %v1406_v27 }
 0x156   : > { %v2245_v45 = vpop.f32.mrb[40].mxu0  ;;  %v2995_v46 = vadd.f32 %v2308_v42, %v1409_v29 }
 0x157   : > { %v2309_v47 = vpop.f32.mrb[40].mxu1  ;;  %v2246_v48 = vpop.f32.mrb[41].mxu0 }
 0x158   : > { %v2247_v49 = vadd.f32 %v2246_v48, %v2245_v45  ;;  %v2310_v50 = vpop.f32.mrb[41].mxu1  ;;  %v2248_v52 = vpop.f32.mrb[42].mxu0 }
 0x159   : > { %v2311_v54 = vadd.f32 %v2310_v50, %v2309_v47  ;;  %v2312_v56 = vpop.f32.mrb[42].mxu1  ;;  %v2249_v58 = vpop.f32.mrb[43].mxu0 }
 0x15a   : > { %v1414_v41 = vadd.f32 %v2247_v49, %v2961_v55  ;;  %v2250_v59 = vadd.f32 %v2249_v58, %v2248_v52  ;;  %v2313_v60 = vpop.f32.mrb[43].mxu1 }
 0x15b   : > { %v2314_v61 = vadd.f32 %v2313_v60, %v2312_v56 }
 0x15c   : > { %v1417_v43 = vadd.f32 %v2250_v59, %v2963_v57  ;;  %v2999_v62 = vadd.f32 %v2311_v54, %v1414_v41 }
 0x15e   : > { %v2251_v63 = vpop.f32.mrb[44].mxu0  ;;  %v3001_v0 = vadd.f32 %v2314_v61, %v1417_v43 }
 0x15f   : > { %v2315_v1 = vpop.f32.mrb[44].mxu1  ;;  %v2252_v2 = vpop.f32.mrb[45].mxu0 }
 0x160   : > { %v2253_v4 = vadd.f32 %v2252_v2, %v2251_v63  ;;  %v2316_v8 = vpop.f32.mrb[45].mxu1  ;;  %v2254_v9 = vpop.f32.mrb[46].mxu0 }
 0x161   : > { %v2317_v10 = vadd.f32 %v2316_v8, %v2315_v1  ;;  %v2318_v11 = vpop.f32.mrb[46].mxu1  ;;  %v2255_v12 = vpop.f32.mrb[47].mxu0 }
 0x162   : > { %v1422_v55 = vadd.f32 %v2253_v4, %v2965_v5  ;;  %v2256_v13 = vadd.f32 %v2255_v12, %v2254_v9  ;;  %v2319_v14 = vpop.f32.mrb[47].mxu1 }
 0x163   : > { %v2320_v15 = vadd.f32 %v2319_v14, %v2318_v11 }
 0x164   : > { %v1425_v57 = vadd.f32 %v2256_v13, %v2967_v7  ;;  %v3005_v16 = vadd.f32 %v2317_v10, %v1422_v55 }
 0x166   : > { %v2257_v17 = vpop.f32.mrb[48].mxu0  ;;  %v3007_v18 = vadd.f32 %v2320_v15, %v1425_v57 }
 0x167   : > { %v2321_v20 = vpop.f32.mrb[48].mxu1  ;;  %v2258_v22 = vpop.f32.mrb[49].mxu0 }
 0x168   : > { %v2259_v23 = vadd.f32 %v2258_v22, %v2257_v17  ;;  %v2322_v25 = vpop.f32.mrb[49].mxu1  ;;  %v2260_v28 = vpop.f32.mrb[50].mxu0 }
 0x169   : > { %v2323_v30 = vadd.f32 %v2322_v25, %v2321_v20  ;;  %v2324_v31 = vpop.f32.mrb[50].mxu1  ;;  %v2261_v32 = vpop.f32.mrb[51].mxu0 }
 0x16a   : > { %v1430_v5 = vadd.f32 %v2259_v23, %v2969_v19  ;;  %v2262_v33 = vadd.f32 %v2261_v32, %v2260_v28  ;;  %v2325_v34 = vpop.f32.mrb[51].mxu1 }
 0x16b   : > { %v2326_v36 = vadd.f32 %v2325_v34, %v2324_v31 }
 0x16c   : > { %v1433_v7 = vadd.f32 %v2262_v33, %v2971_v21  ;;  %v1527_v38 = vadd.f32 %v2323_v30, %v1430_v5 }
 0x16e   : > { %v2263_v27 = vpop.f32.mrb[52].mxu0  ;;  %v3011_v39 = vadd.f32 %v2326_v36, %v1433_v7 }
 0x16f   : > { %v2327_v40 = vpop.f32.mrb[52].mxu1  ;;  %v2264_v42 = vpop.f32.mrb[53].mxu0 }
 0x170   : > { %v2265_v29 = vadd.f32 %v2264_v42, %v2263_v27  ;;  %v2328_v45 = vpop.f32.mrb[53].mxu1  ;;  %v2266_v47 = vpop.f32.mrb[54].mxu0 }
 0x171   : > { %v2329_v48 = vadd.f32 %v2328_v45, %v2327_v40  ;;  %v2330_v49 = vpop.f32.mrb[54].mxu1  ;;  %v2267_v50 = vpop.f32.mrb[55].mxu0 }
 0x172   : > { %v1438_v52 = vadd.f32 %v2265_v29, %v2973_v35  ;;  %v2268_v19 = vadd.f32 %v2267_v50, %v2266_v47  ;;  %v2331_v54 = vpop.f32.mrb[55].mxu1 }
 0x173   : > { %v2332_v56 = vadd.f32 %v2331_v54, %v2330_v49 }
 0x174   : > { %v1441_v58 = vadd.f32 %v2268_v19, %v2975_v37  ;;  %v1535_v21 = vadd.f32 %v2329_v48, %v1438_v52 }
 0x176   : > { %v2269_v41 = vpop.f32.mrb[56].mxu0  ;;  %v1538_v59 = vadd.f32 %v2332_v56, %v1441_v58 }
 0x177   : > { %v2333_v60 = vpop.f32.mrb[56].mxu1  ;;  %v2270_v61 = vpop.f32.mrb[57].mxu0 }
 0x178   : > { %v2271_v43 = vadd.f32 %v2270_v61, %v2269_v41  ;;  %v2334_v63 = vpop.f32.mrb[57].mxu1  ;;  %v2272_v1 = vpop.f32.mrb[58].mxu0 }
 0x179   : > { %v2335_v2 = vadd.f32 %v2334_v63, %v2333_v60  ;;  %v2336_v4 = vpop.f32.mrb[58].mxu1  ;;  %v2273_v8 = vpop.f32.mrb[59].mxu0 }
 0x17a   : > { %v1446_v9 = vadd.f32 %v2271_v43, %v2977_v51  ;;  %v2274_v10 = vadd.f32 %v2273_v8, %v2272_v1  ;;  %v2337_v35 = vpop.f32.mrb[59].mxu1 }
 0x17b   : > { %v2338_v11 = vadd.f32 %v2337_v35, %v2336_v4 }
 0x17c   : > { %v1449_v12 = vadd.f32 %v2274_v10, %v2979_v53  ;;  %v3017_v55 = vadd.f32 %v2335_v2, %v1446_v9 }
 0x17e   : > { %v2275_v37 = vpop.f32.mrb[60].mxu0  ;;  %v3019_v13 = vadd.f32 %v2338_v11, %v1449_v12 }
 0x17f   : > { %v2339_v14 = vpop.f32.mrb[60].mxu1  ;;  %v2276_v15 = vpop.f32.mrb[61].mxu0 }
 0x180   : > { %v2277_v57 = vadd.f32 %v2276_v15, %v2275_v37  ;;  %v2340_v17 = vpop.f32.mrb[61].mxu1  ;;  %v2278_v20 = vpop.f32.mrb[62].mxu0 }
 0x181   : > { %v2341_v22 = vadd.f32 %v2340_v17, %v2339_v14  ;;  %v2342_v23 = vpop.f32.mrb[62].mxu1  ;;  %v2279_v25 = vpop.f32.mrb[63].mxu0 }
 0x182   : > { %v1454_v51 = vadd.f32 %v2277_v57, %v2981_v3  ;;  %v2280_v28 = vadd.f32 %v2279_v25, %v2278_v20  ;;  %v2343_v30 = vpop.f32.mrb[63].mxu1 }
 0x183   : > { %v2344_v31 = vadd.f32 %v2343_v30, %v2342_v23 }
 0x184   : > { %v1457_v53 = vadd.f32 %v2280_v28, %v2983_v6  ;;  %v1551_v32 = vadd.f32 %v2341_v22, %v1454_v51 }
 0x186   : > { %v2379_v5 = vpop.f32.mrb[64].mxu0  ;;  %v3023_v33 = vadd.f32 %v2344_v31, %v1457_v53 }
 0x187   : > { %v3026_v34 = vadd.f32 %v2379_v5, %v2993_v44  ;;  %v2387_v36 = vpop.f32.mrb[64].mxu1  ;;  %v1591_v7 = vpop.f32.mrb[65].mxu0 }
 0x188   : > { %v3028_v27 = vadd.f32 %v2387_v36, %v1535_v21  ;;  %v3031_v40 = vadd.f32 %v1591_v7, %v2987_v24  ;;  %v1623_v3 = vpop.f32.mrb[65].mxu1  ;;  %v2380_v42 = vpop.f32.mrb[66].mxu0 }
 0x189   : > { %v1672_v29 = vmul.f32 %v3026_v34, %v3026_v34  ;;  %v3035_v6 = vadd.f32 %v1623_v3, %v1527_v38  ;;  %v3038_v45 = vadd.f32 %v2380_v42, %v2995_v46  ;;  %v2388_v47 = vpop.f32.mrb[66].mxu1  ;;  %v1594_v44 = vpop.f32.mrb[67].mxu0  ;;  %v1752_v60 = vsub.f32 %v3026_v34, %v3026_v34 }
 0x18a   : > { %v1680_v48 = vmul.f32 %v3028_v27, %v3028_v27  ;;  %v1670_v49 = vmul.f32 %v3031_v40, %v3031_v40  ;;  %v1626_v24 = vpop.f32.mrb[67].mxu1  ;;  %v3048_v46 = vadd.f32 %v2388_v47, %v1538_v59  ;;  %v3051_v41 = vadd.f32 %v1594_v44, %v2989_v26 }
 0x18b   : > { %v1720_v50 = vsub.f32 %v1672_v29, %v1672_v29  ;;  %v1678_v52 = vmul.f32 %v3035_v6, %v3035_v6  ;;  %v1673_v38 = vmul.f32 %v3038_v45, %v3038_v45  ;;  %v1760_v26 = vsub.f32 %v3028_v27, %v3028_v27 }
 0x18c   : > { %v1728_v19 = vsub.f32 %v1680_v48, %v1680_v48  ;;  %v1718_v54 = vsub.f32 %v1670_v49, %v1670_v49  ;;  %v1681_v63 = vmul.f32 %v3048_v46, %v3048_v46  ;;  %v1671_v59 = vmul.f32 %v3051_v41, %v3051_v41 }
 0x18d   : > { %v1736_v56 = vmax.f32 %v1720_v50, 0.0  ;;  %v1726_v58 = vsub.f32 %v1678_v52, %v1678_v52  ;;  %v1721_v21 = vsub.f32 %v1673_v38, %v1673_v38  ;;  %v3062_v25 = vadd.f32 %v1626_v24, %v3011_v39 }
 0x18e   : > { %v1744_v61 = vmax.f32 %v1728_v19, 0.0  ;;  %v1734_v43 = vmax.f32 %v1718_v54, 0.0  ;;  %v2383_v1 = vpop.f32.mrb[68].mxu0  ;;  %v1729_v12 = vsub.f32 %v1681_v63, %v1681_v63  ;;  %v1719_v17 = vsub.f32 %v1671_v59, %v1671_v59 }
 0x18f   : > { %v1768_v2 = vadd.f32 1e-05, %v1736_v56  ;;  %v1742_v4 = vmax.f32 %v1726_v58, 0.0  ;;  %v1737_v8 = vmax.f32 %v1721_v21, 0.0  ;;  %v2391_v9 = vpop.f32.mrb[68].mxu1  ;;  %v1607_v10 = vpop.f32.mrb[69].mxu0  ;;  %v3065_v51 = vadd.f32 %v2383_v1, %v3005_v16 }
 0x190   : > { %v1776_v35 = vadd.f32 1e-05, %v1744_v61  ;;  %v1766_v11 = vadd.f32 1e-05, %v1734_v43  ;;  %v1639_v37 = vpop.f32.mrb[69].mxu1  ;;  %v2384_v14 = vpop.f32.mrb[70].mxu0  ;;  %v3069_v31 = vadd.f32 %v2391_v9, %v1551_v32  ;;  %v3072_v53 = vadd.f32 %v1607_v10, %v2999_v62 }
 0x191   : > { %2594 = vrsqrt.f32 %v1768_v2  ;;  %v1774_v15 = vadd.f32 1e-05, %v1742_v4  ;;  %v1769_v57 = vadd.f32 1e-05, %v1737_v8  ;;  %v2392_v20 = vpop.f32.mrb[70].mxu1  ;;  %v1610_v22 = vpop.f32.mrb[71].mxu0  ;;  %v1750_v5 = vsub.f32 %v3031_v40, %v3031_v40 }
 0x192   : > { %2596 = vrsqrt.f32 %v1776_v35  ;;  %v1745_v23 = vmax.f32 %v1729_v12, 0.0  ;;  %v3067_v28 = vpop.f32.mrb[71].mxu1  ;;  %v1735_v30 = vmax.f32 %v1719_v17, 0.0  ;;  %v1679_v39 = vmul.f32 %v3062_v25, %v3062_v25 }
 0x193   : > { %2598 = vrsqrt.f32 %v1766_v11  ;;  %v1758_v16 = vsub.f32 %v3035_v6, %v3035_v6  ;;  %v1676_v32 = vmul.f32 %v3065_v51, %v3065_v51  ;;  %v1753_v62 = vsub.f32 %v3038_v45, %v3038_v45 }
 0x194   : > { %2600 = vrsqrt.f32 %v1774_v15  ;;  %v1777_v36 = vadd.f32 1e-05, %v1745_v23  ;;  %v1767_v7 = vadd.f32 1e-05, %v1735_v30  ;;  %v1727_v27 = vsub.f32 %v1679_v39, %v1679_v39 }
 0x195   : > { %2602 = vrsqrt.f32 %v1769_v57  ;;  %v1684_v40 = vmul.f32 %v3069_v31, %v3069_v31  ;;  %v1761_v3 = vsub.f32 %v3048_v46, %v3048_v46  ;;  %v1724_v42 = vsub.f32 %v1676_v32, %v1676_v32 }
 0x196   : > { %2604 = vrsqrt.f32 %v1777_v36  ;;  %v1674_v29 = vmul.f32 %v3072_v53, %v3072_v53  ;;  %v1743_v6 = vmax.f32 %v1727_v27, 0.0  ;;  %v3091_v44 = vadd.f32 %v1639_v37, %v3017_v55 }
 0x197   : > { %2606 = vrsqrt.f32 %v1767_v7  ;;  %v1732_v47 = vsub.f32 %v1684_v40, %v1684_v40  ;;  %v3094_v45 = vadd.f32 %v2384_v14, %v3007_v18  ;;  %v1740_v48 = vmax.f32 %v1724_v42, 0.0 }
 0x198   : > { %v1722_v49 = vsub.f32 %v1674_v29, %v1674_v29  ;;  %v3097_v24 = vadd.f32 %v2392_v20, %v3023_v33  ;;  %v3100_v50 = vadd.f32 %v1610_v22, %v3001_v0  ;;  %v1751_v52 = vsub.f32 %v3051_v41, %v3051_v41 }
 0x199   : > { %v1775_v38 = vadd.f32 1e-05, %v1743_v6  ;;  %v1748_v19 = vmax.f32 %v1732_v47, 0.0  ;;  %v1682_v55 = vmul.f32 %v3091_v44, %v3091_v44  ;;  %v1759_v18 = vsub.f32 %v3062_v25, %v3062_v25 }
 0x19a   : > { %v1772_v46 = vadd.f32 1e-05, %v1740_v48  ;;  %v1738_v56 = vmax.f32 %v1722_v49, 0.0  ;;  %v1677_v33 = vmul.f32 %v3094_v45, %v3094_v45  ;;  %v1685_v32 = vmul.f32 %v3097_v24, %v3097_v24 }
 0x19b   : > { %v2595_v54 = vpop.eup %2594  ;;  %2608 = vrsqrt.f32 %v1775_v38  ;;  %v1780_v21 = vadd.f32 1e-05, %v1748_v19  ;;  %v1730_v41 = vsub.f32 %v1682_v55, %v1682_v55  ;;  %v1764_v40 = vsub.f32 %v3069_v31, %v3069_v31 }
 0x19c   : > { %v2597_v0 = vpop.eup %2596  ;;  %v1800_v58 = vmul.f32 %v2595_v54, %v1752_v60  ;;  %2610 = vrsqrt.f32 %v1772_v46  ;;  %v1770_v63 = vadd.f32 1e-05, %v1738_v56  ;;  %v1725_v1 = vsub.f32 %v1677_v33, %v1677_v33 }
 0x19d   : > { %v2599_v61 = vpop.eup %2598  ;;  %v1808_v43 = vmul.f32 %v2597_v0, %v1760_v26  ;;  %2612 = vrsqrt.f32 %v1780_v21  ;;  %v1746_v23 = vmax.f32 %v1730_v41, 0.0  ;;  %v1675_v42 = vmul.f32 %v3100_v50, %v3100_v50 }
 0x19e   : > { %v2601_v2 = vpop.eup %2600  ;;  %vm1816_vm1 = vcmp.ge.f32.partialorder %v1800_v58, 0.0  ;;  %v1832_v4 = vmul.f32 0.2, %v1800_v58  ;;  %v1798_v8 = vmul.f32 %v2599_v61, %v1750_v5  ;;  %2614 = vrsqrt.f32 %v1770_v63 }
 0x19f   : > { %v2603_v34 = vpop.eup %2602  ;;  %vm1824_vm2 = vcmp.ge.f32.partialorder %v1808_v43, 0.0  ;;  %v1840_v60 = vmul.f32 0.2, %v1808_v43  ;;  %v1806_v59 = vmul.f32 %v2601_v2, %v1758_v16  ;;  %v1741_v36 = vmax.f32 %v1725_v1, 0.0 }
 0x1a0   : > { %v2605_v9 = vpop.eup %2604  ;;  %v1848_v10 = vsel %vm1816_vm1, %v1800_v58, %v1832_v4  ;;  %vm1814_vm3 = vcmp.ge.f32.partialorder %v1798_v8, 0.0  ;;  %v1830_v26 = vmul.f32 0.2, %v1798_v8  ;;  %v1801_v35 = vmul.f32 %v2603_v34, %v1753_v62 }
 0x1a1   : > { %v2607_v11 = vpop.eup %2606  ;;  %1865 = vst.msk [vmem:[%s3117_s6 + $0x10] sm:$0xff] %vm1862_vm0, %v1848_v10  ;;  %v1856_v12 = vsel %vm1824_vm2, %v1808_v43, %v1840_v60  ;;  %vm1822_vm4 = vcmp.ge.f32.partialorder %v1806_v59, 0.0  ;;  %v1838_v37 = vmul.f32 0.2, %v1806_v59  ;;  %v1809_v14 = vmul.f32 %v2605_v9, %v1761_v3 }
 0x1a2   : > { %1873 = vst.msk [vmem:[%s3117_s6 + $0x50] sm:$0xff] %vm1862_vm0, %v1856_v12  ;;  %v1846_v15 = vsel %vm1814_vm3, %v1798_v8, %v1830_v26  ;;  %vm1817_vm5 = vcmp.ge.f32.partialorder %v1801_v35, 0.0  ;;  %v1833_v57 = vmul.f32 0.2, %v1801_v35  ;;  %v1799_v17 = vmul.f32 %v2607_v11, %v1751_v52 }
 0x1a3   : > { %1863 = vst.msk [vmem:[%s3117_s6] sm:$0xff] %vm1862_vm0, %v1846_v15  ;;  %v1854_v20 = vsel %vm1822_vm4, %v1806_v59, %v1838_v37  ;;  %vm1825_vm6 = vcmp.ge.f32.partialorder %v1809_v14, 0.0  ;;  %v1841_v22 = vmul.f32 0.2, %v1809_v14  ;;  %v1756_v16 = vsub.f32 %v3065_v51, %v3065_v51 }
 0x1a4   : > { %1871 = vst.msk [vmem:[%s3117_s6 + $0x40] sm:$0xff] %vm1862_vm0, %v1854_v20  ;;  %v1849_v30 = vsel %vm1817_vm5, %v1801_v35, %v1833_v57  ;;  %vm1815_vm7 = vcmp.ge.f32.partialorder %v1799_v17, 0.0  ;;  %v1831_v5 = vmul.f32 0.2, %v1799_v17  ;;  %v1778_v7 = vadd.f32 1e-05, %v1746_v23 }
 0x1a5   : > { %1866 = vst.msk [vmem:[%s3117_s6 + $0x18] sm:$0xff] %vm1862_vm0, %v1849_v30  ;;  %v1857_v39 = vsel %vm1825_vm6, %v1809_v14, %v1841_v22  ;;  %v2609_v62 = vpop.eup %2608  ;;  %v1773_v3 = vadd.f32 1e-05, %v1741_v36  ;;  %v1733_v6 = vsub.f32 %v1685_v32, %v1685_v32  ;;  %v3146_v47 = vadd.f32 %v3067_v28, %v3019_v13 }
 0x1a6   : > { %1874 = vst.msk [vmem:[%s3117_s6 + $0x58] sm:$0xff] %vm1862_vm0, %v1857_v39  ;;  %v1847_v27 = vsel %vm1815_vm7, %v1799_v17, %v1831_v5  ;;  %v2611_v29 = vpop.eup %2610  ;;  %v1807_v51 = vmul.f32 %v2609_v62, %v1759_v18  ;;  %2616 = vrsqrt.f32 %v1778_v7  ;;  %v1754_v31 = vsub.f32 %v3072_v53, %v3072_v53 }
 0x1a7   : > { %1864 = vst.msk [vmem:[%s3117_s6 + $0x8] sm:$0xff] %vm1862_vm0, %v1847_v27  ;;  %v2613_v48 = vpop.eup %2612  ;;  %v1804_v49 = vmul.f32 %v2611_v29, %v1756_v16  ;;  %2618 = vrsqrt.f32 %v1773_v3  ;;  %v1723_v52 = vsub.f32 %v1675_v42, %v1675_v42  ;;  %v1749_v55 = vmax.f32 %v1733_v6, 0.0 }
 0x1a8   : > { %v2615_v38 = vpop.eup %2614  ;;  %vm1823_vm8 = vcmp.ge.f32.partialorder %v1807_v51, 0.0  ;;  %v1839_v19 = vmul.f32 0.2, %v1807_v51  ;;  %v1812_v25 = vmul.f32 %v2613_v48, %v1764_v40  ;;  %v1683_v21 = vmul.f32 %v3146_v47, %v3146_v47 }
 0x1a9   : > { %vm1820_vm9 = vcmp.ge.f32.partialorder %v1804_v49, 0.0  ;;  %v1836_v54 = vmul.f32 0.2, %v1804_v49  ;;  %v1802_v18 = vmul.f32 %v2615_v38, %v1754_v31  ;;  %v1739_v13 = vmax.f32 %v1723_v52, 0.0 }
 0x1aa   : > { %v1855_v28 = vsel %vm1823_vm8, %v1807_v51, %v1839_v19  ;;  %vm1828_vm10 = vcmp.ge.f32.partialorder %v1812_v25, 0.0  ;;  %v1844_v46 = vmul.f32 0.2, %v1812_v25  ;;  %v1781_v56 = vadd.f32 1e-05, %v1749_v55 }
 0x1ab   : > { %1872 = vst.msk [vmem:[%s3117_s6 + $0x48] sm:$0xff] %vm1862_vm0, %v1855_v28  ;;  %v1852_v53 = vsel %vm1820_vm9, %v1804_v49, %v1836_v54  ;;  %vm1818_vm11 = vcmp.ge.f32.partialorder %v1802_v18, 0.0  ;;  %v1834_v33 = vmul.f32 0.2, %v1802_v18  ;;  %v1771_v0 = vadd.f32 1e-05, %v1739_v13 }
 0x1ac   : > { %1869 = vst.msk [vmem:[%s3117_s6 + $0x30] sm:$0xff] %vm1862_vm0, %v1852_v53  ;;  %v1860_v58 = vsel %vm1828_vm10, %v1812_v25, %v1844_v46  ;;  %2620 = vrsqrt.f32 %v1781_v56  ;;  %v1731_v61 = vsub.f32 %v1683_v21, %v1683_v21  ;;  %v1762_v43 = vsub.f32 %v3091_v44, %v3091_v44 }
 0x1ad   : > { %1877 = vst.msk [vmem:[%s3117_s6 + $0x70] sm:$0xff] %vm1862_vm0, %v1860_v58  ;;  %v1850_v41 = vsel %vm1818_vm11, %v1802_v18, %v1834_v33  ;;  %2622 = vrsqrt.f32 %v1771_v0  ;;  %v1757_v1 = vsub.f32 %v3094_v45, %v3094_v45  ;;  %v1765_v44 = vsub.f32 %v3097_v24, %v3097_v24 }
 0x1ae   : > { %1867 = vst.msk [vmem:[%s3117_s6 + $0x20] sm:$0xff] %vm1862_vm0, %v1850_v41  ;;  %v1747_v2 = vmax.f32 %v1731_v61, 0.0  ;;  %v1755_v35 = vsub.f32 %v3100_v50, %v3100_v50  ;;  %v1763_v17 = vsub.f32 %v3146_v47, %v3146_v47 }
 0x1b0   : > { %v2617_v63 = vpop.eup %2616  ;;  %v1779_v60 = vadd.f32 1e-05, %v1747_v2 }
 0x1b1   : > { %v2619_v4 = vpop.eup %2618  ;;  %v1810_v8 = vmul.f32 %v2617_v63, %v1762_v43 }
 0x1b2   : > { %v1805_v34 = vmul.f32 %v2619_v4, %v1757_v1  ;;  %2624 = vrsqrt.f32 %v1779_v60 }
 0x1b3   : > { %vm1826_vm12 = vcmp.ge.f32.partialorder %v1810_v8, 0.0  ;;  %v1842_v59 = vmul.f32 0.2, %v1810_v8 }
 0x1b4   : > { %vm1821_vm13 = vcmp.ge.f32.partialorder %v1805_v34, 0.0  ;;  %v1837_v9 = vmul.f32 0.2, %v1805_v34 }
 0x1b5   : > { %v1858_v10 = vsel %vm1826_vm12, %v1810_v8, %v1842_v59 }
 0x1b6   : > { %v2621_v26 = vpop.eup %2620  ;;  %1875 = vst.msk [vmem:[%s3117_s6 + $0x60] sm:$0xff] %vm1862_vm0, %v1858_v10  ;;  %v1853_v45 = vsel %vm1821_vm13, %v1805_v34, %v1837_v9 }
 0x1b7   : > { %v2623_v11 = vpop.eup %2622  ;;  %1870 = vst.msk [vmem:[%s3117_s6 + $0x38] sm:$0xff] %vm1862_vm0, %v1853_v45  ;;  %v1813_v12 = vmul.f32 %v2621_v26, %v1765_v44 }
 0x1b8   : > { %v1803_v37 = vmul.f32 %v2623_v11, %v1755_v35 }
 0x1b9   : > { %vm1829_vm14 = vcmp.ge.f32.partialorder %v1813_v12, 0.0  ;;  %v1845_v14 = vmul.f32 0.2, %v1813_v12 }
 0x1ba   : > { %vm1819_vm15 = vcmp.ge.f32.partialorder %v1803_v37, 0.0  ;;  %v1835_v15 = vmul.f32 0.2, %v1803_v37 }
 0x1bb   : > { %v1861_v57 = vsel %vm1829_vm14, %v1813_v12, %v1845_v14 }
 0x1bc   : > { %1878 = vst.msk [vmem:[%s3117_s6 + $0x78] sm:$0xff] %vm1862_vm0, %v1861_v57  ;;  %v1851_v24 = vsel %vm1819_vm15, %v1803_v37, %v1835_v15  ;;  %v2625_v50 = vpop.eup %2624 }
 0x1bd   : > { %1868 = vst.msk [vmem:[%s3117_s6 + $0x28] sm:$0xff] %vm1862_vm0, %v1851_v24  ;;  %v1811_v20 = vmul.f32 %v2625_v50, %v1763_v17 }
 0x1bf   : > { %vm1827_vm1 = vcmp.ge.f32.partialorder %v1811_v20, 0.0  ;;  %v1843_v22 = vmul.f32 0.2, %v1811_v20 }
 0x1c1   : > { %v1859_v23 = vsel %vm1827_vm1, %v1811_v20, %v1843_v22 }
 0x1c2   : > { %1876 = vst.msk [vmem:[%s3117_s6 + $0x68] sm:$0xff] %vm1862_vm0, %v1859_v23 }
 0x1c3 PF: > { %s12_s9 = sadd.s32 1, %s2632_s9  }
 0x1c4   : > { %p9_p4 = scmp.ge.s32.totalorder %s12_s9, 10  }
 0x1c6   :  { %11 = sbr.rel (!%p9_p4) target bundleno = 1 (0x1), region = 58 }

// kernel: run.36
= control target key start
LH: loop header
LB: loop body
LE: loop exit
PB: predicated region body
PF: predicated region fallthrough
CT: control target
= control target key end

     0   :  { %s1352_s9 = smov 0   ;;  %s1885_s0 = inlined_call_operand.vmem [shape: bf16[4,64,128], index: 0, kind: input, shape index: {}]   ;;  %s1886_s1 = inlined_call_operand.vmem [shape: bf16[8,128,1], index: 1, kind: input, shape index: {}]   ;;  %s1887_s2 = inlined_call_operand.vmem [shape: f32[8,4,64,1], index: 2, kind: output, shape index: {}]  }
   0x1 LB: > { %s1052_s10 = sadd.s32 4294967295, %s1335_s9   ;;  %p1056_p0 = scmp.ge.s32.totalorder %s1335_s9, 1  ;;  %s1335_s9 = sphi %s1352_s9, %s12_s9  }
   0x2   : > { %p112_p1 = scmp.lt.s32.totalorder %s1335_s9, 9 }
   0x4   : > { %p113_p2 = pnand %p1056_p0, %p112_p1 }
   0x5   : > { %p134_p3 = scmp.lt.s32.totalorder (!%p113_p2), %s1052_s10, 7  ;;  %v1297_v0 = vld [vmem:[%s1885_s0] sm:$0xff] (!%p113_p2)   ;;  %v1299_v10 = vld [vmem:[%s1885_s0 + $0x8] sm:$0xff] (!%p113_p2)   ;;  %v1301_v12 = vld [vmem:[%s1885_s0 + $0x10] sm:$0xff] (!%p113_p2)   ;;  %vm841_vm0 = vcmask (!%p113_p2), 7168  }
   0x6   : > { %116 = sbr.rel (%p113_p2) target bundleno = 372 (0x174), region = 28  ;;  %v1298_v1 = vld [vmem:[%s1885_s0 + $0x20] sm:$0xff] (!%p113_p2)   ;;  %1201 = vmatprep.mubr.bf16.mxu0 (!%p113_p2), %v1297_v0  ;;  %v1300_v11 = vld [vmem:[%s1885_s0 + $0x28] sm:$0xff] (!%p113_p2)   ;;  %v1302_v13 = vld [vmem:[%s1885_s0 + $0x30] sm:$0xff] (!%p113_p2)  }
   0x7   : > { %1225 = vmatprep.mubr.bf16.mxu1 (!%p113_p2), %v1298_v1  ;;  %v1303_v14 = vld [vmem:[%s1885_s0 + $0x18] sm:$0xff] (!%p113_p2)   ;;  %v1305_v16 = vld [vmem:[%s1885_s0 + $0x40] sm:$0xff] (!%p113_p2)   ;;  %v1307_v18 = vld [vmem:[%s1885_s0 + $0x48] sm:$0xff] (!%p113_p2)  }
   0x8   : > { %v1304_v15 = vld [vmem:[%s1885_s0 + $0x38] sm:$0xff] (!%p113_p2)   ;;  %v1306_v17 = vld [vmem:[%s1885_s0 + $0x60] sm:$0xff] (!%p113_p2)   ;;  %v1308_v19 = vld [vmem:[%s1885_s0 + $0x68] sm:$0xff] (!%p113_p2)  }
   0x9   : > { %v1309_v20 = vld [vmem:[%s1885_s0 + $0x50] sm:$0xff] (!%p113_p2)   ;;  %v1311_v22 = vld [vmem:[%s1885_s0 + $0x58] sm:$0xff] (!%p113_p2)  }
   0xa   : > { %v1310_v21 = vld [vmem:[%s1885_s0 + $0x70] sm:$0xff] (!%p113_p2)   ;;  %v1312_v23 = vld [vmem:[%s1885_s0 + $0x78] sm:$0xff] (!%p113_p2)  }
   0xd   : > { %s1902_s10 = smov (!%p134_p3, %s1052_s10), 7 }
   0xe   : > { %s1135_s15 = sshll.u32 %s1902_s10, 6  ;;  %s1136_s21 = sshll.u32 %s1902_s10, 8 }
   0xf   : > { %s1372_s18 = scalar_lea.vmem %s1886_s1, %s1135_s15  ;;  %s1709_s23 = scalar_lea.vmem %s1887_s2, %s1136_s21 }
  0x10   : > { %v1289_v2 = vld [vmem:[%s1372_s18] sm:$0xff]   ;;  %v1290_v3 = vld [vmem:[%s1372_s18 + $0x8] sm:$0xff]   ;;  %v1291_v4 = vld [vmem:[%s1372_s18 + $0x10] sm:$0xff]  }
  0x11   : > { %1185 = vmatprep.subr.bf16.mxu0 %v1289_v2  ;;  %1209 = vmatprep.subr.bf16.mxu1 %v1289_v2  ;;  %v1292_v5 = vld [vmem:[%s1372_s18 + $0x18] sm:$0xff]   ;;  %v1293_v6 = vld [vmem:[%s1372_s18 + $0x20] sm:$0xff]   ;;  %v1294_v7 = vld [vmem:[%s1372_s18 + $0x28] sm:$0xff]  }
  0x12   : > { %1186 = vmatpush3.bf16.msra.mxu0 %v1289_v2  ;;  %1210 = vmatpush3.bf16.msra.mxu1 %v1289_v2  ;;  %v1295_v8 = vld [vmem:[%s1372_s18 + $0x30] sm:$0xff]   ;;  %v1296_v9 = vld [vmem:[%s1372_s18 + $0x38] sm:$0xff]  }
  0x13   : > { %1187 = vmatprep.subr.bf16.mxu0 %v1290_v3  ;;  %1211 = vmatprep.subr.bf16.mxu1 %v1290_v3 }
  0x16   : > { %1188 = vmatpush3.bf16.msra.mxu0 %v1290_v3  ;;  %1212 = vmatpush3.bf16.msra.mxu1 %v1290_v3 }
  0x17   : > { %1189 = vmatprep.subr.bf16.mxu0 %v1291_v4  ;;  %1213 = vmatprep.subr.bf16.mxu1 %v1291_v4 }
  0x1a   : > { %1190 = vmatpush3.bf16.msra.mxu0 %v1291_v4  ;;  %1214 = vmatpush3.bf16.msra.mxu1 %v1291_v4 }
  0x1b   : > { %1191 = vmatprep.subr.bf16.mxu0 %v1292_v5  ;;  %1215 = vmatprep.subr.bf16.mxu1 %v1292_v5 }
  0x1e   : > { %1192 = vmatpush3.bf16.msra.mxu0 %v1292_v5  ;;  %1216 = vmatpush3.bf16.msra.mxu1 %v1292_v5 }
  0x1f   : > { %1193 = vmatprep.subr.bf16.mxu0 %v1293_v6  ;;  %1217 = vmatprep.subr.bf16.mxu1 %v1293_v6 }
  0x22   : > { %1194 = vmatpush3.bf16.msra.mxu0 %v1293_v6  ;;  %1218 = vmatpush3.bf16.msra.mxu1 %v1293_v6 }
  0x23   : > { %1195 = vmatprep.subr.bf16.mxu0 %v1294_v7  ;;  %1219 = vmatprep.subr.bf16.mxu1 %v1294_v7 }
  0x26   : > { %1196 = vmatpush3.bf16.msra.mxu0 %v1294_v7  ;;  %1220 = vmatpush3.bf16.msra.mxu1 %v1294_v7 }
  0x27   : > { %1197 = vmatprep.subr.bf16.mxu0 %v1295_v8  ;;  %1221 = vmatprep.subr.bf16.mxu1 %v1295_v8 }
  0x2a   : > { %1198 = vmatpush3.bf16.msra.mxu0 %v1295_v8  ;;  %1222 = vmatpush3.bf16.msra.mxu1 %v1295_v8 }
  0x2b   : > { %1199 = vmatprep.subr.bf16.mxu0 %v1296_v9  ;;  %1223 = vmatprep.subr.bf16.mxu1 %v1296_v9 }
  0x2e   : > { %1200 = vmatpush3.bf16.msra.mxu0 %v1296_v9  ;;  %1224 = vmatpush3.bf16.msra.mxu1 %v1296_v9 }
  0x2f   : > { %1233 = vmatprep.subr.bf16.mxu0 %v1289_v2  ;;  %1257 = vmatprep.subr.bf16.mxu1 %v1289_v2 }
  0x31   : > { %1202 = vmatmul.mubr.bf16.vlgmr.msra.gmra.mrb[0].mxu0 %v1299_v10  ;;  %1226 = vmatmul.mubr.bf16.vlgmr.msra.gmra.mrb[0].mxu1 %v1300_v11 }
  0x32   : > { %1234 = vmatpush3.bf16.msra.mxu0 %v1289_v2  ;;  %1258 = vmatpush3.bf16.msra.mxu1 %v1289_v2 }
  0x33   : > { %1235 = vmatprep.subr.bf16.mxu0 %v1290_v3  ;;  %1259 = vmatprep.subr.bf16.mxu1 %v1290_v3 }
  0x34   : > { %1205 = vmatprep.mubr.bf16.mxu0 %v1301_v12  ;;  %1229 = vmatprep.mubr.bf16.mxu1 %v1302_v13 }
  0x36   : > { %1236 = vmatpush3.bf16.msra.mxu0 %v1290_v3  ;;  %1260 = vmatpush3.bf16.msra.mxu1 %v1290_v3 }
  0x37   : > { %1237 = vmatprep.subr.bf16.mxu0 %v1291_v4  ;;  %1261 = vmatprep.subr.bf16.mxu1 %v1291_v4 }
  0x39   : > { %1206 = vmatmul.mubr.bf16.gmra.mrb[4].mxu0 %v1303_v14  ;;  %1230 = vmatmul.mubr.bf16.gmra.mrb[4].mxu1 %v1304_v15 }
  0x3a   : > { %1238 = vmatpush3.bf16.msra.mxu0 %v1291_v4  ;;  %1262 = vmatpush3.bf16.msra.mxu1 %v1291_v4 }
  0x3b   : > { %1239 = vmatprep.subr.bf16.mxu0 %v1292_v5  ;;  %1263 = vmatprep.subr.bf16.mxu1 %v1292_v5 }
  0x3c   : > { %1249 = vmatprep.mubr.bf16.mxu0 %v1305_v16  ;;  %1273 = vmatprep.mubr.bf16.mxu1 %v1306_v17 }
  0x3e   : > { %1240 = vmatpush3.bf16.msra.mxu0 %v1292_v5  ;;  %1264 = vmatpush3.bf16.msra.mxu1 %v1292_v5 }
  0x3f   : > { %1241 = vmatprep.subr.bf16.mxu0 %v1293_v6  ;;  %1265 = vmatprep.subr.bf16.mxu1 %v1293_v6 }
  0x42   : > { %1242 = vmatpush3.bf16.msra.mxu0 %v1293_v6  ;;  %1266 = vmatpush3.bf16.msra.mxu1 %v1293_v6 }
  0x43   : > { %1243 = vmatprep.subr.bf16.mxu0 %v1294_v7  ;;  %1267 = vmatprep.subr.bf16.mxu1 %v1294_v7 }
  0x46   : > { %1244 = vmatpush3.bf16.msra.mxu0 %v1294_v7  ;;  %1268 = vmatpush3.bf16.msra.mxu1 %v1294_v7 }
  0x47   : > { %1245 = vmatprep.subr.bf16.mxu0 %v1295_v8  ;;  %1269 = vmatprep.subr.bf16.mxu1 %v1295_v8 }
  0x4a   : > { %1246 = vmatpush3.bf16.msra.mxu0 %v1295_v8  ;;  %1270 = vmatpush3.bf16.msra.mxu1 %v1295_v8 }
  0x4b   : > { %1247 = vmatprep.subr.bf16.mxu0 %v1296_v9  ;;  %1271 = vmatprep.subr.bf16.mxu1 %v1296_v9 }
  0x4e   : > { %1248 = vmatpush3.bf16.msra.mxu0 %v1296_v9  ;;  %1272 = vmatpush3.bf16.msra.mxu1 %v1296_v9 }
  0x51   : > { %1250 = vmatmul.mubr.bf16.vlgmr.msra.gmra.mrb[8].mxu0 %v1307_v18  ;;  %1274 = vmatmul.mubr.bf16.vlgmr.msra.gmra.mrb[8].mxu1 %v1308_v19 }
  0x52   : > { %1253 = vmatprep.mubr.bf16.mxu0 %v1309_v20  ;;  %1277 = vmatprep.mubr.bf16.mxu1 %v1310_v21 }
  0x59   : > { %1254 = vmatmul.mubr.bf16.gmra.mrb[12].mxu0 %v1311_v22  ;;  %1278 = vmatmul.mubr.bf16.gmra.mrb[12].mxu1 %v1312_v23 }
 0x104   : > { %v1424_v24 = vpop.f32.mrb[0].mxu0  ;;  %v1426_v25 = vpop.f32.mrb[0].mxu1 }
 0x105   : > { %v634_v26 = vmul.f32 %v1424_v24, %v1424_v24  ;;  %v650_v27 = vmul.f32 %v1426_v25, %v1426_v25  ;;  %v698_v28 = vadd.f32 %v1426_v25, %v1424_v24  ;;  %v1434_v29 = vpop.f32.mrb[1].mxu0  ;;  %v1436_v30 = vpop.f32.mrb[1].mxu1 }
 0x106   : > { %v632_v31 = vmul.f32 %v1434_v29, %v1434_v29  ;;  %v648_v32 = vmul.f32 %v1436_v30, %v1436_v30  ;;  %v696_v33 = vadd.f32 %v1436_v30, %v1434_v29  ;;  %v1444_v34 = vpop.f32.mrb[2].mxu0  ;;  %v1446_v35 = vpop.f32.mrb[2].mxu1 }
 0x107   : > { %v722_v36 = vadd.f32 %v650_v27, %v634_v26  ;;  %v635_v37 = vmul.f32 %v1444_v34, %v1444_v34  ;;  %v651_v38 = vmul.f32 %v1446_v35, %v1446_v35  ;;  %v699_v39 = vadd.f32 %v1446_v35, %v1444_v34  ;;  %v1454_v40 = vpop.f32.mrb[3].mxu0  ;;  %v1456_v41 = vpop.f32.mrb[3].mxu1 }
 0x108   : > { %v720_v42 = vadd.f32 %v648_v32, %v632_v31  ;;  %v633_v43 = vmul.f32 %v1454_v40, %v1454_v40  ;;  %v649_v44 = vmul.f32 %v1456_v41, %v1456_v41  ;;  %v697_v45 = vadd.f32 %v1456_v41, %v1454_v40 }
 0x109   : > { %v723_v46 = vadd.f32 %v651_v38, %v635_v37 }
 0x10a   : > { %v721_v47 = vadd.f32 %v649_v44, %v633_v43 }
 0x10c   : > { %v1464_v48 = vpop.f32.mrb[4].mxu0  ;;  %v1466_v49 = vpop.f32.mrb[4].mxu1 }
 0x10d   : > { %v638_v50 = vmul.f32 %v1464_v48, %v1464_v48  ;;  %v654_v51 = vmul.f32 %v1466_v49, %v1466_v49  ;;  %v1474_v52 = vadd.f32 %v1466_v49, %v1464_v48  ;;  %v1476_v53 = vpop.f32.mrb[5].mxu0  ;;  %v1478_v54 = vpop.f32.mrb[5].mxu1 }
 0x10e   : > { %v636_v55 = vmul.f32 %v1476_v53, %v1476_v53  ;;  %v652_v56 = vmul.f32 %v1478_v54, %v1478_v54  ;;  %v1486_v57 = vadd.f32 %v1478_v54, %v1476_v53  ;;  %v1488_v58 = vpop.f32.mrb[6].mxu0  ;;  %v1490_v59 = vpop.f32.mrb[6].mxu1 }
 0x10f   : > { %v1492_v60 = vadd.f32 %v654_v51, %v638_v50  ;;  %v639_v61 = vmul.f32 %v1488_v58, %v1488_v58  ;;  %v655_v62 = vmul.f32 %v1490_v59, %v1490_v59  ;;  %v1500_v63 = vadd.f32 %v1490_v59, %v1488_v58  ;;  %v1502_v0 = vpop.f32.mrb[7].mxu0  ;;  %v1504_v1 = vpop.f32.mrb[7].mxu1 }
 0x110   : > { %v1506_v2 = vadd.f32 %v652_v56, %v636_v55  ;;  %v637_v3 = vmul.f32 %v1502_v0, %v1502_v0  ;;  %v653_v4 = vmul.f32 %v1504_v1, %v1504_v1  ;;  %v1514_v5 = vadd.f32 %v1504_v1, %v1502_v0 }
 0x111   : > { %v1516_v6 = vadd.f32 %v655_v62, %v639_v61 }
 0x112   : > { %v1518_v7 = vadd.f32 %v653_v4, %v637_v3 }
 0x124   : > { %v1520_v8 = vpop.f32.mrb[8].mxu0  ;;  %v1522_v9 = vpop.f32.mrb[8].mxu1 }
 0x125   : > { %v666_v10 = vmul.f32 %v1520_v8, %v1520_v8  ;;  %v706_v11 = vadd.f32 %v1520_v8, %v698_v28  ;;  %v682_v12 = vmul.f32 %v1522_v9, %v1522_v9  ;;  %v1529_v13 = vpop.f32.mrb[9].mxu0  ;;  %v1531_v14 = vpop.f32.mrb[9].mxu1 }
 0x126   : > { %v664_v15 = vmul.f32 %v1529_v13, %v1529_v13  ;;  %v704_v16 = vadd.f32 %v696_v33, %v1529_v13  ;;  %v680_v17 = vmul.f32 %v1531_v14, %v1531_v14  ;;  %v1538_v18 = vpop.f32.mrb[10].mxu0  ;;  %v1540_v19 = vpop.f32.mrb[10].mxu1 }
 0x127   : > { %v730_v20 = vadd.f32 %v722_v36, %v666_v10  ;;  %v714_v21 = vadd.f32 %v1522_v9, %v706_v11  ;;  %v667_v22 = vmul.f32 %v1538_v18, %v1538_v18  ;;  %v707_v23 = vadd.f32 %v1538_v18, %v699_v39  ;;  %v1546_v26 = vpop.f32.mrb[11].mxu0  ;;  %v1548_v27 = vpop.f32.mrb[11].mxu1 }
 0x128   : > { %v728_v28 = vadd.f32 %v720_v42, %v664_v15  ;;  %v712_v31 = vadd.f32 %v704_v16, %v1531_v14  ;;  %v683_v32 = vmul.f32 %v1540_v19, %v1540_v19  ;;  %v665_v33 = vmul.f32 %v1546_v26, %v1546_v26 }
 0x129   : > { %v738_v36 = vadd.f32 %v730_v20, %v682_v12  ;;  %v1555_v37 = vmul.f32 0.25, %v714_v21  ;;  %v731_v38 = vadd.f32 %v723_v46, %v667_v22  ;;  %v715_v43 = vadd.f32 %v1540_v19, %v707_v23 }
 0x12a   : > { %v736_v39 = vadd.f32 %v728_v28, %v680_v17  ;;  %v1558_v44 = vmul.f32 0.25, %v712_v31  ;;  %v705_v50 = vadd.f32 %v697_v45, %v1546_v26  ;;  %v729_v42 = vadd.f32 %v721_v47, %v665_v33 }
 0x12b   : > { %v755_v51 = vmul.f32 0.25, %v738_v36  ;;  %v763_v55 = vmul.f32 %v1555_v37, %v1555_v37  ;;  %v803_v56 = vsub.f32 %v1424_v24, %v1555_v37  ;;  %v852_v61 = vsub.f32 %v1426_v25, %v1555_v37 }
 0x12c   : > { %v901_v46 = vsub.f32 %v1520_v8, %v1555_v37  ;;  %v753_v3 = vmul.f32 0.25, %v736_v39  ;;  %v761_v45 = vmul.f32 %v1558_v44, %v1558_v44  ;;  %v1573_v47 = vpop.f32.mrb[12].mxu0  ;;  %v1575_v4 = vpop.f32.mrb[12].mxu1  ;;  %v739_v22 = vadd.f32 %v731_v38, %v683_v32 }
 0x12d   : > { %v771_v10 = vsub.f32 %v755_v51, %v763_v55  ;;  %v1583_v16 = vpop.f32.mrb[13].mxu0  ;;  %v1585_v17 = vpop.f32.mrb[13].mxu1  ;;  %v1589_v23 = vmul.f32 0.25, %v715_v43  ;;  %v681_v36 = vmul.f32 %v1548_v27, %v1548_v27  ;;  %v713_v39 = vadd.f32 %v705_v50, %v1548_v27 }
 0x12e   : > { %v769_v20 = vsub.f32 %v753_v3, %v761_v45  ;;  %v1591_v28 = vpop.f32.mrb[14].mxu0  ;;  %v1593_v31 = vpop.f32.mrb[14].mxu1  ;;  %v670_v51 = vmul.f32 %v1573_v47, %v1573_v47  ;;  %v756_v38 = vmul.f32 0.25, %v739_v22  ;;  %v710_v62 = vadd.f32 %v1573_v47, %v1474_v52 }
 0x12f   : > { %v779_v33 = vmax.f32 %v771_v10, 0.0  ;;  %v1600_v55 = vpop.f32.mrb[15].mxu0  ;;  %v1602_v3 = vpop.f32.mrb[15].mxu1  ;;  %v764_v43 = vmul.f32 %v1589_v23, %v1589_v23  ;;  %v1614_v22 = vmul.f32 0.25, %v713_v39  ;;  %v686_v21 = vmul.f32 %v1575_v4, %v1575_v4 }
 0x130   : > { %v777_v32 = vmax.f32 %v769_v20, 0.0  ;;  %v737_v20 = vadd.f32 %v729_v42, %v681_v36  ;;  %v1890_v24 = vsub.f32 %v1436_v30, %v1558_v44  ;;  %v1891_v25 = vsub.f32 %v1529_v13, %v1558_v44 }
 0x131   : > { %v787_v10 = vadd.f32 1e-05, %v779_v33  ;;  %v772_v11 = vsub.f32 %v756_v38, %v764_v43  ;;  %v734_v33 = vadd.f32 %v1492_v60, %v670_v51  ;;  %v762_v15 = vmul.f32 %v1614_v22, %v1614_v22 }
 0x132   : > { %v785_v12 = vadd.f32 1e-05, %v777_v32  ;;  %v754_v50 = vmul.f32 0.25, %v737_v20  ;;  %v802_v42 = vsub.f32 %v1454_v40, %v1614_v22  ;;  %v851_v36 = vsub.f32 %v1456_v41, %v1614_v22 }
 0x133   : > { %1313 = vrsqrt.f32 %v787_v10  ;;  %v780_v45 = vmax.f32 %v772_v11, 0.0  ;;  %v900_v52 = vsub.f32 %v1546_v26, %v1614_v22  ;;  %v949_v60 = vsub.f32 %v1548_v27, %v1614_v22 }
 0x134   : > { %1315 = vrsqrt.f32 %v785_v12  ;;  %v770_v51 = vsub.f32 %v754_v50, %v762_v15  ;;  %v718_v11 = vadd.f32 %v1575_v4, %v710_v62  ;;  %v742_v12 = vadd.f32 %v734_v33, %v686_v21 }
 0x135   : > { %v788_v39 = vadd.f32 1e-05, %v780_v45  ;;  %v668_v32 = vmul.f32 %v1583_v16, %v1583_v16  ;;  %v708_v38 = vadd.f32 %v1486_v57, %v1583_v16  ;;  %v684_v43 = vmul.f32 %v1585_v17, %v1585_v17 }
 0x136   : > { %v671_v10 = vmul.f32 %v1591_v28, %v1591_v28  ;;  %v778_v20 = vmax.f32 %v770_v51, 0.0  ;;  %v1640_v45 = vmul.f32 0.25, %v718_v11  ;;  %v1642_v15 = vmul.f32 0.25, %v742_v12 }
 0x137   : > { %1317 = vrsqrt.f32 %v788_v39  ;;  %v732_v62 = vadd.f32 %v1506_v2, %v668_v32  ;;  %v716_v21 = vadd.f32 %v708_v38, %v1585_v17  ;;  %v711_v57 = vadd.f32 %v1591_v28, %v1500_v63 }
 0x138   : > { %v1649_v50 = vadd.f32 %v1516_v6, %v671_v10  ;;  %v786_v33 = vadd.f32 1e-05, %v778_v20  ;;  %v767_v39 = vmul.f32 %v1640_v45, %v1640_v45  ;;  %v807_v51 = vsub.f32 %v1464_v48, %v1640_v45 }
 0x139   : > { %v905_v2 = vsub.f32 %v1573_v47, %v1640_v45  ;;  %v740_v63 = vadd.f32 %v732_v62, %v684_v43  ;;  %v1661_v32 = vmul.f32 0.25, %v716_v21  ;;  %v1666_v38 = vmul.f32 %v1593_v31, %v1593_v31 }
 0x13a   : > { %1319 = vrsqrt.f32 %v786_v33  ;;  %v775_v6 = vsub.f32 %v1642_v15, %v767_v39  ;;  %v1669_v10 = vadd.f32 %v1593_v31, %v711_v57  ;;  %v1888_v39 = vsub.f32 %v1522_v9, %v1555_v37 }
 0x13b   : > { %v1672_v11 = vmul.f32 0.25, %v740_v63  ;;  %v1676_v12 = vmul.f32 %v1661_v32, %v1661_v32  ;;  %v1889_v15 = vsub.f32 %v1434_v29, %v1558_v44  ;;  %v1892_v8 = vsub.f32 %v1531_v14, %v1558_v44 }
 0x13d   : > { %v1314_v20 = vpop.eup %1313 }
 0x13e   : > { %v1316_v62 = vpop.eup %1315  ;;  %v811_v21 = vmul.f32 %v1314_v20, %v803_v56  ;;  %v860_v57 = vmul.f32 %v1314_v20, %v852_v61  ;;  %v909_v33 = vmul.f32 %v1314_v20, %v901_v46  ;;  %v958_v63 = vmul.f32 %v1314_v20, %v1888_v39 }
 0x13f   : > { %v809_v43 = vmul.f32 %v1316_v62, %v1889_v15  ;;  %v858_v56 = vmul.f32 %v1316_v62, %v1890_v24  ;;  %v907_v61 = vmul.f32 %v1316_v62, %v1891_v25  ;;  %v956_v46 = vmul.f32 %v1316_v62, %v1892_v8 }
 0x140   : > { %vm819_vm1 = vcmp.ge.f32.partialorder %v811_v21, 0.0  ;;  %v827_v29 = vmul.f32 0.2, %v811_v21  ;;  %vm868_vm2 = vcmp.ge.f32.partialorder %v860_v57, 0.0  ;;  %v876_v30 = vmul.f32 0.2, %v860_v57 }
 0x141   : > { %vm917_vm3 = vcmp.ge.f32.partialorder %v909_v33, 0.0  ;;  %v925_v9 = vmul.f32 0.2, %v909_v33  ;;  %vm966_vm4 = vcmp.ge.f32.partialorder %v958_v63, 0.0  ;;  %v974_v13 = vmul.f32 0.2, %v958_v63  ;;  %v1318_v37 = vpop.eup %1317 }
 0x142   : > { %v835_v14 = vsel %vm819_vm1, %v811_v21, %v827_v29  ;;  %v884_v44 = vsel %vm868_vm2, %v860_v57, %v876_v30  ;;  %vm817_vm5 = vcmp.ge.f32.partialorder %v809_v43, 0.0  ;;  %v825_v20 = vmul.f32 0.2, %v809_v43 }
 0x143   : > { %844 = vst.msk [vmem:[%s1709_s23 + $0x10] sm:$0xff] %vm841_vm0, %v835_v14  ;;  %1111 = vst.msk [vmem:[%s1709_s23 + $0x50] sm:$0xff] %vm841_vm0, %v884_v44  ;;  %v933_v15 = vsel %vm917_vm3, %v909_v33, %v925_v9  ;;  %v982_v62 = vsel %vm966_vm4, %v958_v63, %v974_v13  ;;  %vm866_vm6 = vcmp.ge.f32.partialorder %v858_v56, 0.0  ;;  %v874_v39 = vmul.f32 0.2, %v858_v56 }
 0x144   : > { %1119 = vst.msk [vmem:[%s1709_s23 + $0x90] sm:$0xff] %vm841_vm0, %v933_v15  ;;  %1127 = vst.msk [vmem:[%s1709_s23 + $0xd0] sm:$0xff] %vm841_vm0, %v982_v62  ;;  %v833_v24 = vsel %vm817_vm5, %v809_v43, %v825_v20  ;;  %vm915_vm7 = vcmp.ge.f32.partialorder %v907_v61, 0.0  ;;  %v923_v21 = vmul.f32 0.2, %v907_v61  ;;  %vm964_vm8 = vcmp.ge.f32.partialorder %v956_v46, 0.0  ;;  %v1320_v30 = vpop.eup %1319 }
 0x145   : > { %842 = vst.msk [vmem:[%s1709_s23] sm:$0xff] %vm841_vm0, %v833_v24  ;;  %v882_v57 = vsel %vm866_vm6, %v858_v56, %v874_v39  ;;  %v972_v25 = vmul.f32 0.2, %v956_v46  ;;  %v1893_v33 = vsub.f32 %v1444_v34, %v1589_v23  ;;  %v1894_v8 = vsub.f32 %v1446_v35, %v1589_v23 }
 0x146   : > { %1109 = vst.msk [vmem:[%s1709_s23 + $0x40] sm:$0xff] %vm841_vm0, %v882_v57  ;;  %v931_v43 = vsel %vm915_vm7, %v907_v61, %v923_v21  ;;  %v1895_v9 = vsub.f32 %v1538_v18, %v1589_v23  ;;  %v1896_v56 = vsub.f32 %v1540_v19, %v1589_v23  ;;  %v783_v44 = vmax.f32 %v775_v6, 0.0 }
 0x147   : > { %v812_v63 = vmul.f32 %v1318_v37, %v1893_v33  ;;  %v861_v29 = vmul.f32 %v1318_v37, %v1894_v8  ;;  %1117 = vst.msk [vmem:[%s1709_s23 + $0x80] sm:$0xff] %vm841_vm0, %v931_v43  ;;  %v980_v34 = vsel %vm964_vm8, %v956_v46, %v972_v25  ;;  %v810_v23 = vmul.f32 %v1320_v30, %v802_v42 }
 0x148   : > { %v910_v13 = vmul.f32 %v1318_v37, %v1895_v9  ;;  %v959_v14 = vmul.f32 %v1318_v37, %v1896_v56  ;;  %1125 = vst.msk [vmem:[%s1709_s23 + $0xc0] sm:$0xff] %vm841_vm0, %v980_v34  ;;  %v859_v6 = vmul.f32 %v1320_v30, %v851_v36  ;;  %v908_v15 = vmul.f32 %v1320_v30, %v900_v52 }
 0x149   : > { %vm820_vm9 = vcmp.ge.f32.partialorder %v812_v63, 0.0  ;;  %v828_v35 = vmul.f32 0.2, %v812_v63  ;;  %vm869_vm10 = vcmp.ge.f32.partialorder %v861_v29, 0.0  ;;  %v877_v61 = vmul.f32 0.2, %v861_v29 }
 0x14a   : > { %vm918_vm11 = vcmp.ge.f32.partialorder %v910_v13, 0.0  ;;  %v926_v18 = vmul.f32 0.2, %v910_v13  ;;  %vm967_vm12 = vcmp.ge.f32.partialorder %v959_v14, 0.0  ;;  %v975_v19 = vmul.f32 0.2, %v959_v14 }
 0x14b   : > { %v836_v20 = vsel %vm820_vm9, %v812_v63, %v828_v35  ;;  %v885_v46 = vsel %vm869_vm10, %v861_v29, %v877_v61  ;;  %v957_v62 = vmul.f32 %v1320_v30, %v949_v60  ;;  %vm818_vm13 = vcmp.ge.f32.partialorder %v810_v23, 0.0 }
 0x14c   : > { %845 = vst.msk [vmem:[%s1709_s23 + $0x18] sm:$0xff] %vm841_vm0, %v836_v20  ;;  %v934_v37 = vsel %vm918_vm11, %v910_v13, %v926_v18  ;;  %1112 = vst.msk [vmem:[%s1709_s23 + $0x58] sm:$0xff] %vm841_vm0, %v885_v46  ;;  %v983_v40 = vsel %vm967_vm12, %v959_v14, %v975_v19  ;;  %v826_v41 = vmul.f32 0.2, %v810_v23  ;;  %vm867_vm14 = vcmp.ge.f32.partialorder %v859_v6, 0.0 }
 0x14d   : > { %1120 = vst.msk [vmem:[%s1709_s23 + $0x98] sm:$0xff] %vm841_vm0, %v934_v37  ;;  %1128 = vst.msk [vmem:[%s1709_s23 + $0xd8] sm:$0xff] %vm841_vm0, %v983_v40  ;;  %v875_v42 = vmul.f32 0.2, %v859_v6  ;;  %vm916_vm15 = vcmp.ge.f32.partialorder %v908_v15, 0.0  ;;  %vm965_vm1 = vcmp.ge.f32.partialorder %v957_v62, 0.0  ;;  %v773_v52 = vsub.f32 %v1672_v11, %v1676_v12 }
 0x14e   : > { %v924_v26 = vmul.f32 0.2, %v908_v15  ;;  %v834_v27 = vsel %vm818_vm13, %v810_v23, %v826_v41  ;;  %v973_v22 = vmul.f32 0.2, %v957_v62  ;;  %v791_v36 = vadd.f32 1e-05, %v783_v44 }
 0x14f   : > { %843 = vst.msk [vmem:[%s1709_s23 + $0x8] sm:$0xff] %vm841_vm0, %v834_v27  ;;  %v883_v60 = vsel %vm867_vm14, %v859_v6, %v875_v42  ;;  %v903_v24 = vsub.f32 %v1583_v16, %v1661_v32  ;;  %v952_v21 = vsub.f32 %v1585_v17, %v1661_v32  ;;  %v781_v25 = vmax.f32 %v773_v52, 0.0 }
 0x150   : > { %v932_v39 = vsel %vm916_vm15, %v908_v15, %v924_v26  ;;  %1110 = vst.msk [vmem:[%s1709_s23 + $0x48] sm:$0xff] %vm841_vm0, %v883_v60  ;;  %v981_v57 = vsel %vm965_vm1, %v957_v62, %v973_v22  ;;  %1321 = vrsqrt.f32 %v791_v36  ;;  %v743_v11 = vadd.f32 %v1649_v50, %v1666_v38 }
 0x151   : > { %1118 = vst.msk [vmem:[%s1709_s23 + $0x88] sm:$0xff] %vm841_vm0, %v932_v39  ;;  %1126 = vst.msk [vmem:[%s1709_s23 + $0xc8] sm:$0xff] %vm841_vm0, %v981_v57  ;;  %v1776_v12 = vmul.f32 0.25, %v1669_v10  ;;  %v669_v16 = vmul.f32 %v1600_v55, %v1600_v55  ;;  %v709_v17 = vadd.f32 %v1514_v5, %v1600_v55  ;;  %v789_v33 = vadd.f32 1e-05, %v781_v25 }
 0x152   : > { %v760_v63 = vmul.f32 0.25, %v743_v11  ;;  %v685_v8 = vmul.f32 %v1602_v3, %v1602_v3  ;;  %v1897_v46 = vsub.f32 %v1466_v49, %v1640_v45  ;;  %v1898_v62 = vsub.f32 %v1575_v4, %v1640_v45 }
 0x153   : > { %v768_v29 = vmul.f32 %v1776_v12, %v1776_v12  ;;  %v808_v50 = vsub.f32 %v1488_v58, %v1776_v12  ;;  %v857_v38 = vsub.f32 %v1490_v59, %v1776_v12  ;;  %v906_v10 = vsub.f32 %v1591_v28, %v1776_v12 }
 0x154   : > { %1323 = vrsqrt.f32 %v789_v33  ;;  %v955_v5 = vsub.f32 %v1593_v31, %v1776_v12  ;;  %v733_v30 = vadd.f32 %v1518_v7, %v669_v16  ;;  %v717_v43 = vadd.f32 %v709_v17, %v1602_v3 }
 0x155   : > { %v776_v9 = vsub.f32 %v760_v63, %v768_v29  ;;  %v1899_v4 = vsub.f32 %v1476_v53, %v1661_v32  ;;  %v1900_v27 = vsub.f32 %v1478_v54, %v1661_v32 }
 0x156   : > { %v741_v13 = vadd.f32 %v733_v30, %v685_v8  ;;  %v1796_v56 = vmul.f32 0.25, %v717_v43 }
 0x157   : > { %v784_v14 = vmax.f32 %v776_v9, 0.0 }
 0x158   : > { %v758_v44 = vmul.f32 0.25, %v741_v13  ;;  %v766_v34 = vmul.f32 %v1796_v56, %v1796_v56  ;;  %v806_v35 = vsub.f32 %v1502_v0, %v1796_v56  ;;  %v855_v61 = vsub.f32 %v1504_v1, %v1796_v56 }
 0x159   : > { %v792_v18 = vadd.f32 1e-05, %v784_v14  ;;  %v904_v7 = vsub.f32 %v1600_v55, %v1796_v56  ;;  %v953_v20 = vsub.f32 %v1602_v3, %v1796_v56 }
 0x15a   : > { %v1322_v19 = vpop.eup %1321  ;;  %v774_v23 = vsub.f32 %v758_v44, %v766_v34 }
 0x15b   : > { %v815_v6 = vmul.f32 %v1322_v19, %v807_v51  ;;  %v864_v37 = vmul.f32 %v1322_v19, %v1897_v46  ;;  %v913_v15 = vmul.f32 %v1322_v19, %v905_v2  ;;  %v962_v40 = vmul.f32 %v1322_v19, %v1898_v62 }
 0x15c   : > { %1325 = vrsqrt.f32 %v792_v18  ;;  %v782_v41 = vmax.f32 %v774_v23, 0.0 }
 0x15d   : > { %vm823_vm2 = vcmp.ge.f32.partialorder %v815_v6, 0.0  ;;  %v831_v42 = vmul.f32 0.2, %v815_v6  ;;  %vm872_vm3 = vcmp.ge.f32.partialorder %v864_v37, 0.0  ;;  %v880_v48 = vmul.f32 0.2, %v864_v37 }
 0x15e   : > { %v1324_v51 = vpop.eup %1323  ;;  %vm921_vm4 = vcmp.ge.f32.partialorder %v913_v15, 0.0  ;;  %v929_v49 = vmul.f32 0.2, %v913_v15  ;;  %vm970_vm5 = vcmp.ge.f32.partialorder %v962_v40, 0.0  ;;  %v978_v47 = vmul.f32 0.2, %v962_v40 }
 0x15f   : > { %v839_v2 = vsel %vm823_vm2, %v815_v6, %v831_v42  ;;  %v888_v26 = vsel %vm872_vm3, %v864_v37, %v880_v48  ;;  %v813_v45 = vmul.f32 %v1324_v51, %v1899_v4  ;;  %v862_v22 = vmul.f32 %v1324_v51, %v1900_v27 }
 0x160   : > { %848 = vst.msk [vmem:[%s1709_s23 + $0x30] sm:$0xff] %vm841_vm0, %v839_v2  ;;  %1115 = vst.msk [vmem:[%s1709_s23 + $0x70] sm:$0xff] %vm841_vm0, %v888_v26  ;;  %v937_v36 = vsel %vm921_vm4, %v913_v15, %v929_v49  ;;  %v986_v52 = vsel %vm970_vm5, %v962_v40, %v978_v47  ;;  %v911_v60 = vmul.f32 %v1324_v51, %v903_v24  ;;  %v790_v16 = vadd.f32 1e-05, %v782_v41 }
 0x161   : > { %v960_v39 = vmul.f32 %v1324_v51, %v952_v21  ;;  %1123 = vst.msk [vmem:[%s1709_s23 + $0xb0] sm:$0xff] %vm841_vm0, %v937_v36  ;;  %1131 = vst.msk [vmem:[%s1709_s23 + $0xf0] sm:$0xff] %vm841_vm0, %v986_v52  ;;  %vm821_vm6 = vcmp.ge.f32.partialorder %v813_v45, 0.0  ;;  %v829_v53 = vmul.f32 0.2, %v813_v45  ;;  %vm870_vm7 = vcmp.ge.f32.partialorder %v862_v22, 0.0 }
 0x162   : > { %v878_v54 = vmul.f32 0.2, %v862_v22  ;;  %vm919_vm8 = vcmp.ge.f32.partialorder %v911_v60, 0.0  ;;  %v927_v32 = vmul.f32 0.2, %v911_v60  ;;  %1327 = vrsqrt.f32 %v790_v16 }
 0x163   : > { %vm968_vm9 = vcmp.ge.f32.partialorder %v960_v39, 0.0  ;;  %v976_v57 = vmul.f32 0.2, %v960_v39  ;;  %v837_v25 = vsel %vm821_vm6, %v813_v45, %v829_v53 }
 0x164   : > { %v886_v11 = vsel %vm870_vm7, %v862_v22, %v878_v54  ;;  %846 = vst.msk [vmem:[%s1709_s23 + $0x20] sm:$0xff] %vm841_vm0, %v837_v25  ;;  %v935_v24 = vsel %vm919_vm8, %v911_v60, %v927_v32 }
 0x165   : > { %1113 = vst.msk [vmem:[%s1709_s23 + $0x60] sm:$0xff] %vm841_vm0, %v886_v11  ;;  %v984_v21 = vsel %vm968_vm9, %v960_v39, %v976_v57  ;;  %1121 = vst.msk [vmem:[%s1709_s23 + $0xa0] sm:$0xff] %vm841_vm0, %v935_v24 }
 0x166   : > { %1129 = vst.msk [vmem:[%s1709_s23 + $0xe0] sm:$0xff] %vm841_vm0, %v984_v21  ;;  %v1326_v17 = vpop.eup %1325 }
 0x167   : > { %v816_v33 = vmul.f32 %v1326_v17, %v808_v50  ;;  %v865_v63 = vmul.f32 %v1326_v17, %v857_v38  ;;  %v914_v8 = vmul.f32 %v1326_v17, %v906_v10  ;;  %v963_v29 = vmul.f32 %v1326_v17, %v955_v5 }
 0x169   : > { %vm824_vm10 = vcmp.ge.f32.partialorder %v816_v33, 0.0  ;;  %v832_v30 = vmul.f32 0.2, %v816_v33  ;;  %vm873_vm11 = vcmp.ge.f32.partialorder %v865_v63, 0.0  ;;  %v881_v58 = vmul.f32 0.2, %v865_v63 }
 0x16a   : > { %vm922_vm12 = vcmp.ge.f32.partialorder %v914_v8, 0.0  ;;  %v930_v50 = vmul.f32 0.2, %v914_v8  ;;  %vm971_vm13 = vcmp.ge.f32.partialorder %v963_v29, 0.0  ;;  %v979_v43 = vmul.f32 0.2, %v963_v29 }
 0x16b   : > { %v840_v59 = vsel %vm824_vm10, %v816_v33, %v832_v30  ;;  %v889_v38 = vsel %vm873_vm11, %v865_v63, %v881_v58 }
 0x16c   : > { %849 = vst.msk [vmem:[%s1709_s23 + $0x38] sm:$0xff] %vm841_vm0, %v840_v59  ;;  %1116 = vst.msk [vmem:[%s1709_s23 + $0x78] sm:$0xff] %vm841_vm0, %v889_v38  ;;  %v938_v28 = vsel %vm922_vm12, %v914_v8, %v930_v50  ;;  %v987_v10 = vsel %vm971_vm13, %v963_v29, %v979_v43  ;;  %v1328_v31 = vpop.eup %1327 }
 0x16d   : > { %1124 = vst.msk [vmem:[%s1709_s23 + $0xb8] sm:$0xff] %vm841_vm0, %v938_v28  ;;  %1132 = vst.msk [vmem:[%s1709_s23 + $0xf8] sm:$0xff] %vm841_vm0, %v987_v10  ;;  %v814_v12 = vmul.f32 %v1328_v31, %v806_v35  ;;  %v863_v5 = vmul.f32 %v1328_v31, %v855_v61  ;;  %v912_v9 = vmul.f32 %v1328_v31, %v904_v7 }
 0x16e   : > { %v961_v13 = vmul.f32 %v1328_v31, %v953_v20 }
 0x16f   : > { %vm822_vm14 = vcmp.ge.f32.partialorder %v814_v12, 0.0  ;;  %v830_v14 = vmul.f32 0.2, %v814_v12  ;;  %vm871_vm15 = vcmp.ge.f32.partialorder %v863_v5, 0.0  ;;  %v879_v0 = vmul.f32 0.2, %v863_v5 }
 0x170   : > { %vm920_vm1 = vcmp.ge.f32.partialorder %v912_v9, 0.0  ;;  %v928_v44 = vmul.f32 0.2, %v912_v9  ;;  %vm969_vm2 = vcmp.ge.f32.partialorder %v961_v13, 0.0  ;;  %v977_v34 = vmul.f32 0.2, %v961_v13 }
 0x171   : > { %v838_v1 = vsel %vm822_vm14, %v814_v12, %v830_v14  ;;  %v887_v35 = vsel %vm871_vm15, %v863_v5, %v879_v0 }
 0x172   : > { %847 = vst.msk [vmem:[%s1709_s23 + $0x28] sm:$0xff] %vm841_vm0, %v838_v1  ;;  %1114 = vst.msk [vmem:[%s1709_s23 + $0x68] sm:$0xff] %vm841_vm0, %v887_v35  ;;  %v936_v55 = vsel %vm920_vm1, %v912_v9, %v928_v44  ;;  %v985_v61 = vsel %vm969_vm2, %v961_v13, %v977_v34 }
 0x173   : > { %1122 = vst.msk [vmem:[%s1709_s23 + $0xa8] sm:$0xff] %vm841_vm0, %v936_v55  ;;  %1130 = vst.msk [vmem:[%s1709_s23 + $0xe8] sm:$0xff] %vm841_vm0, %v985_v61 }
 0x174 PF: > { %s12_s9 = sadd.s32 1, %s1335_s9  }
 0x175   : > { %p9_p4 = scmp.ge.s32.totalorder %s12_s9, 10  }
 0x177   :  { %11 = sbr.rel (!%p9_p4) target bundleno = 1 (0x1), region = 64 }

// kernel: run.37
= control target key start
LH: loop header
LB: loop body
LE: loop exit
PB: predicated region body
PF: predicated region fallthrough
CT: control target
= control target key end

     0   :  { %s1990_s9 = smov 0   ;;  %s2313_s0 = inlined_call_operand.vmem [shape: bf16[64,1152], index: 0, kind: input, shape index: {}]   ;;  %s2314_s1 = inlined_call_operand.vmem [shape: bf16[8,1152,4], index: 1, kind: input, shape index: {}]   ;;  %s2315_s2 = inlined_call_operand.vmem [shape: f32[8,64,4], index: 2, kind: output, shape index: {}]  }
   0x1 LB: > { %s1487_s10 = sadd.s32 4294967295, %s1973_s9   ;;  %p1491_p0 = scmp.ge.s32.totalorder %s1973_s9, 1  ;;  %s1973_s9 = sphi %s1990_s9, %s12_s9  }
   0x2   : > { %p112_p1 = scmp.lt.s32.totalorder %s1973_s9, 9 }
   0x4   : > { %p113_p2 = pnand %p1491_p0, %p112_p1 }
   0x5   : > { %p134_p3 = scmp.lt.s32.totalorder (!%p113_p2), %s1487_s10, 7  ;;  %v1861_v0 = vld [vmem:[%s2313_s0 + $0x4] ss:$36 sps:$4 sm:$0xff] (!%p113_p2)   ;;  %v1864_v1 = vld [vmem:[%s2313_s0 + $0xc] ss:$36 sps:$4 sm:$0xff] (!%p113_p2)   ;;  %vm1270_vm0 = vcmask (!%p113_p2), 31744  }
   0x6   : > { %116 = sbr.rel (%p113_p2) target bundleno = 527 (0x20f), region = 28  ;;  %977 = vmatprep.mubr.bf16.mxu0 (!%p113_p2), %v1861_v0  ;;  %1042 = vmatprep.mubr.bf16.mxu1 (!%p113_p2), %v1864_v1  ;;  %v1859_v32 = vld [vmem:[%s2313_s0] ss:$36 sps:$4 sm:$0xff] (!%p113_p2)   ;;  %v1862_v34 = vld [vmem:[%s2313_s0 + $0x8] ss:$36 sps:$4 sm:$0xff] (!%p113_p2)  }
   0x7   : > { %v1873_v36 = vld [vmem:[%s2313_s0 + $0x4c] ss:$36 sps:$4 sm:$0xff] (!%p113_p2)   ;;  %v1875_v38 = vld [vmem:[%s2313_s0 + $0x54] ss:$36 sps:$4 sm:$0xff] (!%p113_p2)   ;;  %v1889_v57 = vld [vmem:[%s2313_s0 + $0x9c] ss:$36 sps:$4 sm:$0xff] (!%p113_p2)  }
   0x8   : > { %v1877_v44 = vld [vmem:[%s2313_s0 + $0x48] ss:$36 sps:$4 sm:$0xff] (!%p113_p2)   ;;  %v1878_v46 = vld [vmem:[%s2313_s0 + $0x50] ss:$36 sps:$4 sm:$0xff] (!%p113_p2)   ;;  %v1892_v59 = vld [vmem:[%s2313_s0 + $0x98] ss:$36 sps:$4 sm:$0xff] (!%p113_p2)  }
   0x9   : > { %v1887_v48 = vld [vmem:[%s2313_s0 + $0x94] ss:$36 sps:$4 sm:$0xff] (!%p113_p2)  }
   0xa   : > { %v1891_v58 = vld [vmem:[%s2313_s0 + $0x90] ss:$36 sps:$4 sm:$0xff] (!%p113_p2)  }
   0xd   : > { %s2317_s10 = smov (!%p134_p3, %s1487_s10), 7 }
   0xe   : > { %s1818_s15 = smul.u32 576, %s2317_s10 }
  0x10   : > { %s2010_s18 = scalar_lea.vmem %s2314_s1, %s1818_s15 }
  0x11   : > { %v1827_v2 = vld [vmem:[%s2010_s18 + $0x40] sm:$0xff]   ;;  %v1831_v6 = vld [vmem:[%s2010_s18 + $0x48] sm:$0xff]   ;;  %v1835_v10 = vld [vmem:[%s2010_s18 + $0x50] sm:$0xff]  }
  0x12   : > { %v1828_v3 = vld [vmem:[%s2010_s18 + $0xc0] sm:$0xff]   ;;  %1606 = vmatprep.subr.bf16.mxu0 %v1827_v2  ;;  %v1832_v7 = vld [vmem:[%s2010_s18 + $0xc8] sm:$0xff]   ;;  %v1836_v11 = vld [vmem:[%s2010_s18 + $0xd0] sm:$0xff]  }
  0x13   : > { %v1829_v4 = vld [vmem:[%s2010_s18] sm:$0xff]   ;;  %1646 = vmatprep.subr.bf16.mxu1 %v1828_v3  ;;  %v1833_v8 = vld [vmem:[%s2010_s18 + $0x8] sm:$0xff]   ;;  %v1837_v12 = vld [vmem:[%s2010_s18 + $0x10] sm:$0xff]  }
  0x14   : > { %v1830_v5 = vld [vmem:[%s2010_s18 + $0x80] sm:$0xff]   ;;  %1607 = vmatpush3.bf16.msra.mxu0 %v1829_v4  ;;  %v1834_v9 = vld [vmem:[%s2010_s18 + $0x88] sm:$0xff]   ;;  %v1838_v13 = vld [vmem:[%s2010_s18 + $0x90] sm:$0xff]  }
  0x15   : > { %1647 = vmatpush3.bf16.msra.mxu1 %v1830_v5  ;;  %1608 = vmatprep.subr.bf16.mxu0 %v1831_v6  ;;  %v1839_v14 = vld [vmem:[%s2010_s18 + $0x58] sm:$0xff]   ;;  %v1843_v18 = vld [vmem:[%s2010_s18 + $0x60] sm:$0xff]   ;;  %v1847_v22 = vld [vmem:[%s2010_s18 + $0x68] sm:$0xff]  }
  0x16   : > { %1648 = vmatprep.subr.bf16.mxu1 %v1832_v7  ;;  %v1840_v15 = vld [vmem:[%s2010_s18 + $0xd8] sm:$0xff]   ;;  %v1844_v19 = vld [vmem:[%s2010_s18 + $0xe0] sm:$0xff]   ;;  %v1848_v23 = vld [vmem:[%s2010_s18 + $0xe8] sm:$0xff]  }
  0x17   : > { %v1841_v16 = vld [vmem:[%s2010_s18 + $0x18] sm:$0xff]   ;;  %v1845_v20 = vld [vmem:[%s2010_s18 + $0x20] sm:$0xff]   ;;  %v1849_v24 = vld [vmem:[%s2010_s18 + $0x28] sm:$0xff]  }
  0x18   : > { %1609 = vmatpush3.bf16.msra.mxu0 %v1833_v8  ;;  %v1842_v17 = vld [vmem:[%s2010_s18 + $0x98] sm:$0xff]   ;;  %v1846_v21 = vld [vmem:[%s2010_s18 + $0xa0] sm:$0xff]   ;;  %v1850_v25 = vld [vmem:[%s2010_s18 + $0xa8] sm:$0xff]  }
  0x19   : > { %1649 = vmatpush3.bf16.msra.mxu1 %v1834_v9  ;;  %1610 = vmatprep.subr.bf16.mxu0 %v1835_v10  ;;  %v1851_v26 = vld [vmem:[%s2010_s18 + $0x70] sm:$0xff]   ;;  %v1855_v30 = vld [vmem:[%s2010_s18 + $0x78] sm:$0xff]   ;;  %v1865_v37 = vld [vmem:[%s2010_s18 + $0x140] sm:$0xff]  }
  0x1a   : > { %1650 = vmatprep.subr.bf16.mxu1 %v1836_v11  ;;  %v1852_v27 = vld [vmem:[%s2010_s18 + $0xf0] sm:$0xff]   ;;  %v1856_v31 = vld [vmem:[%s2010_s18 + $0xf8] sm:$0xff]   ;;  %v1866_v39 = vld [vmem:[%s2010_s18 + $0x1c0] sm:$0xff]  }
  0x1b   : > { %v1853_v28 = vld [vmem:[%s2010_s18 + $0x30] sm:$0xff]   ;;  %v1857_v33 = vld [vmem:[%s2010_s18 + $0x38] sm:$0xff]   ;;  %v1867_v40 = vld [vmem:[%s2010_s18 + $0x100] sm:$0xff]  }
  0x1c   : > { %1611 = vmatpush3.bf16.msra.mxu0 %v1837_v12  ;;  %v1854_v29 = vld [vmem:[%s2010_s18 + $0xb0] sm:$0xff]   ;;  %v1858_v35 = vld [vmem:[%s2010_s18 + $0xb8] sm:$0xff]   ;;  %v1868_v41 = vld [vmem:[%s2010_s18 + $0x180] sm:$0xff]  }
  0x1d   : > { %1651 = vmatpush3.bf16.msra.mxu1 %v1838_v13  ;;  %1612 = vmatprep.subr.bf16.mxu0 %v1839_v14  ;;  %v1869_v42 = vld [vmem:[%s2010_s18 + $0x148] sm:$0xff]   ;;  %v1879_v49 = vld [vmem:[%s2010_s18 + $0x150] sm:$0xff]   ;;  %v1883_v53 = vld [vmem:[%s2010_s18 + $0x158] sm:$0xff]  }
  0x1e   : > { %1652 = vmatprep.subr.bf16.mxu1 %v1840_v15  ;;  %v1870_v43 = vld [vmem:[%s2010_s18 + $0x1c8] sm:$0xff]   ;;  %v1880_v50 = vld [vmem:[%s2010_s18 + $0x1d0] sm:$0xff]   ;;  %v1884_v54 = vld [vmem:[%s2010_s18 + $0x1d8] sm:$0xff]  }
  0x1f   : > { %v1871_v45 = vld [vmem:[%s2010_s18 + $0x108] sm:$0xff]   ;;  %v1881_v51 = vld [vmem:[%s2010_s18 + $0x110] sm:$0xff]   ;;  %v1885_v55 = vld [vmem:[%s2010_s18 + $0x118] sm:$0xff]  }
  0x20   : > { %1613 = vmatpush3.bf16.msra.mxu0 %v1841_v16  ;;  %v1872_v47 = vld [vmem:[%s2010_s18 + $0x188] sm:$0xff]   ;;  %v1882_v52 = vld [vmem:[%s2010_s18 + $0x190] sm:$0xff]   ;;  %v1886_v56 = vld [vmem:[%s2010_s18 + $0x198] sm:$0xff]  }
  0x21   : > { %1653 = vmatpush3.bf16.msra.mxu1 %v1842_v17  ;;  %1614 = vmatprep.subr.bf16.mxu0 %v1843_v18  ;;  %v1893_v60 = vld [vmem:[%s2010_s18 + $0x160] sm:$0xff]   ;;  %v1897_v0 = vld [vmem:[%s2010_s18 + $0x168] sm:$0xff]   ;;  %v1905_v6 = vld [vmem:[%s2313_s0 + $0xd8] ss:$36 sps:$4 sm:$0xff]  }
  0x22   : > { %1654 = vmatprep.subr.bf16.mxu1 %v1844_v19  ;;  %v1894_v61 = vld [vmem:[%s2010_s18 + $0x1e0] sm:$0xff]   ;;  %v1898_v1 = vld [vmem:[%s2010_s18 + $0x1e8] sm:$0xff]   ;;  %v1907_v8 = vld [vmem:[%s2010_s18 + $0x170] sm:$0xff]  }
  0x23   : > { %v1895_v62 = vld [vmem:[%s2010_s18 + $0x120] sm:$0xff]   ;;  %v1899_v2 = vld [vmem:[%s2010_s18 + $0x128] sm:$0xff]   ;;  %v1908_v9 = vld [vmem:[%s2010_s18 + $0x1f0] sm:$0xff]  }
  0x24   : > { %1615 = vmatpush3.bf16.msra.mxu0 %v1845_v20  ;;  %v1896_v63 = vld [vmem:[%s2010_s18 + $0x1a0] sm:$0xff]   ;;  %v1900_v3 = vld [vmem:[%s2010_s18 + $0x1a8] sm:$0xff]   ;;  %v1909_v10 = vld [vmem:[%s2010_s18 + $0x130] sm:$0xff]  }
  0x25   : > { %1655 = vmatpush3.bf16.msra.mxu1 %v1846_v21  ;;  %1616 = vmatprep.subr.bf16.mxu0 %v1847_v22  ;;  %v1901_v4 = vld [vmem:[%s2313_s0 + $0xdc] ss:$36 sps:$4 sm:$0xff]   ;;  %v1903_v5 = vld [vmem:[%s2313_s0 + $0xe4] ss:$36 sps:$4 sm:$0xff]   ;;  %v1910_v11 = vld [vmem:[%s2010_s18 + $0x1b0] sm:$0xff]  }
  0x26   : > { %1656 = vmatprep.subr.bf16.mxu1 %v1848_v23  ;;  %v1906_v7 = vld [vmem:[%s2313_s0 + $0xe0] ss:$36 sps:$4 sm:$0xff]   ;;  %v1911_v12 = vld [vmem:[%s2010_s18 + $0x178] sm:$0xff]   ;;  %v1915_v16 = vld [vmem:[%s2313_s0 + $0x10] ss:$36 sps:$4 sm:$0xff]  }
  0x27   : > { %v1912_v13 = vld [vmem:[%s2010_s18 + $0x1f8] sm:$0xff]   ;;  %v1921_v20 = vld [vmem:[%s2010_s18 + $0x200] sm:$0xff]   ;;  %v1922_v21 = vld [vmem:[%s2010_s18 + $0x208] sm:$0xff]  }
  0x28   : > { %1617 = vmatpush3.bf16.msra.mxu0 %v1849_v24  ;;  %v1913_v14 = vld [vmem:[%s2010_s18 + $0x138] sm:$0xff]   ;;  %v1925_v23 = vld [vmem:[%s2313_s0 + $0x64] ss:$36 sps:$4 sm:$0xff]  }
  0x29   : > { %1657 = vmatpush3.bf16.msra.mxu1 %v1850_v25  ;;  %1618 = vmatprep.subr.bf16.mxu0 %v1851_v26  ;;  %v1914_v15 = vld [vmem:[%s2010_s18 + $0x1b8] sm:$0xff]   ;;  %v1928_v25 = vld [vmem:[%s2313_s0 + $0x60] ss:$36 sps:$4 sm:$0xff]   ;;  %v1929_v26 = vld [vmem:[%s2010_s18 + $0x210] sm:$0xff]  }
  0x2a   : > { %1658 = vmatprep.subr.bf16.mxu1 %v1852_v27  ;;  %v1917_v17 = vld [vmem:[%s2313_s0 + $0x14] ss:$36 sps:$4 sm:$0xff]   ;;  %v1920_v19 = vld [vmem:[%s2313_s0 + $0x1c] ss:$36 sps:$4 sm:$0xff]   ;;  %v1931_v27 = vld [vmem:[%s2313_s0 + $0xa4] ss:$36 sps:$4 sm:$0xff]  }
  0x2b   : > { %v1918_v18 = vld [vmem:[%s2313_s0 + $0x18] ss:$36 sps:$4 sm:$0xff]  }
  0x2c   : > { %1619 = vmatpush3.bf16.msra.mxu0 %v1853_v28  ;;  %v1923_v22 = vld [vmem:[%s2313_s0 + $0x5c] ss:$36 sps:$4 sm:$0xff]   ;;  %v1933_v28 = vld [vmem:[%s2313_s0 + $0xac] ss:$36 sps:$4 sm:$0xff]  }
  0x2d   : > { %1659 = vmatpush3.bf16.msra.mxu1 %v1854_v29  ;;  %1620 = vmatprep.subr.bf16.mxu0 %v1855_v30  ;;  %v1927_v24 = vld [vmem:[%s2313_s0 + $0x58] ss:$36 sps:$4 sm:$0xff]   ;;  %v1935_v30 = vld [vmem:[%s2313_s0 + $0xa0] ss:$36 sps:$4 sm:$0xff]  }
  0x2e   : > { %1660 = vmatprep.subr.bf16.mxu1 %v1856_v31  ;;  %v1930_v29 = vld [vmem:[%s2010_s18 + $0x218] sm:$0xff]   ;;  %v1936_v31 = vld [vmem:[%s2313_s0 + $0xa8] ss:$36 sps:$4 sm:$0xff]  }
  0x30   : > { %1621 = vmatpush3.bf16.msra.mxu0 %v1857_v33  ;;  %v1939_v33 = vld [vmem:[%s2313_s0 + $0xec] ss:$36 sps:$4 sm:$0xff]  }
  0x31   : > { %1661 = vmatpush3.bf16.msra.mxu1 %v1858_v35  ;;  %1686 = vmatprep.subr.bf16.mxu0 %v1865_v37  ;;  %v1938_v35 = vld [vmem:[%s2010_s18 + $0x228] sm:$0xff]   ;;  %v1945_v37 = vld [vmem:[%s2010_s18 + $0x230] sm:$0xff]  }
  0x32   : > { %1726 = vmatprep.subr.bf16.mxu1 %v1866_v39  ;;  %v1947_v39 = vld [vmem:[%s2313_s0 + $0x20] ss:$36 sps:$4 sm:$0xff]  }
  0x33   : > { %978 = vmatmul.mubr.bf16.vlgmr.msra.gmra.mrb[0].mxu0 %v1859_v32  ;;  %v1937_v32 = vld [vmem:[%s2010_s18 + $0x220] sm:$0xff]  }
  0x34   : > { %1043 = vmatmul.mubr.bf16.vlgmr.msra.gmra.mrb[0].mxu1 %v1862_v34  ;;  %1687 = vmatpush3.bf16.msra.mxu0 %v1867_v40  ;;  %v1941_v34 = vld [vmem:[%s2313_s0 + $0xf4] ss:$36 sps:$4 sm:$0xff]  }
  0x35   : > { %1727 = vmatpush3.bf16.msra.mxu1 %v1868_v41  ;;  %985 = vmatprep.mubr.bf16.mxu0 %v1873_v36  ;;  %v1943_v36 = vld [vmem:[%s2313_s0 + $0xe8] ss:$36 sps:$4 sm:$0xff]   ;;  %v1948_v40 = vld [vmem:[%s2313_s0 + $0xb0] ss:$36 sps:$4 sm:$0xff]   ;;  %v1946_v41 = vld [vmem:[%s2010_s18 + $0x238] sm:$0xff]   ;;  %s1605_s18 = sshll.u32 %s2317_s10, 6 }
  0x36   : > { %1688 = vmatprep.subr.bf16.mxu0 %v1869_v42  ;;  %1050 = vmatprep.mubr.bf16.mxu1 %v1875_v38  ;;  %v1944_v38 = vld [vmem:[%s2313_s0 + $0xf0] ss:$36 sps:$4 sm:$0xff]   ;;  %v1949_v42 = vld [vmem:[%s2313_s0 + $0x68] ss:$36 sps:$4 sm:$0xff]   ;;  %s2280_s13 = scalar_lea.vmem %s2315_s2, %s1605_s18 }
  0x37   : > { %1728 = vmatprep.subr.bf16.mxu1 %v1870_v43  ;;  %v1950_v43 = vld [vmem:[%s2313_s0 + $0xf8] ss:$36 sps:$4 sm:$0xff]  }
  0x38   : > { %1689 = vmatpush3.bf16.msra.mxu0 %v1871_v45 }
  0x39   : > { %1729 = vmatpush3.bf16.msra.mxu1 %v1872_v47  ;;  %1690 = vmatprep.subr.bf16.mxu0 %v1879_v49 }
  0x3a   : > { %1730 = vmatprep.subr.bf16.mxu1 %v1880_v50 }
  0x3b   : > { %986 = vmatmul.mubr.bf16.gmra.mrb[4].mxu0 %v1877_v44 }
  0x3c   : > { %1051 = vmatmul.mubr.bf16.gmra.mrb[4].mxu1 %v1878_v46  ;;  %1691 = vmatpush3.bf16.msra.mxu0 %v1881_v51 }
  0x3d   : > { %1731 = vmatpush3.bf16.msra.mxu1 %v1882_v52  ;;  %993 = vmatprep.mubr.bf16.mxu0 %v1887_v48 }
  0x3e   : > { %1692 = vmatprep.subr.bf16.mxu0 %v1883_v53  ;;  %1732 = vmatprep.subr.bf16.mxu1 %v1884_v54 }
  0x3f   : > { %1058 = vmatprep.mubr.bf16.mxu1 %v1889_v57 }
  0x40   : > { %1693 = vmatpush3.bf16.msra.mxu0 %v1885_v55 }
  0x41   : > { %1733 = vmatpush3.bf16.msra.mxu1 %v1886_v56  ;;  %1694 = vmatprep.subr.bf16.mxu0 %v1893_v60 }
  0x42   : > { %1734 = vmatprep.subr.bf16.mxu1 %v1894_v61 }
  0x43   : > { %994 = vmatmul.mubr.bf16.gmra.mrb[8].mxu0 %v1891_v58 }
  0x44   : > { %1059 = vmatmul.mubr.bf16.gmra.mrb[8].mxu1 %v1892_v59  ;;  %1695 = vmatpush3.bf16.msra.mxu0 %v1895_v62 }
  0x45   : > { %1735 = vmatpush3.bf16.msra.mxu1 %v1896_v63  ;;  %1696 = vmatprep.subr.bf16.mxu0 %v1897_v0 }
  0x46   : > { %1736 = vmatprep.subr.bf16.mxu1 %v1898_v1  ;;  %1001 = vmatprep.mubr.bf16.mxu0 %v1901_v4 }
  0x47   : > { %1066 = vmatprep.mubr.bf16.mxu1 %v1903_v5 }
  0x48   : > { %1697 = vmatpush3.bf16.msra.mxu0 %v1899_v2 }
  0x49   : > { %1737 = vmatpush3.bf16.msra.mxu1 %v1900_v3  ;;  %1698 = vmatprep.subr.bf16.mxu0 %v1907_v8 }
  0x4a   : > { %1738 = vmatprep.subr.bf16.mxu1 %v1908_v9 }
  0x4b   : > { %1002 = vmatmul.mubr.bf16.gmra.mrb[12].mxu0 %v1905_v6 }
  0x4c   : > { %1067 = vmatmul.mubr.bf16.gmra.mrb[12].mxu1 %v1906_v7  ;;  %1699 = vmatpush3.bf16.msra.mxu0 %v1909_v10 }
  0x4d   : > { %1739 = vmatpush3.bf16.msra.mxu1 %v1910_v11  ;;  %1700 = vmatprep.subr.bf16.mxu0 %v1911_v12 }
  0x4e   : > { %1740 = vmatprep.subr.bf16.mxu1 %v1912_v13  ;;  %1107 = vmatprep.mubr.bf16.mxu0 %v1917_v17 }
  0x4f   : > { %1172 = vmatprep.mubr.bf16.mxu1 %v1920_v19 }
  0x50   : > { %1701 = vmatpush3.bf16.msra.mxu0 %v1913_v14 }
  0x51   : > { %1741 = vmatpush3.bf16.msra.mxu1 %v1914_v15  ;;  %1778 = vmatprep.subr.bf16.mxu0 %v1921_v20 }
  0x52   : > { %1802 = vmatprep.subr.bf16.mxu1 %v1921_v20 }
  0x53   : > { %1108 = vmatmul.mubr.bf16.vlgmr.msra.gmra.mrb[16].mxu0 %v1915_v16 }
  0x54   : > { %1173 = vmatmul.mubr.bf16.vlgmr.msra.gmra.mrb[16].mxu1 %v1918_v18  ;;  %1779 = vmatpush3.bf16.msra.mxu0 %v1921_v20 }
  0x55   : > { %1810 = vmatpush3.bf16.msra.mxu1 %v1921_v20  ;;  %1780 = vmatprep.subr.bf16.mxu0 %v1922_v21 }
  0x56   : > { %1803 = vmatprep.subr.bf16.mxu1 %v1922_v21  ;;  %1115 = vmatprep.mubr.bf16.mxu0 %v1923_v22 }
  0x57   : > { %1180 = vmatprep.mubr.bf16.mxu1 %v1925_v23 }
  0x58   : > { %1781 = vmatpush3.bf16.msra.mxu0 %v1922_v21 }
  0x59   : > { %1811 = vmatpush3.bf16.msra.mxu1 %v1922_v21  ;;  %1782 = vmatprep.subr.bf16.mxu0 %v1929_v26 }
  0x5a   : > { %1804 = vmatprep.subr.bf16.mxu1 %v1929_v26 }
  0x5b   : > { %1116 = vmatmul.mubr.bf16.gmra.mrb[20].mxu0 %v1927_v24 }
  0x5c   : > { %1181 = vmatmul.mubr.bf16.gmra.mrb[20].mxu1 %v1928_v25  ;;  %1123 = vmatprep.mubr.bf16.mxu0 %v1931_v27 }
  0x5d   : > { %1783 = vmatpush3.bf16.msra.mxu0 %v1929_v26  ;;  %1188 = vmatprep.mubr.bf16.mxu1 %v1933_v28 }
  0x5e   : > { %1812 = vmatpush3.bf16.msra.mxu1 %v1929_v26  ;;  %1784 = vmatprep.subr.bf16.mxu0 %v1930_v29 }
  0x5f   : > { %1805 = vmatprep.subr.bf16.mxu1 %v1930_v29 }
  0x61   : > { %1785 = vmatpush3.bf16.msra.mxu0 %v1930_v29 }
  0x62   : > { %1813 = vmatpush3.bf16.msra.mxu1 %v1930_v29  ;;  %1786 = vmatprep.subr.bf16.mxu0 %v1937_v32 }
  0x63   : > { %1124 = vmatmul.mubr.bf16.gmra.mrb[24].mxu0 %v1935_v30  ;;  %1806 = vmatprep.subr.bf16.mxu1 %v1937_v32 }
  0x64   : > { %1189 = vmatmul.mubr.bf16.gmra.mrb[24].mxu1 %v1936_v31  ;;  %1131 = vmatprep.mubr.bf16.mxu0 %v1939_v33 }
  0x65   : > { %1787 = vmatpush3.bf16.msra.mxu0 %v1937_v32  ;;  %1196 = vmatprep.mubr.bf16.mxu1 %v1941_v34 }
  0x66   : > { %1814 = vmatpush3.bf16.msra.mxu1 %v1937_v32  ;;  %1788 = vmatprep.subr.bf16.mxu0 %v1938_v35 }
  0x67   : > { %1807 = vmatprep.subr.bf16.mxu1 %v1938_v35 }
  0x69   : > { %1789 = vmatpush3.bf16.msra.mxu0 %v1938_v35 }
  0x6a   : > { %1815 = vmatpush3.bf16.msra.mxu1 %v1938_v35  ;;  %1790 = vmatprep.subr.bf16.mxu0 %v1945_v37 }
  0x6b   : > { %1132 = vmatmul.mubr.bf16.gmra.mrb[28].mxu0 %v1943_v36  ;;  %1808 = vmatprep.subr.bf16.mxu1 %v1945_v37 }
  0x6c   : > { %1197 = vmatmul.mubr.bf16.gmra.mrb[28].mxu1 %v1944_v38  ;;  %1794 = vmatprep.mubr.bf16.mxu0 %v1947_v39 }
  0x6d   : > { %1791 = vmatpush3.bf16.msra.mxu0 %v1945_v37  ;;  %1798 = vmatprep.mubr.bf16.mxu1 %v1948_v40 }
  0x6e   : > { %1816 = vmatpush3.bf16.msra.mxu1 %v1945_v37  ;;  %1792 = vmatprep.subr.bf16.mxu0 %v1946_v41 }
  0x6f   : > { %1809 = vmatprep.subr.bf16.mxu1 %v1946_v41 }
  0x71   : > { %1793 = vmatpush3.bf16.msra.mxu0 %v1946_v41 }
  0x72   : > { %1817 = vmatpush3.bf16.msra.mxu1 %v1946_v41 }
  0x74   : > { %1795 = vmatmul.mubr.bf16.vlgmr.msra.gmra.mrb[32].mxu0 %v1949_v42 }
  0x75   : > { %1799 = vmatmul.mubr.bf16.vlgmr.msra.gmra.mrb[32].mxu1 %v1950_v43 }
 0x106   : > { %v1622_v44 = vpop.f32.mrb[0].mxu0 }
 0x107   : > { %v1662_v45 = vpop.f32.mrb[0].mxu1  ;;  %v1623_v46 = vpop.f32.mrb[1].mxu0 }
 0x108   : > { %v1624_v47 = vadd.f32 %v1623_v46, %v1622_v44  ;;  %v1663_v48 = vpop.f32.mrb[1].mxu1  ;;  %v1625_v49 = vpop.f32.mrb[2].mxu0 }
 0x109   : > { %v1664_v50 = vadd.f32 %v1663_v48, %v1662_v45  ;;  %v1665_v51 = vpop.f32.mrb[2].mxu1  ;;  %v1626_v52 = vpop.f32.mrb[3].mxu0 }
 0x10a   : > { %v1627_v53 = vadd.f32 %v1626_v52, %v1625_v49  ;;  %v1666_v54 = vpop.f32.mrb[3].mxu1 }
 0x10b   : > { %v1045_v55 = vadd.f32 %v1664_v50, %v1624_v47  ;;  %v1667_v56 = vadd.f32 %v1666_v54, %v1665_v51 }
 0x10d   : > { %v1048_v57 = vadd.f32 %v1667_v56, %v1627_v53 }
 0x10e   : > { %v1628_v58 = vpop.f32.mrb[4].mxu0 }
 0x10f   : > { %v1668_v59 = vpop.f32.mrb[4].mxu1  ;;  %v1629_v60 = vpop.f32.mrb[5].mxu0 }
 0x110   : > { %v1630_v61 = vadd.f32 %v1629_v60, %v1628_v58  ;;  %v1669_v62 = vpop.f32.mrb[5].mxu1  ;;  %v1631_v63 = vpop.f32.mrb[6].mxu0 }
 0x111   : > { %v1670_v0 = vadd.f32 %v1669_v62, %v1668_v59  ;;  %v1671_v1 = vpop.f32.mrb[6].mxu1  ;;  %v1632_v2 = vpop.f32.mrb[7].mxu0 }
 0x112   : > { %v1633_v3 = vadd.f32 %v1632_v2, %v1631_v63  ;;  %v1672_v4 = vpop.f32.mrb[7].mxu1 }
 0x113   : > { %v1053_v5 = vadd.f32 %v1670_v0, %v1630_v61  ;;  %v1673_v6 = vadd.f32 %v1672_v4, %v1671_v1 }
 0x115   : > { %v1056_v7 = vadd.f32 %v1673_v6, %v1633_v3 }
 0x116   : > { %v1634_v8 = vpop.f32.mrb[8].mxu0 }
 0x117   : > { %v1674_v9 = vpop.f32.mrb[8].mxu1  ;;  %v1635_v10 = vpop.f32.mrb[9].mxu0 }
 0x118   : > { %v1636_v11 = vadd.f32 %v1635_v10, %v1634_v8  ;;  %v1675_v12 = vpop.f32.mrb[9].mxu1  ;;  %v1637_v13 = vpop.f32.mrb[10].mxu0 }
 0x119   : > { %v1676_v14 = vadd.f32 %v1675_v12, %v1674_v9  ;;  %v1677_v15 = vpop.f32.mrb[10].mxu1  ;;  %v1638_v16 = vpop.f32.mrb[11].mxu0 }
 0x11a   : > { %v1639_v17 = vadd.f32 %v1638_v16, %v1637_v13  ;;  %v1678_v18 = vpop.f32.mrb[11].mxu1 }
 0x11b   : > { %v1061_v19 = vadd.f32 %v1676_v14, %v1636_v11  ;;  %v1679_v20 = vadd.f32 %v1678_v18, %v1677_v15 }
 0x11d   : > { %v1064_v21 = vadd.f32 %v1679_v20, %v1639_v17 }
 0x11e   : > { %v1640_v22 = vpop.f32.mrb[12].mxu0 }
 0x11f   : > { %v1680_v23 = vpop.f32.mrb[12].mxu1  ;;  %v1641_v24 = vpop.f32.mrb[13].mxu0 }
 0x120   : > { %v1681_v25 = vpop.f32.mrb[13].mxu1  ;;  %v1642_v26 = vadd.f32 %v1641_v24, %v1640_v22  ;;  %v1643_v28 = vpop.f32.mrb[14].mxu0 }
 0x121   : > { %v1682_v27 = vadd.f32 %v1681_v25, %v1680_v23  ;;  %v1683_v29 = vpop.f32.mrb[14].mxu1  ;;  %v1644_v30 = vpop.f32.mrb[15].mxu0 }
 0x122   : > { %v1684_v31 = vpop.f32.mrb[15].mxu1  ;;  %v1645_v33 = vadd.f32 %v1644_v30, %v1643_v28 }
 0x123   : > { %v1069_v32 = vadd.f32 %v1682_v27, %v1642_v26  ;;  %v1685_v34 = vadd.f32 %v1684_v31, %v1683_v29 }
 0x125   : > { %v1072_v35 = vadd.f32 %v1685_v34, %v1645_v33 }
 0x126   : > { %v1702_v36 = vpop.f32.mrb[16].mxu0 }
 0x127   : > { %v1703_v37 = vpop.f32.mrb[17].mxu0  ;;  %v1742_v38 = vpop.f32.mrb[16].mxu1 }
 0x128   : > { %v1704_v39 = vadd.f32 %v1703_v37, %v1702_v36  ;;  %v1705_v40 = vpop.f32.mrb[18].mxu0  ;;  %v1743_v41 = vpop.f32.mrb[17].mxu1 }
 0x129   : > { %v1706_v42 = vpop.f32.mrb[19].mxu0  ;;  %v1744_v44 = vadd.f32 %v1743_v41, %v1742_v38  ;;  %v1745_v45 = vpop.f32.mrb[18].mxu1 }
 0x12a   : > { %v1110_v43 = vadd.f32 %v1704_v39, %v1045_v55  ;;  %v1707_v46 = vadd.f32 %v1706_v42, %v1705_v40  ;;  %v1746_v47 = vpop.f32.mrb[19].mxu1 }
 0x12b   : > { %v1747_v49 = vadd.f32 %v1746_v47, %v1745_v45 }
 0x12c   : > { %v1113_v48 = vadd.f32 %v1707_v46, %v1048_v57  ;;  %v1175_v50 = vadd.f32 %v1744_v44, %v1110_v43 }
 0x12e   : > { %v1708_v51 = vpop.f32.mrb[20].mxu0  ;;  %v2186_v52 = vadd.f32 %v1747_v49, %v1113_v48 }
 0x12f   : > { %v1709_v53 = vpop.f32.mrb[21].mxu0  ;;  %v1748_v54 = vpop.f32.mrb[20].mxu1 }
 0x130   : > { %v1710_v56 = vadd.f32 %v1709_v53, %v1708_v51  ;;  %v1711_v58 = vpop.f32.mrb[22].mxu0  ;;  %v1749_v59 = vpop.f32.mrb[21].mxu1 }
 0x131   : > { %v1712_v60 = vpop.f32.mrb[23].mxu0  ;;  %v1750_v62 = vadd.f32 %v1749_v59, %v1748_v54  ;;  %v1751_v63 = vpop.f32.mrb[22].mxu1 }
 0x132   : > { %v1118_v61 = vadd.f32 %v1710_v56, %v1053_v5  ;;  %v1713_v55 = vadd.f32 %v1712_v60, %v1711_v58  ;;  %v1752_v0 = vpop.f32.mrb[23].mxu1 }
 0x133   : > { %v1753_v2 = vadd.f32 %v1752_v0, %v1751_v63 }
 0x134   : > { %v1121_v1 = vadd.f32 %v1713_v55, %v1056_v7  ;;  %v1183_v3 = vadd.f32 %v1750_v62, %v1118_v61 }
 0x136   : > { %v1714_v57 = vpop.f32.mrb[24].mxu0  ;;  %v1186_v4 = vadd.f32 %v1753_v2, %v1121_v1 }
 0x137   : > { %v1715_v6 = vpop.f32.mrb[25].mxu0  ;;  %v1754_v8 = vpop.f32.mrb[24].mxu1 }
 0x138   : > { %v1716_v9 = vadd.f32 %v1715_v6, %v1714_v57  ;;  %v1717_v10 = vpop.f32.mrb[26].mxu0  ;;  %v1755_v11 = vpop.f32.mrb[25].mxu1 }
 0x139   : > { %v1718_v12 = vpop.f32.mrb[27].mxu0  ;;  %v1756_v14 = vadd.f32 %v1755_v11, %v1754_v8  ;;  %v1757_v15 = vpop.f32.mrb[26].mxu1 }
 0x13a   : > { %v1126_v13 = vadd.f32 %v1716_v9, %v1061_v19  ;;  %v1719_v16 = vadd.f32 %v1718_v12, %v1717_v10  ;;  %v1758_v5 = vpop.f32.mrb[27].mxu1 }
 0x13b   : > { %v1759_v18 = vadd.f32 %v1758_v5, %v1757_v15 }
 0x13c   : > { %v1129_v17 = vadd.f32 %v1719_v16, %v1064_v21  ;;  %v1191_v20 = vadd.f32 %v1756_v14, %v1126_v13 }
 0x13e   : > { %v1720_v22 = vpop.f32.mrb[28].mxu0  ;;  %v1194_v7 = vadd.f32 %v1759_v18, %v1129_v17 }
 0x13f   : > { %v1721_v23 = vpop.f32.mrb[29].mxu0  ;;  %v1760_v24 = vpop.f32.mrb[28].mxu1 }
 0x140   : > { %v1722_v25 = vadd.f32 %v1721_v23, %v1720_v22  ;;  %v1723_v26 = vpop.f32.mrb[30].mxu0  ;;  %v1761_v27 = vpop.f32.mrb[29].mxu1 }
 0x141   : > { %v1724_v28 = vpop.f32.mrb[31].mxu0  ;;  %v1762_v30 = vadd.f32 %v1761_v27, %v1760_v24  ;;  %v1763_v31 = vpop.f32.mrb[30].mxu1 }
 0x142   : > { %v1134_v29 = vadd.f32 %v1722_v25, %v1069_v32  ;;  %v1725_v33 = vadd.f32 %v1724_v28, %v1723_v26  ;;  %v1764_v19 = vpop.f32.mrb[31].mxu1 }
 0x143   : > { %v1765_v36 = vadd.f32 %v1764_v19, %v1763_v31 }
 0x144   : > { %v1137_v34 = vadd.f32 %v1725_v33, %v1072_v35  ;;  %v1199_v37 = vadd.f32 %v1762_v30, %v1134_v29 }
 0x146   : > { %v1202_v38 = vadd.f32 %v1765_v36, %v1137_v34 }
 0x147   : > { %v1796_v21 = vpop.f32.mrb[32].mxu0 }
 0x148   : > { %v2188_v39 = vadd.f32 %v1796_v21, %v1183_v3  ;;  %v1800_v40 = vpop.f32.mrb[32].mxu1  ;;  %v1239_v41 = vpop.f32.mrb[33].mxu0 }
 0x149   : > { %v2190_v42 = vadd.f32 %v1800_v40, %v1199_v37  ;;  %v2192_v43 = vadd.f32 %v1239_v41, %v1175_v50  ;;  %v1255_v44 = vpop.f32.mrb[33].mxu1  ;;  %v1797_v32 = vpop.f32.mrb[34].mxu0 }
 0x14a   : > { %v2194_v45 = vadd.f32 %v1255_v44, %v1191_v20  ;;  %v2196_v46 = vadd.f32 %v1797_v32, %v1186_v4  ;;  %v1801_v35 = vpop.f32.mrb[34].mxu1  ;;  %v1242_v47 = vpop.f32.mrb[35].mxu0  ;;  %v1277_v48 = vsel %vm1270_vm0, %v2188_v39, 0.0  ;;  %v1306_v60 = vmul.f32 %v2188_v39, %v2188_v39 }
 0x14b   : > { %v2200_v49 = vadd.f32 %v1801_v35, %v1202_v38  ;;  %v2203_v51 = vadd.f32 %v1242_v47, %v2186_v52  ;;  %v1258_v53 = vpop.f32.mrb[35].mxu1  ;;  %v1289_v50 = vsel %vm1270_vm0, %v2190_v42, 0.0  ;;  %1278 = vadd.xlane.f32.xlu1 %v1277_v48  ;;  %v1271_v58 = vsel %vm1270_vm0, %v2192_v43, 0.0 }
 0x14c   : > { %v2207_v54 = vadd.f32 %v1258_v53, %v1194_v7  ;;  %1290 = vadd.xlane.f32.xlu0 %v1289_v50  ;;  %v1280_v56 = vsel %vm1270_vm0, %v2196_v46, 0.0  ;;  %v1283_v59 = vsel %vm1270_vm0, %v2194_v45, 0.0  ;;  %v1307_v62 = vmul.f32 %v2196_v46, %v2196_v46 }
 0x14d   : > { %v1292_v52 = vsel %vm1270_vm0, %v2200_v49, 0.0  ;;  %v1318_v63 = vsel %vm1270_vm0, %v1306_v60, 0.0  ;;  %v1305_v0 = vmul.f32 %v2203_v51, %v2203_v51  ;;  %v1274_v1 = vsel %vm1270_vm0, %v2203_v51, 0.0 }
 0x14e   : > { %v1286_v61 = vsel %vm1270_vm0, %v2207_v54, 0.0  ;;  %v1321_v55 = vsel %vm1270_vm0, %v1307_v62, 0.0  ;;  %v1304_v2 = vmul.f32 %v2192_v43, %v2192_v43  ;;  %v1309_v57 = vmul.f32 %v2207_v54, %v2207_v54 }
 0x14f   : > { %1281 = vadd.xlane.f32.xlu1 %v1280_v56  ;;  %v1315_v3 = vsel %vm1270_vm0, %v1305_v0, 0.0  ;;  %v1308_v6 = vmul.f32 %v2194_v45, %v2194_v45  ;;  %v1311_v9 = vmul.f32 %v2200_v49, %v2200_v49  ;;  %v1310_v11 = vmul.f32 %v2190_v42, %v2190_v42 }
 0x150   : > { %1272 = vadd.xlane.f32.xlu0 %v1271_v58  ;;  %v1312_v4 = vsel %vm1270_vm0, %v1304_v2, 0.0  ;;  %v1327_v8 = vsel %vm1270_vm0, %v1309_v57, 0.0 }
 0x151   : > { %v1324_v10 = vsel %vm1270_vm0, %v1308_v6, 0.0  ;;  %v1333_v12 = vsel %vm1270_vm0, %v1311_v9, 0.0  ;;  %v1330_v13 = vsel %vm1270_vm0, %v1310_v11, 0.0 }
 0x153   : > { %1293 = vadd.xlane.f32.xlu1 %v1292_v52 }
 0x154   : > { %1284 = vadd.xlane.f32.xlu0 %v1283_v59 }
 0x157   : > { %1287 = vadd.xlane.f32.xlu1 %v1286_v61 }
 0x158   : > { %1319 = vadd.xlane.f32.xlu0 %v1318_v63 }
 0x15b   : > { %1322 = vadd.xlane.f32.xlu1 %v1321_v55 }
 0x15c   : > { %1275 = vadd.xlane.f32.xlu0 %v1274_v1 }
 0x15f   : > { %1316 = vadd.xlane.f32.xlu1 %v1315_v3 }
 0x160   : > { %1313 = vadd.xlane.f32.xlu0 %v1312_v4 }
 0x163   : > { %1328 = vadd.xlane.f32.xlu1 %v1327_v8 }
 0x164   : > { %1325 = vadd.xlane.f32.xlu0 %v1324_v10 }
 0x167   : > { %1334 = vadd.xlane.f32.xlu1 %v1333_v12 }
 0x168   : > { %1331 = vadd.xlane.f32.xlu0 %v1330_v13 }
 0x1d8   : > { %v1279_v14 = vpop.xlane.xlu1 %1278 }
 0x1d9   : > { %v1291_v15 = vpop.xlane.xlu0 %1290  ;;  %v1298_v20 = vmul.f32 0.25, %v1279_v14 }
 0x1da   : > { %v2265_v62 = vmul.f32 0.25, %v1291_v15 }
 0x1db   : > { %v1346_v24 = vmul.f32 %v1298_v20, %v1298_v20  ;;  %v1370_v14 = vsub.f32 %v2188_v39, %v1298_v20 }
 0x1dc   : > { %v1282_v16 = vpop.xlane.xlu1 %1281  ;;  %v1350_v11 = vmul.f32 %v2265_v62, %v2265_v62 }
 0x1dd   : > { %v1273_v5 = vpop.xlane.xlu0 %1272  ;;  %v2245_v7 = vmul.f32 0.25, %v1282_v16 }
 0x1de   : > { %v2249_v31 = vmul.f32 0.25, %v1273_v5 }
 0x1df   : > { %v1347_v28 = vmul.f32 %v2245_v7, %v2245_v7 }
 0x1e0   : > { %v1294_v17 = vpop.xlane.xlu1 %1293  ;;  %v1344_v32 = vmul.f32 %v2249_v31, %v2249_v31 }
 0x1e1   : > { %v1285_v18 = vpop.xlane.xlu0 %1284  ;;  %v2261_v50 = vmul.f32 0.25, %v1294_v17 }
 0x1e2   : > { %v2259_v35 = vmul.f32 0.25, %v1285_v18 }
 0x1e3   : > { %v1351_v6 = vmul.f32 %v2261_v50, %v2261_v50 }
 0x1e4   : > { %v1288_v22 = vpop.xlane.xlu1 %1287  ;;  %v1348_v63 = vmul.f32 %v2259_v35, %v2259_v35 }
 0x1e5   : > { %v1320_v23 = vpop.xlane.xlu0 %1319  ;;  %v2253_v38 = vmul.f32 0.25, %v1288_v22 }
 0x1e6   : > { %v1338_v25 = vmul.f32 0.25, %v1320_v23 }
 0x1e7   : > { %v1349_v52 = vmul.f32 %v2253_v38, %v2253_v38 }
 0x1e8   : > { %v1354_v26 = vsub.f32 %v1338_v25, %v1346_v24  ;;  %v1323_v27 = vpop.xlane.xlu1 %1322  ;;  %v1371_v24 = vsub.f32 %v2196_v46, %v2245_v7 }
 0x1e9   : > { %v1339_v29 = vmul.f32 0.25, %v1323_v27  ;;  %v1276_v30 = vpop.xlane.xlu0 %1275 }
 0x1ea   : > { %v1362_v33 = vmax.f32 %v1354_v26, 0.0  ;;  %v2251_v19 = vmul.f32 0.25, %v1276_v30 }
 0x1eb   : > { %v1355_v34 = vsub.f32 %v1339_v29, %v1347_v28 }
 0x1ec   : > { %v1378_v36 = vadd.f32 1e-05, %v1362_v33  ;;  %v1317_v37 = vpop.xlane.xlu1 %1316  ;;  %v1345_v40 = vmul.f32 %v2251_v19, %v2251_v19  ;;  %v1369_v7 = vsub.f32 %v2203_v51, %v2251_v19  ;;  %v1368_v33 = vsub.f32 %v2192_v43, %v2249_v31 }
 0x1ed   : > { %v1363_v21 = vmax.f32 %v1355_v34, 0.0  ;;  %v1337_v41 = vmul.f32 0.25, %v1317_v37  ;;  %v1314_v44 = vpop.xlane.xlu0 %1313  ;;  %v1372_v51 = vsub.f32 %v2194_v45, %v2259_v35  ;;  %v1374_v45 = vsub.f32 %v2190_v42, %v2265_v62 }
 0x1ee   : > { %1951 = vrsqrt.f32 %v1378_v36  ;;  %v1336_v47 = vmul.f32 0.25, %v1314_v44 }
 0x1ef   : > { %v1379_v48 = vadd.f32 1e-05, %v1363_v21  ;;  %v1353_v53 = vsub.f32 %v1337_v41, %v1345_v40  ;;  %v1373_v40 = vsub.f32 %v2207_v54, %v2253_v38  ;;  %v1375_v54 = vsub.f32 %v2200_v49, %v2261_v50 }
 0x1f0   : > { %v1352_v56 = vsub.f32 %v1336_v47, %v1344_v32  ;;  %v1329_v58 = vpop.xlane.xlu1 %1328 }
 0x1f1   : > { %1953 = vrsqrt.f32 %v1379_v48  ;;  %v1361_v59 = vmax.f32 %v1353_v53, 0.0  ;;  %v1341_v60 = vmul.f32 0.25, %v1329_v58  ;;  %v1326_v61 = vpop.xlane.xlu0 %1325 }
 0x1f2   : > { %v1360_v55 = vmax.f32 %v1352_v56, 0.0  ;;  %v1340_v0 = vmul.f32 0.25, %v1326_v61 }
 0x1f3   : > { %v1377_v1 = vadd.f32 1e-05, %v1361_v59  ;;  %v1357_v2 = vsub.f32 %v1341_v60, %v1349_v52 }
 0x1f4   : > { %v1376_v3 = vadd.f32 1e-05, %v1360_v55  ;;  %v1356_v57 = vsub.f32 %v1340_v0, %v1348_v63  ;;  %v1335_v4 = vpop.xlane.xlu1 %1334 }
 0x1f5   : > { %1955 = vrsqrt.f32 %v1377_v1  ;;  %v1365_v8 = vmax.f32 %v1357_v2, 0.0  ;;  %v1343_v9 = vmul.f32 0.25, %v1335_v4  ;;  %v1332_v10 = vpop.xlane.xlu0 %1331 }
 0x1f6   : > { %1957 = vrsqrt.f32 %v1376_v3  ;;  %v1364_v12 = vmax.f32 %v1356_v57, 0.0  ;;  %v1342_v13 = vmul.f32 0.25, %v1332_v10 }
 0x1f7   : > { %v1381_v15 = vadd.f32 1e-05, %v1365_v8  ;;  %v1359_v16 = vsub.f32 %v1343_v9, %v1351_v6 }
 0x1f8   : > { %v1952_v5 = vpop.eup %1951  ;;  %v1380_v17 = vadd.f32 1e-05, %v1364_v12  ;;  %v1358_v18 = vsub.f32 %v1342_v13, %v1350_v11 }
 0x1f9   : > { %v1394_v22 = vmul.f32 %v1952_v5, %v1370_v14  ;;  %1959 = vrsqrt.f32 %v1381_v15  ;;  %v1367_v23 = vmax.f32 %v1359_v16, 0.0 }
 0x1fa   : > { %1961 = vrsqrt.f32 %v1380_v17  ;;  %v1366_v25 = vmax.f32 %v1358_v18, 0.0 }
 0x1fb   : > { %v1954_v26 = vpop.eup %1953  ;;  %vm1402_vm1 = vcmp.ge.f32.partialorder %v1394_v22, 0.0  ;;  %v1410_v39 = vmul.f32 0.2, %v1394_v22  ;;  %v1383_v20 = vadd.f32 1e-05, %v1367_v23 }
 0x1fc   : > { %v1395_v27 = vmul.f32 %v1954_v26, %v1371_v24  ;;  %v1382_v28 = vadd.f32 1e-05, %v1366_v25 }
 0x1fd   : > { %v1418_v29 = vsel %vm1402_vm1, %v1394_v22, %v1410_v39  ;;  %1963 = vrsqrt.f32 %v1383_v20 }
 0x1fe   : > { %1426 = vst.msk [vmem:[%s2280_s13 + $0x10] sm:$0xff] %vm1270_vm0, %v1418_v29  ;;  %vm1403_vm2 = vcmp.ge.f32.partialorder %v1395_v27, 0.0  ;;  %v1411_v46 = vmul.f32 0.2, %v1395_v27  ;;  %1965 = vrsqrt.f32 %v1382_v28 }
 0x1ff   : > { %v1956_v30 = vpop.eup %1955 }
 0x200   : > { %v1958_v34 = vpop.eup %1957  ;;  %v1419_v36 = vsel %vm1403_vm2, %v1395_v27, %v1411_v46  ;;  %v1393_v37 = vmul.f32 %v1956_v30, %v1369_v7 }
 0x201   : > { %1427 = vst.msk [vmem:[%s2280_s13 + $0x18] sm:$0xff] %vm1270_vm0, %v1419_v36  ;;  %v1392_v21 = vmul.f32 %v1958_v34, %v1368_v33 }
 0x202   : > { %vm1401_vm3 = vcmp.ge.f32.partialorder %v1393_v37, 0.0  ;;  %v1409_v41 = vmul.f32 0.2, %v1393_v37 }
 0x203   : > { %v1960_v44 = vpop.eup %1959  ;;  %vm1400_vm4 = vcmp.ge.f32.partialorder %v1392_v21, 0.0  ;;  %v1408_v19 = vmul.f32 0.2, %v1392_v21 }
 0x204   : > { %v1962_v43 = vpop.eup %1961  ;;  %v1417_v31 = vsel %vm1401_vm3, %v1393_v37, %v1409_v41  ;;  %v1397_v32 = vmul.f32 %v1960_v44, %v1373_v40 }
 0x205   : > { %1425 = vst.msk [vmem:[%s2280_s13 + $0x8] sm:$0xff] %vm1270_vm0, %v1417_v31  ;;  %v1416_v47 = vsel %vm1400_vm4, %v1392_v21, %v1408_v19  ;;  %v1396_v48 = vmul.f32 %v1962_v43, %v1372_v51 }
 0x206   : > { %1424 = vst.msk [vmem:[%s2280_s13] sm:$0xff] %vm1270_vm0, %v1416_v47  ;;  %vm1405_vm5 = vcmp.ge.f32.partialorder %v1397_v32, 0.0  ;;  %v1413_v38 = vmul.f32 0.2, %v1397_v32 }
 0x207   : > { %v1964_v53 = vpop.eup %1963  ;;  %vm1404_vm6 = vcmp.ge.f32.partialorder %v1396_v48, 0.0  ;;  %v1412_v35 = vmul.f32 0.2, %v1396_v48 }
 0x208   : > { %v1966_v56 = vpop.eup %1965  ;;  %v1421_v58 = vsel %vm1405_vm5, %v1397_v32, %v1413_v38  ;;  %v1399_v52 = vmul.f32 %v1964_v53, %v1375_v54 }
 0x209   : > { %1429 = vst.msk [vmem:[%s2280_s13 + $0x28] sm:$0xff] %vm1270_vm0, %v1421_v58  ;;  %v1420_v59 = vsel %vm1404_vm6, %v1396_v48, %v1412_v35  ;;  %v1398_v60 = vmul.f32 %v1966_v56, %v1374_v45 }
 0x20a   : > { %1428 = vst.msk [vmem:[%s2280_s13 + $0x20] sm:$0xff] %vm1270_vm0, %v1420_v59  ;;  %vm1407_vm7 = vcmp.ge.f32.partialorder %v1399_v52, 0.0  ;;  %v1415_v49 = vmul.f32 0.2, %v1399_v52 }
 0x20b   : > { %vm1406_vm8 = vcmp.ge.f32.partialorder %v1398_v60, 0.0  ;;  %v1414_v50 = vmul.f32 0.2, %v1398_v60 }
 0x20c   : > { %v1423_v61 = vsel %vm1407_vm7, %v1399_v52, %v1415_v49 }
 0x20d   : > { %1431 = vst.msk [vmem:[%s2280_s13 + $0x38] sm:$0xff] %vm1270_vm0, %v1423_v61  ;;  %v1422_v42 = vsel %vm1406_vm8, %v1398_v60, %v1414_v50 }
 0x20e   : > { %1430 = vst.msk [vmem:[%s2280_s13 + $0x30] sm:$0xff] %vm1270_vm0, %v1422_v42 }
 0x20f PF: > { %s12_s9 = sadd.s32 1, %s1973_s9  }
 0x210   : > { %p9_p4 = scmp.ge.s32.totalorder %s12_s9, 10  }
 0x212   :  { %11 = sbr.rel (!%p9_p4) target bundleno = 1 (0x1), region = 58 }

// kernel: run.39
= control target key start
LH: loop header
LB: loop body
LE: loop exit
PB: predicated region body
PF: predicated region fallthrough
CT: control target
= control target key end

     0   :  { %s957_s9 = smov 0   ;;  %s1213_s0 = inlined_call_operand.vmem [shape: bf16[4,32,64], index: 0, kind: input, shape index: {}]   ;;  %s1214_s1 = inlined_call_operand.vmem [shape: bf16[8,64,4], index: 1, kind: input, shape index: {}]   ;;  %s1215_s2 = inlined_call_operand.vmem [shape: f32[8,4,32,4], index: 2, kind: output, shape index: {}]  }
   0x1 LB: > { %s777_s10 = sadd.s32 4294967295, %s940_s9   ;;  %p781_p0 = scmp.ge.s32.totalorder %s940_s9, 1  ;;  %s940_s9 = sphi %s957_s9, %s12_s9  }
   0x2   : > { %p112_p1 = scmp.lt.s32.totalorder %s940_s9, 9 }
   0x4   : > { %p113_p2 = pnand %p781_p0, %p112_p1 }
   0x5   : > { %p134_p3 = scmp.lt.s32.totalorder (!%p113_p2), %s777_s10, 7  ;;  %v918_v0 = vld [vmem:[%s1213_s0] sm:$0xff] (!%p113_p2)   ;;  %vm191_vm0 = vcmask (!%p113_p2), 523264   ;;  %v919_v1 = vld [vmem:[%s1213_s0 + $0x10] sm:$0xff] (!%p113_p2)   ;;  %v920_v6 = vld [vmem:[%s1213_s0 + $0x8] sm:$0xff] (!%p113_p2)   ;;  %vm457_vm1 = vcmask (!%p113_p2), 31744  }
   0x6   : > { %116 = sbr.rel (%p113_p2) target bundleno = 484 (0x1e4), region = 28  ;;  %866 = vmatprep.mubr.msk.bf16.mxu0 (!%p113_p2), %vm191_vm0, %v918_v0  ;;  %878 = vmatprep.mubr.msk.bf16.mxu1 (!%p113_p2), %vm191_vm0, %v919_v1  ;;  %v921_v7 = vld [vmem:[%s1213_s0 + $0x18] sm:$0xff] (!%p113_p2)   ;;  %v922_v8 = vld [vmem:[%s1213_s0 + $0x20] sm:$0xff] (!%p113_p2)   ;;  %v924_v9 = vld [vmem:[%s1213_s0 + $0x30] sm:$0xff] (!%p113_p2)  }
   0x7   : > { %v923_v10 = vld [vmem:[%s1213_s0 + $0x28] sm:$0xff] (!%p113_p2)   ;;  %v925_v11 = vld [vmem:[%s1213_s0 + $0x38] sm:$0xff] (!%p113_p2)  }
   0xd   : > { %s1217_s10 = smov (!%p134_p3, %s777_s10), 7 }
   0xe   : > { %s832_s15 = sshll.u32 %s1217_s10, 5  ;;  %s833_s3 = sshll.u32 %s1217_s10, 7 }
   0xf   : > { %s138_s18 = scalar_lea.vmem %s1214_s1, %s832_s15  ;;  %s1167_s6 = scalar_lea.vmem %s1215_s2, %s833_s3 }
  0x10   : > { %v914_v2 = vld [vmem:[%s138_s18] sm:$0xff]   ;;  %v915_v3 = vld [vmem:[%s138_s18 + $0x8] sm:$0xff]   ;;  %v916_v4 = vld [vmem:[%s138_s18 + $0x10] sm:$0xff]  }
  0x11   : > { %858 = vmatprep.subr.bf16.mxu0 %v914_v2  ;;  %870 = vmatprep.subr.bf16.mxu1 %v914_v2  ;;  %v917_v5 = vld [vmem:[%s138_s18 + $0x18] sm:$0xff]  }
  0x12   : > { %859 = vmatpush3.bf16.msra.mxu0 %v914_v2  ;;  %871 = vmatpush3.bf16.msra.mxu1 %v914_v2 }
  0x13   : > { %860 = vmatprep.subr.bf16.mxu0 %v915_v3  ;;  %872 = vmatprep.subr.bf16.mxu1 %v915_v3 }
  0x16   : > { %861 = vmatpush3.bf16.msra.mxu0 %v915_v3  ;;  %873 = vmatpush3.bf16.msra.mxu1 %v915_v3 }
  0x17   : > { %862 = vmatprep.subr.bf16.mxu0 %v916_v4  ;;  %874 = vmatprep.subr.bf16.mxu1 %v916_v4 }
  0x1a   : > { %863 = vmatpush3.bf16.msra.mxu0 %v916_v4  ;;  %875 = vmatpush3.bf16.msra.mxu1 %v916_v4 }
  0x1b   : > { %864 = vmatprep.subr.bf16.mxu0 %v917_v5  ;;  %876 = vmatprep.subr.bf16.mxu1 %v917_v5 }
  0x1e   : > { %865 = vmatpush3.bf16.msra.mxu0 %v917_v5  ;;  %877 = vmatpush3.bf16.msra.mxu1 %v917_v5 }
  0x1f   : > { %882 = vmatprep.subr.bf16.mxu0 %v914_v2  ;;  %894 = vmatprep.subr.bf16.mxu1 %v914_v2 }
  0x21   : > { %867 = vmatmul.mubr.msk.bf16.vlgmr.msra.gmra.mrb[0].mxu0 %vm191_vm0, %v920_v6  ;;  %879 = vmatmul.mubr.msk.bf16.vlgmr.msra.gmra.mrb[0].mxu1 %vm191_vm0, %v921_v7 }
  0x22   : > { %883 = vmatpush3.bf16.msra.mxu0 %v914_v2  ;;  %895 = vmatpush3.bf16.msra.mxu1 %v914_v2 }
  0x23   : > { %884 = vmatprep.subr.bf16.mxu0 %v915_v3  ;;  %896 = vmatprep.subr.bf16.mxu1 %v915_v3 }
  0x24   : > { %890 = vmatprep.mubr.msk.bf16.mxu0 %vm191_vm0, %v922_v8  ;;  %902 = vmatprep.mubr.msk.bf16.mxu1 %vm191_vm0, %v924_v9 }
  0x26   : > { %885 = vmatpush3.bf16.msra.mxu0 %v915_v3  ;;  %897 = vmatpush3.bf16.msra.mxu1 %v915_v3 }
  0x27   : > { %886 = vmatprep.subr.bf16.mxu0 %v916_v4  ;;  %898 = vmatprep.subr.bf16.mxu1 %v916_v4 }
  0x2a   : > { %887 = vmatpush3.bf16.msra.mxu0 %v916_v4  ;;  %899 = vmatpush3.bf16.msra.mxu1 %v916_v4 }
  0x2b   : > { %888 = vmatprep.subr.bf16.mxu0 %v917_v5  ;;  %900 = vmatprep.subr.bf16.mxu1 %v917_v5 }
  0x2e   : > { %889 = vmatpush3.bf16.msra.mxu0 %v917_v5  ;;  %901 = vmatpush3.bf16.msra.mxu1 %v917_v5 }
  0x31   : > { %891 = vmatmul.mubr.msk.bf16.vlgmr.msra.gmra.mrb[4].mxu0 %vm191_vm0, %v923_v10  ;;  %903 = vmatmul.mubr.msk.bf16.vlgmr.msra.gmra.mrb[4].mxu1 %vm191_vm0, %v925_v11 }
  0xf4   : > { %v1003_v12 = vpop.f32.mrb[0].mxu0  ;;  %v1005_v13 = vpop.f32.mrb[0].mxu1 }
  0xf5   : > { %v1007_v14 = vpop.f32.mrb[1].mxu0  ;;  %v1009_v15 = vpop.f32.mrb[1].mxu1  ;;  %v476_v16 = vsel %vm457_vm1, %v1005_v13, 0.0  ;;  %v464_v17 = vsel %vm457_vm1, %v1003_v12, 0.0  ;;  %v508_v26 = vmul.f32 %v1003_v12, %v1003_v12  ;;  %v524_v29 = vmul.f32 %v1005_v13, %v1005_v13 }
  0xf6   : > { %477 = vadd.xlane.f32.xlu0 %v476_v16  ;;  %v1015_v18 = vpop.f32.mrb[2].mxu1  ;;  %465 = vadd.xlane.f32.xlu1 %v464_v17  ;;  %v1017_v19 = vpop.f32.mrb[2].mxu0  ;;  %v458_v22 = vsel %vm457_vm1, %v1007_v14, 0.0  ;;  %v470_v24 = vsel %vm457_vm1, %v1009_v15, 0.0  ;;  %v506_v45 = vmul.f32 %v1007_v14, %v1007_v14  ;;  %v522_v49 = vmul.f32 %v1009_v15, %v1009_v15 }
  0xf7   : > { %v1019_v20 = vpop.f32.mrb[3].mxu0  ;;  %v1021_v21 = vpop.f32.mrb[3].mxu1  ;;  %v467_v23 = vsel %vm457_vm1, %v1017_v19, 0.0  ;;  %v479_v25 = vsel %vm457_vm1, %v1015_v18, 0.0  ;;  %v516_v27 = vsel %vm457_vm1, %v508_v26, 0.0  ;;  %v509_v30 = vmul.f32 %v1017_v19, %v1017_v19 }
  0xf8   : > { %v473_v28 = vsel %vm457_vm1, %v1021_v21, 0.0  ;;  %v532_v33 = vsel %vm457_vm1, %v524_v29, 0.0  ;;  %v525_v35 = vmul.f32 %v1015_v18, %v1015_v18  ;;  %v461_v43 = vsel %vm457_vm1, %v1019_v20, 0.0 }
  0xf9   : > { %v519_v34 = vsel %vm457_vm1, %v509_v30, 0.0  ;;  %v507_v44 = vmul.f32 %v1019_v20, %v1019_v20  ;;  %v510_v47 = vsel %vm457_vm1, %v506_v45, 0.0  ;;  %v523_v48 = vmul.f32 %v1021_v21, %v1021_v21 }
  0xfa   : > { %459 = vadd.xlane.f32.xlu0 %v458_v22  ;;  %468 = vadd.xlane.f32.xlu1 %v467_v23  ;;  %v535_v42 = vsel %vm457_vm1, %v525_v35, 0.0  ;;  %v526_v51 = vsel %vm457_vm1, %v522_v49, 0.0 }
  0xfb   : > { %v513_v46 = vsel %vm457_vm1, %v507_v44, 0.0  ;;  %v529_v50 = vsel %vm457_vm1, %v523_v48, 0.0 }
  0xfe   : > { %471 = vadd.xlane.f32.xlu0 %v470_v24  ;;  %480 = vadd.xlane.f32.xlu1 %v479_v25 }
 0x102   : > { %517 = vadd.xlane.f32.xlu0 %v516_v27  ;;  %474 = vadd.xlane.f32.xlu1 %v473_v28 }
 0x104   : > { %v1040_v31 = vpop.f32.mrb[4].mxu0  ;;  %v1042_v32 = vpop.f32.mrb[4].mxu1 }
 0x105   : > { %v1048_v36 = vpop.f32.mrb[5].mxu0  ;;  %v1050_v37 = vpop.f32.mrb[5].mxu1  ;;  %v488_v52 = vsel %vm457_vm1, %v1040_v31, 0.0  ;;  %v500_v54 = vsel %vm457_vm1, %v1042_v32, 0.0  ;;  %v540_v60 = vmul.f32 %v1040_v31, %v1040_v31  ;;  %v556_v8 = vmul.f32 %v1042_v32, %v1042_v32 }
 0x106   : > { %533 = vadd.xlane.f32.xlu0 %v532_v33  ;;  %520 = vadd.xlane.f32.xlu1 %v519_v34  ;;  %v1052_v38 = vpop.f32.mrb[6].mxu0  ;;  %v1054_v39 = vpop.f32.mrb[6].mxu1  ;;  %v482_v56 = vsel %vm457_vm1, %v1048_v36, 0.0  ;;  %v494_v58 = vsel %vm457_vm1, %v1050_v37, 0.0  ;;  %v538_v1 = vmul.f32 %v1048_v36, %v1048_v36  ;;  %v554_v5 = vmul.f32 %v1050_v37, %v1050_v37 }
 0x107   : > { %v1056_v40 = vpop.f32.mrb[7].mxu0  ;;  %v1058_v41 = vpop.f32.mrb[7].mxu1  ;;  %v491_v53 = vsel %vm457_vm1, %v1052_v38, 0.0  ;;  %v503_v55 = vsel %vm457_vm1, %v1054_v39, 0.0  ;;  %v541_v61 = vmul.f32 %v1052_v38, %v1052_v38  ;;  %v548_v63 = vsel %vm457_vm1, %v540_v60, 0.0 }
 0x108   : > { %v485_v57 = vsel %vm457_vm1, %v1056_v40, 0.0  ;;  %v497_v59 = vsel %vm457_vm1, %v1058_v41, 0.0  ;;  %v539_v62 = vmul.f32 %v1056_v40, %v1056_v40  ;;  %v555_v2 = vmul.f32 %v1058_v41, %v1058_v41 }
 0x109   : > { %v551_v0 = vsel %vm457_vm1, %v541_v61, 0.0  ;;  %v542_v3 = vsel %vm457_vm1, %v538_v1, 0.0  ;;  %v558_v6 = vsel %vm457_vm1, %v554_v5, 0.0  ;;  %v557_v9 = vmul.f32 %v1054_v39, %v1054_v39 }
 0x10a   : > { %536 = vadd.xlane.f32.xlu1 %v535_v42  ;;  %462 = vadd.xlane.f32.xlu0 %v461_v43  ;;  %v545_v4 = vsel %vm457_vm1, %v539_v62, 0.0  ;;  %v561_v7 = vsel %vm457_vm1, %v555_v2, 0.0  ;;  %v564_v10 = vsel %vm457_vm1, %v556_v8, 0.0 }
 0x10b   : > { %v567_v11 = vsel %vm457_vm1, %v557_v9, 0.0 }
 0x10e   : > { %514 = vadd.xlane.f32.xlu1 %v513_v46  ;;  %511 = vadd.xlane.f32.xlu0 %v510_v47 }
 0x112   : > { %530 = vadd.xlane.f32.xlu1 %v529_v50  ;;  %527 = vadd.xlane.f32.xlu0 %v526_v51 }
 0x116   : > { %489 = vadd.xlane.f32.xlu0 %v488_v52  ;;  %492 = vadd.xlane.f32.xlu1 %v491_v53 }
 0x11a   : > { %501 = vadd.xlane.f32.xlu0 %v500_v54  ;;  %504 = vadd.xlane.f32.xlu1 %v503_v55 }
 0x11e   : > { %483 = vadd.xlane.f32.xlu0 %v482_v56  ;;  %486 = vadd.xlane.f32.xlu1 %v485_v57 }
 0x122   : > { %495 = vadd.xlane.f32.xlu0 %v494_v58  ;;  %498 = vadd.xlane.f32.xlu1 %v497_v59 }
 0x126   : > { %549 = vadd.xlane.f32.xlu0 %v548_v63  ;;  %552 = vadd.xlane.f32.xlu1 %v551_v0 }
 0x12a   : > { %543 = vadd.xlane.f32.xlu0 %v542_v3  ;;  %546 = vadd.xlane.f32.xlu1 %v545_v4 }
 0x12e   : > { %559 = vadd.xlane.f32.xlu0 %v558_v6  ;;  %562 = vadd.xlane.f32.xlu1 %v561_v7 }
 0x132   : > { %565 = vadd.xlane.f32.xlu0 %v564_v10  ;;  %568 = vadd.xlane.f32.xlu1 %v567_v11 }
 0x183   : > { %v478_v16 = vpop.xlane.xlu0 %477  ;;  %v466_v17 = vpop.xlane.xlu1 %465 }
 0x184   : > { %v572_v58 = vadd.f32 %v478_v16, %v466_v17 }
 0x187   : > { %v460_v22 = vpop.xlane.xlu0 %459  ;;  %v469_v23 = vpop.xlane.xlu1 %468 }
 0x18b   : > { %v472_v24 = vpop.xlane.xlu0 %471  ;;  %v481_v25 = vpop.xlane.xlu1 %480 }
 0x18c   : > { %v570_v52 = vadd.f32 %v472_v24, %v460_v22  ;;  %v573_v59 = vadd.f32 %v481_v25, %v469_v23 }
 0x18f   : > { %v518_v26 = vpop.xlane.xlu0 %517  ;;  %v475_v27 = vpop.xlane.xlu1 %474 }
 0x193   : > { %v534_v28 = vpop.xlane.xlu0 %533  ;;  %v521_v29 = vpop.xlane.xlu1 %520 }
 0x194   : > { %v584_v10 = vadd.f32 %v534_v28, %v518_v26 }
 0x197   : > { %v537_v30 = vpop.xlane.xlu1 %536  ;;  %v463_v33 = vpop.xlane.xlu0 %462 }
 0x198   : > { %v571_v53 = vadd.f32 %v475_v27, %v463_v33  ;;  %v585_v11 = vadd.f32 %v537_v30, %v521_v29 }
 0x19b   : > { %v515_v34 = vpop.xlane.xlu1 %514  ;;  %v512_v35 = vpop.xlane.xlu0 %511 }
 0x19f   : > { %v531_v42 = vpop.xlane.xlu1 %530  ;;  %v528_v43 = vpop.xlane.xlu0 %527 }
 0x1a0   : > { %v583_v2 = vadd.f32 %v531_v42, %v515_v34  ;;  %v582_v3 = vadd.f32 %v528_v43, %v512_v35 }
 0x1a3   : > { %v490_v44 = vpop.xlane.xlu0 %489  ;;  %v493_v45 = vpop.xlane.xlu1 %492 }
 0x1a4   : > { %v576_v62 = vadd.f32 %v572_v58, %v490_v44  ;;  %v577_v63 = vadd.f32 %v573_v59, %v493_v45 }
 0x1a7   : > { %v502_v46 = vpop.xlane.xlu0 %501  ;;  %v505_v47 = vpop.xlane.xlu1 %504 }
 0x1a8   : > { %v580_v4 = vadd.f32 %v576_v62, %v502_v46  ;;  %v581_v5 = vadd.f32 %v577_v63, %v505_v47 }
 0x1aa   : > { %v1119_v24 = vmul.f32 0.0625, %v580_v4  ;;  %v1121_v25 = vmul.f32 0.0625, %v581_v5 }
 0x1ab   : > { %v484_v48 = vpop.xlane.xlu0 %483  ;;  %v487_v49 = vpop.xlane.xlu1 %486 }
 0x1ac   : > { %v574_v56 = vadd.f32 %v570_v52, %v484_v48  ;;  %v575_v57 = vadd.f32 %v571_v53, %v487_v49  ;;  %v605_v46 = vmul.f32 %v1119_v24, %v1119_v24  ;;  %v606_v47 = vmul.f32 %v1121_v25, %v1121_v25 }
 0x1ad   : > { %v674_v62 = vsub.f32 %v1040_v31, %v1119_v24  ;;  %v699_v63 = vsub.f32 %v1042_v32, %v1119_v24 }
 0x1af   : > { %v496_v50 = vpop.xlane.xlu0 %495  ;;  %v499_v51 = vpop.xlane.xlu1 %498 }
 0x1b0   : > { %v578_v60 = vadd.f32 %v574_v56, %v496_v50  ;;  %v579_v61 = vadd.f32 %v575_v57, %v499_v51 }
 0x1b2   : > { %v1115_v6 = vmul.f32 0.0625, %v578_v60  ;;  %v1117_v7 = vmul.f32 0.0625, %v579_v61  ;;  %v625_v60 = vsub.f32 %v1003_v12, %v1119_v24  ;;  %v649_v61 = vsub.f32 %v1005_v13, %v1119_v24 }
 0x1b3   : > { %v550_v54 = vpop.xlane.xlu0 %549  ;;  %v553_v55 = vpop.xlane.xlu1 %552  ;;  %v700_v12 = vsub.f32 %v1054_v39, %v1121_v25 }
 0x1b4   : > { %v588_v27 = vadd.f32 %v584_v10, %v550_v54  ;;  %v589_v33 = vadd.f32 %v585_v11, %v553_v55  ;;  %v603_v34 = vmul.f32 %v1115_v6, %v1115_v6  ;;  %v604_v42 = vmul.f32 %v1117_v7, %v1117_v7 }
 0x1b5   : > { %v623_v13 = vsub.f32 %v1007_v14, %v1115_v6  ;;  %v647_v31 = vsub.f32 %v1009_v15, %v1115_v6  ;;  %v672_v32 = vsub.f32 %v1048_v36, %v1115_v6  ;;  %v624_v4 = vsub.f32 %v1019_v20, %v1117_v7 }
 0x1b6   : > { %v648_v5 = vsub.f32 %v1021_v21, %v1117_v7  ;;  %v673_v14 = vsub.f32 %v1056_v40, %v1117_v7  ;;  %v698_v15 = vsub.f32 %v1058_v41, %v1117_v7 }
 0x1b7   : > { %v544_v0 = vpop.xlane.xlu0 %543  ;;  %v547_v1 = vpop.xlane.xlu1 %546 }
 0x1b8   : > { %v586_v8 = vadd.f32 %v582_v3, %v544_v0  ;;  %v587_v9 = vadd.f32 %v583_v2, %v547_v1  ;;  %v626_v0 = vsub.f32 %v1017_v19, %v1121_v25  ;;  %v650_v1 = vsub.f32 %v1015_v18, %v1121_v25 }
 0x1b9   : > { %v675_v2 = vsub.f32 %v1052_v38, %v1121_v25  ;;  %v697_v19 = vsub.f32 %v1050_v37, %v1115_v6 }
 0x1bb   : > { %v560_v16 = vpop.xlane.xlu0 %559  ;;  %v563_v17 = vpop.xlane.xlu1 %562 }
 0x1bc   : > { %v590_v22 = vadd.f32 %v586_v8, %v560_v16  ;;  %v591_v23 = vadd.f32 %v587_v9, %v563_v17 }
 0x1be   : > { %v599_v35 = vmul.f32 0.0625, %v590_v22  ;;  %v600_v43 = vmul.f32 0.0625, %v591_v23 }
 0x1bf   : > { %v566_v26 = vpop.xlane.xlu0 %565  ;;  %v569_v28 = vpop.xlane.xlu1 %568 }
 0x1c0   : > { %v607_v29 = vsub.f32 %v599_v35, %v603_v34  ;;  %v608_v30 = vsub.f32 %v600_v43, %v604_v42  ;;  %v592_v44 = vadd.f32 %v588_v27, %v566_v26  ;;  %v593_v45 = vadd.f32 %v589_v33, %v569_v28 }
 0x1c2   : > { %v611_v48 = vmax.f32 %v607_v29, 0.0  ;;  %v612_v49 = vmax.f32 %v608_v30, 0.0  ;;  %v601_v50 = vmul.f32 0.0625, %v592_v44  ;;  %v602_v51 = vmul.f32 0.0625, %v593_v45 }
 0x1c4   : > { %v615_v52 = vadd.f32 1e-05, %v611_v48  ;;  %v616_v53 = vadd.f32 1e-05, %v612_v49  ;;  %v609_v54 = vsub.f32 %v601_v50, %v605_v46  ;;  %v610_v55 = vsub.f32 %v602_v51, %v606_v47 }
 0x1c6   : > { %926 = vrsqrt.f32 %v615_v52  ;;  %v613_v56 = vmax.f32 %v609_v54, 0.0  ;;  %v614_v57 = vmax.f32 %v610_v55, 0.0 }
 0x1c7   : > { %928 = vrsqrt.f32 %v616_v53 }
 0x1c8   : > { %v617_v58 = vadd.f32 1e-05, %v613_v56  ;;  %v618_v59 = vadd.f32 1e-05, %v614_v57 }
 0x1ca   : > { %930 = vrsqrt.f32 %v617_v58 }
 0x1cb   : > { %932 = vrsqrt.f32 %v618_v59 }
 0x1d0   : > { %v927_v3 = vpop.eup %926 }
 0x1d1   : > { %v929_v8 = vpop.eup %928  ;;  %v627_v9 = vmul.f32 %v927_v3, %v623_v13  ;;  %v651_v36 = vmul.f32 %v927_v3, %v647_v31  ;;  %v676_v10 = vmul.f32 %v927_v3, %v672_v32  ;;  %v701_v11 = vmul.f32 %v927_v3, %v697_v19 }
 0x1d2   : > { %v628_v37 = vmul.f32 %v929_v8, %v624_v4  ;;  %v652_v6 = vmul.f32 %v929_v8, %v648_v5  ;;  %v677_v16 = vmul.f32 %v929_v8, %v673_v14  ;;  %v702_v17 = vmul.f32 %v929_v8, %v698_v15 }
 0x1d3   : > { %vm631_vm2 = vcmp.ge.f32.partialorder %v627_v9, 0.0  ;;  %v635_v20 = vmul.f32 0.2, %v627_v9  ;;  %vm655_vm3 = vcmp.ge.f32.partialorder %v651_v36, 0.0  ;;  %v659_v21 = vmul.f32 0.2, %v651_v36 }
 0x1d4   : > { %vm680_vm4 = vcmp.ge.f32.partialorder %v676_v10, 0.0  ;;  %v684_v40 = vmul.f32 0.2, %v676_v10  ;;  %vm705_vm5 = vcmp.ge.f32.partialorder %v701_v11, 0.0  ;;  %v709_v41 = vmul.f32 0.2, %v701_v11  ;;  %v931_v7 = vpop.eup %930 }
 0x1d5   : > { %v639_v22 = vsel %vm631_vm2, %v627_v9, %v635_v20  ;;  %v663_v23 = vsel %vm655_vm3, %v651_v36, %v659_v21  ;;  %vm632_vm6 = vcmp.ge.f32.partialorder %v628_v37, 0.0  ;;  %v636_v24 = vmul.f32 0.2, %v628_v37  ;;  %v933_v27 = vpop.eup %932 }
 0x1d6   : > { %643 = vst.msk [vmem:[%s1167_s6] sm:$0xff] %vm457_vm1, %v639_v22  ;;  %818 = vst.msk [vmem:[%s1167_s6 + $0x20] sm:$0xff] %vm457_vm1, %v663_v23  ;;  %v688_v33 = vsel %vm680_vm4, %v676_v10, %v684_v40  ;;  %v713_v34 = vsel %vm705_vm5, %v701_v11, %v709_v41  ;;  %vm656_vm7 = vcmp.ge.f32.partialorder %v652_v6, 0.0  ;;  %v660_v35 = vmul.f32 0.2, %v652_v6 }
 0x1d7   : > { %822 = vst.msk [vmem:[%s1167_s6 + $0x40] sm:$0xff] %vm457_vm1, %v688_v33  ;;  %826 = vst.msk [vmem:[%s1167_s6 + $0x60] sm:$0xff] %vm457_vm1, %v713_v34  ;;  %v640_v42 = vsel %vm632_vm6, %v628_v37, %v636_v24  ;;  %vm681_vm8 = vcmp.ge.f32.partialorder %v677_v16, 0.0  ;;  %v685_v43 = vmul.f32 0.2, %v677_v16  ;;  %vm706_vm9 = vcmp.ge.f32.partialorder %v702_v17, 0.0 }
 0x1d8   : > { %644 = vst.msk [vmem:[%s1167_s6 + $0x8] sm:$0xff] %vm457_vm1, %v640_v42  ;;  %v664_v26 = vsel %vm656_vm7, %v652_v6, %v660_v35  ;;  %v710_v28 = vmul.f32 0.2, %v702_v17  ;;  %v629_v29 = vmul.f32 %v931_v7, %v625_v60  ;;  %v653_v30 = vmul.f32 %v931_v7, %v649_v61 }
 0x1d9   : > { %819 = vst.msk [vmem:[%s1167_s6 + $0x28] sm:$0xff] %vm457_vm1, %v664_v26  ;;  %v689_v44 = vsel %vm681_vm8, %v677_v16, %v685_v43  ;;  %v678_v45 = vmul.f32 %v931_v7, %v674_v62  ;;  %v703_v46 = vmul.f32 %v931_v7, %v699_v63  ;;  %v630_v47 = vmul.f32 %v933_v27, %v626_v0 }
 0x1da   : > { %823 = vst.msk [vmem:[%s1167_s6 + $0x48] sm:$0xff] %vm457_vm1, %v689_v44  ;;  %v714_v48 = vsel %vm706_vm9, %v702_v17, %v710_v28  ;;  %vm633_vm10 = vcmp.ge.f32.partialorder %v629_v29, 0.0  ;;  %v637_v49 = vmul.f32 0.2, %v629_v29  ;;  %vm657_vm11 = vcmp.ge.f32.partialorder %v653_v30, 0.0 }
 0x1db   : > { %827 = vst.msk [vmem:[%s1167_s6 + $0x68] sm:$0xff] %vm457_vm1, %v714_v48  ;;  %v661_v50 = vmul.f32 0.2, %v653_v30  ;;  %vm682_vm12 = vcmp.ge.f32.partialorder %v678_v45, 0.0  ;;  %v686_v51 = vmul.f32 0.2, %v678_v45  ;;  %v654_v57 = vmul.f32 %v933_v27, %v650_v1 }
 0x1dc   : > { %vm707_vm13 = vcmp.ge.f32.partialorder %v703_v46, 0.0  ;;  %v641_v52 = vsel %vm633_vm10, %v629_v29, %v637_v49  ;;  %v711_v53 = vmul.f32 0.2, %v703_v46  ;;  %vm634_vm14 = vcmp.ge.f32.partialorder %v630_v47, 0.0 }
 0x1dd   : > { %v638_v54 = vmul.f32 0.2, %v630_v47  ;;  %645 = vst.msk [vmem:[%s1167_s6 + $0x10] sm:$0xff] %vm457_vm1, %v641_v52  ;;  %v665_v55 = vsel %vm657_vm11, %v653_v30, %v661_v50  ;;  %v690_v56 = vsel %vm682_vm12, %v678_v45, %v686_v51  ;;  %v679_v58 = vmul.f32 %v933_v27, %v675_v2 }
 0x1de   : > { %820 = vst.msk [vmem:[%s1167_s6 + $0x30] sm:$0xff] %vm457_vm1, %v665_v55  ;;  %824 = vst.msk [vmem:[%s1167_s6 + $0x50] sm:$0xff] %vm457_vm1, %v690_v56  ;;  %v715_v59 = vsel %vm707_vm13, %v703_v46, %v711_v53  ;;  %v704_v61 = vmul.f32 %v933_v27, %v700_v12  ;;  %vm658_vm15 = vcmp.ge.f32.partialorder %v654_v57, 0.0  ;;  %v662_v18 = vmul.f32 0.2, %v654_v57 }
 0x1df   : > { %v642_v60 = vsel %vm634_vm14, %v630_v47, %v638_v54  ;;  %828 = vst.msk [vmem:[%s1167_s6 + $0x70] sm:$0xff] %vm457_vm1, %v715_v59  ;;  %vm683_vm0 = vcmp.ge.f32.partialorder %v679_v58, 0.0  ;;  %v687_v38 = vmul.f32 0.2, %v679_v58 }
 0x1e0   : > { %646 = vst.msk [vmem:[%s1167_s6 + $0x18] sm:$0xff] %vm457_vm1, %v642_v60  ;;  %vm708_vm2 = vcmp.ge.f32.partialorder %v704_v61, 0.0  ;;  %v712_v62 = vmul.f32 0.2, %v704_v61  ;;  %v666_v63 = vsel %vm658_vm15, %v654_v57, %v662_v18 }
 0x1e1   : > { %v691_v0 = vsel %vm683_vm0, %v679_v58, %v687_v38  ;;  %821 = vst.msk [vmem:[%s1167_s6 + $0x38] sm:$0xff] %vm457_vm1, %v666_v63 }
 0x1e2   : > { %825 = vst.msk [vmem:[%s1167_s6 + $0x58] sm:$0xff] %vm457_vm1, %v691_v0  ;;  %v716_v1 = vsel %vm708_vm2, %v704_v61, %v712_v62 }
 0x1e3   : > { %829 = vst.msk [vmem:[%s1167_s6 + $0x78] sm:$0xff] %vm457_vm1, %v716_v1 }
 0x1e4 PF: > { %s12_s9 = sadd.s32 1, %s940_s9  }
 0x1e5   : > { %p9_p4 = scmp.ge.s32.totalorder %s12_s9, 10  }
 0x1e7   :  { %11 = sbr.rel (!%p9_p4) target bundleno = 1 (0x1), region = 64 }

// kernel: run.40
= control target key start
LH: loop header
LB: loop body
LE: loop exit
PB: predicated region body
PF: predicated region fallthrough
CT: control target
= control target key end

     0   :  { %s1009_s9 = smov 0   ;;  %s1128_s0 = inlined_call_operand.vmem [shape: bf16[32,576], index: 0, kind: input, shape index: {}]   ;;  %s1129_s1 = inlined_call_operand.vmem [shape: bf16[8,576,16], index: 1, kind: input, shape index: {}]   ;;  %s1130_s2 = inlined_call_operand.vmem [shape: f32[8,32,16], index: 2, kind: output, shape index: {}]  }
   0x1 LB: > { %s786_s10 = sadd.s32 4294967295, %s992_s9   ;;  %p790_p0 = scmp.ge.s32.totalorder %s992_s9, 1  ;;  %s992_s9 = sphi %s1009_s9, %s12_s9  }
   0x2   : > { %p112_p1 = scmp.lt.s32.totalorder %s992_s9, 9 }
   0x4   : > { %p113_p2 = pnand %p790_p0, %p112_p1 }
   0x5   : > { %p134_p3 = scmp.lt.s32.totalorder (!%p113_p2), %s786_s10, 7  ;;  %v962_v0 = vld [vmem:[%s1128_s0 + $0x4] ss:$20 sps:$4 sm:$0xff] (!%p113_p2)   ;;  %v965_v1 = vld [vmem:[%s1128_s0 + $0xc] ss:$20 sps:$4 sm:$0xff] (!%p113_p2)   ;;  %vm495_vm0 = vcmask (!%p113_p2), 523264  }
   0x6   : > { %116 = sbr.rel (%p113_p2) target bundleno = 462 (0x1ce), region = 28  ;;  %534 = vmatprep.mubr.bf16.mxu0 (!%p113_p2), %v962_v0  ;;  %583 = vmatprep.mubr.bf16.mxu1 (!%p113_p2), %v965_v1  ;;  %v960_v32 = vld [vmem:[%s1128_s0] ss:$20 sps:$4 sm:$0xff] (!%p113_p2)   ;;  %v963_v34 = vld [vmem:[%s1128_s0 + $0x8] ss:$20 sps:$4 sm:$0xff] (!%p113_p2)   ;;  %vm649_vm1 = vcmask (!%p113_p2), 130048  }
   0x7   : > { %v968_v36 = vld [vmem:[%s1128_s0 + $0x2c] ss:$20 sps:$4 sm:$0xff] (!%p113_p2)   ;;  %v970_v39 = vld [vmem:[%s1128_s0 + $0x34] ss:$20 sps:$4 sm:$0xff] (!%p113_p2)   ;;  %v973_v42 = vld [vmem:[%s1128_s0 + $0x30] ss:$20 sps:$4 sm:$0xff] (!%p113_p2)  }
   0x8   : > { %v972_v41 = vld [vmem:[%s1128_s0 + $0x28] ss:$20 sps:$4 sm:$0xff] (!%p113_p2)   ;;  %v976_v44 = vld [vmem:[%s1128_s0 + $0x10] ss:$20 sps:$4 sm:$0xff] (!%p113_p2)   ;;  %v977_v45 = vld [vmem:[%s1128_s0 + $0x38] ss:$20 sps:$4 sm:$0xff] (!%p113_p2)  }
   0xd   : > { %s1132_s10 = smov (!%p134_p3, %s786_s10), 7 }
   0xe   : > { %s919_s15 = smul.u32 288, %s1132_s10  ;;  %s844_s7 = sshll.u32 %s1132_s10, 5 }
   0xf   : > { %s143_s12 = scalar_lea.vmem %s1130_s2, %s844_s7 }
  0x10   : > { %s1029_s18 = scalar_lea.vmem %s1129_s1, %s919_s15 }
  0x11   : > { %v928_v2 = vld [vmem:[%s1029_s18 + $0x40] sm:$0xff]   ;;  %v932_v6 = vld [vmem:[%s1029_s18 + $0x48] sm:$0xff]   ;;  %v936_v10 = vld [vmem:[%s1029_s18 + $0x50] sm:$0xff]  }
  0x12   : > { %v929_v3 = vld [vmem:[%s1029_s18 + $0xc0] sm:$0xff]   ;;  %845 = vmatprep.subr.bf16.mxu0 %v928_v2  ;;  %v933_v7 = vld [vmem:[%s1029_s18 + $0xc8] sm:$0xff]   ;;  %v937_v11 = vld [vmem:[%s1029_s18 + $0xd0] sm:$0xff]  }
  0x13   : > { %v930_v4 = vld [vmem:[%s1029_s18] sm:$0xff]   ;;  %873 = vmatprep.subr.bf16.mxu1 %v929_v3  ;;  %v934_v8 = vld [vmem:[%s1029_s18 + $0x8] sm:$0xff]   ;;  %v938_v12 = vld [vmem:[%s1029_s18 + $0x10] sm:$0xff]  }
  0x14   : > { %v931_v5 = vld [vmem:[%s1029_s18 + $0x80] sm:$0xff]   ;;  %846 = vmatpush3.bf16.msra.mxu0 %v930_v4  ;;  %v935_v9 = vld [vmem:[%s1029_s18 + $0x88] sm:$0xff]   ;;  %v939_v13 = vld [vmem:[%s1029_s18 + $0x90] sm:$0xff]  }
  0x15   : > { %874 = vmatpush3.bf16.msra.mxu1 %v931_v5  ;;  %847 = vmatprep.subr.bf16.mxu0 %v932_v6  ;;  %v940_v14 = vld [vmem:[%s1029_s18 + $0x58] sm:$0xff]   ;;  %v944_v18 = vld [vmem:[%s1029_s18 + $0x60] sm:$0xff]   ;;  %v948_v22 = vld [vmem:[%s1029_s18 + $0x68] sm:$0xff]  }
  0x16   : > { %875 = vmatprep.subr.bf16.mxu1 %v933_v7  ;;  %v941_v15 = vld [vmem:[%s1029_s18 + $0xd8] sm:$0xff]   ;;  %v945_v19 = vld [vmem:[%s1029_s18 + $0xe0] sm:$0xff]   ;;  %v949_v23 = vld [vmem:[%s1029_s18 + $0xe8] sm:$0xff]  }
  0x17   : > { %v942_v16 = vld [vmem:[%s1029_s18 + $0x18] sm:$0xff]   ;;  %v946_v20 = vld [vmem:[%s1029_s18 + $0x20] sm:$0xff]   ;;  %v950_v24 = vld [vmem:[%s1029_s18 + $0x28] sm:$0xff]  }
  0x18   : > { %848 = vmatpush3.bf16.msra.mxu0 %v934_v8  ;;  %v943_v17 = vld [vmem:[%s1029_s18 + $0x98] sm:$0xff]   ;;  %v947_v21 = vld [vmem:[%s1029_s18 + $0xa0] sm:$0xff]   ;;  %v951_v25 = vld [vmem:[%s1029_s18 + $0xa8] sm:$0xff]  }
  0x19   : > { %876 = vmatpush3.bf16.msra.mxu1 %v935_v9  ;;  %849 = vmatprep.subr.bf16.mxu0 %v936_v10  ;;  %v952_v26 = vld [vmem:[%s1029_s18 + $0x70] sm:$0xff]   ;;  %v956_v30 = vld [vmem:[%s1029_s18 + $0x78] sm:$0xff]   ;;  %v966_v37 = vld [vmem:[%s1029_s18 + $0x100] sm:$0xff]  }
  0x1a   : > { %877 = vmatprep.subr.bf16.mxu1 %v937_v11  ;;  %v953_v27 = vld [vmem:[%s1029_s18 + $0xf0] sm:$0xff]   ;;  %v957_v31 = vld [vmem:[%s1029_s18 + $0xf8] sm:$0xff]   ;;  %v967_v38 = vld [vmem:[%s1029_s18 + $0x108] sm:$0xff]  }
  0x1b   : > { %v954_v28 = vld [vmem:[%s1029_s18 + $0x30] sm:$0xff]   ;;  %v958_v33 = vld [vmem:[%s1029_s18 + $0x38] sm:$0xff]  }
  0x1c   : > { %850 = vmatpush3.bf16.msra.mxu0 %v938_v12  ;;  %v955_v29 = vld [vmem:[%s1029_s18 + $0xb0] sm:$0xff]   ;;  %v959_v35 = vld [vmem:[%s1029_s18 + $0xb8] sm:$0xff]  }
  0x1d   : > { %878 = vmatpush3.bf16.msra.mxu1 %v939_v13  ;;  %851 = vmatprep.subr.bf16.mxu0 %v940_v14  ;;  %v974_v40 = vld [vmem:[%s1029_s18 + $0x110] sm:$0xff]   ;;  %v975_v43 = vld [vmem:[%s1029_s18 + $0x118] sm:$0xff]  }
  0x1e   : > { %879 = vmatprep.subr.bf16.mxu1 %v941_v15 }
  0x20   : > { %852 = vmatpush3.bf16.msra.mxu0 %v942_v16 }
  0x21   : > { %880 = vmatpush3.bf16.msra.mxu1 %v943_v17  ;;  %853 = vmatprep.subr.bf16.mxu0 %v944_v18 }
  0x22   : > { %881 = vmatprep.subr.bf16.mxu1 %v945_v19 }
  0x24   : > { %854 = vmatpush3.bf16.msra.mxu0 %v946_v20 }
  0x25   : > { %882 = vmatpush3.bf16.msra.mxu1 %v947_v21  ;;  %855 = vmatprep.subr.bf16.mxu0 %v948_v22 }
  0x26   : > { %883 = vmatprep.subr.bf16.mxu1 %v949_v23 }
  0x28   : > { %856 = vmatpush3.bf16.msra.mxu0 %v950_v24 }
  0x29   : > { %884 = vmatpush3.bf16.msra.mxu1 %v951_v25  ;;  %857 = vmatprep.subr.bf16.mxu0 %v952_v26 }
  0x2a   : > { %885 = vmatprep.subr.bf16.mxu1 %v953_v27 }
  0x2c   : > { %858 = vmatpush3.bf16.msra.mxu0 %v954_v28 }
  0x2d   : > { %886 = vmatpush3.bf16.msra.mxu1 %v955_v29  ;;  %859 = vmatprep.subr.bf16.mxu0 %v956_v30 }
  0x2e   : > { %887 = vmatprep.subr.bf16.mxu1 %v957_v31 }
  0x30   : > { %860 = vmatpush3.bf16.msra.mxu0 %v958_v33 }
  0x31   : > { %888 = vmatpush3.bf16.msra.mxu1 %v959_v35  ;;  %907 = vmatprep.subr.bf16.mxu0 %v966_v37 }
  0x33   : > { %535 = vmatmul.mubr.bf16.vlgmr.msra.gmra.mrb[0].mxu0 %v960_v32 }
  0x34   : > { %584 = vmatmul.mubr.bf16.vlgmr.msra.gmra.mrb[0].mxu1 %v963_v34  ;;  %908 = vmatpush3.bf16.msra.mxu0 %v966_v37 }
  0x35   : > { %909 = vmatprep.subr.bf16.mxu0 %v967_v38  ;;  %542 = vmatprep.mubr.bf16.mxu0 %v968_v36 }
  0x36   : > { %591 = vmatprep.mubr.bf16.mxu1 %v970_v39 }
  0x38   : > { %910 = vmatpush3.bf16.msra.mxu0 %v967_v38 }
  0x39   : > { %911 = vmatprep.subr.bf16.mxu0 %v974_v40 }
  0x3b   : > { %543 = vmatmul.mubr.bf16.gmra.mrb[4].mxu0 %v972_v41 }
  0x3c   : > { %592 = vmatmul.mubr.bf16.gmra.mrb[4].mxu1 %v973_v42  ;;  %912 = vmatpush3.bf16.msra.mxu0 %v974_v40 }
  0x3d   : > { %913 = vmatprep.subr.bf16.mxu0 %v975_v43  ;;  %915 = vmatprep.mubr.msk.bf16.mxu0 %vm495_vm0, %v976_v44 }
  0x40   : > { %914 = vmatpush3.bf16.msra.mxu0 %v975_v43 }
  0x43   : > { %916 = vmatmul.mubr.msk.bf16.vlgmr.msra.gmra.mrb[8].mxu0 %vm495_vm0, %v977_v45 }
 0x106   : > { %v861_v46 = vpop.f32.mrb[0].mxu0 }
 0x107   : > { %v889_v47 = vpop.f32.mrb[0].mxu1  ;;  %v862_v48 = vpop.f32.mrb[1].mxu0 }
 0x108   : > { %v863_v49 = vadd.f32 %v862_v48, %v861_v46  ;;  %v890_v50 = vpop.f32.mrb[1].mxu1  ;;  %v864_v51 = vpop.f32.mrb[2].mxu0 }
 0x109   : > { %v891_v52 = vadd.f32 %v890_v50, %v889_v47  ;;  %v892_v53 = vpop.f32.mrb[2].mxu1  ;;  %v865_v54 = vpop.f32.mrb[3].mxu0 }
 0x10a   : > { %v866_v55 = vadd.f32 %v865_v54, %v864_v51  ;;  %v893_v56 = vpop.f32.mrb[3].mxu1 }
 0x10b   : > { %v894_v57 = vadd.f32 %v893_v56, %v892_v53  ;;  %v586_v58 = vadd.f32 %v891_v52, %v863_v49 }
 0x10d   : > { %v589_v59 = vadd.f32 %v894_v57, %v866_v55 }
 0x10e   : > { %v867_v60 = vpop.f32.mrb[4].mxu0 }
 0x10f   : > { %v895_v61 = vpop.f32.mrb[4].mxu1  ;;  %v868_v62 = vpop.f32.mrb[5].mxu0 }
 0x110   : > { %v869_v63 = vadd.f32 %v868_v62, %v867_v60  ;;  %v896_v0 = vpop.f32.mrb[5].mxu1  ;;  %v870_v1 = vpop.f32.mrb[6].mxu0 }
 0x111   : > { %v897_v2 = vadd.f32 %v896_v0, %v895_v61  ;;  %v898_v3 = vpop.f32.mrb[6].mxu1  ;;  %v871_v4 = vpop.f32.mrb[7].mxu0 }
 0x112   : > { %v872_v5 = vadd.f32 %v871_v4, %v870_v1  ;;  %v899_v6 = vpop.f32.mrb[7].mxu1 }
 0x113   : > { %v900_v7 = vadd.f32 %v899_v6, %v898_v3  ;;  %v594_v8 = vadd.f32 %v897_v2, %v869_v63 }
 0x115   : > { %v597_v9 = vadd.f32 %v900_v7, %v872_v5 }
 0x116   : > { %v917_v10 = vpop.f32.mrb[8].mxu0 }
 0x117   : > { %v1091_v11 = vadd.f32 %v917_v10, %v594_v8  ;;  %v634_v12 = vpop.f32.mrb[9].mxu0 }
 0x118   : > { %v1093_v13 = vadd.f32 %v634_v12, %v586_v58  ;;  %v918_v14 = vpop.f32.mrb[10].mxu0 }
 0x119   : > { %v1095_v15 = vadd.f32 %v918_v14, %v597_v9  ;;  %v637_v16 = vpop.f32.mrb[11].mxu0  ;;  %v656_v17 = vsel %vm649_vm1, %v1091_v11, 0.0  ;;  %v669_v27 = vmul.f32 %v1091_v11, %v1091_v11 }
 0x11a   : > { %v638_v18 = vadd.f32 %v637_v16, %v589_v59  ;;  %657 = vadd.xlane.f32.xlu1 %v656_v17  ;;  %v650_v19 = vsel %vm649_vm1, %v1093_v13, 0.0  ;;  %v667_v23 = vmul.f32 %v1093_v13, %v1093_v13 }
 0x11b   : > { %651 = vadd.xlane.f32.xlu0 %v650_v19  ;;  %v659_v20 = vsel %vm649_vm1, %v1095_v15, 0.0  ;;  %v670_v25 = vmul.f32 %v1095_v15, %v1095_v15  ;;  %v677_v29 = vsel %vm649_vm1, %v669_v27, 0.0 }
 0x11c   : > { %v668_v21 = vmul.f32 %v638_v18, %v638_v18  ;;  %v653_v22 = vsel %vm649_vm1, %v638_v18, 0.0  ;;  %v671_v26 = vsel %vm649_vm1, %v667_v23, 0.0 }
 0x11d   : > { %v680_v28 = vsel %vm649_vm1, %v670_v25, 0.0 }
 0x11e   : > { %660 = vadd.xlane.f32.xlu1 %v659_v20  ;;  %v674_v24 = vsel %vm649_vm1, %v668_v21, 0.0 }
 0x11f   : > { %654 = vadd.xlane.f32.xlu0 %v653_v22 }
 0x122   : > { %675 = vadd.xlane.f32.xlu1 %v674_v24 }
 0x123   : > { %672 = vadd.xlane.f32.xlu0 %v671_v26 }
 0x126   : > { %681 = vadd.xlane.f32.xlu1 %v680_v28 }
 0x127   : > { %678 = vadd.xlane.f32.xlu0 %v677_v29 }
 0x1a7   : > { %v658_v30 = vpop.xlane.xlu1 %657 }
 0x1a8   : > { %v652_v31 = vpop.xlane.xlu0 %651  ;;  %v665_v41 = vmul.f32 0.0625, %v658_v30 }
 0x1a9   : > { %v663_v34 = vmul.f32 0.0625, %v652_v31 }
 0x1aa   : > { %v689_v51 = vmul.f32 %v665_v41, %v665_v41  ;;  %v701_v7 = vsub.f32 %v1091_v11, %v665_v41 }
 0x1ab   : > { %v661_v32 = vpop.xlane.xlu1 %660  ;;  %v687_v42 = vmul.f32 %v663_v34, %v663_v34  ;;  %v699_v0 = vsub.f32 %v1093_v13, %v663_v34 }
 0x1ac   : > { %v655_v33 = vpop.xlane.xlu0 %654  ;;  %v666_v38 = vmul.f32 0.0625, %v661_v32 }
 0x1ad   : > { %v664_v35 = vmul.f32 0.0625, %v655_v33 }
 0x1ae   : > { %v690_v47 = vmul.f32 %v666_v38, %v666_v38  ;;  %v702_v4 = vsub.f32 %v1095_v15, %v666_v38 }
 0x1af   : > { %v688_v36 = vmul.f32 %v664_v35, %v664_v35  ;;  %v676_v37 = vpop.xlane.xlu1 %675  ;;  %v700_v62 = vsub.f32 %v638_v18, %v664_v35 }
 0x1b0   : > { %v684_v39 = vmul.f32 0.0625, %v676_v37  ;;  %v673_v40 = vpop.xlane.xlu0 %672 }
 0x1b1   : > { %v683_v43 = vmul.f32 0.0625, %v673_v40 }
 0x1b2   : > { %v692_v44 = vsub.f32 %v684_v39, %v688_v36 }
 0x1b3   : > { %v691_v45 = vsub.f32 %v683_v43, %v687_v42  ;;  %v682_v46 = vpop.xlane.xlu1 %681 }
 0x1b4   : > { %v696_v48 = vmax.f32 %v692_v44, 0.0  ;;  %v686_v49 = vmul.f32 0.0625, %v682_v46  ;;  %v679_v50 = vpop.xlane.xlu0 %678 }
 0x1b5   : > { %v695_v52 = vmax.f32 %v691_v45, 0.0  ;;  %v685_v53 = vmul.f32 0.0625, %v679_v50 }
 0x1b6   : > { %v704_v54 = vadd.f32 1e-05, %v696_v48  ;;  %v694_v55 = vsub.f32 %v686_v49, %v690_v47 }
 0x1b7   : > { %v703_v56 = vadd.f32 1e-05, %v695_v52  ;;  %v693_v57 = vsub.f32 %v685_v53, %v689_v51 }
 0x1b8   : > { %978 = vrsqrt.f32 %v704_v54  ;;  %v698_v58 = vmax.f32 %v694_v55, 0.0 }
 0x1b9   : > { %980 = vrsqrt.f32 %v703_v56  ;;  %v697_v59 = vmax.f32 %v693_v57, 0.0 }
 0x1ba   : > { %v706_v60 = vadd.f32 1e-05, %v698_v58 }
 0x1bb   : > { %v705_v61 = vadd.f32 1e-05, %v697_v59 }
 0x1bc   : > { %982 = vrsqrt.f32 %v706_v60 }
 0x1bd   : > { %984 = vrsqrt.f32 %v705_v61 }
 0x1c2   : > { %v979_v63 = vpop.eup %978 }
 0x1c3   : > { %v981_v1 = vpop.eup %980  ;;  %v712_v2 = vmul.f32 %v979_v63, %v700_v62 }
 0x1c4   : > { %v711_v3 = vmul.f32 %v981_v1, %v699_v0 }
 0x1c5   : > { %vm716_vm2 = vcmp.ge.f32.partialorder %v712_v2, 0.0  ;;  %v720_v5 = vmul.f32 0.2, %v712_v2 }
 0x1c6   : > { %v983_v6 = vpop.eup %982  ;;  %vm715_vm3 = vcmp.ge.f32.partialorder %v711_v3, 0.0  ;;  %v719_v8 = vmul.f32 0.2, %v711_v3 }
 0x1c7   : > { %v985_v9 = vpop.eup %984  ;;  %v724_v10 = vsel %vm716_vm2, %v712_v2, %v720_v5  ;;  %v714_v12 = vmul.f32 %v983_v6, %v702_v4 }
 0x1c8   : > { %728 = vst.msk [vmem:[%s143_s12 + $0x8] sm:$0xff] %vm649_vm1, %v724_v10  ;;  %v723_v13 = vsel %vm715_vm3, %v711_v3, %v719_v8  ;;  %v713_v14 = vmul.f32 %v985_v9, %v701_v7 }
 0x1c9   : > { %727 = vst.msk [vmem:[%s143_s12] sm:$0xff] %vm649_vm1, %v723_v13  ;;  %vm718_vm4 = vcmp.ge.f32.partialorder %v714_v12, 0.0  ;;  %v722_v15 = vmul.f32 0.2, %v714_v12 }
 0x1ca   : > { %vm717_vm5 = vcmp.ge.f32.partialorder %v713_v14, 0.0  ;;  %v721_v16 = vmul.f32 0.2, %v713_v14 }
 0x1cb   : > { %v726_v17 = vsel %vm718_vm4, %v714_v12, %v722_v15 }
 0x1cc   : > { %730 = vst.msk [vmem:[%s143_s12 + $0x18] sm:$0xff] %vm649_vm1, %v726_v17  ;;  %v725_v18 = vsel %vm717_vm5, %v713_v14, %v721_v16 }
 0x1cd   : > { %729 = vst.msk [vmem:[%s143_s12 + $0x10] sm:$0xff] %vm649_vm1, %v725_v18 }
 0x1ce PF: > { %s12_s9 = sadd.s32 1, %s992_s9  }
 0x1cf   : > { %p9_p4 = scmp.ge.s32.totalorder %s12_s9, 10  }
 0x1d1   :  { %11 = sbr.rel (!%p9_p4) target bundleno = 1 (0x1), region = 58 }

// kernel: run.42
= control target key start
LH: loop header
LB: loop body
LE: loop exit
PB: predicated region body
PF: predicated region fallthrough
CT: control target
= control target key end

     0   :  { %s683_s9 = smov 0   ;;  %s806_s0 = inlined_call_operand.vmem [shape: bf16[4,16,32], index: 0, kind: input, shape index: {}]   ;;  %s807_s1 = inlined_call_operand.vmem [shape: bf16[8,32,16], index: 1, kind: input, shape index: {}]   ;;  %s808_s2 = inlined_call_operand.vmem [shape: f32[8,4,16,16], index: 2, kind: output, shape index: {}]  }
   0x1 LB: > { %s559_s10 = sadd.s32 4294967295, %s664_s9   ;;  %p563_p0 = scmp.ge.s32.totalorder %s664_s9, 1  ;;  %s664_s9 = sphi %s683_s9, %s12_s9  }
   0x2   : > { %p112_p1 = scmp.lt.s32.totalorder %s664_s9, 9 }
   0x4   : > { %p113_p2 = pnand %p563_p0, %p112_p1 }
   0x5   : > { %p134_p3 = scmp.lt.s32.totalorder (!%p113_p2), %s559_s10, 7  ;;  %v666_v0 = vmov (!%p113_p2), 0.0   ;;  %vm667_vm0 = vmmov (!%p113_p2), 0   ;;  %v650_v3 = vld [vmem:[%s806_s0] sm:$0xff] (!%p113_p2)   ;;  %v651_v4 = vld [vmem:[%s806_s0 + $0x8] sm:$0xff] (!%p113_p2)   ;;  %vm168_vm1 = vcmask (!%p113_p2), 261120  }
   0x6   : > { %116 = sbr.rel (%p113_p2) target bundleno = 439 (0x1b7), region = 28  ;;  %606 = vmatprep.subr.bf16.mxu0 (!%p113_p2), %v666_v0  ;;  %614 = vmatprep.subr.bf16.mxu1 (!%p113_p2), %v666_v0  ;;  %v652_v5 = vld [vmem:[%s806_s0 + $0x10] sm:$0xff] (!%p113_p2)   ;;  %v653_v6 = vld [vmem:[%s806_s0 + $0x18] sm:$0xff] (!%p113_p2)   ;;  %vm369_vm2 = vcmask (!%p113_p2), 130048  }
   0x7   : > { %610 = vmatprep.mubr.msk.bf16.mxu0 (!%p113_p2), %vm667_vm0, %v666_v0  ;;  %618 = vmatprep.mubr.msk.bf16.mxu1 (!%p113_p2), %vm667_vm0, %v666_v0 }
   0xd   : > { %s810_s10 = smov (!%p134_p3, %s559_s10), 7 }
   0xe   : > { %s592_s11 = sshll.u32 %s810_s10, 4  ;;  %s593_s23 = sshll.u32 %s810_s10, 6 }
   0xf   : > { %s138_s14 = scalar_lea.vmem %s807_s1, %s592_s11  ;;  %s785_s26 = scalar_lea.vmem %s808_s2, %s593_s23 }
  0x10   : > { %v648_v1 = vld [vmem:[%s138_s14] sm:$0xff]   ;;  %v649_v2 = vld [vmem:[%s138_s14 + $0x8] sm:$0xff]  }
  0x11   : > { %607 = vmatpush3.bf16.msra.mxu0 %v648_v1  ;;  %615 = vmatpush3.bf16.msra.mxu1 %v648_v1 }
  0x12   : > { %608 = vmatprep.subr.bf16.mxu0 %v666_v0  ;;  %616 = vmatprep.subr.bf16.mxu1 %v666_v0 }
  0x15   : > { %609 = vmatpush3.bf16.msra.mxu0 %v649_v2  ;;  %617 = vmatpush3.bf16.msra.mxu1 %v649_v2 }
  0x16   : > { %622 = vmatprep.subr.bf16.mxu0 %v666_v0  ;;  %630 = vmatprep.subr.bf16.mxu1 %v666_v0 }
  0x18   : > { %611 = vmatmul.mubr.msk.bf16.vlgmr.msra.gmra.mrb[0].mxu0 %vm168_vm1, %v650_v3  ;;  %619 = vmatmul.mubr.msk.bf16.vlgmr.msra.gmra.mrb[0].mxu1 %vm168_vm1, %v651_v4 }
  0x19   : > { %623 = vmatpush3.bf16.msra.mxu0 %v648_v1  ;;  %631 = vmatpush3.bf16.msra.mxu1 %v648_v1 }
  0x1a   : > { %624 = vmatprep.subr.bf16.mxu0 %v666_v0  ;;  %626 = vmatprep.mubr.msk.bf16.mxu0 %vm667_vm0, %v666_v0 }
  0x1b   : > { %632 = vmatprep.subr.bf16.mxu1 %v666_v0  ;;  %634 = vmatprep.mubr.msk.bf16.mxu1 %vm667_vm0, %v666_v0 }
  0x1d   : > { %625 = vmatpush3.bf16.msra.mxu0 %v649_v2  ;;  %633 = vmatpush3.bf16.msra.mxu1 %v649_v2 }
  0x20   : > { %627 = vmatmul.mubr.msk.bf16.vlgmr.msra.gmra.mrb[4].mxu0 %vm168_vm1, %v652_v5  ;;  %635 = vmatmul.mubr.msk.bf16.vlgmr.msra.gmra.mrb[4].mxu1 %vm168_vm1, %v653_v6 }
  0xeb   : > { %v717_v7 = vpop.f32.mrb[0].mxu0  ;;  %v719_v8 = vpop.f32.mrb[0].mxu1 }
  0xec   : > { %v612_v9 = vpop.f32.mrb[1].mxu0  ;;  %v620_v10 = vpop.f32.mrb[1].mxu1  ;;  %v376_v11 = vsel %vm369_vm2, %v719_v8, 0.0  ;;  %v370_v12 = vsel %vm369_vm2, %v717_v7, 0.0  ;;  %v394_v20 = vmul.f32 %v717_v7, %v717_v7  ;;  %v402_v27 = vmul.f32 %v719_v8, %v719_v8 }
  0xed   : > { %377 = vadd.xlane.f32.xlu1 %v376_v11  ;;  %v725_v13 = vpop.f32.mrb[2].mxu1  ;;  %371 = vadd.xlane.f32.xlu0 %v370_v12  ;;  %v727_v14 = vpop.f32.mrb[2].mxu0 }
  0xee   : > { %v613_v15 = vpop.f32.mrb[3].mxu0  ;;  %v621_v16 = vpop.f32.mrb[3].mxu1  ;;  %v379_v17 = vsel %vm369_vm2, %v725_v13, 0.0  ;;  %v373_v18 = vsel %vm369_vm2, %v727_v14, 0.0  ;;  %v395_v19 = vmul.f32 %v727_v14, %v727_v14  ;;  %v396_v24 = vsel %vm369_vm2, %v394_v20, 0.0 }
  0xef   : > { %v403_v26 = vmul.f32 %v725_v13, %v725_v13  ;;  %v404_v34 = vsel %vm369_vm2, %v402_v27, 0.0 }
  0xf0   : > { %v399_v23 = vsel %vm369_vm2, %v395_v19, 0.0 }
  0xf1   : > { %380 = vadd.xlane.f32.xlu1 %v379_v17  ;;  %374 = vadd.xlane.f32.xlu0 %v373_v18  ;;  %v407_v33 = vsel %vm369_vm2, %v403_v26, 0.0 }
  0xf3   : > { %v737_v21 = vpop.f32.mrb[4].mxu0  ;;  %v739_v22 = vpop.f32.mrb[4].mxu1 }
  0xf4   : > { %v628_v25 = vpop.f32.mrb[5].mxu0  ;;  %v636_v28 = vpop.f32.mrb[5].mxu1  ;;  %v382_v35 = vsel %vm369_vm2, %v737_v21, 0.0  ;;  %v388_v37 = vsel %vm369_vm2, %v739_v22, 0.0  ;;  %v410_v39 = vmul.f32 %v737_v21, %v737_v21  ;;  %v418_v43 = vmul.f32 %v739_v22, %v739_v22 }
  0xf5   : > { %400 = vadd.xlane.f32.xlu1 %v399_v23  ;;  %397 = vadd.xlane.f32.xlu0 %v396_v24  ;;  %v747_v29 = vpop.f32.mrb[6].mxu0  ;;  %v749_v30 = vpop.f32.mrb[6].mxu1 }
  0xf6   : > { %v629_v31 = vpop.f32.mrb[7].mxu0  ;;  %v637_v32 = vpop.f32.mrb[7].mxu1  ;;  %v385_v36 = vsel %vm369_vm2, %v747_v29, 0.0  ;;  %v391_v38 = vsel %vm369_vm2, %v749_v30, 0.0  ;;  %v411_v40 = vmul.f32 %v747_v29, %v747_v29  ;;  %v412_v41 = vsel %vm369_vm2, %v410_v39, 0.0 }
  0xf7   : > { %v419_v44 = vmul.f32 %v749_v30, %v749_v30  ;;  %v420_v45 = vsel %vm369_vm2, %v418_v43, 0.0 }
  0xf8   : > { %v415_v42 = vsel %vm369_vm2, %v411_v40, 0.0 }
  0xf9   : > { %408 = vadd.xlane.f32.xlu1 %v407_v33  ;;  %405 = vadd.xlane.f32.xlu0 %v404_v34  ;;  %v423_v46 = vsel %vm369_vm2, %v419_v44, 0.0 }
  0xfd   : > { %383 = vadd.xlane.f32.xlu0 %v382_v35  ;;  %386 = vadd.xlane.f32.xlu1 %v385_v36 }
 0x101   : > { %389 = vadd.xlane.f32.xlu0 %v388_v37  ;;  %392 = vadd.xlane.f32.xlu1 %v391_v38 }
 0x105   : > { %413 = vadd.xlane.f32.xlu0 %v412_v41  ;;  %416 = vadd.xlane.f32.xlu1 %v415_v42 }
 0x109   : > { %421 = vadd.xlane.f32.xlu0 %v420_v45  ;;  %424 = vadd.xlane.f32.xlu1 %v423_v46 }
 0x17a   : > { %v378_v47 = vpop.xlane.xlu1 %377  ;;  %v372_v48 = vpop.xlane.xlu0 %371 }
 0x17b   : > { %v426_v57 = vadd.f32 %v378_v47, %v372_v48 }
 0x17e   : > { %v381_v49 = vpop.xlane.xlu1 %380  ;;  %v375_v50 = vpop.xlane.xlu0 %374 }
 0x17f   : > { %v427_v58 = vadd.f32 %v381_v49, %v375_v50 }
 0x182   : > { %v401_v51 = vpop.xlane.xlu1 %400  ;;  %v398_v52 = vpop.xlane.xlu0 %397 }
 0x186   : > { %v409_v53 = vpop.xlane.xlu1 %408  ;;  %v406_v54 = vpop.xlane.xlu0 %405 }
 0x187   : > { %v433_v3 = vadd.f32 %v409_v53, %v401_v51  ;;  %v432_v4 = vadd.f32 %v406_v54, %v398_v52 }
 0x18a   : > { %v384_v55 = vpop.xlane.xlu0 %383  ;;  %v387_v56 = vpop.xlane.xlu1 %386 }
 0x18b   : > { %v428_v61 = vadd.f32 %v426_v57, %v384_v55  ;;  %v429_v62 = vadd.f32 %v427_v58, %v387_v56 }
 0x18e   : > { %v390_v59 = vpop.xlane.xlu0 %389  ;;  %v393_v60 = vpop.xlane.xlu1 %392 }
 0x18f   : > { %v430_v63 = vadd.f32 %v428_v61, %v390_v59  ;;  %v431_v0 = vadd.f32 %v429_v62, %v393_v60 }
 0x191   : > { %v439_v5 = vmul.f32 0.015625, %v430_v63  ;;  %v440_v6 = vmul.f32 0.015625, %v431_v0 }
 0x192   : > { %v414_v1 = vpop.xlane.xlu0 %413  ;;  %v417_v2 = vpop.xlane.xlu1 %416 }
 0x193   : > { %v434_v9 = vadd.f32 %v432_v4, %v414_v1  ;;  %v435_v10 = vadd.f32 %v433_v3, %v417_v2  ;;  %v443_v17 = vmul.f32 %v439_v5, %v439_v5  ;;  %v444_v19 = vmul.f32 %v440_v6, %v440_v6 }
 0x194   : > { %v453_v31 = vsub.f32 %v717_v7, %v439_v5  ;;  %v465_v32 = vsub.f32 %v719_v8, %v439_v5  ;;  %v478_v33 = vsub.f32 %v737_v21, %v439_v5  ;;  %v491_v34 = vsub.f32 %v739_v22, %v439_v5 }
 0x195   : > { %v454_v36 = vsub.f32 %v727_v14, %v440_v6  ;;  %v466_v37 = vsub.f32 %v725_v13, %v440_v6  ;;  %v479_v38 = vsub.f32 %v747_v29, %v440_v6  ;;  %v492_v39 = vsub.f32 %v749_v30, %v440_v6 }
 0x196   : > { %v422_v11 = vpop.xlane.xlu0 %421  ;;  %v425_v12 = vpop.xlane.xlu1 %424 }
 0x197   : > { %v436_v15 = vadd.f32 %v434_v9, %v422_v11  ;;  %v437_v16 = vadd.f32 %v435_v10, %v425_v12 }
 0x199   : > { %v441_v18 = vmul.f32 0.015625, %v436_v15  ;;  %v442_v20 = vmul.f32 0.015625, %v437_v16 }
 0x19b   : > { %v445_v23 = vsub.f32 %v441_v18, %v443_v17  ;;  %v446_v24 = vsub.f32 %v442_v20, %v444_v19 }
 0x19d   : > { %v447_v25 = vmax.f32 %v445_v23, 0.0  ;;  %v448_v26 = vmax.f32 %v446_v24, 0.0 }
 0x19f   : > { %v449_v27 = vadd.f32 1e-05, %v447_v25  ;;  %v450_v28 = vadd.f32 1e-05, %v448_v26 }
 0x1a1   : > { %654 = vrsqrt.f32 %v449_v27 }
 0x1a2   : > { %656 = vrsqrt.f32 %v450_v28 }
 0x1ab   : > { %v655_v35 = vpop.eup %654 }
 0x1ac   : > { %v657_v40 = vpop.eup %656  ;;  %v455_v41 = vmul.f32 %v655_v35, %v453_v31  ;;  %v467_v42 = vmul.f32 %v655_v35, %v465_v32  ;;  %v480_v7 = vmul.f32 %v655_v35, %v478_v33  ;;  %v493_v43 = vmul.f32 %v655_v35, %v491_v34 }
 0x1ad   : > { %v456_v8 = vmul.f32 %v657_v40, %v454_v36  ;;  %v468_v44 = vmul.f32 %v657_v40, %v466_v37  ;;  %v481_v21 = vmul.f32 %v657_v40, %v479_v38  ;;  %v494_v45 = vmul.f32 %v657_v40, %v492_v39 }
 0x1ae   : > { %vm457_vm3 = vcmp.ge.f32.partialorder %v455_v41, 0.0  ;;  %v459_v13 = vmul.f32 0.2, %v455_v41  ;;  %vm469_vm4 = vcmp.ge.f32.partialorder %v467_v42, 0.0  ;;  %v471_v14 = vmul.f32 0.2, %v467_v42 }
 0x1af   : > { %vm482_vm5 = vcmp.ge.f32.partialorder %v480_v7, 0.0  ;;  %v484_v22 = vmul.f32 0.2, %v480_v7  ;;  %vm495_vm6 = vcmp.ge.f32.partialorder %v493_v43, 0.0  ;;  %v497_v29 = vmul.f32 0.2, %v493_v43 }
 0x1b0   : > { %v461_v30 = vsel %vm457_vm3, %v455_v41, %v459_v13  ;;  %v473_v46 = vsel %vm469_vm4, %v467_v42, %v471_v14  ;;  %vm458_vm7 = vcmp.ge.f32.partialorder %v456_v8, 0.0  ;;  %v460_v47 = vmul.f32 0.2, %v456_v8 }
 0x1b1   : > { %463 = vst.msk [vmem:[%s785_s26] sm:$0xff] %vm369_vm2, %v461_v30  ;;  %584 = vst.msk [vmem:[%s785_s26 + $0x10] sm:$0xff] %vm369_vm2, %v473_v46  ;;  %v486_v48 = vsel %vm482_vm5, %v480_v7, %v484_v22  ;;  %v499_v49 = vsel %vm495_vm6, %v493_v43, %v497_v29  ;;  %vm470_vm8 = vcmp.ge.f32.partialorder %v468_v44, 0.0  ;;  %v472_v50 = vmul.f32 0.2, %v468_v44 }
 0x1b2   : > { %586 = vst.msk [vmem:[%s785_s26 + $0x20] sm:$0xff] %vm369_vm2, %v486_v48  ;;  %588 = vst.msk [vmem:[%s785_s26 + $0x30] sm:$0xff] %vm369_vm2, %v499_v49  ;;  %v462_v51 = vsel %vm458_vm7, %v456_v8, %v460_v47  ;;  %vm483_vm9 = vcmp.ge.f32.partialorder %v481_v21, 0.0  ;;  %v485_v52 = vmul.f32 0.2, %v481_v21  ;;  %vm496_vm10 = vcmp.ge.f32.partialorder %v494_v45, 0.0 }
 0x1b3   : > { %464 = vst.msk [vmem:[%s785_s26 + $0x8] sm:$0xff] %vm369_vm2, %v462_v51  ;;  %v474_v53 = vsel %vm470_vm8, %v468_v44, %v472_v50  ;;  %v498_v54 = vmul.f32 0.2, %v494_v45 }
 0x1b4   : > { %585 = vst.msk [vmem:[%s785_s26 + $0x18] sm:$0xff] %vm369_vm2, %v474_v53  ;;  %v487_v55 = vsel %vm483_vm9, %v481_v21, %v485_v52 }
 0x1b5   : > { %587 = vst.msk [vmem:[%s785_s26 + $0x28] sm:$0xff] %vm369_vm2, %v487_v55  ;;  %v500_v56 = vsel %vm496_vm10, %v494_v45, %v498_v54 }
 0x1b6   : > { %589 = vst.msk [vmem:[%s785_s26 + $0x38] sm:$0xff] %vm369_vm2, %v500_v56 }
 0x1b7 PF: > { %s12_s9 = sadd.s32 1, %s664_s9  }
 0x1b8   : > { %p9_p4 = scmp.ge.s32.totalorder %s12_s9, 10  }
 0x1ba   :  { %11 = sbr.rel (!%p9_p4) target bundleno = 1 (0x1), region = 64 }

// kernel: run.43
= control target key start
LH: loop header
LB: loop body
LE: loop exit
PB: predicated region body
PF: predicated region fallthrough
CT: control target
= control target key end

     0   :  { %s619_s9 = smov 0   ;;  %s675_s0 = inlined_call_operand.vmem [shape: bf16[16,288], index: 0, kind: input, shape index: {}]   ;;  %s676_s1 = inlined_call_operand.vmem [shape: bf16[8,288,64], index: 1, kind: input, shape index: {}]   ;;  %s677_s2 = inlined_call_operand.vmem [shape: f32[8,16,64], index: 2, kind: output, shape index: {}]  }
   0x1 LB: > { %s491_s10 = sadd.s32 4294967295, %s600_s9   ;;  %p495_p0 = scmp.ge.s32.totalorder %s600_s9, 1  ;;  %s600_s9 = sphi %s619_s9, %s12_s9  }
   0x2   : > { %p112_p1 = scmp.lt.s32.totalorder %s600_s9, 9 }
   0x4   : > { %p113_p2 = pnand %p495_p0, %p112_p1 }
   0x5   : > { %p134_p3 = scmp.lt.s32.totalorder (!%p113_p2), %s491_s10, 7  ;;  %v602_v0 = vmov (!%p113_p2), 0.0   ;;  %v588_v1 = vld [vmem:[%s675_s0 + $0x4] ss:$12 sps:$4 sm:$0xff] (!%p113_p2)   ;;  %vm603_vm0 = vmmov (!%p113_p2), 0   ;;  %vm308_vm1 = vcmask (!%p113_p2), 261120  }
   0x6   : > { %116 = sbr.rel (%p113_p2) target bundleno = 441 (0x1b9), region = 28  ;;  %549 = vmatprep.subr.bf16.mxu1 (!%p113_p2), %v602_v0  ;;  %553 = vmatprep.mubr.msk.bf16.mxu1 (!%p113_p2), %vm603_vm0, %v602_v0  ;;  %v589_v16 = vld [vmem:[%s675_s0 + $0x8] ss:$12 sps:$4 sm:$0xff] (!%p113_p2)   ;;  %v586_v21 = vld [vmem:[%s675_s0] ss:$12 sps:$4 sm:$0xff] (!%p113_p2)   ;;  %vm394_vm2 = vcmask (!%p113_p2), 523264  }
   0x7   : > { %344 = vmatprep.mubr.bf16.mxu0 (!%p113_p2), %v588_v1 }
   0xd   : > { %s679_s10 = smov (!%p134_p3, %s491_s10), 7 }
   0xe   : > { %s557_s13 = smul.u32 144, %s679_s10  ;;  %s523_s21 = sshll.u32 %s679_s10, 4 }
   0xf   : > { %s143_s24 = scalar_lea.vmem %s677_s2, %s523_s21 }
  0x10   : > { %s636_s16 = scalar_lea.vmem %s676_s1, %s557_s13 }
  0x11   : > { %v568_v2 = vld [vmem:[%s636_s16 + $0x40] sm:$0xff]   ;;  %v570_v4 = vld [vmem:[%s636_s16 + $0x48] sm:$0xff]   ;;  %v572_v6 = vld [vmem:[%s636_s16 + $0x50] sm:$0xff]  }
  0x12   : > { %v569_v3 = vld [vmem:[%s636_s16] sm:$0xff]   ;;  %524 = vmatprep.subr.bf16.mxu0 %v568_v2  ;;  %v571_v5 = vld [vmem:[%s636_s16 + $0x8] sm:$0xff]   ;;  %v573_v7 = vld [vmem:[%s636_s16 + $0x10] sm:$0xff]  }
  0x13   : > { %525 = vmatpush3.bf16.msra.mxu0 %v569_v3  ;;  %v574_v8 = vld [vmem:[%s636_s16 + $0x58] sm:$0xff]   ;;  %v576_v10 = vld [vmem:[%s636_s16 + $0x60] sm:$0xff]   ;;  %v578_v13 = vld [vmem:[%s636_s16 + $0x68] sm:$0xff]  }
  0x14   : > { %526 = vmatprep.subr.bf16.mxu0 %v570_v4  ;;  %v575_v9 = vld [vmem:[%s636_s16 + $0x18] sm:$0xff]   ;;  %v582_v11 = vld [vmem:[%s636_s16 + $0x80] sm:$0xff]   ;;  %v585_v14 = vld [vmem:[%s636_s16 + $0x88] sm:$0xff]  }
  0x15   : > { %v577_v12 = vld [vmem:[%s636_s16 + $0x20] sm:$0xff]   ;;  %550 = vmatpush3.bf16.msra.mxu1 %v582_v11  ;;  %v579_v15 = vld [vmem:[%s636_s16 + $0x28] sm:$0xff]   ;;  %v580_v17 = vld [vmem:[%s636_s16 + $0x70] sm:$0xff]  }
  0x16   : > { %551 = vmatprep.subr.bf16.mxu1 %v602_v0  ;;  %v581_v18 = vld [vmem:[%s636_s16 + $0x30] sm:$0xff]   ;;  %v583_v19 = vld [vmem:[%s636_s16 + $0x78] sm:$0xff]  }
  0x17   : > { %527 = vmatpush3.bf16.msra.mxu0 %v571_v5  ;;  %v584_v20 = vld [vmem:[%s636_s16 + $0x38] sm:$0xff]  }
  0x18   : > { %528 = vmatprep.subr.bf16.mxu0 %v572_v6 }
  0x19   : > { %552 = vmatpush3.bf16.msra.mxu1 %v585_v14 }
  0x1b   : > { %529 = vmatpush3.bf16.msra.mxu0 %v573_v7 }
  0x1c   : > { %530 = vmatprep.subr.bf16.mxu0 %v574_v8  ;;  %554 = vmatmul.mubr.msk.bf16.vlgmr.msra.gmra.mrb[0].mxu1 %vm308_vm1, %v589_v16 }
  0x1f   : > { %531 = vmatpush3.bf16.msra.mxu0 %v575_v9 }
  0x20   : > { %532 = vmatprep.subr.bf16.mxu0 %v576_v10 }
  0x23   : > { %533 = vmatpush3.bf16.msra.mxu0 %v577_v12 }
  0x24   : > { %534 = vmatprep.subr.bf16.mxu0 %v578_v13 }
  0x27   : > { %535 = vmatpush3.bf16.msra.mxu0 %v579_v15 }
  0x28   : > { %536 = vmatprep.subr.bf16.mxu0 %v580_v17 }
  0x2b   : > { %537 = vmatpush3.bf16.msra.mxu0 %v581_v18 }
  0x2c   : > { %538 = vmatprep.subr.bf16.mxu0 %v583_v19 }
  0x2f   : > { %539 = vmatpush3.bf16.msra.mxu0 %v584_v20 }
  0x32   : > { %345 = vmatmul.mubr.bf16.vlgmr.msra.gmra.mrb[0].mxu0 %v586_v21 }
  0xef   : > { %v387_v22 = vpop.f32.mrb[0].mxu1 }
  0xf0   : > { %v555_v23 = vpop.f32.mrb[1].mxu1 }
  0xf1   : > { %v390_v24 = vpop.f32.mrb[2].mxu1 }
  0xf2   : > { %v556_v25 = vpop.f32.mrb[3].mxu1 }
 0x105   : > { %v540_v26 = vpop.f32.mrb[0].mxu0 }
 0x106   : > { %v541_v27 = vpop.f32.mrb[1].mxu0 }
 0x107   : > { %v542_v28 = vadd.f32 %v541_v27, %v540_v26  ;;  %v543_v29 = vpop.f32.mrb[2].mxu0 }
 0x108   : > { %v544_v30 = vpop.f32.mrb[3].mxu0 }
 0x109   : > { %v388_v31 = vadd.f32 %v542_v28, %v387_v22  ;;  %v545_v32 = vadd.f32 %v544_v30, %v543_v29 }
 0x10b   : > { %v391_v33 = vadd.f32 %v545_v32, %v390_v24  ;;  %v395_v34 = vsel %vm394_vm2, %v388_v31, 0.0  ;;  %v404_v35 = vmul.f32 %v388_v31, %v388_v31 }
 0x10c   : > { %396 = vadd.xlane.f32.xlu0 %v395_v34 }
 0x10d   : > { %v406_v36 = vsel %vm394_vm2, %v404_v35, 0.0  ;;  %v405_v37 = vmul.f32 %v391_v33, %v391_v33  ;;  %v398_v38 = vsel %vm394_vm2, %v391_v33, 0.0 }
 0x10e   : > { %407 = vadd.xlane.f32.xlu1 %v406_v36 }
 0x10f   : > { %v409_v39 = vsel %vm394_vm2, %v405_v37, 0.0 }
 0x110   : > { %399 = vadd.xlane.f32.xlu0 %v398_v38 }
 0x112   : > { %410 = vadd.xlane.f32.xlu1 %v409_v39 }
 0x199   : > { %v397_v40 = vpop.xlane.xlu0 %396 }
 0x19a   : > { %v402_v41 = vmul.f32 0.015625, %v397_v40 }
 0x19b   : > { %v408_v42 = vpop.xlane.xlu1 %407 }
 0x19c   : > { %v414_v43 = vmul.f32 %v402_v41, %v402_v41  ;;  %v412_v44 = vmul.f32 0.015625, %v408_v42  ;;  %v420_v56 = vsub.f32 %v388_v31, %v402_v41 }
 0x19d   : > { %v400_v45 = vpop.xlane.xlu0 %399 }
 0x19e   : > { %v416_v46 = vsub.f32 %v412_v44, %v414_v43  ;;  %v403_v47 = vmul.f32 0.015625, %v400_v45 }
 0x19f   : > { %v411_v48 = vpop.xlane.xlu1 %410 }
 0x1a0   : > { %v418_v49 = vmax.f32 %v416_v46, 0.0  ;;  %v415_v50 = vmul.f32 %v403_v47, %v403_v47  ;;  %v413_v51 = vmul.f32 0.015625, %v411_v48  ;;  %v421_v60 = vsub.f32 %v391_v33, %v403_v47 }
 0x1a2   : > { %v422_v52 = vadd.f32 1e-05, %v418_v49  ;;  %v417_v53 = vsub.f32 %v413_v51, %v415_v50 }
 0x1a4   : > { %590 = vrsqrt.f32 %v422_v52  ;;  %v419_v54 = vmax.f32 %v417_v53, 0.0 }
 0x1a6   : > { %v423_v55 = vadd.f32 1e-05, %v419_v54 }
 0x1a8   : > { %592 = vrsqrt.f32 %v423_v55 }
 0x1ae   : > { %v591_v57 = vpop.eup %590 }
 0x1af   : > { %v426_v58 = vmul.f32 %v591_v57, %v420_v56 }
 0x1b1   : > { %vm428_vm3 = vcmp.ge.f32.partialorder %v426_v58, 0.0  ;;  %v430_v59 = vmul.f32 0.2, %v426_v58 }
 0x1b2   : > { %v593_v61 = vpop.eup %592 }
 0x1b3   : > { %v432_v62 = vsel %vm428_vm3, %v426_v58, %v430_v59  ;;  %v427_v63 = vmul.f32 %v593_v61, %v421_v60 }
 0x1b4   : > { %434 = vst.msk [vmem:[%s143_s24] sm:$0xff] %vm394_vm2, %v432_v62 }
 0x1b5   : > { %vm429_vm4 = vcmp.ge.f32.partialorder %v427_v63, 0.0  ;;  %v431_v0 = vmul.f32 0.2, %v427_v63 }
 0x1b7   : > { %v433_v1 = vsel %vm429_vm4, %v427_v63, %v431_v0 }
 0x1b8   : > { %435 = vst.msk [vmem:[%s143_s24 + $0x8] sm:$0xff] %vm394_vm2, %v433_v1 }
 0x1b9 PF: > { %s12_s9 = sadd.s32 1, %s600_s9  }
 0x1ba   : > { %p9_p4 = scmp.ge.s32.totalorder %s12_s9, 10  }
 0x1bc   :  { %11 = sbr.rel (!%p9_p4) target bundleno = 1 (0x1), region = 58 }

// kernel: run.45
= control target key start
LH: loop header
LB: loop body
LE: loop exit
PB: predicated region body
PF: predicated region fallthrough
CT: control target
= control target key end

     0   :  { %s552_s9 = smov 0   ;;  %s613_s0 = inlined_call_operand.vmem [shape: bf16[4,8,16], index: 0, kind: input, shape index: {}]   ;;  %s614_s1 = inlined_call_operand.vmem [shape: bf16[8,16,64], index: 1, kind: input, shape index: {}]   ;;  %s615_s2 = inlined_call_operand.vmem [shape: f32[8,4,8,64], index: 2, kind: output, shape index: {}]  }
   0x1 LB: > { %s458_s10 = sadd.s32 4294967295, %s533_s9   ;;  %p462_p0 = scmp.ge.s32.totalorder %s533_s9, 1  ;;  %s533_s9 = sphi %s552_s9, %s12_s9  }
   0x2   : > { %p112_p1 = scmp.lt.s32.totalorder %s533_s9, 9 }
   0x4   : > { %p113_p2 = pnand %p462_p0, %p112_p1 }
   0x5   : > { %p134_p3 = scmp.lt.s32.totalorder (!%p113_p2), %s458_s10, 7  ;;  %v535_v0 = vmov (!%p113_p2), 0.0   ;;  %vm536_vm0 = vmmov (!%p113_p2), 0   ;;  %v147_v2 = vld [vmem:[%s613_s0] sm:$0xf] (!%p113_p2)  ;;  %vm154_vm1 = vcmask (!%p113_p2), 130048  }
   0x6   : > { %116 = sbr.rel (%p113_p2) target bundleno = 419 (0x1a3), region = 28  ;;  %490 = vmatprep.subr.bf16.mxu0 (!%p113_p2), %v535_v0  ;;  %496 = vmatprep.subr.bf16.mxu1 (!%p113_p2), %v535_v0  ;;  %v469_v3 = vld [vmem:[%s613_s0 + $0x4] sm:$0xf] (!%p113_p2)  ;;  %v471_v4 = vld [vmem:[%s613_s0 + $0x8] sm:$0xf] (!%p113_p2)  ;;  %vm333_vm2 = vcmask (!%p113_p2), 523264  }
   0x7   : > { %492 = vmatprep.mubr.msk.bf16.mxu0 (!%p113_p2), %vm536_vm0, %v535_v0  ;;  %498 = vmatprep.mubr.msk.bf16.mxu1 (!%p113_p2), %vm536_vm0, %v535_v0  ;;  %v473_v5 = vld [vmem:[%s613_s0 + $0xc] sm:$0xf] (!%p113_p2) }
   0xd   : > { %s617_s10 = smov (!%p134_p3, %s458_s10), 7 }
   0xe   : > { %s480_s11 = sshll.u32 %s617_s10, 3  ;;  %s481_s23 = sshll.u32 %s617_s10, 5 }
   0xf   : > { %s138_s14 = scalar_lea.vmem %s614_s1, %s480_s11  ;;  %s143_s26 = scalar_lea.vmem %s615_s2, %s481_s23 }
  0x10   : > { %v524_v1 = vld [vmem:[%s138_s14] sm:$0xff]  }
  0x11   : > { %491 = vmatpush3.bf16.msra.mxu0 %v524_v1  ;;  %497 = vmatpush3.bf16.msra.mxu1 %v524_v1 }
  0x12   : > { %502 = vmatprep.subr.bf16.mxu0 %v535_v0  ;;  %508 = vmatprep.subr.bf16.mxu1 %v535_v0 }
  0x14   : > { %493 = vmatmul.mubr.msk.bf16.vlgmr.msra.gmra.mrb[0].mxu0 %vm154_vm1, %v147_v2  ;;  %499 = vmatmul.mubr.msk.bf16.vlgmr.msra.gmra.mrb[0].mxu1 %vm154_vm1, %v469_v3 }
  0x15   : > { %503 = vmatpush3.bf16.msra.mxu0 %v524_v1  ;;  %509 = vmatpush3.bf16.msra.mxu1 %v524_v1 }
  0x16   : > { %504 = vmatprep.mubr.msk.bf16.mxu0 %vm536_vm0, %v535_v0  ;;  %510 = vmatprep.mubr.msk.bf16.mxu1 %vm536_vm0, %v535_v0 }
  0x1c   : > { %505 = vmatmul.mubr.msk.bf16.vlgmr.msra.gmra.mrb[4].mxu0 %vm154_vm1, %v471_v4  ;;  %511 = vmatmul.mubr.msk.bf16.vlgmr.msra.gmra.mrb[4].mxu1 %vm154_vm1, %v473_v5 }
  0xe7   : > { %v582_v6 = vpop.f32.mrb[0].mxu0  ;;  %v584_v7 = vpop.f32.mrb[0].mxu1 }
  0xe8   : > { %v494_v8 = vpop.f32.mrb[1].mxu0  ;;  %v334_v9 = vsel %vm333_vm2, %v582_v6, 0.0  ;;  %v500_v10 = vpop.f32.mrb[1].mxu1  ;;  %v346_v11 = vmul.f32 %v582_v6, %v582_v6  ;;  %v337_v17 = vsel %vm333_vm2, %v584_v7, 0.0  ;;  %v350_v18 = vmul.f32 %v584_v7, %v584_v7 }
  0xe9   : > { %335 = vadd.xlane.f32.xlu0 %v334_v9  ;;  %v195_v12 = vpop.f32.mrb[2].mxu0  ;;  %v240_v13 = vpop.f32.mrb[2].mxu1 }
  0xea   : > { %v495_v14 = vpop.f32.mrb[3].mxu0  ;;  %v501_v15 = vpop.f32.mrb[3].mxu1  ;;  %v347_v16 = vsel %vm333_vm2, %v346_v11, 0.0  ;;  %v351_v22 = vsel %vm333_vm2, %v350_v18, 0.0 }
  0xeb   : > { %348 = vadd.xlane.f32.xlu1 %v347_v16 }
  0xed   : > { %338 = vadd.xlane.f32.xlu0 %v337_v17 }
  0xef   : > { %v282_v19 = vpop.f32.mrb[4].mxu0  ;;  %v327_v20 = vpop.f32.mrb[4].mxu1 }
  0xf0   : > { %v506_v21 = vpop.f32.mrb[5].mxu0  ;;  %v340_v23 = vsel %vm333_vm2, %v282_v19, 0.0  ;;  %v512_v24 = vpop.f32.mrb[5].mxu1  ;;  %v354_v25 = vmul.f32 %v282_v19, %v282_v19  ;;  %v343_v30 = vsel %vm333_vm2, %v327_v20, 0.0  ;;  %v358_v32 = vmul.f32 %v327_v20, %v327_v20 }
  0xf1   : > { %352 = vadd.xlane.f32.xlu0 %v351_v22  ;;  %341 = vadd.xlane.f32.xlu1 %v340_v23  ;;  %v285_v26 = vpop.f32.mrb[6].mxu0  ;;  %v330_v27 = vpop.f32.mrb[6].mxu1 }
  0xf2   : > { %v507_v28 = vpop.f32.mrb[7].mxu0  ;;  %v513_v29 = vpop.f32.mrb[7].mxu1  ;;  %v355_v31 = vsel %vm333_vm2, %v354_v25, 0.0  ;;  %v359_v33 = vsel %vm333_vm2, %v358_v32, 0.0 }
  0xf5   : > { %356 = vadd.xlane.f32.xlu0 %v355_v31  ;;  %344 = vadd.xlane.f32.xlu1 %v343_v30 }
  0xf9   : > { %360 = vadd.xlane.f32.xlu1 %v359_v33 }
 0x176   : > { %v336_v34 = vpop.xlane.xlu0 %335 }
 0x178   : > { %v349_v35 = vpop.xlane.xlu1 %348 }
 0x17a   : > { %v339_v36 = vpop.xlane.xlu0 %338 }
 0x17b   : > { %v362_v39 = vadd.f32 %v339_v36, %v336_v34 }
 0x17e   : > { %v353_v37 = vpop.xlane.xlu0 %352  ;;  %v342_v38 = vpop.xlane.xlu1 %341 }
 0x17f   : > { %v363_v40 = vadd.f32 %v362_v39, %v342_v38  ;;  %v365_v44 = vadd.f32 %v353_v37, %v349_v35 }
 0x182   : > { %v345_v41 = vpop.xlane.xlu1 %344  ;;  %v357_v42 = vpop.xlane.xlu0 %356 }
 0x183   : > { %v364_v43 = vadd.f32 %v363_v40, %v345_v41  ;;  %v366_v45 = vadd.f32 %v365_v44, %v357_v42 }
 0x185   : > { %v369_v46 = vmul.f32 0.00390625, %v364_v43 }
 0x186   : > { %v361_v47 = vpop.xlane.xlu1 %360 }
 0x187   : > { %v367_v48 = vadd.f32 %v366_v45, %v361_v47  ;;  %v371_v49 = vmul.f32 %v369_v46, %v369_v46  ;;  %v376_v54 = vsub.f32 %v582_v6, %v369_v46  ;;  %v382_v55 = vsub.f32 %v584_v7, %v369_v46 }
 0x188   : > { %v389_v56 = vsub.f32 %v282_v19, %v369_v46  ;;  %v396_v57 = vsub.f32 %v327_v20, %v369_v46 }
 0x189   : > { %v370_v50 = vmul.f32 0.00390625, %v367_v48 }
 0x18b   : > { %v372_v51 = vsub.f32 %v370_v50, %v371_v49 }
 0x18d   : > { %v373_v52 = vmax.f32 %v372_v51, 0.0 }
 0x18f   : > { %v374_v53 = vadd.f32 1e-05, %v373_v52 }
 0x191   : > { %525 = vrsqrt.f32 %v374_v53 }
 0x19b   : > { %v526_v58 = vpop.eup %525 }
 0x19c   : > { %v377_v59 = vmul.f32 %v526_v58, %v376_v54  ;;  %v383_v60 = vmul.f32 %v526_v58, %v382_v55  ;;  %v390_v61 = vmul.f32 %v526_v58, %v389_v56  ;;  %v397_v62 = vmul.f32 %v526_v58, %v396_v57 }
 0x19e   : > { %vm378_vm3 = vcmp.ge.f32.partialorder %v377_v59, 0.0  ;;  %v379_v63 = vmul.f32 0.2, %v377_v59  ;;  %vm384_vm4 = vcmp.ge.f32.partialorder %v383_v60, 0.0  ;;  %v385_v0 = vmul.f32 0.2, %v383_v60 }
 0x19f   : > { %vm391_vm5 = vcmp.ge.f32.partialorder %v390_v61, 0.0  ;;  %v392_v1 = vmul.f32 0.2, %v390_v61  ;;  %vm398_vm6 = vcmp.ge.f32.partialorder %v397_v62, 0.0  ;;  %v399_v2 = vmul.f32 0.2, %v397_v62 }
 0x1a0   : > { %v380_v3 = vsel %vm378_vm3, %v377_v59, %v379_v63  ;;  %v386_v4 = vsel %vm384_vm4, %v383_v60, %v385_v0 }
 0x1a1   : > { %381 = vst.msk [vmem:[%s143_s26] sm:$0xff] %vm333_vm2, %v380_v3  ;;  %475 = vst.msk [vmem:[%s143_s26 + $0x8] sm:$0xff] %vm333_vm2, %v386_v4  ;;  %v393_v5 = vsel %vm391_vm5, %v390_v61, %v392_v1  ;;  %v400_v6 = vsel %vm398_vm6, %v397_v62, %v399_v2 }
 0x1a2   : > { %476 = vst.msk [vmem:[%s143_s26 + $0x10] sm:$0xff] %vm333_vm2, %v393_v5  ;;  %477 = vst.msk [vmem:[%s143_s26 + $0x18] sm:$0xff] %vm333_vm2, %v400_v6 }
 0x1a3 PF: > { %s12_s9 = sadd.s32 1, %s533_s9  }
 0x1a4   : > { %p9_p4 = scmp.ge.s32.totalorder %s12_s9, 10  }
 0x1a6   :  { %11 = sbr.rel (!%p9_p4) target bundleno = 1 (0x1), region = 64 }

// kernel: run.46
= control target key start
LH: loop header
LB: loop body
LE: loop exit
PB: predicated region body
PF: predicated region fallthrough
CT: control target
= control target key end

     0   :  { %s483_s9 = smov 0   ;;  %s527_s0 = inlined_call_operand.vmem [shape: bf16[8,144], index: 0, kind: input, shape index: {}]   ;;  %s528_s1 = inlined_call_operand.vmem [shape: bf16[8,144,256], index: 1, kind: input, shape index: {}]   ;;  %s529_s2 = inlined_call_operand.vmem [shape: f32[8,8,256], index: 2, kind: output, shape index: {}]  }
   0x1 LB: > { %s388_s10 = sadd.s32 4294967295, %s466_s9   ;;  %p392_p0 = scmp.ge.s32.totalorder %s466_s9, 1  ;;  %s466_s9 = sphi %s483_s9, %s12_s9  }
   0x2   : > { %p112_p1 = scmp.lt.s32.totalorder %s466_s9, 9 }
   0x4   : > { %p113_p2 = pnand %p392_p0, %p112_p1 }
   0x5   : > { %p134_p3 = scmp.lt.s32.totalorder (!%p113_p2), %s388_s10, 7  ;;  %v145_v0 = vld [vmem:[%s527_s0] sm:$0xff] (!%p113_p2)  ;;  %vm260_vm0 = vcmask (!%p113_p2), 130048  }
   0x6   : > { %116 = sbr.rel (%p113_p2) target bundleno = 440 (0x1b8), region = 28  ;;  %v397_v1 = vcombine.high (!%p113_p2), %v145_v0, %v145_v0  ;;  %v396_v20 = vcombine.low (!%p113_p2), %v145_v0, %v145_v0 }
   0x8   : > { %416 = vmatprep.mubr.msk.bf16.mxu0 (!%p113_p2), %vm260_vm0, %v397_v1 }
   0xd   : > { %s531_s10 = smov (!%p134_p3, %s388_s10), 7 }
   0xe   : > { %s420_s13 = smul.u32 144, %s531_s10  ;;  %s419_s17 = sshll.u32 %s531_s10, 4 }
   0xf   : > { %s143_s20 = scalar_lea.vmem %s529_s2, %s419_s17 }
  0x10   : > { %s500_s16 = scalar_lea.vmem %s528_s1, %s420_s13 }
  0x11   : > { %v429_v2 = vld [vmem:[%s500_s16 + $0x4] ss:$8 sps:$4 sm:$0xff]   ;;  %v431_v3 = vld [vmem:[%s500_s16] ss:$8 sps:$4 sm:$0xff]   ;;  %v432_v4 = vld [vmem:[%s500_s16 + $0x14] ss:$8 sps:$4 sm:$0xff]  }
  0x12   : > { %264 = vmatprep.subr.bf16.mxu0 %v429_v2  ;;  %v434_v5 = vld [vmem:[%s500_s16 + $0x10] ss:$8 sps:$4 sm:$0xff]   ;;  %v435_v6 = vld [vmem:[%s500_s16 + $0x24] ss:$8 sps:$4 sm:$0xff]   ;;  %v437_v7 = vld [vmem:[%s500_s16 + $0x20] ss:$8 sps:$4 sm:$0xff]  }
  0x13   : > { %265 = vmatpush1.bf16.msra.mxu0 %v431_v3  ;;  %v438_v8 = vld [vmem:[%s500_s16 + $0x34] ss:$8 sps:$4 sm:$0xff]   ;;  %v440_v9 = vld [vmem:[%s500_s16 + $0x30] ss:$8 sps:$4 sm:$0xff]   ;;  %v441_v10 = vld [vmem:[%s500_s16 + $0x44] ss:$8 sps:$4 sm:$0xff]  }
  0x14   : > { %266 = vmatprep.subr.bf16.mxu0 %v432_v4  ;;  %v443_v11 = vld [vmem:[%s500_s16 + $0x40] ss:$8 sps:$4 sm:$0xff]   ;;  %v444_v12 = vld [vmem:[%s500_s16 + $0x54] ss:$8 sps:$4 sm:$0xff]   ;;  %v446_v13 = vld [vmem:[%s500_s16 + $0x50] ss:$8 sps:$4 sm:$0xff]  }
  0x15   : > { %v447_v14 = vld [vmem:[%s500_s16 + $0x64] ss:$8 sps:$4 sm:$0xff]   ;;  %v449_v15 = vld [vmem:[%s500_s16 + $0x60] ss:$8 sps:$4 sm:$0xff]   ;;  %v450_v16 = vld [vmem:[%s500_s16 + $0x74] ss:$8 sps:$4 sm:$0xff]  }
  0x16   : > { %v452_v17 = vld [vmem:[%s500_s16 + $0x70] ss:$8 sps:$4 sm:$0xff]   ;;  %v453_v18 = vld [vmem:[%s500_s16 + $0x84] ss:$8 sps:$4 sm:$0xff]   ;;  %v455_v19 = vld [vmem:[%s500_s16 + $0x80] ss:$8 sps:$4 sm:$0xff]  }
  0x17   : > { %267 = vmatpush1.bf16.msra.mxu0 %v434_v5 }
  0x18   : > { %268 = vmatprep.subr.bf16.mxu0 %v435_v6 }
  0x1b   : > { %269 = vmatpush1.bf16.msra.mxu0 %v437_v7 }
  0x1c   : > { %270 = vmatprep.subr.bf16.mxu0 %v438_v8 }
  0x1f   : > { %271 = vmatpush1.bf16.msra.mxu0 %v440_v9 }
  0x20   : > { %272 = vmatprep.subr.bf16.mxu0 %v441_v10 }
  0x23   : > { %273 = vmatpush1.bf16.msra.mxu0 %v443_v11 }
  0x24   : > { %274 = vmatprep.subr.bf16.mxu0 %v444_v12 }
  0x27   : > { %275 = vmatpush1.bf16.msra.mxu0 %v446_v13 }
  0x28   : > { %276 = vmatprep.subr.bf16.mxu0 %v447_v14 }
  0x2b   : > { %277 = vmatpush1.bf16.msra.mxu0 %v449_v15 }
  0x2c   : > { %278 = vmatprep.subr.bf16.mxu0 %v450_v16 }
  0x2f   : > { %279 = vmatpush1.bf16.msra.mxu0 %v452_v17 }
  0x30   : > { %280 = vmatprep.subr.bf16.mxu0 %v453_v18 }
  0x33   : > { %281 = vmatpush1.bf16.msra.mxu0 %v455_v19 }
  0x36   : > { %297 = vmatmul.mubr.bf16.vlgmr.msra.gmra.mrb[0].mxu0 %v396_v20 }
 0x109   : > { %v298_v21 = vpop.f32.mrb[0].mxu0 }
 0x10a   : > { %v300_v22 = vpop.f32.mrb[1].mxu0  ;;  %v310_v23 = vmul.f32 %v298_v21, %v298_v21 }
 0x10b   : > { %v302_v24 = vpop.f32.mrb[2].mxu0  ;;  %v305_v25 = vadd.f32 %v300_v22, %v298_v21  ;;  %v311_v26 = vmul.f32 %v300_v22, %v300_v22 }
 0x10c   : > { %v303_v27 = vpop.f32.mrb[3].mxu0 }
 0x10d   : > { %306 = vadd.xlane.f32.xlu0 %v305_v25  ;;  %v312_v28 = vadd.f32 %v311_v26, %v310_v23 }
 0x111   : > { %313 = vadd.xlane.f32.xlu0 %v312_v28 }
 0x19a   : > { %v307_v29 = vpop.xlane.xlu0 %306 }
 0x19b   : > { %v309_v30 = vmul.f32 0.00390625, %v307_v29 }
 0x19d   : > { %v316_v32 = vmul.f32 %v309_v30, %v309_v30  ;;  %v319_v37 = vsub.f32 %v298_v21, %v309_v30  ;;  %v320_v38 = vsub.f32 %v300_v22, %v309_v30 }
 0x19e   : > { %v314_v31 = vpop.xlane.xlu0 %313 }
 0x19f   : > { %v315_v33 = vmul.f32 0.00390625, %v314_v31 }
 0x1a1   : > { %v317_v34 = vsub.f32 %v315_v33, %v316_v32 }
 0x1a3   : > { %v318_v35 = vmax.f32 %v317_v34, 0.0 }
 0x1a5   : > { %v321_v36 = vadd.f32 1e-05, %v318_v35 }
 0x1a7   : > { %458 = vrsqrt.f32 %v321_v36 }
 0x1b1   : > { %v459_v39 = vpop.eup %458 }
 0x1b2   : > { %v323_v40 = vmul.f32 %v459_v39, %v319_v37  ;;  %v324_v41 = vmul.f32 %v459_v39, %v320_v38 }
 0x1b4   : > { %vm325_vm1 = vcmp.ge.f32.partialorder %v323_v40, 0.0  ;;  %vm326_vm2 = vcmp.ge.f32.partialorder %v324_v41, 0.0  ;;  %v327_v42 = vmul.f32 0.2, %v323_v40  ;;  %v328_v43 = vmul.f32 0.2, %v324_v41 }
 0x1b6   : > { %v329_v44 = vsel %vm325_vm1, %v323_v40, %v327_v42  ;;  %v330_v45 = vsel %vm326_vm2, %v324_v41, %v328_v43 }
 0x1b7   : > { %331 = vst [vmem:[%s143_s20] sm:$0xff] %v329_v44  ;;  %332 = vst [vmem:[%s143_s20 + $0x8] sm:$0xff] %v330_v45 }
 0x1b8 PF: > { %s12_s9 = sadd.s32 1, %s466_s9  }
 0x1b9   : > { %p9_p4 = scmp.ge.s32.totalorder %s12_s9, 10  }
 0x1bb   :  { %11 = sbr.rel (!%p9_p4) target bundleno = 1 (0x1), region = 58 }

// kernel: run.48
= control target key start
LH: loop header
LB: loop body
LE: loop exit
PB: predicated region body
PF: predicated region fallthrough
CT: control target
= control target key end

     0   :  { %s363_s12 = smov 0   ;;  %s386_s0 = inlined_call_operand.vmem [shape: bf16[2,8], index: 0, kind: input, shape index: {}]   ;;  %s387_s1 = inlined_call_operand.vmem [shape: f32[2,1], index: 1, kind: input, shape index: {}]   ;;  %s388_s2 = inlined_call_operand.vmem [shape: bf16[8,8,256], index: 2, kind: input, shape index: {}]   ;;  %s389_s3 = inlined_call_operand.vmem [shape: f32[8,2,256], index: 3, kind: output, shape index: {}]  }
   0x1 LB: > { %s304_s13 = sadd.s32 4294967295, %s340_s12   ;;  %p308_p0 = scmp.ge.s32.totalorder %s340_s12, 1  ;;  %s340_s12 = sphi %s363_s12, %s13_s12  }
   0x2   : > { %p137_p1 = scmp.lt.s32.totalorder %s340_s12, 9 }
   0x4   : > { %p138_p2 = pnand %p308_p0, %p137_p1 }
   0x5   : > { %p161_p3 = scmp.lt.s32.totalorder (!%p138_p2), %s304_s13, 7  ;;  %v342_v0 = vmov (!%p138_p2), 0   ;;  %v174_v1 = vld [vmem:[%s387_s1] sm:$0x3] (!%p138_p2)  ;;  %vm189_vm0 = vcmask (!%p138_p2), 1043456   ;;  %vm185_vm1 = vcmask (!%p138_p2), 64512  }
   0x6   : > { %141 = sbr.rel (%p138_p2) target bundleno = 241 (0xf1), region = 32  ;;  %228 = vmatprep.mubr.bf16.mxu0 (!%p138_p2), %v342_v0  ;;  %331 = vset.pattern.permute.xlu0 (!%p138_p2), %v342_v0  ;;  %v172_v6 = vld [vmem:[%s386_s0] sm:$0x1] (!%p138_p2) }
   0x7   : > { %177 = vperm.xlu0 (!%p138_p2), %331, %v174_v1  }
   0xd   : > { %s391_s13 = smov (!%p161_p3, %s304_s13), 7 }
   0xe   : > { %s320_s16 = sshll.u32 %s391_s13, 3  ;;  %s321_s22 = sshll.u32 %s391_s13, 2 }
   0xf   : > { %s165_s19 = scalar_lea.vmem %s388_s2, %s320_s16  ;;  %s170_s25 = scalar_lea.vmem %s389_s3, %s321_s22 }
  0x10   : > { %v173_v2 = vld [vmem:[%s165_s19] sm:$0xff] }
  0x11   : > { %v314_v3 = vcombine.high %v173_v2, %v173_v2  ;;  %v313_v4 = vcombine.low %v173_v2, %v173_v2 }
  0x13   : > { %315 = vmatprep.subr.msk.bf16.mxu0 %vm189_vm0, %v314_v3  ;;  %v191_v5 = vsel %vm189_vm0, %v313_v4, 0 }
  0x14   : > { %197 = vmatpush1.bf16.msra.mxu0 %v191_v5 }
  0x17   : > { %316 = vmatmul.mubr.msk.bf16.vlgmr.msra.gmra.mrb[0].mxu0 %vm185_vm1, %v172_v6 }
  0x86   : > { %v178_v7 = vpop.permute.xlu0 %177 }
  0xea   : > { %v230_v8 = vpop.f32.mrb[0].mxu0 }
  0xeb   : > { %v231_v9 = vadd.f32 %v230_v8, %v178_v7  ;;  %v232_v10 = vpop.f32.mrb[1].mxu0 }
  0xec   : > { %v233_v11 = vadd.f32 %v232_v10, %v178_v7  ;;  %v234_v12 = vpop.f32.mrb[2].mxu0 }
  0xed   : > { %v235_v13 = vpop.f32.mrb[3].mxu0 }
  0xee   : > { %v239_v14 = vcombine.low %v231_v9, %v233_v11 }
  0xf0   : > { %317 = vst.sshfl [vmem:[%s170_s25] sm:$0x33 pattern:$0x76325410] %v239_v14 }
  0xf1 PF: > { %s13_s12 = sadd.s32 1, %s340_s12  }
  0xf2   : > { %p10_p4 = scmp.ge.s32.totalorder %s13_s12, 10  }
  0xf4   :  { %12 = sbr.rel (!%p10_p4) target bundleno = 1 (0x1), region = 62 }

// kernel: run.49
= control target key start
LH: loop header
LB: loop body
LE: loop exit
PB: predicated region body
PF: predicated region fallthrough
CT: control target
= control target key end

     0   :  { %s98_s0 = inlined_call_operand.vmem [shape: f32[8,512], index: 0, kind: input, shape index: {}]   ;;  %s99_s1 = inlined_call_operand.vmem [shape: f32[8,512], index: 1, kind: output, shape index: {}]  }
   0x1   :  { %v8_v0 = vld [vmem:[%s98_s0] sm:$0xff]  ;;  %v9_v1 = vld [vmem:[%s98_s0 + $0x8] sm:$0xff]  ;;  %v10_v2 = vld [vmem:[%s98_s0 + $0x10] sm:$0xff] }
   0x2   :  { %v12_v3 = vmul.f32 %v8_v0, %v8_v0  ;;  %v13_v4 = vmul.f32 %v9_v1, %v9_v1  ;;  %v14_v5 = vmul.f32 %v10_v2, %v10_v2  ;;  %v11_v6 = vld [vmem:[%s98_s0 + $0x18] sm:$0xff] }
   0x3   :  { %v15_v7 = vmul.f32 %v11_v6, %v11_v6 }
   0x4   :  { %v16_v8 = vrot.slane %v12_v3, 4  ;;  %v22_v9 = vrot.slane %v13_v4, 4  ;;  %v28_v10 = vrot.slane %v14_v5, 4 }
   0x5   :  { %v34_v11 = vrot.slane %v15_v7, 4 }
   0x6   :  { %v17_v12 = vadd.f32 %v16_v8, %v12_v3  ;;  %v23_v13 = vadd.f32 %v22_v9, %v13_v4  ;;  %v29_v14 = vadd.f32 %v28_v10, %v14_v5 }
   0x7   :  { %v35_v15 = vadd.f32 %v34_v11, %v15_v7 }
   0x8   :  { %v18_v16 = vrot.slane %v17_v12, 2  ;;  %v24_v17 = vrot.slane %v23_v13, 2  ;;  %v30_v18 = vrot.slane %v29_v14, 2 }
   0x9   :  { %v36_v19 = vrot.slane %v35_v15, 2 }
   0xa   :  { %v19_v20 = vadd.f32 %v18_v16, %v17_v12  ;;  %v25_v21 = vadd.f32 %v24_v17, %v23_v13  ;;  %v31_v22 = vadd.f32 %v30_v18, %v29_v14 }
   0xb   :  { %v37_v23 = vadd.f32 %v36_v19, %v35_v15 }
   0xc   :  { %v20_v24 = vrot.slane %v19_v20, 1  ;;  %v26_v25 = vrot.slane %v25_v21, 1  ;;  %v32_v26 = vrot.slane %v31_v22, 1 }
   0xd   :  { %v38_v27 = vrot.slane %v37_v23, 1 }
   0xe   :  { %v21_v28 = vadd.f32 %v20_v24, %v19_v20  ;;  %v27_v29 = vadd.f32 %v26_v25, %v25_v21  ;;  %v33_v30 = vadd.f32 %v32_v26, %v31_v22 }
   0xf   :  { %v39_v31 = vadd.f32 %v38_v27, %v37_v23 }
  0x10   :  { %56 = vrsqrt.f32 %v21_v28 }
  0x11   :  { %58 = vrsqrt.f32 %v27_v29 }
  0x12   :  { %60 = vrsqrt.f32 %v33_v30 }
  0x13   :  { %62 = vrsqrt.f32 %v39_v31 }
  0x1a   :  { %v57_v32 = vpop.eup %56 }
  0x1b   :  { %v59_v33 = vpop.eup %58  ;;  %v44_v34 = vmul.f32 %v57_v32, %v8_v0 }
  0x1c   :  { %v61_v35 = vpop.eup %60  ;;  %v45_v36 = vmul.f32 %v59_v33, %v9_v1 }
  0x1d   :  { %v63_v37 = vpop.eup %62  ;;  %48 = vst [vmem:[%s99_s1] sm:$0xff] %v44_v34  ;;  %v46_v38 = vmul.f32 %v61_v35, %v10_v2 }
  0x1e   :  { %49 = vst [vmem:[%s99_s1 + $0x8] sm:$0xff] %v45_v36  ;;  %v47_v39 = vmul.f32 %v63_v37, %v11_v6 }
  0x1f   :  { %50 = vst [vmem:[%s99_s1 + $0x10] sm:$0xff] %v46_v38 }
  0x20   :  { %51 = vst [vmem:[%s99_s1 + $0x18] sm:$0xff] %v47_v39 }

</bundles_post_ra>
